<compile_context>
chip_gen: v7x
topology: tpu7x:2x2x1
jax: 0.10.0
libtpu: 0.0.40
codegen_flags: <defaults>
</compile_context>

<pallas_src>
import functools

import jax
import jax.numpy as jnp
from jax import lax
from jax.experimental import pallas as pl
from jax.experimental.pallas import tpu as pltpu

HIDDEN = 32
NLAYER = 2          # model_config.nlayer (model layers)
NLSTM = 2           # nn.LSTM(num_layers=model_config.nlayer) sublayers
CACHE_LEN = 200     # hardcoded in mplstm.__init__
KSIZE = 5           # add_transformer.hyper_kernel
HYPER_LAYER = 1
EPS = 1e-5


# ----------------------------------------------------------------------------- helpers
def _norm(x):
    # LayerNorm without affine (gamma/beta are folded into the following weight matrices)
    mu = jnp.mean(x, axis=-1, keepdims=True)
    xc = x - mu
    var = jnp.mean(xc * xc, axis=-1, keepdims=True)
    return xc * lax.rsqrt(var + EPS)


def _ln_ref(x, g, b):
    mu = jnp.mean(x, axis=-1, keepdims=True)
    var = jnp.mean((x - mu) ** 2, axis=-1, keepdims=True)
    return (x - mu) * lax.rsqrt(var + EPS) * g + b


# ----------------------------------------------------------------------------- fused whole-model kernel
def model_kernel(q_ref, wih_ref, be_ref, wc_ref, wqkv_ref, bqkv_ref, kvpad_ref,
                 convw_ref, convb_ref, fnnw_ref, fnnb_ref,
                 bw1_ref, bb1_ref, bw2_ref, bb2_ref,
                 qout_ref, cache_ref, hn_ref, cn_ref,
                 *, nlayer, ksize, cache_len):
    B = q_ref.shape[0]
    H = q_ref.shape[2]
    f32 = jnp.float32
    # lane mask keeping the sublayer-0 half of the packed (B, 2H) state
    sub0_mask = (lax.broadcasted_iota(jnp.int32, (1, 2 * H), 1) < H).astype(f32)

    q = q_ref[...]                                             # (B, T0, H)
    for l in range(nlayer):
        T = q.shape[1]
        Tout = T - (ksize - 1)                                 # hyper_layer == 1

        # -------- rnln (affine folded into wih) + hoisted LSTM input projection -------
        x2 = _norm(q.reshape(B * T, H))                        # (B*T, H)
        xpe = jnp.dot(x2, wih_ref[l], preferred_element_type=f32) + be_ref[l]
        xpe = xpe.reshape(B, T, 8 * H)   # gate columns: [i0 i1 f0 f1 g0 g1 o0 o1]

        # -------- wavefront-interleaved 2-sublayer LSTM (zero initial state) ----------
        wc = wc_ref[l]                                         # (2H, 8H) packed recurrent weight
        be_l = be_ref[l]                                       # (1, 8H)
        hcat = jnp.zeros((B, 2 * H), f32)                      # [h0[s] | h1[s-1]]
        ccat = jnp.zeros((B, 2 * H), f32)
        h1_seq = []
        hn0 = cn0 = None
        for s in range(T + 1):                                 # T+1 waves instead of 2*T steps
            if s == 0:
                gates = xpe[:, 0, :]                           # h-state is zero: skip the push
            elif s < T:
                gates = jnp.dot(hcat, wc, preferred_element_type=f32) + xpe[:, s, :]
            else:
                gates = jnp.dot(hcat, wc, preferred_element_type=f32) + be_l
            sg = jax.nn.sigmoid(gates)                         # one pass over all 8 gate blocks
            tg = jnp.tanh(gates)
            ccat = sg[:, 2*H:4*H] * ccat + sg[:, 0:2*H] * tg[:, 4*H:6*H]
            hcat = sg[:, 6*H:8*H] * jnp.tanh(ccat)
            if s == 0:
                hcat = hcat * sub0_mask                        # sublayer-1 initial state == 0
                ccat = ccat * sub0_mask
            if s == T - 1:                                     # final state of sublayer 0
                hn0 = hcat[:, 0:H]
                cn0 = ccat[:, 0:H]
            if s >= 1:                                         # top-sublayer output h1[s-1]
                h1_seq.append(hcat[:, H:2*H].reshape(B, 1, H))
        hn1 = hcat[:, H:2*H]
        cn1 = ccat[:, H:2*H]
        hn_ref[:, l:l+1, 0:1, :] = hn0.reshape(B, 1, 1, H)
        hn_ref[:, l:l+1, 1:2, :] = hn1.reshape(B, 1, 1, H)
        cn_ref[:, l:l+1, 0:1, :] = cn0.reshape(B, 1, 1, H)
        cn_ref[:, l:l+1, 1:2, :] = cn1.reshape(B, 1, 1, H)

        # -------- relu + cache output: last cache_len rows of [zero pad ; relu(q)] ----
        y = jnp.concatenate(h1_seq, axis=1)                    # (B, T, H)
        q_relu = jnp.maximum(y, 0.0)
        pad_keep = cache_len - T                               # T <= cache_len in this script
        cache_ref[:, l:l+1, 0:pad_keep, :] = jnp.zeros((B, 1, pad_keep, H), f32)
        cache_ref[:, l:l+1, pad_keep:, :] = q_relu.reshape(B, 1, T, H)

        # -------- shared LN stats + fused q/k/v projection (ln affines folded in) -----
        xh = _norm(q_relu.reshape(B * T, H))
        qkv = jnp.dot(xh, wqkv_ref[l], preferred_element_type=f32) + bqkv_ref[l]
        qp = qkv[:, 0:H].reshape(B, T, H)        # (torch.relu(q) is discarded per reference)
        kvq = (jnp.maximum(qkv[:, H:2*H], 0.0) * qkv[:, 2*H:3*H]).reshape(B, T, H)

        # -------- hyper-net weights for ALL sliding windows: one K=ksize*H matmul -----
        qwin = jnp.concatenate([qp[:, t:t + Tout, :] for t in range(ksize)], axis=-1)
        hid = jnp.maximum(
            jnp.dot(qwin.reshape(B * Tout, ksize * H), convw_ref[l],
                    preferred_element_type=f32) + convb_ref[l], 0.0)
        w3 = jax.nn.sigmoid(
            jnp.dot(hid, fnnw_ref[l], preferred_element_type=f32) + fnnb_ref[l])
        w3 = w3.reshape(B, Tout, cache_len)

        # -------- pad-aware windowed weighted mean -------------------------------------
        # window i of the zero-front-padded key holds (cache_len - i) copies of the constant
        # projected pad row (LayerNorm(0) == beta) followed by kvq[0:i], so
        #   att[b,i] = (sum_{j<cache_len-i} w3[b,i,j]) * kv_pad
        #              + sum_{t<i} w3[b,i,cache_len-i+t] * kvq[b,t]
        ii = lax.broadcasted_iota(jnp.int32, (Tout, T), 0)
        tt = lax.broadcasted_iota(jnp.int32, (Tout, T), 1)
        diff = ii - tt
        band = jnp.zeros((B, Tout, T), f32)
        for d in range(1, Tout):                               # d = i - t  (diagonal of the band)
            m = (diff == d).astype(f32)                        # (Tout, T) constant mask
            band = band + m[None, :, :] * w3[:, :, cache_len - d:cache_len - d + 1]
        pad_coef = jnp.sum(w3, axis=-1) - jnp.sum(band, axis=-1)          # (B, Tout)
        att_q = jnp.einsum('bit,bth->bih', band, kvq, preferred_element_type=f32)
        att = (att_q + pad_coef[:, :, None] * kvpad_ref[l]) * (1.0 / cache_len)

        # -------- Boom FFN --------------------------------------------------------------
        a2 = att.reshape(B * Tout, H)
        hb = jnp.dot(a2, bw1_ref[l], preferred_element_type=f32) + bb1_ref[l]
        hb = hb * jax.nn.sigmoid(1.702 * hb)                   # GELU of the reference
        ob = jnp.dot(hb, bw2_ref[l], preferred_element_type=f32) + bb2_ref[l]
        q = ob.reshape(B, Tout, H)

    qout_ref[...] = q


# ----------------------------------------------------------------------------- pallas_call wrapper
def _num_parallel_cores():
    try:
        kind = jax.devices()[0].device_kind.lower()
    except Exception:
        return 1
    return 2 if ('v7' in kind or 'tpu7' in kind) else 1


def _full_spec(shape):
    ndim = len(shape)
    return pl.BlockSpec(tuple(shape), lambda b, _n=ndim: (0,) * _n)


def _batch_spec(shape):
    ndim = len(shape)
    return pl.BlockSpec((1,) + tuple(shape[1:]),
                        lambda b, _n=ndim: (b,) + (0,) * (_n - 1))


def mplstm_forward(x, packed):
    # x: (B, T, H) batch-first, exactly like the PyTorch module (extra_input is None).
    B, T, H = x.shape
    nlayer = int(packed['wih'].shape[0])
    assert T <= CACHE_LEN
    t_final = T - nlayer * (KSIZE - 1) * HYPER_LAYER
    kernel = functools.partial(model_kernel, nlayer=nlayer, ksize=KSIZE, cache_len=CACHE_LEN)
    out_shape = (
        jax.ShapeDtypeStruct((B, t_final, H), jnp.float32),              # final q
        jax.ShapeDtypeStruct((B, nlayer, CACHE_LEN, H), jnp.float32),    # caches
        jax.ShapeDtypeStruct((B, nlayer, NLSTM, H), jnp.float32),        # h_n
        jax.ShapeDtypeStruct((B, nlayer, NLSTM, H), jnp.float32),        # c_n
    )
    operands = (x, packed['wih'], packed['be'], packed['wc'], packed['wqkv'],
                packed['bqkv'], packed['kvpad'], packed['convw'], packed['convb'],
                packed['fnnw'], packed['fnnb'], packed['bw1'], packed['bb1'],
                packed['bw2'], packed['bb2'])

    if B > 1 and _num_parallel_cores() > 1:
        # TPU v7x: shard the batch across the two TensorCores; each core runs one batch
        # element's serial LSTM chain + attention independently.
        in_specs = [_batch_spec(x.shape)] + [_full_spec(op.shape) for op in operands[1:]]
        out_specs = tuple(_batch_spec(s.shape) for s in out_shape)
        q_out, cache, hn, cn = pl.pallas_call(
            kernel, out_shape=out_shape, grid=(B,),
            in_specs=in_specs, out_specs=out_specs,
            compiler_params=pltpu.CompilerParams(dimension_semantics=("parallel",)),
        )(*operands)
    else:
        # single TensorCore (v5e / v6e): one gridless launch, everything resident in VMEM.
        q_out, cache, hn, cn = pl.pallas_call(kernel, out_shape=out_shape)(*operands)

    extra_output = {
        'cache': [cache[:, l] for l in range(nlayer)],
        'hstas': [jnp.transpose(hn[:, l], (1, 0, 2)) for l in range(nlayer)],
        'cstas': [jnp.transpose(cn[:, l], (1, 0, 2)) for l in range(nlayer)],
    }
    return q_out, extra_output


# ----------------------------------------------------------------------------- parameters
def init_params(key):
    keys = [key]

    def nxt():
        keys[0], sub = jax.random.split(keys[0])
        return sub

    def linear(in_dim, out_dim):
        w = jax.random.normal(nxt(), (out_dim, in_dim), jnp.float32) / jnp.sqrt(float(in_dim))
        b = jax.random.normal(nxt(), (out_dim,), jnp.float32) * 0.01
        return w, b

    def ln_params():
        g = 1.0 + 0.1 * jax.random.normal(nxt(), (1, HIDDEN), jnp.float32)
        b = 0.1 * jax.random.normal(nxt(), (1, HIDDEN), jnp.float32)
        return g, b

    layers = []
    for _ in range(NLAYER):
        layer = {}
        layer['rnln_g'], layer['rnln_b'] = ln_params()
        wihs, whhs, bs = [], [], []
        for _l in range(NLSTM):
            wih, bih = linear(HIDDEN, 4 * HIDDEN)
            whh, bhh = linear(HIDDEN, 4 * HIDDEN)
            wihs.append(wih.T)
            whhs.append(whh.T)
            bs.append((bih + bhh).reshape(1, 4 * HIDDEN))
        layer['lstm_wih'] = jnp.stack(wihs)          # (NLSTM, H, 4H)
        layer['lstm_whh'] = jnp.stack(whhs)          # (NLSTM, H, 4H)
        layer['lstm_b'] = jnp.stack(bs)              # (NLSTM, 1, 4H)
        att = {}
        for nm in ('lnq', 'lnk', 'lnv'):
            att[nm + '_g'], att[nm + '_b'] = ln_params()
        for nm in ('wq', 'wk', 'wv'):
            w, b = linear(HIDDEN, HIDDEN)
            att[nm + '_t'] = w.T
            att['b' + nm[1]] = b.reshape(1, HIDDEN)
        convw = jax.random.normal(nxt(), (CACHE_LEN, HIDDEN, KSIZE), jnp.float32) \
            / jnp.sqrt(float(HIDDEN * KSIZE))
        convb = jax.random.normal(nxt(), (CACHE_LEN,), jnp.float32) * 0.01
        # torch layout (out, in, k) -> (k, in, out) -> (k*H, out)
        att['convw'] = jnp.transpose(convw, (2, 1, 0)).reshape(KSIZE * HIDDEN, CACHE_LEN)
        att['convb'] = convb.reshape(1, CACHE_LEN)
        fw, fb = linear(CACHE_LEN, CACHE_LEN)
        att['fnnw_t'] = fw.T
        att['fnnb'] = fb.reshape(1, CACHE_LEN)
        layer['att'] = att
        w1, b1 = linear(HIDDEN, 2 * HIDDEN)
        w2, b2 = linear(2 * HIDDEN, HIDDEN)
        layer['boom'] = {'w1_t': w1.T, 'b1': b1.reshape(1, 2 * HIDDEN),
                         'w2_t': w2.T, 'b2': b2.reshape(1, HIDDEN)}
        layers.append(layer)
    return layers


def pack_params(layers):
    """One-time repack of the torch-layout weights into the fused kernel layouts."""
    H = HIDDEN

    def gate_interleave(m0, m1):
        # (.., 4H) x2 -> (.., 8H) with columns [i0 i1 f0 f1 g0 g1 o0 o1]
        parts = []
        for gi in range(4):
            parts.append(m0[..., gi * H:(gi + 1) * H])
            parts.append(m1[..., gi * H:(gi + 1) * H])
        return jnp.concatenate(parts, axis=-1)

    keys = ('wih', 'be', 'wc', 'wqkv', 'bqkv', 'kvpad', 'convw', 'convb',
            'fnnw', 'fnnb', 'bw1', 'bb1', 'bw2', 'bb2')
    packed = {k: [] for k in keys}
    for layer in layers:
        assert layer['lstm_wih'].shape[0] == 2, "wavefront packing assumes 2 LSTM sublayers"
        wih0, wih1 = layer['lstm_wih'][0], layer['lstm_wih'][1]
        whh0, whh1 = layer['lstm_whh'][0], layer['lstm_whh'][1]
        b0, b1 = layer['lstm_b'][0], layer['lstm_b'][1]
        # fold rnln affine into sublayer-0 input projection
        wih0_f = layer['rnln_g'].reshape(H, 1) * wih0
        b0_f = b0 + layer['rnln_b'] @ wih0
        packed['wih'].append(gate_interleave(wih0_f, jnp.zeros_like(wih0_f)))
        packed['be'].append(gate_interleave(b0_f, b1))
        packed['wc'].append(jnp.concatenate(
            [gate_interleave(whh0, wih1),
             gate_interleave(jnp.zeros_like(whh1), whh1)], axis=0))
        att = layer['att']
        wq = att['lnq_g'].reshape(H, 1) * att['wq_t']
        bq = att['lnq_b'] @ att['wq_t'] + att['bq']
        wk = att['lnk_g'].reshape(H, 1) * att['wk_t']
        bk = att['lnk_b'] @ att['wk_t'] + att['bk']
        wv = att['lnv_g'].reshape(H, 1) * att['wv_t']
        bv = att['lnv_b'] @ att['wv_t'] + att['bv']
        packed['wqkv'].append(jnp.concatenate([wq, wk, wv], axis=1))
        packed['bqkv'].append(jnp.concatenate([bq, bk, bv], axis=1))
        packed['kvpad'].append(jnp.maximum(bk, 0.0) * bv)   # projected LayerNorm(0)==beta row
        packed['convw'].append(att['convw'])
        packed['convb'].append(att['convb'])
        packed['fnnw'].append(att['fnnw_t'])
        packed['fnnb'].append(att['fnnb'])
        bm = layer['boom']
        packed['bw1'].append(bm['w1_t'])
        packed['bb1'].append(bm['b1'])
        packed['bw2'].append(bm['w2_t'])
        packed['bb2'].append(bm['b2'])
    return {k: jnp.stack(v) for k, v in packed.items()}


# ----------------------------------------------------------------------------- pure-JAX reference
def mplstm_reference(x, layers):
    q = x
    caches, hstas, cstas = [], [], []
    for layer in layers:
        B, T, H = q.shape
        xseq = _ln_ref(q, layer['rnln_g'], layer['rnln_b'])
        hs, cs = [], []
        for l in range(layer['lstm_wih'].shape[0]):
            wih, whh, b = layer['lstm_wih'][l], layer['lstm_whh'][l], layer['lstm_b'][l]
            h = jnp.zeros((B, H), jnp.float32)
            c = jnp.zeros((B, H), jnp.float32)
            outs = []
            for t in range(T):
                gates = xseq[:, t, :] @ wih + h @ whh + b
                i = jax.nn.sigmoid(gates[:, 0:H])
                f = jax.nn.sigmoid(gates[:, H:2 * H])
                gg = jnp.tanh(gates[:, 2 * H:3 * H])
                o = jax.nn.sigmoid(gates[:, 3 * H:4 * H])
                c = f * c + i * gg
                h = o * jnp.tanh(c)
                outs.append(h)
            xseq = jnp.stack(outs, axis=1)
            hs.append(h)
            cs.append(c)
        q_relu = jnp.maximum(xseq, 0.0)
        k = jnp.concatenate([jnp.zeros((B, CACHE_LEN, H), jnp.float32), q_relu], axis=1)
        caches.append(k[:, -CACHE_LEN:, :])
        hstas.append(jnp.stack(hs))
        cstas.append(jnp.stack(cs))
        att = layer['att']
        kk = jnp.maximum(_ln_ref(k, att['lnk_g'], att['lnk_b']) @ att['wk_t'] + att['bk'], 0.0)
        vv = _ln_ref(k, att['lnv_g'], att['lnv_b']) @ att['wv_t'] + att['bv']
        kv = kk * vv
        Tout = T - (KSIZE - 1) * HYPER_LAYER
        rets = []
        for idx in range(Tout):
            qw = q_relu[:, idx:idx + KSIZE, :]
            qw = _ln_ref(qw, att['lnq_g'], att['lnq_b']) @ att['wq_t'] + att['bq']
            hid = jnp.maximum(qw.reshape(B, KSIZE * H) @ att['convw'] + att['convb'], 0.0)
            w = jax.nn.sigmoid(hid @ att['fnnw_t'] + att['fnnb'])           # (B, CACHE_LEN)
            win = kv[:, idx:idx + CACHE_LEN, :]
            rets.append(jnp.mean(win * w[:, :, None], axis=1, keepdims=True))
        a = jnp.concatenate(rets, axis=1)
        bm = layer['boom']
        hb = a.reshape(B * Tout, H) @ bm['w1_t'] + bm['b1']
        hb = hb * jax.nn.sigmoid(1.702 * hb)
        ob = hb @ bm['w2_t'] + bm['b2']
        q = ob.reshape(B, Tout, H)
    return q, caches, hstas, cstas


# ----------------------------------------------------------------------------- main
if __name__ == "__main__":
    key = jax.random.PRNGKey(0)
    pkey, xkey = jax.random.split(key)
    layers = init_params(pkey)
    packed = pack_params(layers)

    B, T = 2, 16
    x = jax.random.normal(xkey, (B, T, HIDDEN), jnp.float32)

    fwd = jax.jit(mplstm_forward)
    out, extra = fwd(x, packed)
    out = jax.block_until_ready(out)

    t_final = T - (KSIZE - 1) * HYPER_LAYER * NLAYER
    assert out.shape == (B, t_final, HIDDEN), out.shape
    assert bool(jnp.all(jnp.isfinite(out)))
    assert len(extra['cache']) == NLAYER and extra['cache'][0].shape == (B, CACHE_LEN, HIDDEN)
    assert extra['hstas'][0].shape == (NLSTM, B, HIDDEN)
    assert extra['cstas'][0].shape == (NLSTM, B, HIDDEN)

    # correctness check against a straightforward pure-JAX port of the PyTorch module
    ref_out, ref_cache, ref_h, ref_c = jax.jit(mplstm_reference)(x, layers)

    def maxdiff(a, b):
        return float(jnp.max(jnp.abs(a - b)))

    assert maxdiff(out, ref_out) < 5e-3, maxdiff(out, ref_out)
    for l in range(NLAYER):
        assert maxdiff(extra['cache'][l], ref_cache[l]) < 5e-3
        assert maxdiff(extra['hstas'][l], ref_h[l]) < 5e-3
        assert maxdiff(extra['cstas'][l], ref_c[l]) < 5e-3

    print("KERNEL_OK")
</pallas_src>

<mosaic_0001>
module attributes {stable_mosaic.version = 11 : i64} {
  func.func @model_kernel(%arg0: memref<2x16x32xf32, #tpu.memory_space<vmem>>, %arg1: memref<2x32x256xf32, #tpu.memory_space<vmem>>, %arg2: memref<2x1x256xf32, #tpu.memory_space<vmem>>, %arg3: memref<2x64x256xf32, #tpu.memory_space<vmem>>, %arg4: memref<2x32x96xf32, #tpu.memory_space<vmem>>, %arg5: memref<2x1x96xf32, #tpu.memory_space<vmem>>, %arg6: memref<2x1x32xf32, #tpu.memory_space<vmem>>, %arg7: memref<2x160x200xf32, #tpu.memory_space<vmem>>, %arg8: memref<2x1x200xf32, #tpu.memory_space<vmem>>, %arg9: memref<2x200x200xf32, #tpu.memory_space<vmem>>, %arg10: memref<2x1x200xf32, #tpu.memory_space<vmem>>, %arg11: memref<2x32x64xf32, #tpu.memory_space<vmem>>, %arg12: memref<2x1x64xf32, #tpu.memory_space<vmem>>, %arg13: memref<2x64x32xf32, #tpu.memory_space<vmem>>, %arg14: memref<2x1x32xf32, #tpu.memory_space<vmem>>, %arg15: memref<2x8x32xf32, #tpu.memory_space<vmem>>, %arg16: memref<2x2x200x32xf32, #tpu.memory_space<vmem>>, %arg17: memref<2x2x2x32xf32, #tpu.memory_space<vmem>>, %arg18: memref<2x2x2x32xf32, #tpu.memory_space<vmem>>) attributes {dimension_semantics = [], scalar_prefetch = 0 : i64, scratch_operands = 0 : i64, tpu.core_type = #tpu.core_type<tc>} {
    %0 = tpu.iota {dimensions = array<i32: 1>} : vector<1x64xi32>
    %c32_i32 = arith.constant 32 : i32
    %1 = vector.broadcast %c32_i32 : i32 to vector<1x64xi32>
    %2 = arith.cmpi slt, %0, %1 : vector<1x64xi32>
    %3 = arith.extui %2 : vector<1x64xi1> to vector<1x64xi32>
    %4 = arith.sitofp %3 : vector<1x64xi32> to vector<1x64xf32>
    %c0 = arith.constant 0 : index
    %c0_0 = arith.constant 0 : index
    %c0_1 = arith.constant 0 : index
    %5 = vector.load %arg0[%c0, %c0_0, %c0_1] : memref<2x16x32xf32, #tpu.memory_space<vmem>>, vector<2x16x32xf32>
    %6 = vector.shape_cast %5 : vector<2x16x32xf32> to vector<32x32xf32>
    %cst = arith.constant dense<0.000000e+00> : vector<32xf32>
    %7 = vector.multi_reduction <add>, %6, %cst [1] : vector<32x32xf32> to vector<32xf32>
    %8 = vector.shape_cast %7 : vector<32xf32> to vector<32x1xf32>
    %cst_2 = arith.constant 3.200000e+01 : f32
    %9 = vector.broadcast %cst_2 : f32 to vector<32x1xf32>
    %10 = arith.divf %8, %9 : vector<32x1xf32>
    %11 = vector.broadcast %10 : vector<32x1xf32> to vector<32x32xf32>
    %12 = arith.subf %6, %11 : vector<32x32xf32>
    %13 = arith.mulf %12, %12 : vector<32x32xf32>
    %cst_3 = arith.constant dense<0.000000e+00> : vector<32xf32>
    %14 = vector.multi_reduction <add>, %13, %cst_3 [1] : vector<32x32xf32> to vector<32xf32>
    %15 = vector.shape_cast %14 : vector<32xf32> to vector<32x1xf32>
    %cst_4 = arith.constant 3.200000e+01 : f32
    %16 = vector.broadcast %cst_4 : f32 to vector<32x1xf32>
    %17 = arith.divf %15, %16 : vector<32x1xf32>
    %cst_5 = arith.constant 9.99999974E-6 : f32
    %18 = vector.broadcast %cst_5 : f32 to vector<32x1xf32>
    %19 = arith.addf %17, %18 : vector<32x1xf32>
    %20 = math.rsqrt %19 : vector<32x1xf32>
    %21 = vector.broadcast %20 : vector<32x1xf32> to vector<32x32xf32>
    %22 = arith.mulf %12, %21 : vector<32x32xf32>
    %c0_6 = arith.constant 0 : index
    %c0_7 = arith.constant 0 : index
    %c0_8 = arith.constant 0 : index
    %23 = vector.load %arg1[%c0_6, %c0_7, %c0_8] : memref<2x32x256xf32, #tpu.memory_space<vmem>>, vector<1x32x256xf32>
    %24 = vector.shape_cast %23 : vector<1x32x256xf32> to vector<32x256xf32>
    %cst_9 = arith.constant dense<0.000000e+00> : vector<32x256xf32>
    %25 = tpu.matmul %22, %24, %cst_9 {dimension_numbers = #tpu.dot_dimension_numbers<[1], [0], [0], [1], [0, 0, 1, 1], [], []>} : vector<32x32xf32>, vector<32x256xf32>, vector<32x256xf32> -> vector<32x256xf32>
    %c0_10 = arith.constant 0 : index
    %c0_11 = arith.constant 0 : index
    %c0_12 = arith.constant 0 : index
    %26 = vector.load %arg2[%c0_10, %c0_11, %c0_12] : memref<2x1x256xf32, #tpu.memory_space<vmem>>, vector<1x1x256xf32>
    %27 = vector.shape_cast %26 : vector<1x1x256xf32> to vector<1x256xf32>
    %28 = vector.broadcast %27 : vector<1x256xf32> to vector<32x256xf32>
    %29 = arith.addf %25, %28 : vector<32x256xf32>
    %30 = vector.shape_cast %29 : vector<32x256xf32> to vector<2x16x256xf32>
    %c0_13 = arith.constant 0 : index
    %c0_14 = arith.constant 0 : index
    %c0_15 = arith.constant 0 : index
    %31 = vector.load %arg3[%c0_13, %c0_14, %c0_15] : memref<2x64x256xf32, #tpu.memory_space<vmem>>, vector<1x64x256xf32>
    %32 = vector.shape_cast %31 : vector<1x64x256xf32> to vector<64x256xf32>
    %c0_16 = arith.constant 0 : index
    %c0_17 = arith.constant 0 : index
    %c0_18 = arith.constant 0 : index
    %33 = vector.load %arg2[%c0_16, %c0_17, %c0_18] : memref<2x1x256xf32, #tpu.memory_space<vmem>>, vector<1x1x256xf32>
    %34 = vector.shape_cast %33 : vector<1x1x256xf32> to vector<1x256xf32>
    %cst_19 = arith.constant 0.000000e+00 : f32
    %35 = vector.broadcast %cst_19 : f32 to vector<2x64xf32>
    %36 = vector.extract_strided_slice %30 {offsets = [0, 0, 0], sizes = [2, 1, 256], strides = [1, 1, 1]} : vector<2x16x256xf32> to vector<2x1x256xf32>
    %37 = vector.shape_cast %36 : vector<2x1x256xf32> to vector<2x256xf32>
    %38 = arith.negf %37 : vector<2x256xf32>
    %39 = math.exp %38 : vector<2x256xf32>
    %cst_20 = arith.constant 1.000000e+00 : f32
    %40 = vector.broadcast %cst_20 : f32 to vector<2x256xf32>
    %41 = arith.addf %40, %39 : vector<2x256xf32>
    %42 = arith.divf %40, %41 : vector<2x256xf32>
    %43 = math.tanh %37 : vector<2x256xf32>
    %44 = vector.extract_strided_slice %42 {offsets = [0, 64], sizes = [2, 64], strides = [1, 1]} : vector<2x256xf32> to vector<2x64xf32>
    %45 = arith.mulf %44, %35 : vector<2x64xf32>
    %46 = vector.extract_strided_slice %42 {offsets = [0, 0], sizes = [2, 64], strides = [1, 1]} : vector<2x256xf32> to vector<2x64xf32>
    %47 = vector.extract_strided_slice %43 {offsets = [0, 128], sizes = [2, 64], strides = [1, 1]} : vector<2x256xf32> to vector<2x64xf32>
    %48 = arith.mulf %46, %47 : vector<2x64xf32>
    %49 = arith.addf %45, %48 : vector<2x64xf32>
    %50 = vector.extract_strided_slice %42 {offsets = [0, 192], sizes = [2, 64], strides = [1, 1]} : vector<2x256xf32> to vector<2x64xf32>
    %51 = math.tanh %49 : vector<2x64xf32>
    %52 = arith.mulf %50, %51 : vector<2x64xf32>
    %53 = vector.broadcast %4 : vector<1x64xf32> to vector<2x64xf32>
    %54 = arith.mulf %52, %53 : vector<2x64xf32>
    %55 = vector.broadcast %4 : vector<1x64xf32> to vector<2x64xf32>
    %56 = arith.mulf %49, %55 : vector<2x64xf32>
    %cst_21 = arith.constant dense<0.000000e+00> : vector<2x256xf32>
    %57 = tpu.matmul %54, %32, %cst_21 {dimension_numbers = #tpu.dot_dimension_numbers<[1], [0], [0], [1], [0, 0, 1, 1], [], []>} : vector<2x64xf32>, vector<64x256xf32>, vector<2x256xf32> -> vector<2x256xf32>
    %58 = vector.extract_strided_slice %30 {offsets = [0, 1, 0], sizes = [2, 1, 256], strides = [1, 1, 1]} : vector<2x16x256xf32> to vector<2x1x256xf32>
    %59 = vector.shape_cast %58 : vector<2x1x256xf32> to vector<2x256xf32>
    %60 = arith.addf %57, %59 : vector<2x256xf32>
    %61 = arith.negf %60 : vector<2x256xf32>
    %62 = math.exp %61 : vector<2x256xf32>
    %cst_22 = arith.constant 1.000000e+00 : f32
    %63 = vector.broadcast %cst_22 : f32 to vector<2x256xf32>
    %64 = arith.addf %63, %62 : vector<2x256xf32>
    %65 = arith.divf %63, %64 : vector<2x256xf32>
    %66 = math.tanh %60 : vector<2x256xf32>
    %67 = vector.extract_strided_slice %65 {offsets = [0, 64], sizes = [2, 64], strides = [1, 1]} : vector<2x256xf32> to vector<2x64xf32>
    %68 = arith.mulf %67, %56 : vector<2x64xf32>
    %69 = vector.extract_strided_slice %65 {offsets = [0, 0], sizes = [2, 64], strides = [1, 1]} : vector<2x256xf32> to vector<2x64xf32>
    %70 = vector.extract_strided_slice %66 {offsets = [0, 128], sizes = [2, 64], strides = [1, 1]} : vector<2x256xf32> to vector<2x64xf32>
    %71 = arith.mulf %69, %70 : vector<2x64xf32>
    %72 = arith.addf %68, %71 : vector<2x64xf32>
    %73 = vector.extract_strided_slice %65 {offsets = [0, 192], sizes = [2, 64], strides = [1, 1]} : vector<2x256xf32> to vector<2x64xf32>
    %74 = math.tanh %72 : vector<2x64xf32>
    %75 = arith.mulf %73, %74 : vector<2x64xf32>
    %76 = vector.extract_strided_slice %75 {offsets = [0, 32], sizes = [2, 32], strides = [1, 1]} : vector<2x64xf32> to vector<2x32xf32>
    %77 = vector.shape_cast %76 : vector<2x32xf32> to vector<2x1x32xf32>
    %cst_23 = arith.constant dense<0.000000e+00> : vector<2x256xf32>
    %78 = tpu.matmul %75, %32, %cst_23 {dimension_numbers = #tpu.dot_dimension_numbers<[1], [0], [0], [1], [0, 0, 1, 1], [], []>} : vector<2x64xf32>, vector<64x256xf32>, vector<2x256xf32> -> vector<2x256xf32>
    %79 = vector.extract_strided_slice %30 {offsets = [0, 2, 0], sizes = [2, 1, 256], strides = [1, 1, 1]} : vector<2x16x256xf32> to vector<2x1x256xf32>
    %80 = vector.shape_cast %79 : vector<2x1x256xf32> to vector<2x256xf32>
    %81 = arith.addf %78, %80 : vector<2x256xf32>
    %82 = arith.negf %81 : vector<2x256xf32>
    %83 = math.exp %82 : vector<2x256xf32>
    %cst_24 = arith.constant 1.000000e+00 : f32
    %84 = vector.broadcast %cst_24 : f32 to vector<2x256xf32>
    %85 = arith.addf %84, %83 : vector<2x256xf32>
    %86 = arith.divf %84, %85 : vector<2x256xf32>
    %87 = math.tanh %81 : vector<2x256xf32>
    %88 = vector.extract_strided_slice %86 {offsets = [0, 64], sizes = [2, 64], strides = [1, 1]} : vector<2x256xf32> to vector<2x64xf32>
    %89 = arith.mulf %88, %72 : vector<2x64xf32>
    %90 = vector.extract_strided_slice %86 {offsets = [0, 0], sizes = [2, 64], strides = [1, 1]} : vector<2x256xf32> to vector<2x64xf32>
    %91 = vector.extract_strided_slice %87 {offsets = [0, 128], sizes = [2, 64], strides = [1, 1]} : vector<2x256xf32> to vector<2x64xf32>
    %92 = arith.mulf %90, %91 : vector<2x64xf32>
    %93 = arith.addf %89, %92 : vector<2x64xf32>
    %94 = vector.extract_strided_slice %86 {offsets = [0, 192], sizes = [2, 64], strides = [1, 1]} : vector<2x256xf32> to vector<2x64xf32>
    %95 = math.tanh %93 : vector<2x64xf32>
    %96 = arith.mulf %94, %95 : vector<2x64xf32>
    %97 = vector.extract_strided_slice %96 {offsets = [0, 32], sizes = [2, 32], strides = [1, 1]} : vector<2x64xf32> to vector<2x32xf32>
    %98 = vector.shape_cast %97 : vector<2x32xf32> to vector<2x1x32xf32>
    %cst_25 = arith.constant dense<0.000000e+00> : vector<2x256xf32>
    %99 = tpu.matmul %96, %32, %cst_25 {dimension_numbers = #tpu.dot_dimension_numbers<[1], [0], [0], [1], [0, 0, 1, 1], [], []>} : vector<2x64xf32>, vector<64x256xf32>, vector<2x256xf32> -> vector<2x256xf32>
    %100 = vector.extract_strided_slice %30 {offsets = [0, 3, 0], sizes = [2, 1, 256], strides = [1, 1, 1]} : vector<2x16x256xf32> to vector<2x1x256xf32>
    %101 = vector.shape_cast %100 : vector<2x1x256xf32> to vector<2x256xf32>
    %102 = arith.addf %99, %101 : vector<2x256xf32>
    %103 = arith.negf %102 : vector<2x256xf32>
    %104 = math.exp %103 : vector<2x256xf32>
    %cst_26 = arith.constant 1.000000e+00 : f32
    %105 = vector.broadcast %cst_26 : f32 to vector<2x256xf32>
    %106 = arith.addf %105, %104 : vector<2x256xf32>
    %107 = arith.divf %105, %106 : vector<2x256xf32>
    %108 = math.tanh %102 : vector<2x256xf32>
    %109 = vector.extract_strided_slice %107 {offsets = [0, 64], sizes = [2, 64], strides = [1, 1]} : vector<2x256xf32> to vector<2x64xf32>
    %110 = arith.mulf %109, %93 : vector<2x64xf32>
    %111 = vector.extract_strided_slice %107 {offsets = [0, 0], sizes = [2, 64], strides = [1, 1]} : vector<2x256xf32> to vector<2x64xf32>
    %112 = vector.extract_strided_slice %108 {offsets = [0, 128], sizes = [2, 64], strides = [1, 1]} : vector<2x256xf32> to vector<2x64xf32>
    %113 = arith.mulf %111, %112 : vector<2x64xf32>
    %114 = arith.addf %110, %113 : vector<2x64xf32>
    %115 = vector.extract_strided_slice %107 {offsets = [0, 192], sizes = [2, 64], strides = [1, 1]} : vector<2x256xf32> to vector<2x64xf32>
    %116 = math.tanh %114 : vector<2x64xf32>
    %117 = arith.mulf %115, %116 : vector<2x64xf32>
    %118 = vector.extract_strided_slice %117 {offsets = [0, 32], sizes = [2, 32], strides = [1, 1]} : vector<2x64xf32> to vector<2x32xf32>
    %119 = vector.shape_cast %118 : vector<2x32xf32> to vector<2x1x32xf32>
    %cst_27 = arith.constant dense<0.000000e+00> : vector<2x256xf32>
    %120 = tpu.matmul %117, %32, %cst_27 {dimension_numbers = #tpu.dot_dimension_numbers<[1], [0], [0], [1], [0, 0, 1, 1], [], []>} : vector<2x64xf32>, vector<64x256xf32>, vector<2x256xf32> -> vector<2x256xf32>
    %121 = vector.extract_strided_slice %30 {offsets = [0, 4, 0], sizes = [2, 1, 256], strides = [1, 1, 1]} : vector<2x16x256xf32> to vector<2x1x256xf32>
    %122 = vector.shape_cast %121 : vector<2x1x256xf32> to vector<2x256xf32>
    %123 = arith.addf %120, %122 : vector<2x256xf32>
    %124 = arith.negf %123 : vector<2x256xf32>
    %125 = math.exp %124 : vector<2x256xf32>
    %cst_28 = arith.constant 1.000000e+00 : f32
    %126 = vector.broadcast %cst_28 : f32 to vector<2x256xf32>
    %127 = arith.addf %126, %125 : vector<2x256xf32>
    %128 = arith.divf %126, %127 : vector<2x256xf32>
    %129 = math.tanh %123 : vector<2x256xf32>
    %130 = vector.extract_strided_slice %128 {offsets = [0, 64], sizes = [2, 64], strides = [1, 1]} : vector<2x256xf32> to vector<2x64xf32>
    %131 = arith.mulf %130, %114 : vector<2x64xf32>
    %132 = vector.extract_strided_slice %128 {offsets = [0, 0], sizes = [2, 64], strides = [1, 1]} : vector<2x256xf32> to vector<2x64xf32>
    %133 = vector.extract_strided_slice %129 {offsets = [0, 128], sizes = [2, 64], strides = [1, 1]} : vector<2x256xf32> to vector<2x64xf32>
    %134 = arith.mulf %132, %133 : vector<2x64xf32>
    %135 = arith.addf %131, %134 : vector<2x64xf32>
    %136 = vector.extract_strided_slice %128 {offsets = [0, 192], sizes = [2, 64], strides = [1, 1]} : vector<2x256xf32> to vector<2x64xf32>
    %137 = math.tanh %135 : vector<2x64xf32>
    %138 = arith.mulf %136, %137 : vector<2x64xf32>
    %139 = vector.extract_strided_slice %138 {offsets = [0, 32], sizes = [2, 32], strides = [1, 1]} : vector<2x64xf32> to vector<2x32xf32>
    %140 = vector.shape_cast %139 : vector<2x32xf32> to vector<2x1x32xf32>
    %cst_29 = arith.constant dense<0.000000e+00> : vector<2x256xf32>
    %141 = tpu.matmul %138, %32, %cst_29 {dimension_numbers = #tpu.dot_dimension_numbers<[1], [0], [0], [1], [0, 0, 1, 1], [], []>} : vector<2x64xf32>, vector<64x256xf32>, vector<2x256xf32> -> vector<2x256xf32>
    %142 = vector.extract_strided_slice %30 {offsets = [0, 5, 0], sizes = [2, 1, 256], strides = [1, 1, 1]} : vector<2x16x256xf32> to vector<2x1x256xf32>
    %143 = vector.shape_cast %142 : vector<2x1x256xf32> to vector<2x256xf32>
    %144 = arith.addf %141, %143 : vector<2x256xf32>
    %145 = arith.negf %144 : vector<2x256xf32>
    %146 = math.exp %145 : vector<2x256xf32>
    %cst_30 = arith.constant 1.000000e+00 : f32
    %147 = vector.broadcast %cst_30 : f32 to vector<2x256xf32>
    %148 = arith.addf %147, %146 : vector<2x256xf32>
    %149 = arith.divf %147, %148 : vector<2x256xf32>
    %150 = math.tanh %144 : vector<2x256xf32>
    %151 = vector.extract_strided_slice %149 {offsets = [0, 64], sizes = [2, 64], strides = [1, 1]} : vector<2x256xf32> to vector<2x64xf32>
    %152 = arith.mulf %151, %135 : vector<2x64xf32>
    %153 = vector.extract_strided_slice %149 {offsets = [0, 0], sizes = [2, 64], strides = [1, 1]} : vector<2x256xf32> to vector<2x64xf32>
    %154 = vector.extract_strided_slice %150 {offsets = [0, 128], sizes = [2, 64], strides = [1, 1]} : vector<2x256xf32> to vector<2x64xf32>
    %155 = arith.mulf %153, %154 : vector<2x64xf32>
    %156 = arith.addf %152, %155 : vector<2x64xf32>
    %157 = vector.extract_strided_slice %149 {offsets = [0, 192], sizes = [2, 64], strides = [1, 1]} : vector<2x256xf32> to vector<2x64xf32>
    %158 = math.tanh %156 : vector<2x64xf32>
    %159 = arith.mulf %157, %158 : vector<2x64xf32>
    %160 = vector.extract_strided_slice %159 {offsets = [0, 32], sizes = [2, 32], strides = [1, 1]} : vector<2x64xf32> to vector<2x32xf32>
    %161 = vector.shape_cast %160 : vector<2x32xf32> to vector<2x1x32xf32>
    %cst_31 = arith.constant dense<0.000000e+00> : vector<2x256xf32>
    %162 = tpu.matmul %159, %32, %cst_31 {dimension_numbers = #tpu.dot_dimension_numbers<[1], [0], [0], [1], [0, 0, 1, 1], [], []>} : vector<2x64xf32>, vector<64x256xf32>, vector<2x256xf32> -> vector<2x256xf32>
    %163 = vector.extract_strided_slice %30 {offsets = [0, 6, 0], sizes = [2, 1, 256], strides = [1, 1, 1]} : vector<2x16x256xf32> to vector<2x1x256xf32>
    %164 = vector.shape_cast %163 : vector<2x1x256xf32> to vector<2x256xf32>
    %165 = arith.addf %162, %164 : vector<2x256xf32>
    %166 = arith.negf %165 : vector<2x256xf32>
    %167 = math.exp %166 : vector<2x256xf32>
    %cst_32 = arith.constant 1.000000e+00 : f32
    %168 = vector.broadcast %cst_32 : f32 to vector<2x256xf32>
    %169 = arith.addf %168, %167 : vector<2x256xf32>
    %170 = arith.divf %168, %169 : vector<2x256xf32>
    %171 = math.tanh %165 : vector<2x256xf32>
    %172 = vector.extract_strided_slice %170 {offsets = [0, 64], sizes = [2, 64], strides = [1, 1]} : vector<2x256xf32> to vector<2x64xf32>
    %173 = arith.mulf %172, %156 : vector<2x64xf32>
    %174 = vector.extract_strided_slice %170 {offsets = [0, 0], sizes = [2, 64], strides = [1, 1]} : vector<2x256xf32> to vector<2x64xf32>
    %175 = vector.extract_strided_slice %171 {offsets = [0, 128], sizes = [2, 64], strides = [1, 1]} : vector<2x256xf32> to vector<2x64xf32>
    %176 = arith.mulf %174, %175 : vector<2x64xf32>
    %177 = arith.addf %173, %176 : vector<2x64xf32>
    %178 = vector.extract_strided_slice %170 {offsets = [0, 192], sizes = [2, 64], strides = [1, 1]} : vector<2x256xf32> to vector<2x64xf32>
    %179 = math.tanh %177 : vector<2x64xf32>
    %180 = arith.mulf %178, %179 : vector<2x64xf32>
    %181 = vector.extract_strided_slice %180 {offsets = [0, 32], sizes = [2, 32], strides = [1, 1]} : vector<2x64xf32> to vector<2x32xf32>
    %182 = vector.shape_cast %181 : vector<2x32xf32> to vector<2x1x32xf32>
    %cst_33 = arith.constant dense<0.000000e+00> : vector<2x256xf32>
    %183 = tpu.matmul %180, %32, %cst_33 {dimension_numbers = #tpu.dot_dimension_numbers<[1], [0], [0], [1], [0, 0, 1, 1], [], []>} : vector<2x64xf32>, vector<64x256xf32>, vector<2x256xf32> -> vector<2x256xf32>
    %184 = vector.extract_strided_slice %30 {offsets = [0, 7, 0], sizes = [2, 1, 256], strides = [1, 1, 1]} : vector<2x16x256xf32> to vector<2x1x256xf32>
    %185 = vector.shape_cast %184 : vector<2x1x256xf32> to vector<2x256xf32>
    %186 = arith.addf %183, %185 : vector<2x256xf32>
    %187 = arith.negf %186 : vector<2x256xf32>
    %188 = math.exp %187 : vector<2x256xf32>
    %cst_34 = arith.constant 1.000000e+00 : f32
    %189 = vector.broadcast %cst_34 : f32 to vector<2x256xf32>
    %190 = arith.addf %189, %188 : vector<2x256xf32>
    %191 = arith.divf %189, %190 : vector<2x256xf32>
    %192 = math.tanh %186 : vector<2x256xf32>
    %193 = vector.extract_strided_slice %191 {offsets = [0, 64], sizes = [2, 64], strides = [1, 1]} : vector<2x256xf32> to vector<2x64xf32>
    %194 = arith.mulf %193, %177 : vector<2x64xf32>
    %195 = vector.extract_strided_slice %191 {offsets = [0, 0], sizes = [2, 64], strides = [1, 1]} : vector<2x256xf32> to vector<2x64xf32>
    %196 = vector.extract_strided_slice %192 {offsets = [0, 128], sizes = [2, 64], strides = [1, 1]} : vector<2x256xf32> to vector<2x64xf32>
    %197 = arith.mulf %195, %196 : vector<2x64xf32>
    %198 = arith.addf %194, %197 : vector<2x64xf32>
    %199 = vector.extract_strided_slice %191 {offsets = [0, 192], sizes = [2, 64], strides = [1, 1]} : vector<2x256xf32> to vector<2x64xf32>
    %200 = math.tanh %198 : vector<2x64xf32>
    %201 = arith.mulf %199, %200 : vector<2x64xf32>
    %202 = vector.extract_strided_slice %201 {offsets = [0, 32], sizes = [2, 32], strides = [1, 1]} : vector<2x64xf32> to vector<2x32xf32>
    %203 = vector.shape_cast %202 : vector<2x32xf32> to vector<2x1x32xf32>
    %cst_35 = arith.constant dense<0.000000e+00> : vector<2x256xf32>
    %204 = tpu.matmul %201, %32, %cst_35 {dimension_numbers = #tpu.dot_dimension_numbers<[1], [0], [0], [1], [0, 0, 1, 1], [], []>} : vector<2x64xf32>, vector<64x256xf32>, vector<2x256xf32> -> vector<2x256xf32>
    %205 = vector.extract_strided_slice %30 {offsets = [0, 8, 0], sizes = [2, 1, 256], strides = [1, 1, 1]} : vector<2x16x256xf32> to vector<2x1x256xf32>
    %206 = vector.shape_cast %205 : vector<2x1x256xf32> to vector<2x256xf32>
    %207 = arith.addf %204, %206 : vector<2x256xf32>
    %208 = arith.negf %207 : vector<2x256xf32>
    %209 = math.exp %208 : vector<2x256xf32>
    %cst_36 = arith.constant 1.000000e+00 : f32
    %210 = vector.broadcast %cst_36 : f32 to vector<2x256xf32>
    %211 = arith.addf %210, %209 : vector<2x256xf32>
    %212 = arith.divf %210, %211 : vector<2x256xf32>
    %213 = math.tanh %207 : vector<2x256xf32>
    %214 = vector.extract_strided_slice %212 {offsets = [0, 64], sizes = [2, 64], strides = [1, 1]} : vector<2x256xf32> to vector<2x64xf32>
    %215 = arith.mulf %214, %198 : vector<2x64xf32>
    %216 = vector.extract_strided_slice %212 {offsets = [0, 0], sizes = [2, 64], strides = [1, 1]} : vector<2x256xf32> to vector<2x64xf32>
    %217 = vector.extract_strided_slice %213 {offsets = [0, 128], sizes = [2, 64], strides = [1, 1]} : vector<2x256xf32> to vector<2x64xf32>
    %218 = arith.mulf %216, %217 : vector<2x64xf32>
    %219 = arith.addf %215, %218 : vector<2x64xf32>
    %220 = vector.extract_strided_slice %212 {offsets = [0, 192], sizes = [2, 64], strides = [1, 1]} : vector<2x256xf32> to vector<2x64xf32>
    %221 = math.tanh %219 : vector<2x64xf32>
    %222 = arith.mulf %220, %221 : vector<2x64xf32>
    %223 = vector.extract_strided_slice %222 {offsets = [0, 32], sizes = [2, 32], strides = [1, 1]} : vector<2x64xf32> to vector<2x32xf32>
    %224 = vector.shape_cast %223 : vector<2x32xf32> to vector<2x1x32xf32>
    %cst_37 = arith.constant dense<0.000000e+00> : vector<2x256xf32>
    %225 = tpu.matmul %222, %32, %cst_37 {dimension_numbers = #tpu.dot_dimension_numbers<[1], [0], [0], [1], [0, 0, 1, 1], [], []>} : vector<2x64xf32>, vector<64x256xf32>, vector<2x256xf32> -> vector<2x256xf32>
    %226 = vector.extract_strided_slice %30 {offsets = [0, 9, 0], sizes = [2, 1, 256], strides = [1, 1, 1]} : vector<2x16x256xf32> to vector<2x1x256xf32>
    %227 = vector.shape_cast %226 : vector<2x1x256xf32> to vector<2x256xf32>
    %228 = arith.addf %225, %227 : vector<2x256xf32>
    %229 = arith.negf %228 : vector<2x256xf32>
    %230 = math.exp %229 : vector<2x256xf32>
    %cst_38 = arith.constant 1.000000e+00 : f32
    %231 = vector.broadcast %cst_38 : f32 to vector<2x256xf32>
    %232 = arith.addf %231, %230 : vector<2x256xf32>
    %233 = arith.divf %231, %232 : vector<2x256xf32>
    %234 = math.tanh %228 : vector<2x256xf32>
    %235 = vector.extract_strided_slice %233 {offsets = [0, 64], sizes = [2, 64], strides = [1, 1]} : vector<2x256xf32> to vector<2x64xf32>
    %236 = arith.mulf %235, %219 : vector<2x64xf32>
    %237 = vector.extract_strided_slice %233 {offsets = [0, 0], sizes = [2, 64], strides = [1, 1]} : vector<2x256xf32> to vector<2x64xf32>
    %238 = vector.extract_strided_slice %234 {offsets = [0, 128], sizes = [2, 64], strides = [1, 1]} : vector<2x256xf32> to vector<2x64xf32>
    %239 = arith.mulf %237, %238 : vector<2x64xf32>
    %240 = arith.addf %236, %239 : vector<2x64xf32>
    %241 = vector.extract_strided_slice %233 {offsets = [0, 192], sizes = [2, 64], strides = [1, 1]} : vector<2x256xf32> to vector<2x64xf32>
    %242 = math.tanh %240 : vector<2x64xf32>
    %243 = arith.mulf %241, %242 : vector<2x64xf32>
    %244 = vector.extract_strided_slice %243 {offsets = [0, 32], sizes = [2, 32], strides = [1, 1]} : vector<2x64xf32> to vector<2x32xf32>
    %245 = vector.shape_cast %244 : vector<2x32xf32> to vector<2x1x32xf32>
    %cst_39 = arith.constant dense<0.000000e+00> : vector<2x256xf32>
    %246 = tpu.matmul %243, %32, %cst_39 {dimension_numbers = #tpu.dot_dimension_numbers<[1], [0], [0], [1], [0, 0, 1, 1], [], []>} : vector<2x64xf32>, vector<64x256xf32>, vector<2x256xf32> -> vector<2x256xf32>
    %247 = vector.extract_strided_slice %30 {offsets = [0, 10, 0], sizes = [2, 1, 256], strides = [1, 1, 1]} : vector<2x16x256xf32> to vector<2x1x256xf32>
    %248 = vector.shape_cast %247 : vector<2x1x256xf32> to vector<2x256xf32>
    %249 = arith.addf %246, %248 : vector<2x256xf32>
    %250 = arith.negf %249 : vector<2x256xf32>
    %251 = math.exp %250 : vector<2x256xf32>
    %cst_40 = arith.constant 1.000000e+00 : f32
    %252 = vector.broadcast %cst_40 : f32 to vector<2x256xf32>
    %253 = arith.addf %252, %251 : vector<2x256xf32>
    %254 = arith.divf %252, %253 : vector<2x256xf32>
    %255 = math.tanh %249 : vector<2x256xf32>
    %256 = vector.extract_strided_slice %254 {offsets = [0, 64], sizes = [2, 64], strides = [1, 1]} : vector<2x256xf32> to vector<2x64xf32>
    %257 = arith.mulf %256, %240 : vector<2x64xf32>
    %258 = vector.extract_strided_slice %254 {offsets = [0, 0], sizes = [2, 64], strides = [1, 1]} : vector<2x256xf32> to vector<2x64xf32>
    %259 = vector.extract_strided_slice %255 {offsets = [0, 128], sizes = [2, 64], strides = [1, 1]} : vector<2x256xf32> to vector<2x64xf32>
    %260 = arith.mulf %258, %259 : vector<2x64xf32>
    %261 = arith.addf %257, %260 : vector<2x64xf32>
    %262 = vector.extract_strided_slice %254 {offsets = [0, 192], sizes = [2, 64], strides = [1, 1]} : vector<2x256xf32> to vector<2x64xf32>
    %263 = math.tanh %261 : vector<2x64xf32>
    %264 = arith.mulf %262, %263 : vector<2x64xf32>
    %265 = vector.extract_strided_slice %264 {offsets = [0, 32], sizes = [2, 32], strides = [1, 1]} : vector<2x64xf32> to vector<2x32xf32>
    %266 = vector.shape_cast %265 : vector<2x32xf32> to vector<2x1x32xf32>
    %cst_41 = arith.constant dense<0.000000e+00> : vector<2x256xf32>
    %267 = tpu.matmul %264, %32, %cst_41 {dimension_numbers = #tpu.dot_dimension_numbers<[1], [0], [0], [1], [0, 0, 1, 1], [], []>} : vector<2x64xf32>, vector<64x256xf32>, vector<2x256xf32> -> vector<2x256xf32>
    %268 = vector.extract_strided_slice %30 {offsets = [0, 11, 0], sizes = [2, 1, 256], strides = [1, 1, 1]} : vector<2x16x256xf32> to vector<2x1x256xf32>
    %269 = vector.shape_cast %268 : vector<2x1x256xf32> to vector<2x256xf32>
    %270 = arith.addf %267, %269 : vector<2x256xf32>
    %271 = arith.negf %270 : vector<2x256xf32>
    %272 = math.exp %271 : vector<2x256xf32>
    %cst_42 = arith.constant 1.000000e+00 : f32
    %273 = vector.broadcast %cst_42 : f32 to vector<2x256xf32>
    %274 = arith.addf %273, %272 : vector<2x256xf32>
    %275 = arith.divf %273, %274 : vector<2x256xf32>
    %276 = math.tanh %270 : vector<2x256xf32>
    %277 = vector.extract_strided_slice %275 {offsets = [0, 64], sizes = [2, 64], strides = [1, 1]} : vector<2x256xf32> to vector<2x64xf32>
    %278 = arith.mulf %277, %261 : vector<2x64xf32>
    %279 = vector.extract_strided_slice %275 {offsets = [0, 0], sizes = [2, 64], strides = [1, 1]} : vector<2x256xf32> to vector<2x64xf32>
    %280 = vector.extract_strided_slice %276 {offsets = [0, 128], sizes = [2, 64], strides = [1, 1]} : vector<2x256xf32> to vector<2x64xf32>
    %281 = arith.mulf %279, %280 : vector<2x64xf32>
    %282 = arith.addf %278, %281 : vector<2x64xf32>
    %283 = vector.extract_strided_slice %275 {offsets = [0, 192], sizes = [2, 64], strides = [1, 1]} : vector<2x256xf32> to vector<2x64xf32>
    %284 = math.tanh %282 : vector<2x64xf32>
    %285 = arith.mulf %283, %284 : vector<2x64xf32>
    %286 = vector.extract_strided_slice %285 {offsets = [0, 32], sizes = [2, 32], strides = [1, 1]} : vector<2x64xf32> to vector<2x32xf32>
    %287 = vector.shape_cast %286 : vector<2x32xf32> to vector<2x1x32xf32>
    %cst_43 = arith.constant dense<0.000000e+00> : vector<2x256xf32>
    %288 = tpu.matmul %285, %32, %cst_43 {dimension_numbers = #tpu.dot_dimension_numbers<[1], [0], [0], [1], [0, 0, 1, 1], [], []>} : vector<2x64xf32>, vector<64x256xf32>, vector<2x256xf32> -> vector<2x256xf32>
    %289 = vector.extract_strided_slice %30 {offsets = [0, 12, 0], sizes = [2, 1, 256], strides = [1, 1, 1]} : vector<2x16x256xf32> to vector<2x1x256xf32>
    %290 = vector.shape_cast %289 : vector<2x1x256xf32> to vector<2x256xf32>
    %291 = arith.addf %288, %290 : vector<2x256xf32>
    %292 = arith.negf %291 : vector<2x256xf32>
    %293 = math.exp %292 : vector<2x256xf32>
    %cst_44 = arith.constant 1.000000e+00 : f32
    %294 = vector.broadcast %cst_44 : f32 to vector<2x256xf32>
    %295 = arith.addf %294, %293 : vector<2x256xf32>
    %296 = arith.divf %294, %295 : vector<2x256xf32>
    %297 = math.tanh %291 : vector<2x256xf32>
    %298 = vector.extract_strided_slice %296 {offsets = [0, 64], sizes = [2, 64], strides = [1, 1]} : vector<2x256xf32> to vector<2x64xf32>
    %299 = arith.mulf %298, %282 : vector<2x64xf32>
    %300 = vector.extract_strided_slice %296 {offsets = [0, 0], sizes = [2, 64], strides = [1, 1]} : vector<2x256xf32> to vector<2x64xf32>
    %301 = vector.extract_strided_slice %297 {offsets = [0, 128], sizes = [2, 64], strides = [1, 1]} : vector<2x256xf32> to vector<2x64xf32>
    %302 = arith.mulf %300, %301 : vector<2x64xf32>
    %303 = arith.addf %299, %302 : vector<2x64xf32>
    %304 = vector.extract_strided_slice %296 {offsets = [0, 192], sizes = [2, 64], strides = [1, 1]} : vector<2x256xf32> to vector<2x64xf32>
    %305 = math.tanh %303 : vector<2x64xf32>
    %306 = arith.mulf %304, %305 : vector<2x64xf32>
    %307 = vector.extract_strided_slice %306 {offsets = [0, 32], sizes = [2, 32], strides = [1, 1]} : vector<2x64xf32> to vector<2x32xf32>
    %308 = vector.shape_cast %307 : vector<2x32xf32> to vector<2x1x32xf32>
    %cst_45 = arith.constant dense<0.000000e+00> : vector<2x256xf32>
    %309 = tpu.matmul %306, %32, %cst_45 {dimension_numbers = #tpu.dot_dimension_numbers<[1], [0], [0], [1], [0, 0, 1, 1], [], []>} : vector<2x64xf32>, vector<64x256xf32>, vector<2x256xf32> -> vector<2x256xf32>
    %310 = vector.extract_strided_slice %30 {offsets = [0, 13, 0], sizes = [2, 1, 256], strides = [1, 1, 1]} : vector<2x16x256xf32> to vector<2x1x256xf32>
    %311 = vector.shape_cast %310 : vector<2x1x256xf32> to vector<2x256xf32>
    %312 = arith.addf %309, %311 : vector<2x256xf32>
    %313 = arith.negf %312 : vector<2x256xf32>
    %314 = math.exp %313 : vector<2x256xf32>
    %cst_46 = arith.constant 1.000000e+00 : f32
    %315 = vector.broadcast %cst_46 : f32 to vector<2x256xf32>
    %316 = arith.addf %315, %314 : vector<2x256xf32>
    %317 = arith.divf %315, %316 : vector<2x256xf32>
    %318 = math.tanh %312 : vector<2x256xf32>
    %319 = vector.extract_strided_slice %317 {offsets = [0, 64], sizes = [2, 64], strides = [1, 1]} : vector<2x256xf32> to vector<2x64xf32>
    %320 = arith.mulf %319, %303 : vector<2x64xf32>
    %321 = vector.extract_strided_slice %317 {offsets = [0, 0], sizes = [2, 64], strides = [1, 1]} : vector<2x256xf32> to vector<2x64xf32>
    %322 = vector.extract_strided_slice %318 {offsets = [0, 128], sizes = [2, 64], strides = [1, 1]} : vector<2x256xf32> to vector<2x64xf32>
    %323 = arith.mulf %321, %322 : vector<2x64xf32>
    %324 = arith.addf %320, %323 : vector<2x64xf32>
    %325 = vector.extract_strided_slice %317 {offsets = [0, 192], sizes = [2, 64], strides = [1, 1]} : vector<2x256xf32> to vector<2x64xf32>
    %326 = math.tanh %324 : vector<2x64xf32>
    %327 = arith.mulf %325, %326 : vector<2x64xf32>
    %328 = vector.extract_strided_slice %327 {offsets = [0, 32], sizes = [2, 32], strides = [1, 1]} : vector<2x64xf32> to vector<2x32xf32>
    %329 = vector.shape_cast %328 : vector<2x32xf32> to vector<2x1x32xf32>
    %cst_47 = arith.constant dense<0.000000e+00> : vector<2x256xf32>
    %330 = tpu.matmul %327, %32, %cst_47 {dimension_numbers = #tpu.dot_dimension_numbers<[1], [0], [0], [1], [0, 0, 1, 1], [], []>} : vector<2x64xf32>, vector<64x256xf32>, vector<2x256xf32> -> vector<2x256xf32>
    %331 = vector.extract_strided_slice %30 {offsets = [0, 14, 0], sizes = [2, 1, 256], strides = [1, 1, 1]} : vector<2x16x256xf32> to vector<2x1x256xf32>
    %332 = vector.shape_cast %331 : vector<2x1x256xf32> to vector<2x256xf32>
    %333 = arith.addf %330, %332 : vector<2x256xf32>
    %334 = arith.negf %333 : vector<2x256xf32>
    %335 = math.exp %334 : vector<2x256xf32>
    %cst_48 = arith.constant 1.000000e+00 : f32
    %336 = vector.broadcast %cst_48 : f32 to vector<2x256xf32>
    %337 = arith.addf %336, %335 : vector<2x256xf32>
    %338 = arith.divf %336, %337 : vector<2x256xf32>
    %339 = math.tanh %333 : vector<2x256xf32>
    %340 = vector.extract_strided_slice %338 {offsets = [0, 64], sizes = [2, 64], strides = [1, 1]} : vector<2x256xf32> to vector<2x64xf32>
    %341 = arith.mulf %340, %324 : vector<2x64xf32>
    %342 = vector.extract_strided_slice %338 {offsets = [0, 0], sizes = [2, 64], strides = [1, 1]} : vector<2x256xf32> to vector<2x64xf32>
    %343 = vector.extract_strided_slice %339 {offsets = [0, 128], sizes = [2, 64], strides = [1, 1]} : vector<2x256xf32> to vector<2x64xf32>
    %344 = arith.mulf %342, %343 : vector<2x64xf32>
    %345 = arith.addf %341, %344 : vector<2x64xf32>
    %346 = vector.extract_strided_slice %338 {offsets = [0, 192], sizes = [2, 64], strides = [1, 1]} : vector<2x256xf32> to vector<2x64xf32>
    %347 = math.tanh %345 : vector<2x64xf32>
    %348 = arith.mulf %346, %347 : vector<2x64xf32>
    %349 = vector.extract_strided_slice %348 {offsets = [0, 32], sizes = [2, 32], strides = [1, 1]} : vector<2x64xf32> to vector<2x32xf32>
    %350 = vector.shape_cast %349 : vector<2x32xf32> to vector<2x1x32xf32>
    %cst_49 = arith.constant dense<0.000000e+00> : vector<2x256xf32>
    %351 = tpu.matmul %348, %32, %cst_49 {dimension_numbers = #tpu.dot_dimension_numbers<[1], [0], [0], [1], [0, 0, 1, 1], [], []>} : vector<2x64xf32>, vector<64x256xf32>, vector<2x256xf32> -> vector<2x256xf32>
    %352 = vector.extract_strided_slice %30 {offsets = [0, 15, 0], sizes = [2, 1, 256], strides = [1, 1, 1]} : vector<2x16x256xf32> to vector<2x1x256xf32>
    %353 = vector.shape_cast %352 : vector<2x1x256xf32> to vector<2x256xf32>
    %354 = arith.addf %351, %353 : vector<2x256xf32>
    %355 = arith.negf %354 : vector<2x256xf32>
    %356 = math.exp %355 : vector<2x256xf32>
    %cst_50 = arith.constant 1.000000e+00 : f32
    %357 = vector.broadcast %cst_50 : f32 to vector<2x256xf32>
    %358 = arith.addf %357, %356 : vector<2x256xf32>
    %359 = arith.divf %357, %358 : vector<2x256xf32>
    %360 = math.tanh %354 : vector<2x256xf32>
    %361 = vector.extract_strided_slice %359 {offsets = [0, 64], sizes = [2, 64], strides = [1, 1]} : vector<2x256xf32> to vector<2x64xf32>
    %362 = arith.mulf %361, %345 : vector<2x64xf32>
    %363 = vector.extract_strided_slice %359 {offsets = [0, 0], sizes = [2, 64], strides = [1, 1]} : vector<2x256xf32> to vector<2x64xf32>
    %364 = vector.extract_strided_slice %360 {offsets = [0, 128], sizes = [2, 64], strides = [1, 1]} : vector<2x256xf32> to vector<2x64xf32>
    %365 = arith.mulf %363, %364 : vector<2x64xf32>
    %366 = arith.addf %362, %365 : vector<2x64xf32>
    %367 = vector.extract_strided_slice %359 {offsets = [0, 192], sizes = [2, 64], strides = [1, 1]} : vector<2x256xf32> to vector<2x64xf32>
    %368 = math.tanh %366 : vector<2x64xf32>
    %369 = arith.mulf %367, %368 : vector<2x64xf32>
    %370 = vector.extract_strided_slice %369 {offsets = [0, 0], sizes = [2, 32], strides = [1, 1]} : vector<2x64xf32> to vector<2x32xf32>
    %371 = vector.extract_strided_slice %366 {offsets = [0, 0], sizes = [2, 32], strides = [1, 1]} : vector<2x64xf32> to vector<2x32xf32>
    %372 = vector.extract_strided_slice %369 {offsets = [0, 32], sizes = [2, 32], strides = [1, 1]} : vector<2x64xf32> to vector<2x32xf32>
    %373 = vector.shape_cast %372 : vector<2x32xf32> to vector<2x1x32xf32>
    %cst_51 = arith.constant dense<0.000000e+00> : vector<2x256xf32>
    %374 = tpu.matmul %369, %32, %cst_51 {dimension_numbers = #tpu.dot_dimension_numbers<[1], [0], [0], [1], [0, 0, 1, 1], [], []>} : vector<2x64xf32>, vector<64x256xf32>, vector<2x256xf32> -> vector<2x256xf32>
    %375 = vector.broadcast %34 : vector<1x256xf32> to vector<2x256xf32>
    %376 = arith.addf %374, %375 : vector<2x256xf32>
    %377 = arith.negf %376 : vector<2x256xf32>
    %378 = math.exp %377 : vector<2x256xf32>
    %cst_52 = arith.constant 1.000000e+00 : f32
    %379 = vector.broadcast %cst_52 : f32 to vector<2x256xf32>
    %380 = arith.addf %379, %378 : vector<2x256xf32>
    %381 = arith.divf %379, %380 : vector<2x256xf32>
    %382 = math.tanh %376 : vector<2x256xf32>
    %383 = vector.extract_strided_slice %381 {offsets = [0, 64], sizes = [2, 64], strides = [1, 1]} : vector<2x256xf32> to vector<2x64xf32>
    %384 = arith.mulf %383, %366 : vector<2x64xf32>
    %385 = vector.extract_strided_slice %381 {offsets = [0, 0], sizes = [2, 64], strides = [1, 1]} : vector<2x256xf32> to vector<2x64xf32>
    %386 = vector.extract_strided_slice %382 {offsets = [0, 128], sizes = [2, 64], strides = [1, 1]} : vector<2x256xf32> to vector<2x64xf32>
    %387 = arith.mulf %385, %386 : vector<2x64xf32>
    %388 = arith.addf %384, %387 : vector<2x64xf32>
    %389 = vector.extract_strided_slice %381 {offsets = [0, 192], sizes = [2, 64], strides = [1, 1]} : vector<2x256xf32> to vector<2x64xf32>
    %390 = math.tanh %388 : vector<2x64xf32>
    %391 = arith.mulf %389, %390 : vector<2x64xf32>
    %392 = vector.extract_strided_slice %391 {offsets = [0, 32], sizes = [2, 32], strides = [1, 1]} : vector<2x64xf32> to vector<2x32xf32>
    %393 = vector.shape_cast %392 : vector<2x32xf32> to vector<2x1x32xf32>
    %394 = vector.extract_strided_slice %391 {offsets = [0, 32], sizes = [2, 32], strides = [1, 1]} : vector<2x64xf32> to vector<2x32xf32>
    %395 = vector.extract_strided_slice %388 {offsets = [0, 32], sizes = [2, 32], strides = [1, 1]} : vector<2x64xf32> to vector<2x32xf32>
    %396 = vector.shape_cast %370 : vector<2x32xf32> to vector<2x1x1x32xf32>
    %c0_53 = arith.constant 0 : index
    %c0_54 = arith.constant 0 : index
    %c0_55 = arith.constant 0 : index
    %c0_56 = arith.constant 0 : index
    %397 = vector.load %arg17[%c0_53, %c0_54, %c0_55, %c0_56] : memref<2x2x2x32xf32, #tpu.memory_space<vmem>>, vector<2x1x1x32xf32>
    tpu.vector_store %arg17[%c0_53, %c0_54, %c0_55, %c0_56], %396 {strides = array<i32>} : memref<2x2x2x32xf32, #tpu.memory_space<vmem>>, vector<2x1x1x32xf32>,
    %398 = vector.shape_cast %394 : vector<2x32xf32> to vector<2x1x1x32xf32>
    %c0_57 = arith.constant 0 : index
    %c0_58 = arith.constant 0 : index
    %c1 = arith.constant 1 : index
    %c0_59 = arith.constant 0 : index
    %399 = vector.load %arg17[%c0_57, %c0_58, %c1, %c0_59] : memref<2x2x2x32xf32, #tpu.memory_space<vmem>>, vector<2x1x1x32xf32>
    tpu.vector_store %arg17[%c0_57, %c0_58, %c1, %c0_59], %398 {strides = array<i32>} : memref<2x2x2x32xf32, #tpu.memory_space<vmem>>, vector<2x1x1x32xf32>,
    %400 = vector.shape_cast %371 : vector<2x32xf32> to vector<2x1x1x32xf32>
    %c0_60 = arith.constant 0 : index
    %c0_61 = arith.constant 0 : index
    %c0_62 = arith.constant 0 : index
    %c0_63 = arith.constant 0 : index
    %401 = vector.load %arg18[%c0_60, %c0_61, %c0_62, %c0_63] : memref<2x2x2x32xf32, #tpu.memory_space<vmem>>, vector<2x1x1x32xf32>
    tpu.vector_store %arg18[%c0_60, %c0_61, %c0_62, %c0_63], %400 {strides = array<i32>} : memref<2x2x2x32xf32, #tpu.memory_space<vmem>>, vector<2x1x1x32xf32>,
    %402 = vector.shape_cast %395 : vector<2x32xf32> to vector<2x1x1x32xf32>
    %c0_64 = arith.constant 0 : index
    %c0_65 = arith.constant 0 : index
    %c1_66 = arith.constant 1 : index
    %c0_67 = arith.constant 0 : index
    %403 = vector.load %arg18[%c0_64, %c0_65, %c1_66, %c0_67] : memref<2x2x2x32xf32, #tpu.memory_space<vmem>>, vector<2x1x1x32xf32>
    tpu.vector_store %arg18[%c0_64, %c0_65, %c1_66, %c0_67], %402 {strides = array<i32>} : memref<2x2x2x32xf32, #tpu.memory_space<vmem>>, vector<2x1x1x32xf32>,
    %404 = tpu.concatenate %77, %98, %119, %140, %161, %182, %203, %224, %245, %266, %287, %308, %329, %350, %373, %393 in 1 : vector<2x1x32xf32>, vector<2x1x32xf32>, vector<2x1x32xf32>, vector<2x1x32xf32>, vector<2x1x32xf32>, vector<2x1x32xf32>, vector<2x1x32xf32>, vector<2x1x32xf32>, vector<2x1x32xf32>, vector<2x1x32xf32>, vector<2x1x32xf32>, vector<2x1x32xf32>, vector<2x1x32xf32>, vector<2x1x32xf32>, vector<2x1x32xf32>, vector<2x1x32xf32> -> vector<2x16x32xf32>
    %cst_68 = arith.constant 0.000000e+00 : f32
    %405 = vector.broadcast %cst_68 : f32 to vector<2x16x32xf32>
    %406 = arith.maximumf %404, %405 : vector<2x16x32xf32>
    %cst_69 = arith.constant 0.000000e+00 : f32
    %407 = vector.broadcast %cst_69 : f32 to vector<2x1x184x32xf32>
    %c0_70 = arith.constant 0 : index
    %c0_71 = arith.constant 0 : index
    %c0_72 = arith.constant 0 : index
    %c0_73 = arith.constant 0 : index
    %408 = vector.load %arg16[%c0_70, %c0_71, %c0_72, %c0_73] : memref<2x2x200x32xf32, #tpu.memory_space<vmem>>, vector<2x1x184x32xf32>
    tpu.vector_store %arg16[%c0_70, %c0_71, %c0_72, %c0_73], %407 {strides = array<i32>} : memref<2x2x200x32xf32, #tpu.memory_space<vmem>>, vector<2x1x184x32xf32>,
    %409 = vector.shape_cast %406 : vector<2x16x32xf32> to vector<2x1x16x32xf32>
    %c0_74 = arith.constant 0 : index
    %c0_75 = arith.constant 0 : index
    %c184 = arith.constant 184 : index
    %c0_76 = arith.constant 0 : index
    %410 = vector.load %arg16[%c0_74, %c0_75, %c184, %c0_76] : memref<2x2x200x32xf32, #tpu.memory_space<vmem>>, vector<2x1x16x32xf32>
    tpu.vector_store %arg16[%c0_74, %c0_75, %c184, %c0_76], %409 {strides = array<i32>} : memref<2x2x200x32xf32, #tpu.memory_space<vmem>>, vector<2x1x16x32xf32>,
    %411 = vector.shape_cast %406 : vector<2x16x32xf32> to vector<32x32xf32>
    %cst_77 = arith.constant dense<0.000000e+00> : vector<32xf32>
    %412 = vector.multi_reduction <add>, %411, %cst_77 [1] : vector<32x32xf32> to vector<32xf32>
    %413 = vector.shape_cast %412 : vector<32xf32> to vector<32x1xf32>
    %cst_78 = arith.constant 3.200000e+01 : f32
    %414 = vector.broadcast %cst_78 : f32 to vector<32x1xf32>
    %415 = arith.divf %413, %414 : vector<32x1xf32>
    %416 = vector.broadcast %415 : vector<32x1xf32> to vector<32x32xf32>
    %417 = arith.subf %411, %416 : vector<32x32xf32>
    %418 = arith.mulf %417, %417 : vector<32x32xf32>
    %cst_79 = arith.constant dense<0.000000e+00> : vector<32xf32>
    %419 = vector.multi_reduction <add>, %418, %cst_79 [1] : vector<32x32xf32> to vector<32xf32>
    %420 = vector.shape_cast %419 : vector<32xf32> to vector<32x1xf32>
    %cst_80 = arith.constant 3.200000e+01 : f32
    %421 = vector.broadcast %cst_80 : f32 to vector<32x1xf32>
    %422 = arith.divf %420, %421 : vector<32x1xf32>
    %cst_81 = arith.constant 9.99999974E-6 : f32
    %423 = vector.broadcast %cst_81 : f32 to vector<32x1xf32>
    %424 = arith.addf %422, %423 : vector<32x1xf32>
    %425 = math.rsqrt %424 : vector<32x1xf32>
    %426 = vector.broadcast %425 : vector<32x1xf32> to vector<32x32xf32>
    %427 = arith.mulf %417, %426 : vector<32x32xf32>
    %c0_82 = arith.constant 0 : index
    %c0_83 = arith.constant 0 : index
    %c0_84 = arith.constant 0 : index
    %428 = vector.load %arg4[%c0_82, %c0_83, %c0_84] : memref<2x32x96xf32, #tpu.memory_space<vmem>>, vector<1x32x96xf32>
    %429 = vector.shape_cast %428 : vector<1x32x96xf32> to vector<32x96xf32>
    %cst_85 = arith.constant dense<0.000000e+00> : vector<32x96xf32>
    %430 = tpu.matmul %427, %429, %cst_85 {dimension_numbers = #tpu.dot_dimension_numbers<[1], [0], [0], [1], [0, 0, 1, 1], [], []>} : vector<32x32xf32>, vector<32x96xf32>, vector<32x96xf32> -> vector<32x96xf32>
    %c0_86 = arith.constant 0 : index
    %c0_87 = arith.constant 0 : index
    %c0_88 = arith.constant 0 : index
    %431 = vector.load %arg5[%c0_86, %c0_87, %c0_88] : memref<2x1x96xf32, #tpu.memory_space<vmem>>, vector<1x1x96xf32>
    %432 = vector.shape_cast %431 : vector<1x1x96xf32> to vector<1x96xf32>
    %433 = vector.broadcast %432 : vector<1x96xf32> to vector<32x96xf32>
    %434 = arith.addf %430, %433 : vector<32x96xf32>
    %435 = vector.extract_strided_slice %434 {offsets = [0, 0], sizes = [32, 32], strides = [1, 1]} : vector<32x96xf32> to vector<32x32xf32>
    %436 = vector.shape_cast %435 : vector<32x32xf32> to vector<2x16x32xf32>
    %437 = vector.extract_strided_slice %434 {offsets = [0, 32], sizes = [32, 32], strides = [1, 1]} : vector<32x96xf32> to vector<32x32xf32>
    %cst_89 = arith.constant 0.000000e+00 : f32
    %438 = vector.broadcast %cst_89 : f32 to vector<32x32xf32>
    %439 = arith.maximumf %437, %438 : vector<32x32xf32>
    %440 = vector.extract_strided_slice %434 {offsets = [0, 64], sizes = [32, 32], strides = [1, 1]} : vector<32x96xf32> to vector<32x32xf32>
    %441 = arith.mulf %439, %440 : vector<32x32xf32>
    %442 = vector.shape_cast %441 : vector<32x32xf32> to vector<2x16x32xf32>
    %443 = vector.extract_strided_slice %436 {offsets = [0, 0, 0], sizes = [2, 12, 32], strides = [1, 1, 1]} : vector<2x16x32xf32> to vector<2x12x32xf32>
    %444 = vector.extract_strided_slice %436 {offsets = [0, 1, 0], sizes = [2, 12, 32], strides = [1, 1, 1]} : vector<2x16x32xf32> to vector<2x12x32xf32>
    %445 = vector.extract_strided_slice %436 {offsets = [0, 2, 0], sizes = [2, 12, 32], strides = [1, 1, 1]} : vector<2x16x32xf32> to vector<2x12x32xf32>
    %446 = vector.extract_strided_slice %436 {offsets = [0, 3, 0], sizes = [2, 12, 32], strides = [1, 1, 1]} : vector<2x16x32xf32> to vector<2x12x32xf32>
    %447 = vector.extract_strided_slice %436 {offsets = [0, 4, 0], sizes = [2, 12, 32], strides = [1, 1, 1]} : vector<2x16x32xf32> to vector<2x12x32xf32>
    %448 = tpu.concatenate %443, %444, %445, %446, %447 in 2 : vector<2x12x32xf32>, vector<2x12x32xf32>, vector<2x12x32xf32>, vector<2x12x32xf32>, vector<2x12x32xf32> -> vector<2x12x160xf32>
    %449 = vector.shape_cast %448 : vector<2x12x160xf32> to vector<24x160xf32>
    %c0_90 = arith.constant 0 : index
    %c0_91 = arith.constant 0 : index
    %c0_92 = arith.constant 0 : index
    %450 = vector.load %arg7[%c0_90, %c0_91, %c0_92] : memref<2x160x200xf32, #tpu.memory_space<vmem>>, vector<1x160x200xf32>
    %451 = vector.shape_cast %450 : vector<1x160x200xf32> to vector<160x200xf32>
    %cst_93 = arith.constant dense<0.000000e+00> : vector<24x200xf32>
    %452 = tpu.matmul %449, %451, %cst_93 {dimension_numbers = #tpu.dot_dimension_numbers<[1], [0], [0], [1], [0, 0, 1, 1], [], []>} : vector<24x160xf32>, vector<160x200xf32>, vector<24x200xf32> -> vector<24x200xf32>
    %c0_94 = arith.constant 0 : index
    %c0_95 = arith.constant 0 : index
    %c0_96 = arith.constant 0 : index
    %453 = vector.load %arg8[%c0_94, %c0_95, %c0_96] : memref<2x1x200xf32, #tpu.memory_space<vmem>>, vector<1x1x200xf32>
    %454 = vector.shape_cast %453 : vector<1x1x200xf32> to vector<1x200xf32>
    %455 = vector.broadcast %454 : vector<1x200xf32> to vector<24x200xf32>
    %456 = arith.addf %452, %455 : vector<24x200xf32>
    %cst_97 = arith.constant 0.000000e+00 : f32
    %457 = vector.broadcast %cst_97 : f32 to vector<24x200xf32>
    %458 = arith.maximumf %456, %457 : vector<24x200xf32>
    %c0_98 = arith.constant 0 : index
    %c0_99 = arith.constant 0 : index
    %c0_100 = arith.constant 0 : index
    %459 = vector.load %arg9[%c0_98, %c0_99, %c0_100] : memref<2x200x200xf32, #tpu.memory_space<vmem>>, vector<1x200x200xf32>
    %460 = vector.shape_cast %459 : vector<1x200x200xf32> to vector<200x200xf32>
    %cst_101 = arith.constant dense<0.000000e+00> : vector<24x200xf32>
    %461 = tpu.matmul %458, %460, %cst_101 {dimension_numbers = #tpu.dot_dimension_numbers<[1], [0], [0], [1], [0, 0, 1, 1], [], []>} : vector<24x200xf32>, vector<200x200xf32>, vector<24x200xf32> -> vector<24x200xf32>
    %c0_102 = arith.constant 0 : index
    %c0_103 = arith.constant 0 : index
    %c0_104 = arith.constant 0 : index
    %462 = vector.load %arg10[%c0_102, %c0_103, %c0_104] : memref<2x1x200xf32, #tpu.memory_space<vmem>>, vector<1x1x200xf32>
    %463 = vector.shape_cast %462 : vector<1x1x200xf32> to vector<1x200xf32>
    %464 = vector.broadcast %463 : vector<1x200xf32> to vector<24x200xf32>
    %465 = arith.addf %461, %464 : vector<24x200xf32>
    %466 = arith.negf %465 : vector<24x200xf32>
    %467 = math.exp %466 : vector<24x200xf32>
    %cst_105 = arith.constant 1.000000e+00 : f32
    %468 = vector.broadcast %cst_105 : f32 to vector<24x200xf32>
    %469 = arith.addf %468, %467 : vector<24x200xf32>
    %470 = arith.divf %468, %469 : vector<24x200xf32>
    %471 = vector.shape_cast %470 : vector<24x200xf32> to vector<2x12x200xf32>
    %472 = tpu.iota {dimensions = array<i32: 0>} : vector<12x16xi32>
    %473 = tpu.iota {dimensions = array<i32: 1>} : vector<12x16xi32>
    %474 = arith.subi %472, %473 : vector<12x16xi32>
    %cst_106 = arith.constant 0.000000e+00 : f32
    %475 = vector.broadcast %cst_106 : f32 to vector<2x12x16xf32>
    %c1_i32 = arith.constant 1 : i32
    %476 = vector.broadcast %c1_i32 : i32 to vector<12x16xi32>
    %477 = arith.cmpi eq, %474, %476 : vector<12x16xi32>
    %478 = arith.extui %477 : vector<12x16xi1> to vector<12x16xi32>
    %479 = arith.sitofp %478 : vector<12x16xi32> to vector<12x16xf32>
    %480 = vector.shape_cast %479 : vector<12x16xf32> to vector<1x12x16xf32>
    %481 = vector.extract_strided_slice %471 {offsets = [0, 0, 199], sizes = [2, 12, 1], strides = [1, 1, 1]} : vector<2x12x200xf32> to vector<2x12x1xf32>
    %482 = vector.broadcast %480 : vector<1x12x16xf32> to vector<2x12x16xf32>
    %483 = vector.broadcast %481 : vector<2x12x1xf32> to vector<2x12x16xf32>
    %484 = arith.mulf %482, %483 : vector<2x12x16xf32>
    %485 = arith.addf %475, %484 : vector<2x12x16xf32>
    %c2_i32 = arith.constant 2 : i32
    %486 = vector.broadcast %c2_i32 : i32 to vector<12x16xi32>
    %487 = arith.cmpi eq, %474, %486 : vector<12x16xi32>
    %488 = arith.extui %487 : vector<12x16xi1> to vector<12x16xi32>
    %489 = arith.sitofp %488 : vector<12x16xi32> to vector<12x16xf32>
    %490 = vector.shape_cast %489 : vector<12x16xf32> to vector<1x12x16xf32>
    %491 = vector.extract_strided_slice %471 {offsets = [0, 0, 198], sizes = [2, 12, 1], strides = [1, 1, 1]} : vector<2x12x200xf32> to vector<2x12x1xf32>
    %492 = vector.broadcast %490 : vector<1x12x16xf32> to vector<2x12x16xf32>
    %493 = vector.broadcast %491 : vector<2x12x1xf32> to vector<2x12x16xf32>
    %494 = arith.mulf %492, %493 : vector<2x12x16xf32>
    %495 = arith.addf %485, %494 : vector<2x12x16xf32>
    %c3_i32 = arith.constant 3 : i32
    %496 = vector.broadcast %c3_i32 : i32 to vector<12x16xi32>
    %497 = arith.cmpi eq, %474, %496 : vector<12x16xi32>
    %498 = arith.extui %497 : vector<12x16xi1> to vector<12x16xi32>
    %499 = arith.sitofp %498 : vector<12x16xi32> to vector<12x16xf32>
    %500 = vector.shape_cast %499 : vector<12x16xf32> to vector<1x12x16xf32>
    %501 = vector.extract_strided_slice %471 {offsets = [0, 0, 197], sizes = [2, 12, 1], strides = [1, 1, 1]} : vector<2x12x200xf32> to vector<2x12x1xf32>
    %502 = vector.broadcast %500 : vector<1x12x16xf32> to vector<2x12x16xf32>
    %503 = vector.broadcast %501 : vector<2x12x1xf32> to vector<2x12x16xf32>
    %504 = arith.mulf %502, %503 : vector<2x12x16xf32>
    %505 = arith.addf %495, %504 : vector<2x12x16xf32>
    %c4_i32 = arith.constant 4 : i32
    %506 = vector.broadcast %c4_i32 : i32 to vector<12x16xi32>
    %507 = arith.cmpi eq, %474, %506 : vector<12x16xi32>
    %508 = arith.extui %507 : vector<12x16xi1> to vector<12x16xi32>
    %509 = arith.sitofp %508 : vector<12x16xi32> to vector<12x16xf32>
    %510 = vector.shape_cast %509 : vector<12x16xf32> to vector<1x12x16xf32>
    %511 = vector.extract_strided_slice %471 {offsets = [0, 0, 196], sizes = [2, 12, 1], strides = [1, 1, 1]} : vector<2x12x200xf32> to vector<2x12x1xf32>
    %512 = vector.broadcast %510 : vector<1x12x16xf32> to vector<2x12x16xf32>
    %513 = vector.broadcast %511 : vector<2x12x1xf32> to vector<2x12x16xf32>
    %514 = arith.mulf %512, %513 : vector<2x12x16xf32>
    %515 = arith.addf %505, %514 : vector<2x12x16xf32>
    %c5_i32 = arith.constant 5 : i32
    %516 = vector.broadcast %c5_i32 : i32 to vector<12x16xi32>
    %517 = arith.cmpi eq, %474, %516 : vector<12x16xi32>
    %518 = arith.extui %517 : vector<12x16xi1> to vector<12x16xi32>
    %519 = arith.sitofp %518 : vector<12x16xi32> to vector<12x16xf32>
    %520 = vector.shape_cast %519 : vector<12x16xf32> to vector<1x12x16xf32>
    %521 = vector.extract_strided_slice %471 {offsets = [0, 0, 195], sizes = [2, 12, 1], strides = [1, 1, 1]} : vector<2x12x200xf32> to vector<2x12x1xf32>
    %522 = vector.broadcast %520 : vector<1x12x16xf32> to vector<2x12x16xf32>
    %523 = vector.broadcast %521 : vector<2x12x1xf32> to vector<2x12x16xf32>
    %524 = arith.mulf %522, %523 : vector<2x12x16xf32>
    %525 = arith.addf %515, %524 : vector<2x12x16xf32>
    %c6_i32 = arith.constant 6 : i32
    %526 = vector.broadcast %c6_i32 : i32 to vector<12x16xi32>
    %527 = arith.cmpi eq, %474, %526 : vector<12x16xi32>
    %528 = arith.extui %527 : vector<12x16xi1> to vector<12x16xi32>
    %529 = arith.sitofp %528 : vector<12x16xi32> to vector<12x16xf32>
    %530 = vector.shape_cast %529 : vector<12x16xf32> to vector<1x12x16xf32>
    %531 = vector.extract_strided_slice %471 {offsets = [0, 0, 194], sizes = [2, 12, 1], strides = [1, 1, 1]} : vector<2x12x200xf32> to vector<2x12x1xf32>
    %532 = vector.broadcast %530 : vector<1x12x16xf32> to vector<2x12x16xf32>
    %533 = vector.broadcast %531 : vector<2x12x1xf32> to vector<2x12x16xf32>
    %534 = arith.mulf %532, %533 : vector<2x12x16xf32>
    %535 = arith.addf %525, %534 : vector<2x12x16xf32>
    %c7_i32 = arith.constant 7 : i32
    %536 = vector.broadcast %c7_i32 : i32 to vector<12x16xi32>
    %537 = arith.cmpi eq, %474, %536 : vector<12x16xi32>
    %538 = arith.extui %537 : vector<12x16xi1> to vector<12x16xi32>
    %539 = arith.sitofp %538 : vector<12x16xi32> to vector<12x16xf32>
    %540 = vector.shape_cast %539 : vector<12x16xf32> to vector<1x12x16xf32>
    %541 = vector.extract_strided_slice %471 {offsets = [0, 0, 193], sizes = [2, 12, 1], strides = [1, 1, 1]} : vector<2x12x200xf32> to vector<2x12x1xf32>
    %542 = vector.broadcast %540 : vector<1x12x16xf32> to vector<2x12x16xf32>
    %543 = vector.broadcast %541 : vector<2x12x1xf32> to vector<2x12x16xf32>
    %544 = arith.mulf %542, %543 : vector<2x12x16xf32>
    %545 = arith.addf %535, %544 : vector<2x12x16xf32>
    %c8_i32 = arith.constant 8 : i32
    %546 = vector.broadcast %c8_i32 : i32 to vector<12x16xi32>
    %547 = arith.cmpi eq, %474, %546 : vector<12x16xi32>
    %548 = arith.extui %547 : vector<12x16xi1> to vector<12x16xi32>
    %549 = arith.sitofp %548 : vector<12x16xi32> to vector<12x16xf32>
    %550 = vector.shape_cast %549 : vector<12x16xf32> to vector<1x12x16xf32>
    %551 = vector.extract_strided_slice %471 {offsets = [0, 0, 192], sizes = [2, 12, 1], strides = [1, 1, 1]} : vector<2x12x200xf32> to vector<2x12x1xf32>
    %552 = vector.broadcast %550 : vector<1x12x16xf32> to vector<2x12x16xf32>
    %553 = vector.broadcast %551 : vector<2x12x1xf32> to vector<2x12x16xf32>
    %554 = arith.mulf %552, %553 : vector<2x12x16xf32>
    %555 = arith.addf %545, %554 : vector<2x12x16xf32>
    %c9_i32 = arith.constant 9 : i32
    %556 = vector.broadcast %c9_i32 : i32 to vector<12x16xi32>
    %557 = arith.cmpi eq, %474, %556 : vector<12x16xi32>
    %558 = arith.extui %557 : vector<12x16xi1> to vector<12x16xi32>
    %559 = arith.sitofp %558 : vector<12x16xi32> to vector<12x16xf32>
    %560 = vector.shape_cast %559 : vector<12x16xf32> to vector<1x12x16xf32>
    %561 = vector.extract_strided_slice %471 {offsets = [0, 0, 191], sizes = [2, 12, 1], strides = [1, 1, 1]} : vector<2x12x200xf32> to vector<2x12x1xf32>
    %562 = vector.broadcast %560 : vector<1x12x16xf32> to vector<2x12x16xf32>
    %563 = vector.broadcast %561 : vector<2x12x1xf32> to vector<2x12x16xf32>
    %564 = arith.mulf %562, %563 : vector<2x12x16xf32>
    %565 = arith.addf %555, %564 : vector<2x12x16xf32>
    %c10_i32 = arith.constant 10 : i32
    %566 = vector.broadcast %c10_i32 : i32 to vector<12x16xi32>
    %567 = arith.cmpi eq, %474, %566 : vector<12x16xi32>
    %568 = arith.extui %567 : vector<12x16xi1> to vector<12x16xi32>
    %569 = arith.sitofp %568 : vector<12x16xi32> to vector<12x16xf32>
    %570 = vector.shape_cast %569 : vector<12x16xf32> to vector<1x12x16xf32>
    %571 = vector.extract_strided_slice %471 {offsets = [0, 0, 190], sizes = [2, 12, 1], strides = [1, 1, 1]} : vector<2x12x200xf32> to vector<2x12x1xf32>
    %572 = vector.broadcast %570 : vector<1x12x16xf32> to vector<2x12x16xf32>
    %573 = vector.broadcast %571 : vector<2x12x1xf32> to vector<2x12x16xf32>
    %574 = arith.mulf %572, %573 : vector<2x12x16xf32>
    %575 = arith.addf %565, %574 : vector<2x12x16xf32>
    %c11_i32 = arith.constant 11 : i32
    %576 = vector.broadcast %c11_i32 : i32 to vector<12x16xi32>
    %577 = arith.cmpi eq, %474, %576 : vector<12x16xi32>
    %578 = arith.extui %577 : vector<12x16xi1> to vector<12x16xi32>
    %579 = arith.sitofp %578 : vector<12x16xi32> to vector<12x16xf32>
    %580 = vector.shape_cast %579 : vector<12x16xf32> to vector<1x12x16xf32>
    %581 = vector.extract_strided_slice %471 {offsets = [0, 0, 189], sizes = [2, 12, 1], strides = [1, 1, 1]} : vector<2x12x200xf32> to vector<2x12x1xf32>
    %582 = vector.broadcast %580 : vector<1x12x16xf32> to vector<2x12x16xf32>
    %583 = vector.broadcast %581 : vector<2x12x1xf32> to vector<2x12x16xf32>
    %584 = arith.mulf %582, %583 : vector<2x12x16xf32>
    %585 = arith.addf %575, %584 : vector<2x12x16xf32>
    %cst_107 = arith.constant dense<0.000000e+00> : vector<2x12xf32>
    %586 = vector.multi_reduction <add>, %471, %cst_107 [2] : vector<2x12x200xf32> to vector<2x12xf32>
    %cst_108 = arith.constant dense<0.000000e+00> : vector<2x12xf32>
    %587 = vector.multi_reduction <add>, %585, %cst_108 [2] : vector<2x12x16xf32> to vector<2x12xf32>
    %588 = arith.subf %586, %587 : vector<2x12xf32>
    "tpu.trace_start"() <{level = 10 : i32, message = "bit,bth->bih"}> : () -> ()
    %cst_109 = arith.constant dense<0.000000e+00> : vector<2x12x32xf32>
    %589 = tpu.matmul %585, %442, %cst_109 {dimension_numbers = #tpu.dot_dimension_numbers<[2], [1], [1], [2], [0, 0, 0, 1, 1, 2], [0], [0]>} : vector<2x12x16xf32>, vector<2x16x32xf32>, vector<2x12x32xf32> -> vector<2x12x32xf32>
    "tpu.trace_stop"() : () -> ()
    %590 = vector.shape_cast %588 : vector<2x12xf32> to vector<2x12x1xf32>
    %c0_110 = arith.constant 0 : index
    %c0_111 = arith.constant 0 : index
    %c0_112 = arith.constant 0 : index
    %591 = vector.load %arg6[%c0_110, %c0_111, %c0_112] : memref<2x1x32xf32, #tpu.memory_space<vmem>>, vector<1x1x32xf32>
    %592 = vector.shape_cast %591 : vector<1x1x32xf32> to vector<1x32xf32>
    %593 = vector.shape_cast %592 : vector<1x32xf32> to vector<1x1x32xf32>
    %594 = vector.broadcast %590 : vector<2x12x1xf32> to vector<2x12x32xf32>
    %595 = vector.broadcast %593 : vector<1x1x32xf32> to vector<2x12x32xf32>
    %596 = arith.mulf %594, %595 : vector<2x12x32xf32>
    %597 = arith.addf %589, %596 : vector<2x12x32xf32>
    %cst_113 = arith.constant 5.000000e-03 : f32
    %598 = vector.broadcast %cst_113 : f32 to vector<2x12x32xf32>
    %599 = arith.mulf %597, %598 : vector<2x12x32xf32>
    %600 = vector.shape_cast %599 : vector<2x12x32xf32> to vector<24x32xf32>
    %c0_114 = arith.constant 0 : index
    %c0_115 = arith.constant 0 : index
    %c0_116 = arith.constant 0 : index
    %601 = vector.load %arg11[%c0_114, %c0_115, %c0_116] : memref<2x32x64xf32, #tpu.memory_space<vmem>>, vector<1x32x64xf32>
    %602 = vector.shape_cast %601 : vector<1x32x64xf32> to vector<32x64xf32>
    %cst_117 = arith.constant dense<0.000000e+00> : vector<24x64xf32>
    %603 = tpu.matmul %600, %602, %cst_117 {dimension_numbers = #tpu.dot_dimension_numbers<[1], [0], [0], [1], [0, 0, 1, 1], [], []>} : vector<24x32xf32>, vector<32x64xf32>, vector<24x64xf32> -> vector<24x64xf32>
    %c0_118 = arith.constant 0 : index
    %c0_119 = arith.constant 0 : index
    %c0_120 = arith.constant 0 : index
    %604 = vector.load %arg12[%c0_118, %c0_119, %c0_120] : memref<2x1x64xf32, #tpu.memory_space<vmem>>, vector<1x1x64xf32>
    %605 = vector.shape_cast %604 : vector<1x1x64xf32> to vector<1x64xf32>
    %606 = vector.broadcast %605 : vector<1x64xf32> to vector<24x64xf32>
    %607 = arith.addf %603, %606 : vector<24x64xf32>
    %cst_121 = arith.constant 1.702000e+00 : f32
    %608 = vector.broadcast %cst_121 : f32 to vector<24x64xf32>
    %609 = arith.mulf %608, %607 : vector<24x64xf32>
    %610 = arith.negf %609 : vector<24x64xf32>
    %611 = math.exp %610 : vector<24x64xf32>
    %cst_122 = arith.constant 1.000000e+00 : f32
    %612 = vector.broadcast %cst_122 : f32 to vector<24x64xf32>
    %613 = arith.addf %612, %611 : vector<24x64xf32>
    %614 = arith.divf %612, %613 : vector<24x64xf32>
    %615 = arith.mulf %607, %614 : vector<24x64xf32>
    %c0_123 = arith.constant 0 : index
    %c0_124 = arith.constant 0 : index
    %c0_125 = arith.constant 0 : index
    %616 = vector.load %arg13[%c0_123, %c0_124, %c0_125] : memref<2x64x32xf32, #tpu.memory_space<vmem>>, vector<1x64x32xf32>
    %617 = vector.shape_cast %616 : vector<1x64x32xf32> to vector<64x32xf32>
    %cst_126 = arith.constant dense<0.000000e+00> : vector<24x32xf32>
    %618 = tpu.matmul %615, %617, %cst_126 {dimension_numbers = #tpu.dot_dimension_numbers<[1], [0], [0], [1], [0, 0, 1, 1], [], []>} : vector<24x64xf32>, vector<64x32xf32>, vector<24x32xf32> -> vector<24x32xf32>
    %c0_127 = arith.constant 0 : index
    %c0_128 = arith.constant 0 : index
    %c0_129 = arith.constant 0 : index
    %619 = vector.load %arg14[%c0_127, %c0_128, %c0_129] : memref<2x1x32xf32, #tpu.memory_space<vmem>>, vector<1x1x32xf32>
    %620 = vector.shape_cast %619 : vector<1x1x32xf32> to vector<1x32xf32>
    %621 = vector.broadcast %620 : vector<1x32xf32> to vector<24x32xf32>
    %622 = arith.addf %618, %621 : vector<24x32xf32>
    %623 = vector.shape_cast %622 : vector<24x32xf32> to vector<2x12x32xf32>
    %624 = vector.shape_cast %623 : vector<2x12x32xf32> to vector<24x32xf32>
    %cst_130 = arith.constant dense<0.000000e+00> : vector<24xf32>
    %625 = vector.multi_reduction <add>, %624, %cst_130 [1] : vector<24x32xf32> to vector<24xf32>
    %626 = vector.shape_cast %625 : vector<24xf32> to vector<24x1xf32>
    %cst_131 = arith.constant 3.200000e+01 : f32
    %627 = vector.broadcast %cst_131 : f32 to vector<24x1xf32>
    %628 = arith.divf %626, %627 : vector<24x1xf32>
    %629 = vector.broadcast %628 : vector<24x1xf32> to vector<24x32xf32>
    %630 = arith.subf %624, %629 : vector<24x32xf32>
    %631 = arith.mulf %630, %630 : vector<24x32xf32>
    %cst_132 = arith.constant dense<0.000000e+00> : vector<24xf32>
    %632 = vector.multi_reduction <add>, %631, %cst_132 [1] : vector<24x32xf32> to vector<24xf32>
    %633 = vector.shape_cast %632 : vector<24xf32> to vector<24x1xf32>
    %cst_133 = arith.constant 3.200000e+01 : f32
    %634 = vector.broadcast %cst_133 : f32 to vector<24x1xf32>
    %635 = arith.divf %633, %634 : vector<24x1xf32>
    %cst_134 = arith.constant 9.99999974E-6 : f32
    %636 = vector.broadcast %cst_134 : f32 to vector<24x1xf32>
    %637 = arith.addf %635, %636 : vector<24x1xf32>
    %638 = math.rsqrt %637 : vector<24x1xf32>
    %639 = vector.broadcast %638 : vector<24x1xf32> to vector<24x32xf32>
    %640 = arith.mulf %630, %639 : vector<24x32xf32>
    %c1_135 = arith.constant 1 : index
    %c0_136 = arith.constant 0 : index
    %c0_137 = arith.constant 0 : index
    %641 = vector.load %arg1[%c1_135, %c0_136, %c0_137] : memref<2x32x256xf32, #tpu.memory_space<vmem>>, vector<1x32x256xf32>
    %642 = vector.shape_cast %641 : vector<1x32x256xf32> to vector<32x256xf32>
    %cst_138 = arith.constant dense<0.000000e+00> : vector<24x256xf32>
    %643 = tpu.matmul %640, %642, %cst_138 {dimension_numbers = #tpu.dot_dimension_numbers<[1], [0], [0], [1], [0, 0, 1, 1], [], []>} : vector<24x32xf32>, vector<32x256xf32>, vector<24x256xf32> -> vector<24x256xf32>
    %c1_139 = arith.constant 1 : index
    %c0_140 = arith.constant 0 : index
    %c0_141 = arith.constant 0 : index
    %644 = vector.load %arg2[%c1_139, %c0_140, %c0_141] : memref<2x1x256xf32, #tpu.memory_space<vmem>>, vector<1x1x256xf32>
    %645 = vector.shape_cast %644 : vector<1x1x256xf32> to vector<1x256xf32>
    %646 = vector.broadcast %645 : vector<1x256xf32> to vector<24x256xf32>
    %647 = arith.addf %643, %646 : vector<24x256xf32>
    %648 = vector.shape_cast %647 : vector<24x256xf32> to vector<2x12x256xf32>
    %c1_142 = arith.constant 1 : index
    %c0_143 = arith.constant 0 : index
    %c0_144 = arith.constant 0 : index
    %649 = vector.load %arg3[%c1_142, %c0_143, %c0_144] : memref<2x64x256xf32, #tpu.memory_space<vmem>>, vector<1x64x256xf32>
    %650 = vector.shape_cast %649 : vector<1x64x256xf32> to vector<64x256xf32>
    %c1_145 = arith.constant 1 : index
    %c0_146 = arith.constant 0 : index
    %c0_147 = arith.constant 0 : index
    %651 = vector.load %arg2[%c1_145, %c0_146, %c0_147] : memref<2x1x256xf32, #tpu.memory_space<vmem>>, vector<1x1x256xf32>
    %652 = vector.shape_cast %651 : vector<1x1x256xf32> to vector<1x256xf32>
    %cst_148 = arith.constant 0.000000e+00 : f32
    %653 = vector.broadcast %cst_148 : f32 to vector<2x64xf32>
    %654 = vector.extract_strided_slice %648 {offsets = [0, 0, 0], sizes = [2, 1, 256], strides = [1, 1, 1]} : vector<2x12x256xf32> to vector<2x1x256xf32>
    %655 = vector.shape_cast %654 : vector<2x1x256xf32> to vector<2x256xf32>
    %656 = arith.negf %655 : vector<2x256xf32>
    %657 = math.exp %656 : vector<2x256xf32>
    %cst_149 = arith.constant 1.000000e+00 : f32
    %658 = vector.broadcast %cst_149 : f32 to vector<2x256xf32>
    %659 = arith.addf %658, %657 : vector<2x256xf32>
    %660 = arith.divf %658, %659 : vector<2x256xf32>
    %661 = math.tanh %655 : vector<2x256xf32>
    %662 = vector.extract_strided_slice %660 {offsets = [0, 64], sizes = [2, 64], strides = [1, 1]} : vector<2x256xf32> to vector<2x64xf32>
    %663 = arith.mulf %662, %653 : vector<2x64xf32>
    %664 = vector.extract_strided_slice %660 {offsets = [0, 0], sizes = [2, 64], strides = [1, 1]} : vector<2x256xf32> to vector<2x64xf32>
    %665 = vector.extract_strided_slice %661 {offsets = [0, 128], sizes = [2, 64], strides = [1, 1]} : vector<2x256xf32> to vector<2x64xf32>
    %666 = arith.mulf %664, %665 : vector<2x64xf32>
    %667 = arith.addf %663, %666 : vector<2x64xf32>
    %668 = vector.extract_strided_slice %660 {offsets = [0, 192], sizes = [2, 64], strides = [1, 1]} : vector<2x256xf32> to vector<2x64xf32>
    %669 = math.tanh %667 : vector<2x64xf32>
    %670 = arith.mulf %668, %669 : vector<2x64xf32>
    %671 = vector.broadcast %4 : vector<1x64xf32> to vector<2x64xf32>
    %672 = arith.mulf %670, %671 : vector<2x64xf32>
    %673 = vector.broadcast %4 : vector<1x64xf32> to vector<2x64xf32>
    %674 = arith.mulf %667, %673 : vector<2x64xf32>
    %cst_150 = arith.constant dense<0.000000e+00> : vector<2x256xf32>
    %675 = tpu.matmul %672, %650, %cst_150 {dimension_numbers = #tpu.dot_dimension_numbers<[1], [0], [0], [1], [0, 0, 1, 1], [], []>} : vector<2x64xf32>, vector<64x256xf32>, vector<2x256xf32> -> vector<2x256xf32>
    %676 = vector.extract_strided_slice %648 {offsets = [0, 1, 0], sizes = [2, 1, 256], strides = [1, 1, 1]} : vector<2x12x256xf32> to vector<2x1x256xf32>
    %677 = vector.shape_cast %676 : vector<2x1x256xf32> to vector<2x256xf32>
    %678 = arith.addf %675, %677 : vector<2x256xf32>
    %679 = arith.negf %678 : vector<2x256xf32>
    %680 = math.exp %679 : vector<2x256xf32>
    %cst_151 = arith.constant 1.000000e+00 : f32
    %681 = vector.broadcast %cst_151 : f32 to vector<2x256xf32>
    %682 = arith.addf %681, %680 : vector<2x256xf32>
    %683 = arith.divf %681, %682 : vector<2x256xf32>
    %684 = math.tanh %678 : vector<2x256xf32>
    %685 = vector.extract_strided_slice %683 {offsets = [0, 64], sizes = [2, 64], strides = [1, 1]} : vector<2x256xf32> to vector<2x64xf32>
    %686 = arith.mulf %685, %674 : vector<2x64xf32>
    %687 = vector.extract_strided_slice %683 {offsets = [0, 0], sizes = [2, 64], strides = [1, 1]} : vector<2x256xf32> to vector<2x64xf32>
    %688 = vector.extract_strided_slice %684 {offsets = [0, 128], sizes = [2, 64], strides = [1, 1]} : vector<2x256xf32> to vector<2x64xf32>
    %689 = arith.mulf %687, %688 : vector<2x64xf32>
    %690 = arith.addf %686, %689 : vector<2x64xf32>
    %691 = vector.extract_strided_slice %683 {offsets = [0, 192], sizes = [2, 64], strides = [1, 1]} : vector<2x256xf32> to vector<2x64xf32>
    %692 = math.tanh %690 : vector<2x64xf32>
    %693 = arith.mulf %691, %692 : vector<2x64xf32>
    %694 = vector.extract_strided_slice %693 {offsets = [0, 32], sizes = [2, 32], strides = [1, 1]} : vector<2x64xf32> to vector<2x32xf32>
    %695 = vector.shape_cast %694 : vector<2x32xf32> to vector<2x1x32xf32>
    %cst_152 = arith.constant dense<0.000000e+00> : vector<2x256xf32>
    %696 = tpu.matmul %693, %650, %cst_152 {dimension_numbers = #tpu.dot_dimension_numbers<[1], [0], [0], [1], [0, 0, 1, 1], [], []>} : vector<2x64xf32>, vector<64x256xf32>, vector<2x256xf32> -> vector<2x256xf32>
    %697 = vector.extract_strided_slice %648 {offsets = [0, 2, 0], sizes = [2, 1, 256], strides = [1, 1, 1]} : vector<2x12x256xf32> to vector<2x1x256xf32>
    %698 = vector.shape_cast %697 : vector<2x1x256xf32> to vector<2x256xf32>
    %699 = arith.addf %696, %698 : vector<2x256xf32>
    %700 = arith.negf %699 : vector<2x256xf32>
    %701 = math.exp %700 : vector<2x256xf32>
    %cst_153 = arith.constant 1.000000e+00 : f32
    %702 = vector.broadcast %cst_153 : f32 to vector<2x256xf32>
    %703 = arith.addf %702, %701 : vector<2x256xf32>
    %704 = arith.divf %702, %703 : vector<2x256xf32>
    %705 = math.tanh %699 : vector<2x256xf32>
    %706 = vector.extract_strided_slice %704 {offsets = [0, 64], sizes = [2, 64], strides = [1, 1]} : vector<2x256xf32> to vector<2x64xf32>
    %707 = arith.mulf %706, %690 : vector<2x64xf32>
    %708 = vector.extract_strided_slice %704 {offsets = [0, 0], sizes = [2, 64], strides = [1, 1]} : vector<2x256xf32> to vector<2x64xf32>
    %709 = vector.extract_strided_slice %705 {offsets = [0, 128], sizes = [2, 64], strides = [1, 1]} : vector<2x256xf32> to vector<2x64xf32>
    %710 = arith.mulf %708, %709 : vector<2x64xf32>
    %711 = arith.addf %707, %710 : vector<2x64xf32>
    %712 = vector.extract_strided_slice %704 {offsets = [0, 192], sizes = [2, 64], strides = [1, 1]} : vector<2x256xf32> to vector<2x64xf32>
    %713 = math.tanh %711 : vector<2x64xf32>
    %714 = arith.mulf %712, %713 : vector<2x64xf32>
    %715 = vector.extract_strided_slice %714 {offsets = [0, 32], sizes = [2, 32], strides = [1, 1]} : vector<2x64xf32> to vector<2x32xf32>
    %716 = vector.shape_cast %715 : vector<2x32xf32> to vector<2x1x32xf32>
    %cst_154 = arith.constant dense<0.000000e+00> : vector<2x256xf32>
    %717 = tpu.matmul %714, %650, %cst_154 {dimension_numbers = #tpu.dot_dimension_numbers<[1], [0], [0], [1], [0, 0, 1, 1], [], []>} : vector<2x64xf32>, vector<64x256xf32>, vector<2x256xf32> -> vector<2x256xf32>
    %718 = vector.extract_strided_slice %648 {offsets = [0, 3, 0], sizes = [2, 1, 256], strides = [1, 1, 1]} : vector<2x12x256xf32> to vector<2x1x256xf32>
    %719 = vector.shape_cast %718 : vector<2x1x256xf32> to vector<2x256xf32>
    %720 = arith.addf %717, %719 : vector<2x256xf32>
    %721 = arith.negf %720 : vector<2x256xf32>
    %722 = math.exp %721 : vector<2x256xf32>
    %cst_155 = arith.constant 1.000000e+00 : f32
    %723 = vector.broadcast %cst_155 : f32 to vector<2x256xf32>
    %724 = arith.addf %723, %722 : vector<2x256xf32>
    %725 = arith.divf %723, %724 : vector<2x256xf32>
    %726 = math.tanh %720 : vector<2x256xf32>
    %727 = vector.extract_strided_slice %725 {offsets = [0, 64], sizes = [2, 64], strides = [1, 1]} : vector<2x256xf32> to vector<2x64xf32>
    %728 = arith.mulf %727, %711 : vector<2x64xf32>
    %729 = vector.extract_strided_slice %725 {offsets = [0, 0], sizes = [2, 64], strides = [1, 1]} : vector<2x256xf32> to vector<2x64xf32>
    %730 = vector.extract_strided_slice %726 {offsets = [0, 128], sizes = [2, 64], strides = [1, 1]} : vector<2x256xf32> to vector<2x64xf32>
    %731 = arith.mulf %729, %730 : vector<2x64xf32>
    %732 = arith.addf %728, %731 : vector<2x64xf32>
    %733 = vector.extract_strided_slice %725 {offsets = [0, 192], sizes = [2, 64], strides = [1, 1]} : vector<2x256xf32> to vector<2x64xf32>
    %734 = math.tanh %732 : vector<2x64xf32>
    %735 = arith.mulf %733, %734 : vector<2x64xf32>
    %736 = vector.extract_strided_slice %735 {offsets = [0, 32], sizes = [2, 32], strides = [1, 1]} : vector<2x64xf32> to vector<2x32xf32>
    %737 = vector.shape_cast %736 : vector<2x32xf32> to vector<2x1x32xf32>
    %cst_156 = arith.constant dense<0.000000e+00> : vector<2x256xf32>
    %738 = tpu.matmul %735, %650, %cst_156 {dimension_numbers = #tpu.dot_dimension_numbers<[1], [0], [0], [1], [0, 0, 1, 1], [], []>} : vector<2x64xf32>, vector<64x256xf32>, vector<2x256xf32> -> vector<2x256xf32>
    %739 = vector.extract_strided_slice %648 {offsets = [0, 4, 0], sizes = [2, 1, 256], strides = [1, 1, 1]} : vector<2x12x256xf32> to vector<2x1x256xf32>
    %740 = vector.shape_cast %739 : vector<2x1x256xf32> to vector<2x256xf32>
    %741 = arith.addf %738, %740 : vector<2x256xf32>
    %742 = arith.negf %741 : vector<2x256xf32>
    %743 = math.exp %742 : vector<2x256xf32>
    %cst_157 = arith.constant 1.000000e+00 : f32
    %744 = vector.broadcast %cst_157 : f32 to vector<2x256xf32>
    %745 = arith.addf %744, %743 : vector<2x256xf32>
    %746 = arith.divf %744, %745 : vector<2x256xf32>
    %747 = math.tanh %741 : vector<2x256xf32>
    %748 = vector.extract_strided_slice %746 {offsets = [0, 64], sizes = [2, 64], strides = [1, 1]} : vector<2x256xf32> to vector<2x64xf32>
    %749 = arith.mulf %748, %732 : vector<2x64xf32>
    %750 = vector.extract_strided_slice %746 {offsets = [0, 0], sizes = [2, 64], strides = [1, 1]} : vector<2x256xf32> to vector<2x64xf32>
    %751 = vector.extract_strided_slice %747 {offsets = [0, 128], sizes = [2, 64], strides = [1, 1]} : vector<2x256xf32> to vector<2x64xf32>
    %752 = arith.mulf %750, %751 : vector<2x64xf32>
    %753 = arith.addf %749, %752 : vector<2x64xf32>
    %754 = vector.extract_strided_slice %746 {offsets = [0, 192], sizes = [2, 64], strides = [1, 1]} : vector<2x256xf32> to vector<2x64xf32>
    %755 = math.tanh %753 : vector<2x64xf32>
    %756 = arith.mulf %754, %755 : vector<2x64xf32>
    %757 = vector.extract_strided_slice %756 {offsets = [0, 32], sizes = [2, 32], strides = [1, 1]} : vector<2x64xf32> to vector<2x32xf32>
    %758 = vector.shape_cast %757 : vector<2x32xf32> to vector<2x1x32xf32>
    %cst_158 = arith.constant dense<0.000000e+00> : vector<2x256xf32>
    %759 = tpu.matmul %756, %650, %cst_158 {dimension_numbers = #tpu.dot_dimension_numbers<[1], [0], [0], [1], [0, 0, 1, 1], [], []>} : vector<2x64xf32>, vector<64x256xf32>, vector<2x256xf32> -> vector<2x256xf32>
    %760 = vector.extract_strided_slice %648 {offsets = [0, 5, 0], sizes = [2, 1, 256], strides = [1, 1, 1]} : vector<2x12x256xf32> to vector<2x1x256xf32>
    %761 = vector.shape_cast %760 : vector<2x1x256xf32> to vector<2x256xf32>
    %762 = arith.addf %759, %761 : vector<2x256xf32>
    %763 = arith.negf %762 : vector<2x256xf32>
    %764 = math.exp %763 : vector<2x256xf32>
    %cst_159 = arith.constant 1.000000e+00 : f32
    %765 = vector.broadcast %cst_159 : f32 to vector<2x256xf32>
    %766 = arith.addf %765, %764 : vector<2x256xf32>
    %767 = arith.divf %765, %766 : vector<2x256xf32>
    %768 = math.tanh %762 : vector<2x256xf32>
    %769 = vector.extract_strided_slice %767 {offsets = [0, 64], sizes = [2, 64], strides = [1, 1]} : vector<2x256xf32> to vector<2x64xf32>
    %770 = arith.mulf %769, %753 : vector<2x64xf32>
    %771 = vector.extract_strided_slice %767 {offsets = [0, 0], sizes = [2, 64], strides = [1, 1]} : vector<2x256xf32> to vector<2x64xf32>
    %772 = vector.extract_strided_slice %768 {offsets = [0, 128], sizes = [2, 64], strides = [1, 1]} : vector<2x256xf32> to vector<2x64xf32>
    %773 = arith.mulf %771, %772 : vector<2x64xf32>
    %774 = arith.addf %770, %773 : vector<2x64xf32>
    %775 = vector.extract_strided_slice %767 {offsets = [0, 192], sizes = [2, 64], strides = [1, 1]} : vector<2x256xf32> to vector<2x64xf32>
    %776 = math.tanh %774 : vector<2x64xf32>
    %777 = arith.mulf %775, %776 : vector<2x64xf32>
    %778 = vector.extract_strided_slice %777 {offsets = [0, 32], sizes = [2, 32], strides = [1, 1]} : vector<2x64xf32> to vector<2x32xf32>
    %779 = vector.shape_cast %778 : vector<2x32xf32> to vector<2x1x32xf32>
    %cst_160 = arith.constant dense<0.000000e+00> : vector<2x256xf32>
    %780 = tpu.matmul %777, %650, %cst_160 {dimension_numbers = #tpu.dot_dimension_numbers<[1], [0], [0], [1], [0, 0, 1, 1], [], []>} : vector<2x64xf32>, vector<64x256xf32>, vector<2x256xf32> -> vector<2x256xf32>
    %781 = vector.extract_strided_slice %648 {offsets = [0, 6, 0], sizes = [2, 1, 256], strides = [1, 1, 1]} : vector<2x12x256xf32> to vector<2x1x256xf32>
    %782 = vector.shape_cast %781 : vector<2x1x256xf32> to vector<2x256xf32>
    %783 = arith.addf %780, %782 : vector<2x256xf32>
    %784 = arith.negf %783 : vector<2x256xf32>
    %785 = math.exp %784 : vector<2x256xf32>
    %cst_161 = arith.constant 1.000000e+00 : f32
    %786 = vector.broadcast %cst_161 : f32 to vector<2x256xf32>
    %787 = arith.addf %786, %785 : vector<2x256xf32>
    %788 = arith.divf %786, %787 : vector<2x256xf32>
    %789 = math.tanh %783 : vector<2x256xf32>
    %790 = vector.extract_strided_slice %788 {offsets = [0, 64], sizes = [2, 64], strides = [1, 1]} : vector<2x256xf32> to vector<2x64xf32>
    %791 = arith.mulf %790, %774 : vector<2x64xf32>
    %792 = vector.extract_strided_slice %788 {offsets = [0, 0], sizes = [2, 64], strides = [1, 1]} : vector<2x256xf32> to vector<2x64xf32>
    %793 = vector.extract_strided_slice %789 {offsets = [0, 128], sizes = [2, 64], strides = [1, 1]} : vector<2x256xf32> to vector<2x64xf32>
    %794 = arith.mulf %792, %793 : vector<2x64xf32>
    %795 = arith.addf %791, %794 : vector<2x64xf32>
    %796 = vector.extract_strided_slice %788 {offsets = [0, 192], sizes = [2, 64], strides = [1, 1]} : vector<2x256xf32> to vector<2x64xf32>
    %797 = math.tanh %795 : vector<2x64xf32>
    %798 = arith.mulf %796, %797 : vector<2x64xf32>
    %799 = vector.extract_strided_slice %798 {offsets = [0, 32], sizes = [2, 32], strides = [1, 1]} : vector<2x64xf32> to vector<2x32xf32>
    %800 = vector.shape_cast %799 : vector<2x32xf32> to vector<2x1x32xf32>
    %cst_162 = arith.constant dense<0.000000e+00> : vector<2x256xf32>
    %801 = tpu.matmul %798, %650, %cst_162 {dimension_numbers = #tpu.dot_dimension_numbers<[1], [0], [0], [1], [0, 0, 1, 1], [], []>} : vector<2x64xf32>, vector<64x256xf32>, vector<2x256xf32> -> vector<2x256xf32>
    %802 = vector.extract_strided_slice %648 {offsets = [0, 7, 0], sizes = [2, 1, 256], strides = [1, 1, 1]} : vector<2x12x256xf32> to vector<2x1x256xf32>
    %803 = vector.shape_cast %802 : vector<2x1x256xf32> to vector<2x256xf32>
    %804 = arith.addf %801, %803 : vector<2x256xf32>
    %805 = arith.negf %804 : vector<2x256xf32>
    %806 = math.exp %805 : vector<2x256xf32>
    %cst_163 = arith.constant 1.000000e+00 : f32
    %807 = vector.broadcast %cst_163 : f32 to vector<2x256xf32>
    %808 = arith.addf %807, %806 : vector<2x256xf32>
    %809 = arith.divf %807, %808 : vector<2x256xf32>
    %810 = math.tanh %804 : vector<2x256xf32>
    %811 = vector.extract_strided_slice %809 {offsets = [0, 64], sizes = [2, 64], strides = [1, 1]} : vector<2x256xf32> to vector<2x64xf32>
    %812 = arith.mulf %811, %795 : vector<2x64xf32>
    %813 = vector.extract_strided_slice %809 {offsets = [0, 0], sizes = [2, 64], strides = [1, 1]} : vector<2x256xf32> to vector<2x64xf32>
    %814 = vector.extract_strided_slice %810 {offsets = [0, 128], sizes = [2, 64], strides = [1, 1]} : vector<2x256xf32> to vector<2x64xf32>
    %815 = arith.mulf %813, %814 : vector<2x64xf32>
    %816 = arith.addf %812, %815 : vector<2x64xf32>
    %817 = vector.extract_strided_slice %809 {offsets = [0, 192], sizes = [2, 64], strides = [1, 1]} : vector<2x256xf32> to vector<2x64xf32>
    %818 = math.tanh %816 : vector<2x64xf32>
    %819 = arith.mulf %817, %818 : vector<2x64xf32>
    %820 = vector.extract_strided_slice %819 {offsets = [0, 32], sizes = [2, 32], strides = [1, 1]} : vector<2x64xf32> to vector<2x32xf32>
    %821 = vector.shape_cast %820 : vector<2x32xf32> to vector<2x1x32xf32>
    %cst_164 = arith.constant dense<0.000000e+00> : vector<2x256xf32>
    %822 = tpu.matmul %819, %650, %cst_164 {dimension_numbers = #tpu.dot_dimension_numbers<[1], [0], [0], [1], [0, 0, 1, 1], [], []>} : vector<2x64xf32>, vector<64x256xf32>, vector<2x256xf32> -> vector<2x256xf32>
    %823 = vector.extract_strided_slice %648 {offsets = [0, 8, 0], sizes = [2, 1, 256], strides = [1, 1, 1]} : vector<2x12x256xf32> to vector<2x1x256xf32>
    %824 = vector.shape_cast %823 : vector<2x1x256xf32> to vector<2x256xf32>
    %825 = arith.addf %822, %824 : vector<2x256xf32>
    %826 = arith.negf %825 : vector<2x256xf32>
    %827 = math.exp %826 : vector<2x256xf32>
    %cst_165 = arith.constant 1.000000e+00 : f32
    %828 = vector.broadcast %cst_165 : f32 to vector<2x256xf32>
    %829 = arith.addf %828, %827 : vector<2x256xf32>
    %830 = arith.divf %828, %829 : vector<2x256xf32>
    %831 = math.tanh %825 : vector<2x256xf32>
    %832 = vector.extract_strided_slice %830 {offsets = [0, 64], sizes = [2, 64], strides = [1, 1]} : vector<2x256xf32> to vector<2x64xf32>
    %833 = arith.mulf %832, %816 : vector<2x64xf32>
    %834 = vector.extract_strided_slice %830 {offsets = [0, 0], sizes = [2, 64], strides = [1, 1]} : vector<2x256xf32> to vector<2x64xf32>
    %835 = vector.extract_strided_slice %831 {offsets = [0, 128], sizes = [2, 64], strides = [1, 1]} : vector<2x256xf32> to vector<2x64xf32>
    %836 = arith.mulf %834, %835 : vector<2x64xf32>
    %837 = arith.addf %833, %836 : vector<2x64xf32>
    %838 = vector.extract_strided_slice %830 {offsets = [0, 192], sizes = [2, 64], strides = [1, 1]} : vector<2x256xf32> to vector<2x64xf32>
    %839 = math.tanh %837 : vector<2x64xf32>
    %840 = arith.mulf %838, %839 : vector<2x64xf32>
    %841 = vector.extract_strided_slice %840 {offsets = [0, 32], sizes = [2, 32], strides = [1, 1]} : vector<2x64xf32> to vector<2x32xf32>
    %842 = vector.shape_cast %841 : vector<2x32xf32> to vector<2x1x32xf32>
    %cst_166 = arith.constant dense<0.000000e+00> : vector<2x256xf32>
    %843 = tpu.matmul %840, %650, %cst_166 {dimension_numbers = #tpu.dot_dimension_numbers<[1], [0], [0], [1], [0, 0, 1, 1], [], []>} : vector<2x64xf32>, vector<64x256xf32>, vector<2x256xf32> -> vector<2x256xf32>
    %844 = vector.extract_strided_slice %648 {offsets = [0, 9, 0], sizes = [2, 1, 256], strides = [1, 1, 1]} : vector<2x12x256xf32> to vector<2x1x256xf32>
    %845 = vector.shape_cast %844 : vector<2x1x256xf32> to vector<2x256xf32>
    %846 = arith.addf %843, %845 : vector<2x256xf32>
    %847 = arith.negf %846 : vector<2x256xf32>
    %848 = math.exp %847 : vector<2x256xf32>
    %cst_167 = arith.constant 1.000000e+00 : f32
    %849 = vector.broadcast %cst_167 : f32 to vector<2x256xf32>
    %850 = arith.addf %849, %848 : vector<2x256xf32>
    %851 = arith.divf %849, %850 : vector<2x256xf32>
    %852 = math.tanh %846 : vector<2x256xf32>
    %853 = vector.extract_strided_slice %851 {offsets = [0, 64], sizes = [2, 64], strides = [1, 1]} : vector<2x256xf32> to vector<2x64xf32>
    %854 = arith.mulf %853, %837 : vector<2x64xf32>
    %855 = vector.extract_strided_slice %851 {offsets = [0, 0], sizes = [2, 64], strides = [1, 1]} : vector<2x256xf32> to vector<2x64xf32>
    %856 = vector.extract_strided_slice %852 {offsets = [0, 128], sizes = [2, 64], strides = [1, 1]} : vector<2x256xf32> to vector<2x64xf32>
    %857 = arith.mulf %855, %856 : vector<2x64xf32>
    %858 = arith.addf %854, %857 : vector<2x64xf32>
    %859 = vector.extract_strided_slice %851 {offsets = [0, 192], sizes = [2, 64], strides = [1, 1]} : vector<2x256xf32> to vector<2x64xf32>
    %860 = math.tanh %858 : vector<2x64xf32>
    %861 = arith.mulf %859, %860 : vector<2x64xf32>
    %862 = vector.extract_strided_slice %861 {offsets = [0, 32], sizes = [2, 32], strides = [1, 1]} : vector<2x64xf32> to vector<2x32xf32>
    %863 = vector.shape_cast %862 : vector<2x32xf32> to vector<2x1x32xf32>
    %cst_168 = arith.constant dense<0.000000e+00> : vector<2x256xf32>
    %864 = tpu.matmul %861, %650, %cst_168 {dimension_numbers = #tpu.dot_dimension_numbers<[1], [0], [0], [1], [0, 0, 1, 1], [], []>} : vector<2x64xf32>, vector<64x256xf32>, vector<2x256xf32> -> vector<2x256xf32>
    %865 = vector.extract_strided_slice %648 {offsets = [0, 10, 0], sizes = [2, 1, 256], strides = [1, 1, 1]} : vector<2x12x256xf32> to vector<2x1x256xf32>
    %866 = vector.shape_cast %865 : vector<2x1x256xf32> to vector<2x256xf32>
    %867 = arith.addf %864, %866 : vector<2x256xf32>
    %868 = arith.negf %867 : vector<2x256xf32>
    %869 = math.exp %868 : vector<2x256xf32>
    %cst_169 = arith.constant 1.000000e+00 : f32
    %870 = vector.broadcast %cst_169 : f32 to vector<2x256xf32>
    %871 = arith.addf %870, %869 : vector<2x256xf32>
    %872 = arith.divf %870, %871 : vector<2x256xf32>
    %873 = math.tanh %867 : vector<2x256xf32>
    %874 = vector.extract_strided_slice %872 {offsets = [0, 64], sizes = [2, 64], strides = [1, 1]} : vector<2x256xf32> to vector<2x64xf32>
    %875 = arith.mulf %874, %858 : vector<2x64xf32>
    %876 = vector.extract_strided_slice %872 {offsets = [0, 0], sizes = [2, 64], strides = [1, 1]} : vector<2x256xf32> to vector<2x64xf32>
    %877 = vector.extract_strided_slice %873 {offsets = [0, 128], sizes = [2, 64], strides = [1, 1]} : vector<2x256xf32> to vector<2x64xf32>
    %878 = arith.mulf %876, %877 : vector<2x64xf32>
    %879 = arith.addf %875, %878 : vector<2x64xf32>
    %880 = vector.extract_strided_slice %872 {offsets = [0, 192], sizes = [2, 64], strides = [1, 1]} : vector<2x256xf32> to vector<2x64xf32>
    %881 = math.tanh %879 : vector<2x64xf32>
    %882 = arith.mulf %880, %881 : vector<2x64xf32>
    %883 = vector.extract_strided_slice %882 {offsets = [0, 32], sizes = [2, 32], strides = [1, 1]} : vector<2x64xf32> to vector<2x32xf32>
    %884 = vector.shape_cast %883 : vector<2x32xf32> to vector<2x1x32xf32>
    %cst_170 = arith.constant dense<0.000000e+00> : vector<2x256xf32>
    %885 = tpu.matmul %882, %650, %cst_170 {dimension_numbers = #tpu.dot_dimension_numbers<[1], [0], [0], [1], [0, 0, 1, 1], [], []>} : vector<2x64xf32>, vector<64x256xf32>, vector<2x256xf32> -> vector<2x256xf32>
    %886 = vector.extract_strided_slice %648 {offsets = [0, 11, 0], sizes = [2, 1, 256], strides = [1, 1, 1]} : vector<2x12x256xf32> to vector<2x1x256xf32>
    %887 = vector.shape_cast %886 : vector<2x1x256xf32> to vector<2x256xf32>
    %888 = arith.addf %885, %887 : vector<2x256xf32>
    %889 = arith.negf %888 : vector<2x256xf32>
    %890 = math.exp %889 : vector<2x256xf32>
    %cst_171 = arith.constant 1.000000e+00 : f32
    %891 = vector.broadcast %cst_171 : f32 to vector<2x256xf32>
    %892 = arith.addf %891, %890 : vector<2x256xf32>
    %893 = arith.divf %891, %892 : vector<2x256xf32>
    %894 = math.tanh %888 : vector<2x256xf32>
    %895 = vector.extract_strided_slice %893 {offsets = [0, 64], sizes = [2, 64], strides = [1, 1]} : vector<2x256xf32> to vector<2x64xf32>
    %896 = arith.mulf %895, %879 : vector<2x64xf32>
    %897 = vector.extract_strided_slice %893 {offsets = [0, 0], sizes = [2, 64], strides = [1, 1]} : vector<2x256xf32> to vector<2x64xf32>
    %898 = vector.extract_strided_slice %894 {offsets = [0, 128], sizes = [2, 64], strides = [1, 1]} : vector<2x256xf32> to vector<2x64xf32>
    %899 = arith.mulf %897, %898 : vector<2x64xf32>
    %900 = arith.addf %896, %899 : vector<2x64xf32>
    %901 = vector.extract_strided_slice %893 {offsets = [0, 192], sizes = [2, 64], strides = [1, 1]} : vector<2x256xf32> to vector<2x64xf32>
    %902 = math.tanh %900 : vector<2x64xf32>
    %903 = arith.mulf %901, %902 : vector<2x64xf32>
    %904 = vector.extract_strided_slice %903 {offsets = [0, 0], sizes = [2, 32], strides = [1, 1]} : vector<2x64xf32> to vector<2x32xf32>
    %905 = vector.extract_strided_slice %900 {offsets = [0, 0], sizes = [2, 32], strides = [1, 1]} : vector<2x64xf32> to vector<2x32xf32>
    %906 = vector.extract_strided_slice %903 {offsets = [0, 32], sizes = [2, 32], strides = [1, 1]} : vector<2x64xf32> to vector<2x32xf32>
    %907 = vector.shape_cast %906 : vector<2x32xf32> to vector<2x1x32xf32>
    %cst_172 = arith.constant dense<0.000000e+00> : vector<2x256xf32>
    %908 = tpu.matmul %903, %650, %cst_172 {dimension_numbers = #tpu.dot_dimension_numbers<[1], [0], [0], [1], [0, 0, 1, 1], [], []>} : vector<2x64xf32>, vector<64x256xf32>, vector<2x256xf32> -> vector<2x256xf32>
    %909 = vector.broadcast %652 : vector<1x256xf32> to vector<2x256xf32>
    %910 = arith.addf %908, %909 : vector<2x256xf32>
    %911 = arith.negf %910 : vector<2x256xf32>
    %912 = math.exp %911 : vector<2x256xf32>
    %cst_173 = arith.constant 1.000000e+00 : f32
    %913 = vector.broadcast %cst_173 : f32 to vector<2x256xf32>
    %914 = arith.addf %913, %912 : vector<2x256xf32>
    %915 = arith.divf %913, %914 : vector<2x256xf32>
    %916 = math.tanh %910 : vector<2x256xf32>
    %917 = vector.extract_strided_slice %915 {offsets = [0, 64], sizes = [2, 64], strides = [1, 1]} : vector<2x256xf32> to vector<2x64xf32>
    %918 = arith.mulf %917, %900 : vector<2x64xf32>
    %919 = vector.extract_strided_slice %915 {offsets = [0, 0], sizes = [2, 64], strides = [1, 1]} : vector<2x256xf32> to vector<2x64xf32>
    %920 = vector.extract_strided_slice %916 {offsets = [0, 128], sizes = [2, 64], strides = [1, 1]} : vector<2x256xf32> to vector<2x64xf32>
    %921 = arith.mulf %919, %920 : vector<2x64xf32>
    %922 = arith.addf %918, %921 : vector<2x64xf32>
    %923 = vector.extract_strided_slice %915 {offsets = [0, 192], sizes = [2, 64], strides = [1, 1]} : vector<2x256xf32> to vector<2x64xf32>
    %924 = math.tanh %922 : vector<2x64xf32>
    %925 = arith.mulf %923, %924 : vector<2x64xf32>
    %926 = vector.extract_strided_slice %925 {offsets = [0, 32], sizes = [2, 32], strides = [1, 1]} : vector<2x64xf32> to vector<2x32xf32>
    %927 = vector.shape_cast %926 : vector<2x32xf32> to vector<2x1x32xf32>
    %928 = vector.extract_strided_slice %925 {offsets = [0, 32], sizes = [2, 32], strides = [1, 1]} : vector<2x64xf32> to vector<2x32xf32>
    %929 = vector.extract_strided_slice %922 {offsets = [0, 32], sizes = [2, 32], strides = [1, 1]} : vector<2x64xf32> to vector<2x32xf32>
    %930 = vector.shape_cast %904 : vector<2x32xf32> to vector<2x1x1x32xf32>
    %c0_174 = arith.constant 0 : index
    %c1_175 = arith.constant 1 : index
    %c0_176 = arith.constant 0 : index
    %c0_177 = arith.constant 0 : index
    %931 = vector.load %arg17[%c0_174, %c1_175, %c0_176, %c0_177] : memref<2x2x2x32xf32, #tpu.memory_space<vmem>>, vector<2x1x1x32xf32>
    tpu.vector_store %arg17[%c0_174, %c1_175, %c0_176, %c0_177], %930 {strides = array<i32>} : memref<2x2x2x32xf32, #tpu.memory_space<vmem>>, vector<2x1x1x32xf32>,
    %932 = vector.shape_cast %928 : vector<2x32xf32> to vector<2x1x1x32xf32>
    %c0_178 = arith.constant 0 : index
    %c1_179 = arith.constant 1 : index
    %c1_180 = arith.constant 1 : index
    %c0_181 = arith.constant 0 : index
    %933 = vector.load %arg17[%c0_178, %c1_179, %c1_180, %c0_181] : memref<2x2x2x32xf32, #tpu.memory_space<vmem>>, vector<2x1x1x32xf32>
    tpu.vector_store %arg17[%c0_178, %c1_179, %c1_180, %c0_181], %932 {strides = array<i32>} : memref<2x2x2x32xf32, #tpu.memory_space<vmem>>, vector<2x1x1x32xf32>,
    %934 = vector.shape_cast %905 : vector<2x32xf32> to vector<2x1x1x32xf32>
    %c0_182 = arith.constant 0 : index
    %c1_183 = arith.constant 1 : index
    %c0_184 = arith.constant 0 : index
    %c0_185 = arith.constant 0 : index
    %935 = vector.load %arg18[%c0_182, %c1_183, %c0_184, %c0_185] : memref<2x2x2x32xf32, #tpu.memory_space<vmem>>, vector<2x1x1x32xf32>
    tpu.vector_store %arg18[%c0_182, %c1_183, %c0_184, %c0_185], %934 {strides = array<i32>} : memref<2x2x2x32xf32, #tpu.memory_space<vmem>>, vector<2x1x1x32xf32>,
    %936 = vector.shape_cast %929 : vector<2x32xf32> to vector<2x1x1x32xf32>
    %c0_186 = arith.constant 0 : index
    %c1_187 = arith.constant 1 : index
    %c1_188 = arith.constant 1 : index
    %c0_189 = arith.constant 0 : index
    %937 = vector.load %arg18[%c0_186, %c1_187, %c1_188, %c0_189] : memref<2x2x2x32xf32, #tpu.memory_space<vmem>>, vector<2x1x1x32xf32>
    tpu.vector_store %arg18[%c0_186, %c1_187, %c1_188, %c0_189], %936 {strides = array<i32>} : memref<2x2x2x32xf32, #tpu.memory_space<vmem>>, vector<2x1x1x32xf32>,
    %938 = tpu.concatenate %695, %716, %737, %758, %779, %800, %821, %842, %863, %884, %907, %927 in 1 : vector<2x1x32xf32>, vector<2x1x32xf32>, vector<2x1x32xf32>, vector<2x1x32xf32>, vector<2x1x32xf32>, vector<2x1x32xf32>, vector<2x1x32xf32>, vector<2x1x32xf32>, vector<2x1x32xf32>, vector<2x1x32xf32>, vector<2x1x32xf32>, vector<2x1x32xf32> -> vector<2x12x32xf32>
    %cst_190 = arith.constant 0.000000e+00 : f32
    %939 = vector.broadcast %cst_190 : f32 to vector<2x12x32xf32>
    %940 = arith.maximumf %938, %939 : vector<2x12x32xf32>
    %cst_191 = arith.constant 0.000000e+00 : f32
    %941 = vector.broadcast %cst_191 : f32 to vector<2x1x188x32xf32>
    %c0_192 = arith.constant 0 : index
    %c1_193 = arith.constant 1 : index
    %c0_194 = arith.constant 0 : index
    %c0_195 = arith.constant 0 : index
    %942 = vector.load %arg16[%c0_192, %c1_193, %c0_194, %c0_195] : memref<2x2x200x32xf32, #tpu.memory_space<vmem>>, vector<2x1x188x32xf32>
    tpu.vector_store %arg16[%c0_192, %c1_193, %c0_194, %c0_195], %941 {strides = array<i32>} : memref<2x2x200x32xf32, #tpu.memory_space<vmem>>, vector<2x1x188x32xf32>,
    %943 = vector.shape_cast %940 : vector<2x12x32xf32> to vector<2x1x12x32xf32>
    %c0_196 = arith.constant 0 : index
    %c1_197 = arith.constant 1 : index
    %c188 = arith.constant 188 : index
    %c0_198 = arith.constant 0 : index
    %944 = vector.load %arg16[%c0_196, %c1_197, %c188, %c0_198] : memref<2x2x200x32xf32, #tpu.memory_space<vmem>>, vector<2x1x12x32xf32>
    tpu.vector_store %arg16[%c0_196, %c1_197, %c188, %c0_198], %943 {strides = array<i32>} : memref<2x2x200x32xf32, #tpu.memory_space<vmem>>, vector<2x1x12x32xf32>,
    %945 = vector.shape_cast %940 : vector<2x12x32xf32> to vector<24x32xf32>
    %cst_199 = arith.constant dense<0.000000e+00> : vector<24xf32>
    %946 = vector.multi_reduction <add>, %945, %cst_199 [1] : vector<24x32xf32> to vector<24xf32>
    %947 = vector.shape_cast %946 : vector<24xf32> to vector<24x1xf32>
    %cst_200 = arith.constant 3.200000e+01 : f32
    %948 = vector.broadcast %cst_200 : f32 to vector<24x1xf32>
    %949 = arith.divf %947, %948 : vector<24x1xf32>
    %950 = vector.broadcast %949 : vector<24x1xf32> to vector<24x32xf32>
    %951 = arith.subf %945, %950 : vector<24x32xf32>
    %952 = arith.mulf %951, %951 : vector<24x32xf32>
    %cst_201 = arith.constant dense<0.000000e+00> : vector<24xf32>
    %953 = vector.multi_reduction <add>, %952, %cst_201 [1] : vector<24x32xf32> to vector<24xf32>
    %954 = vector.shape_cast %953 : vector<24xf32> to vector<24x1xf32>
    %cst_202 = arith.constant 3.200000e+01 : f32
    %955 = vector.broadcast %cst_202 : f32 to vector<24x1xf32>
    %956 = arith.divf %954, %955 : vector<24x1xf32>
    %cst_203 = arith.constant 9.99999974E-6 : f32
    %957 = vector.broadcast %cst_203 : f32 to vector<24x1xf32>
    %958 = arith.addf %956, %957 : vector<24x1xf32>
    %959 = math.rsqrt %958 : vector<24x1xf32>
    %960 = vector.broadcast %959 : vector<24x1xf32> to vector<24x32xf32>
    %961 = arith.mulf %951, %960 : vector<24x32xf32>
    %c1_204 = arith.constant 1 : index
    %c0_205 = arith.constant 0 : index
    %c0_206 = arith.constant 0 : index
    %962 = vector.load %arg4[%c1_204, %c0_205, %c0_206] : memref<2x32x96xf32, #tpu.memory_space<vmem>>, vector<1x32x96xf32>
    %963 = vector.shape_cast %962 : vector<1x32x96xf32> to vector<32x96xf32>
    %cst_207 = arith.constant dense<0.000000e+00> : vector<24x96xf32>
    %964 = tpu.matmul %961, %963, %cst_207 {dimension_numbers = #tpu.dot_dimension_numbers<[1], [0], [0], [1], [0, 0, 1, 1], [], []>} : vector<24x32xf32>, vector<32x96xf32>, vector<24x96xf32> -> vector<24x96xf32>
    %c1_208 = arith.constant 1 : index
    %c0_209 = arith.constant 0 : index
    %c0_210 = arith.constant 0 : index
    %965 = vector.load %arg5[%c1_208, %c0_209, %c0_210] : memref<2x1x96xf32, #tpu.memory_space<vmem>>, vector<1x1x96xf32>
    %966 = vector.shape_cast %965 : vector<1x1x96xf32> to vector<1x96xf32>
    %967 = vector.broadcast %966 : vector<1x96xf32> to vector<24x96xf32>
    %968 = arith.addf %964, %967 : vector<24x96xf32>
    %969 = vector.extract_strided_slice %968 {offsets = [0, 0], sizes = [24, 32], strides = [1, 1]} : vector<24x96xf32> to vector<24x32xf32>
    %970 = vector.shape_cast %969 : vector<24x32xf32> to vector<2x12x32xf32>
    %971 = vector.extract_strided_slice %968 {offsets = [0, 32], sizes = [24, 32], strides = [1, 1]} : vector<24x96xf32> to vector<24x32xf32>
    %cst_211 = arith.constant 0.000000e+00 : f32
    %972 = vector.broadcast %cst_211 : f32 to vector<24x32xf32>
    %973 = arith.maximumf %971, %972 : vector<24x32xf32>
    %974 = vector.extract_strided_slice %968 {offsets = [0, 64], sizes = [24, 32], strides = [1, 1]} : vector<24x96xf32> to vector<24x32xf32>
    %975 = arith.mulf %973, %974 : vector<24x32xf32>
    %976 = vector.shape_cast %975 : vector<24x32xf32> to vector<2x12x32xf32>
    %977 = vector.extract_strided_slice %970 {offsets = [0, 0, 0], sizes = [2, 8, 32], strides = [1, 1, 1]} : vector<2x12x32xf32> to vector<2x8x32xf32>
    %978 = vector.extract_strided_slice %970 {offsets = [0, 1, 0], sizes = [2, 8, 32], strides = [1, 1, 1]} : vector<2x12x32xf32> to vector<2x8x32xf32>
    %979 = vector.extract_strided_slice %970 {offsets = [0, 2, 0], sizes = [2, 8, 32], strides = [1, 1, 1]} : vector<2x12x32xf32> to vector<2x8x32xf32>
    %980 = vector.extract_strided_slice %970 {offsets = [0, 3, 0], sizes = [2, 8, 32], strides = [1, 1, 1]} : vector<2x12x32xf32> to vector<2x8x32xf32>
    %981 = vector.extract_strided_slice %970 {offsets = [0, 4, 0], sizes = [2, 8, 32], strides = [1, 1, 1]} : vector<2x12x32xf32> to vector<2x8x32xf32>
    %982 = tpu.concatenate %977, %978, %979, %980, %981 in 2 : vector<2x8x32xf32>, vector<2x8x32xf32>, vector<2x8x32xf32>, vector<2x8x32xf32>, vector<2x8x32xf32> -> vector<2x8x160xf32>
    %983 = vector.shape_cast %982 : vector<2x8x160xf32> to vector<16x160xf32>
    %c1_212 = arith.constant 1 : index
    %c0_213 = arith.constant 0 : index
    %c0_214 = arith.constant 0 : index
    %984 = vector.load %arg7[%c1_212, %c0_213, %c0_214] : memref<2x160x200xf32, #tpu.memory_space<vmem>>, vector<1x160x200xf32>
    %985 = vector.shape_cast %984 : vector<1x160x200xf32> to vector<160x200xf32>
    %cst_215 = arith.constant dense<0.000000e+00> : vector<16x200xf32>
    %986 = tpu.matmul %983, %985, %cst_215 {dimension_numbers = #tpu.dot_dimension_numbers<[1], [0], [0], [1], [0, 0, 1, 1], [], []>} : vector<16x160xf32>, vector<160x200xf32>, vector<16x200xf32> -> vector<16x200xf32>
    %c1_216 = arith.constant 1 : index
    %c0_217 = arith.constant 0 : index
    %c0_218 = arith.constant 0 : index
    %987 = vector.load %arg8[%c1_216, %c0_217, %c0_218] : memref<2x1x200xf32, #tpu.memory_space<vmem>>, vector<1x1x200xf32>
    %988 = vector.shape_cast %987 : vector<1x1x200xf32> to vector<1x200xf32>
    %989 = vector.broadcast %988 : vector<1x200xf32> to vector<16x200xf32>
    %990 = arith.addf %986, %989 : vector<16x200xf32>
    %cst_219 = arith.constant 0.000000e+00 : f32
    %991 = vector.broadcast %cst_219 : f32 to vector<16x200xf32>
    %992 = arith.maximumf %990, %991 : vector<16x200xf32>
    %c1_220 = arith.constant 1 : index
    %c0_221 = arith.constant 0 : index
    %c0_222 = arith.constant 0 : index
    %993 = vector.load %arg9[%c1_220, %c0_221, %c0_222] : memref<2x200x200xf32, #tpu.memory_space<vmem>>, vector<1x200x200xf32>
    %994 = vector.shape_cast %993 : vector<1x200x200xf32> to vector<200x200xf32>
    %cst_223 = arith.constant dense<0.000000e+00> : vector<16x200xf32>
    %995 = tpu.matmul %992, %994, %cst_223 {dimension_numbers = #tpu.dot_dimension_numbers<[1], [0], [0], [1], [0, 0, 1, 1], [], []>} : vector<16x200xf32>, vector<200x200xf32>, vector<16x200xf32> -> vector<16x200xf32>
    %c1_224 = arith.constant 1 : index
    %c0_225 = arith.constant 0 : index
    %c0_226 = arith.constant 0 : index
    %996 = vector.load %arg10[%c1_224, %c0_225, %c0_226] : memref<2x1x200xf32, #tpu.memory_space<vmem>>, vector<1x1x200xf32>
    %997 = vector.shape_cast %996 : vector<1x1x200xf32> to vector<1x200xf32>
    %998 = vector.broadcast %997 : vector<1x200xf32> to vector<16x200xf32>
    %999 = arith.addf %995, %998 : vector<16x200xf32>
    %1000 = arith.negf %999 : vector<16x200xf32>
    %1001 = math.exp %1000 : vector<16x200xf32>
    %cst_227 = arith.constant 1.000000e+00 : f32
    %1002 = vector.broadcast %cst_227 : f32 to vector<16x200xf32>
    %1003 = arith.addf %1002, %1001 : vector<16x200xf32>
    %1004 = arith.divf %1002, %1003 : vector<16x200xf32>
    %1005 = vector.shape_cast %1004 : vector<16x200xf32> to vector<2x8x200xf32>
    %1006 = tpu.iota {dimensions = array<i32: 0>} : vector<8x12xi32>
    %1007 = tpu.iota {dimensions = array<i32: 1>} : vector<8x12xi32>
    %1008 = arith.subi %1006, %1007 : vector<8x12xi32>
    %cst_228 = arith.constant 0.000000e+00 : f32
    %1009 = vector.broadcast %cst_228 : f32 to vector<2x8x12xf32>
    %c1_i32_229 = arith.constant 1 : i32
    %1010 = vector.broadcast %c1_i32_229 : i32 to vector<8x12xi32>
    %1011 = arith.cmpi eq, %1008, %1010 : vector<8x12xi32>
    %1012 = arith.extui %1011 : vector<8x12xi1> to vector<8x12xi32>
    %1013 = arith.sitofp %1012 : vector<8x12xi32> to vector<8x12xf32>
    %1014 = vector.shape_cast %1013 : vector<8x12xf32> to vector<1x8x12xf32>
    %1015 = vector.extract_strided_slice %1005 {offsets = [0, 0, 199], sizes = [2, 8, 1], strides = [1, 1, 1]} : vector<2x8x200xf32> to vector<2x8x1xf32>
    %1016 = vector.broadcast %1014 : vector<1x8x12xf32> to vector<2x8x12xf32>
    %1017 = vector.broadcast %1015 : vector<2x8x1xf32> to vector<2x8x12xf32>
    %1018 = arith.mulf %1016, %1017 : vector<2x8x12xf32>
    %1019 = arith.addf %1009, %1018 : vector<2x8x12xf32>
    %c2_i32_230 = arith.constant 2 : i32
    %1020 = vector.broadcast %c2_i32_230 : i32 to vector<8x12xi32>
    %1021 = arith.cmpi eq, %1008, %1020 : vector<8x12xi32>
    %1022 = arith.extui %1021 : vector<8x12xi1> to vector<8x12xi32>
    %1023 = arith.sitofp %1022 : vector<8x12xi32> to vector<8x12xf32>
    %1024 = vector.shape_cast %1023 : vector<8x12xf32> to vector<1x8x12xf32>
    %1025 = vector.extract_strided_slice %1005 {offsets = [0, 0, 198], sizes = [2, 8, 1], strides = [1, 1, 1]} : vector<2x8x200xf32> to vector<2x8x1xf32>
    %1026 = vector.broadcast %1024 : vector<1x8x12xf32> to vector<2x8x12xf32>
    %1027 = vector.broadcast %1025 : vector<2x8x1xf32> to vector<2x8x12xf32>
    %1028 = arith.mulf %1026, %1027 : vector<2x8x12xf32>
    %1029 = arith.addf %1019, %1028 : vector<2x8x12xf32>
    %c3_i32_231 = arith.constant 3 : i32
    %1030 = vector.broadcast %c3_i32_231 : i32 to vector<8x12xi32>
    %1031 = arith.cmpi eq, %1008, %1030 : vector<8x12xi32>
    %1032 = arith.extui %1031 : vector<8x12xi1> to vector<8x12xi32>
    %1033 = arith.sitofp %1032 : vector<8x12xi32> to vector<8x12xf32>
    %1034 = vector.shape_cast %1033 : vector<8x12xf32> to vector<1x8x12xf32>
    %1035 = vector.extract_strided_slice %1005 {offsets = [0, 0, 197], sizes = [2, 8, 1], strides = [1, 1, 1]} : vector<2x8x200xf32> to vector<2x8x1xf32>
    %1036 = vector.broadcast %1034 : vector<1x8x12xf32> to vector<2x8x12xf32>
    %1037 = vector.broadcast %1035 : vector<2x8x1xf32> to vector<2x8x12xf32>
    %1038 = arith.mulf %1036, %1037 : vector<2x8x12xf32>
    %1039 = arith.addf %1029, %1038 : vector<2x8x12xf32>
    %c4_i32_232 = arith.constant 4 : i32
    %1040 = vector.broadcast %c4_i32_232 : i32 to vector<8x12xi32>
    %1041 = arith.cmpi eq, %1008, %1040 : vector<8x12xi32>
    %1042 = arith.extui %1041 : vector<8x12xi1> to vector<8x12xi32>
    %1043 = arith.sitofp %1042 : vector<8x12xi32> to vector<8x12xf32>
    %1044 = vector.shape_cast %1043 : vector<8x12xf32> to vector<1x8x12xf32>
    %1045 = vector.extract_strided_slice %1005 {offsets = [0, 0, 196], sizes = [2, 8, 1], strides = [1, 1, 1]} : vector<2x8x200xf32> to vector<2x8x1xf32>
    %1046 = vector.broadcast %1044 : vector<1x8x12xf32> to vector<2x8x12xf32>
    %1047 = vector.broadcast %1045 : vector<2x8x1xf32> to vector<2x8x12xf32>
    %1048 = arith.mulf %1046, %1047 : vector<2x8x12xf32>
    %1049 = arith.addf %1039, %1048 : vector<2x8x12xf32>
    %c5_i32_233 = arith.constant 5 : i32
    %1050 = vector.broadcast %c5_i32_233 : i32 to vector<8x12xi32>
    %1051 = arith.cmpi eq, %1008, %1050 : vector<8x12xi32>
    %1052 = arith.extui %1051 : vector<8x12xi1> to vector<8x12xi32>
    %1053 = arith.sitofp %1052 : vector<8x12xi32> to vector<8x12xf32>
    %1054 = vector.shape_cast %1053 : vector<8x12xf32> to vector<1x8x12xf32>
    %1055 = vector.extract_strided_slice %1005 {offsets = [0, 0, 195], sizes = [2, 8, 1], strides = [1, 1, 1]} : vector<2x8x200xf32> to vector<2x8x1xf32>
    %1056 = vector.broadcast %1054 : vector<1x8x12xf32> to vector<2x8x12xf32>
    %1057 = vector.broadcast %1055 : vector<2x8x1xf32> to vector<2x8x12xf32>
    %1058 = arith.mulf %1056, %1057 : vector<2x8x12xf32>
    %1059 = arith.addf %1049, %1058 : vector<2x8x12xf32>
    %c6_i32_234 = arith.constant 6 : i32
    %1060 = vector.broadcast %c6_i32_234 : i32 to vector<8x12xi32>
    %1061 = arith.cmpi eq, %1008, %1060 : vector<8x12xi32>
    %1062 = arith.extui %1061 : vector<8x12xi1> to vector<8x12xi32>
    %1063 = arith.sitofp %1062 : vector<8x12xi32> to vector<8x12xf32>
    %1064 = vector.shape_cast %1063 : vector<8x12xf32> to vector<1x8x12xf32>
    %1065 = vector.extract_strided_slice %1005 {offsets = [0, 0, 194], sizes = [2, 8, 1], strides = [1, 1, 1]} : vector<2x8x200xf32> to vector<2x8x1xf32>
    %1066 = vector.broadcast %1064 : vector<1x8x12xf32> to vector<2x8x12xf32>
    %1067 = vector.broadcast %1065 : vector<2x8x1xf32> to vector<2x8x12xf32>
    %1068 = arith.mulf %1066, %1067 : vector<2x8x12xf32>
    %1069 = arith.addf %1059, %1068 : vector<2x8x12xf32>
    %c7_i32_235 = arith.constant 7 : i32
    %1070 = vector.broadcast %c7_i32_235 : i32 to vector<8x12xi32>
    %1071 = arith.cmpi eq, %1008, %1070 : vector<8x12xi32>
    %1072 = arith.extui %1071 : vector<8x12xi1> to vector<8x12xi32>
    %1073 = arith.sitofp %1072 : vector<8x12xi32> to vector<8x12xf32>
    %1074 = vector.shape_cast %1073 : vector<8x12xf32> to vector<1x8x12xf32>
    %1075 = vector.extract_strided_slice %1005 {offsets = [0, 0, 193], sizes = [2, 8, 1], strides = [1, 1, 1]} : vector<2x8x200xf32> to vector<2x8x1xf32>
    %1076 = vector.broadcast %1074 : vector<1x8x12xf32> to vector<2x8x12xf32>
    %1077 = vector.broadcast %1075 : vector<2x8x1xf32> to vector<2x8x12xf32>
    %1078 = arith.mulf %1076, %1077 : vector<2x8x12xf32>
    %1079 = arith.addf %1069, %1078 : vector<2x8x12xf32>
    %cst_236 = arith.constant dense<0.000000e+00> : vector<2x8xf32>
    %1080 = vector.multi_reduction <add>, %1005, %cst_236 [2] : vector<2x8x200xf32> to vector<2x8xf32>
    %cst_237 = arith.constant dense<0.000000e+00> : vector<2x8xf32>
    %1081 = vector.multi_reduction <add>, %1079, %cst_237 [2] : vector<2x8x12xf32> to vector<2x8xf32>
    %1082 = arith.subf %1080, %1081 : vector<2x8xf32>
    "tpu.trace_start"() <{level = 10 : i32, message = "bit,bth->bih"}> : () -> ()
    %cst_238 = arith.constant dense<0.000000e+00> : vector<2x8x32xf32>
    %1083 = tpu.matmul %1079, %976, %cst_238 {dimension_numbers = #tpu.dot_dimension_numbers<[2], [1], [1], [2], [0, 0, 0, 1, 1, 2], [0], [0]>} : vector<2x8x12xf32>, vector<2x12x32xf32>, vector<2x8x32xf32> -> vector<2x8x32xf32>
    "tpu.trace_stop"() : () -> ()
    %1084 = vector.shape_cast %1082 : vector<2x8xf32> to vector<2x8x1xf32>
    %c1_239 = arith.constant 1 : index
    %c0_240 = arith.constant 0 : index
    %c0_241 = arith.constant 0 : index
    %1085 = vector.load %arg6[%c1_239, %c0_240, %c0_241] : memref<2x1x32xf32, #tpu.memory_space<vmem>>, vector<1x1x32xf32>
    %1086 = vector.shape_cast %1085 : vector<1x1x32xf32> to vector<1x32xf32>
    %1087 = vector.shape_cast %1086 : vector<1x32xf32> to vector<1x1x32xf32>
    %1088 = vector.broadcast %1084 : vector<2x8x1xf32> to vector<2x8x32xf32>
    %1089 = vector.broadcast %1087 : vector<1x1x32xf32> to vector<2x8x32xf32>
    %1090 = arith.mulf %1088, %1089 : vector<2x8x32xf32>
    %1091 = arith.addf %1083, %1090 : vector<2x8x32xf32>
    %cst_242 = arith.constant 5.000000e-03 : f32
    %1092 = vector.broadcast %cst_242 : f32 to vector<2x8x32xf32>
    %1093 = arith.mulf %1091, %1092 : vector<2x8x32xf32>
    %1094 = vector.shape_cast %1093 : vector<2x8x32xf32> to vector<16x32xf32>
    %c1_243 = arith.constant 1 : index
    %c0_244 = arith.constant 0 : index
    %c0_245 = arith.constant 0 : index
    %1095 = vector.load %arg11[%c1_243, %c0_244, %c0_245] : memref<2x32x64xf32, #tpu.memory_space<vmem>>, vector<1x32x64xf32>
    %1096 = vector.shape_cast %1095 : vector<1x32x64xf32> to vector<32x64xf32>
    %cst_246 = arith.constant dense<0.000000e+00> : vector<16x64xf32>
    %1097 = tpu.matmul %1094, %1096, %cst_246 {dimension_numbers = #tpu.dot_dimension_numbers<[1], [0], [0], [1], [0, 0, 1, 1], [], []>} : vector<16x32xf32>, vector<32x64xf32>, vector<16x64xf32> -> vector<16x64xf32>
    %c1_247 = arith.constant 1 : index
    %c0_248 = arith.constant 0 : index
    %c0_249 = arith.constant 0 : index
    %1098 = vector.load %arg12[%c1_247, %c0_248, %c0_249] : memref<2x1x64xf32, #tpu.memory_space<vmem>>, vector<1x1x64xf32>
    %1099 = vector.shape_cast %1098 : vector<1x1x64xf32> to vector<1x64xf32>
    %1100 = vector.broadcast %1099 : vector<1x64xf32> to vector<16x64xf32>
    %1101 = arith.addf %1097, %1100 : vector<16x64xf32>
    %cst_250 = arith.constant 1.702000e+00 : f32
    %1102 = vector.broadcast %cst_250 : f32 to vector<16x64xf32>
    %1103 = arith.mulf %1102, %1101 : vector<16x64xf32>
    %1104 = arith.negf %1103 : vector<16x64xf32>
    %1105 = math.exp %1104 : vector<16x64xf32>
    %cst_251 = arith.constant 1.000000e+00 : f32
    %1106 = vector.broadcast %cst_251 : f32 to vector<16x64xf32>
    %1107 = arith.addf %1106, %1105 : vector<16x64xf32>
    %1108 = arith.divf %1106, %1107 : vector<16x64xf32>
    %1109 = arith.mulf %1101, %1108 : vector<16x64xf32>
    %c1_252 = arith.constant 1 : index
    %c0_253 = arith.constant 0 : index
    %c0_254 = arith.constant 0 : index
    %1110 = vector.load %arg13[%c1_252, %c0_253, %c0_254] : memref<2x64x32xf32, #tpu.memory_space<vmem>>, vector<1x64x32xf32>
    %1111 = vector.shape_cast %1110 : vector<1x64x32xf32> to vector<64x32xf32>
    %cst_255 = arith.constant dense<0.000000e+00> : vector<16x32xf32>
    %1112 = tpu.matmul %1109, %1111, %cst_255 {dimension_numbers = #tpu.dot_dimension_numbers<[1], [0], [0], [1], [0, 0, 1, 1], [], []>} : vector<16x64xf32>, vector<64x32xf32>, vector<16x32xf32> -> vector<16x32xf32>
    %c1_256 = arith.constant 1 : index
    %c0_257 = arith.constant 0 : index
    %c0_258 = arith.constant 0 : index
    %1113 = vector.load %arg14[%c1_256, %c0_257, %c0_258] : memref<2x1x32xf32, #tpu.memory_space<vmem>>, vector<1x1x32xf32>
    %1114 = vector.shape_cast %1113 : vector<1x1x32xf32> to vector<1x32xf32>
    %1115 = vector.broadcast %1114 : vector<1x32xf32> to vector<16x32xf32>
    %1116 = arith.addf %1112, %1115 : vector<16x32xf32>
    %1117 = vector.shape_cast %1116 : vector<16x32xf32> to vector<2x8x32xf32>
    %c0_259 = arith.constant 0 : index
    %c0_260 = arith.constant 0 : index
    %c0_261 = arith.constant 0 : index
    %1118 = vector.load %arg15[%c0_259, %c0_260, %c0_261] : memref<2x8x32xf32, #tpu.memory_space<vmem>>, vector<2x8x32xf32>
    tpu.vector_store %arg15[%c0_259, %c0_260, %c0_261], %1117 {strides = array<i32>} : memref<2x8x32xf32, #tpu.memory_space<vmem>>, vector<2x8x32xf32>,
    return
  }
}

</mosaic_0001>

<bundles_post_ra>
// kernel: mplstm_forward.1
= control target key start
LH: loop header
LB: loop body
LE: loop exit
PB: predicated region body
PF: predicated region fallthrough
CT: control target
= control target key end

     0   :  { %s13088_s0 = inlined_call_operand.vmem [shape: f32[2,16,32], index: 0, kind: input, shape index: {}]   ;;  %s13089_s1 = inlined_call_operand.vmem [shape: f32[2,32,256], index: 1, kind: input, shape index: {}]   ;;  %s13090_s2 = inlined_call_operand.vmem [shape: f32[2,1,256], index: 2, kind: input, shape index: {}]   ;;  %s13091_s3 = inlined_call_operand.hbm [shape: f32[2,64,256], index: 3, kind: input, shape index: {}]   ;;  %s13092_s4 = inlined_call_operand.vmem [shape: f32[2,32,96], index: 4, kind: input, shape index: {}]   ;;  %s13093_s5 = inlined_call_operand.vmem [shape: f32[2,1,96], index: 5, kind: input, shape index: {}]   ;;  %s13094_s6 = inlined_call_operand.vmem [shape: f32[2,1,32], index: 6, kind: input, shape index: {}]   ;;  %s13095_s7 = inlined_call_operand.hbm [shape: f32[2,160,200], index: 7, kind: input, shape index: {}]   ;;  %s13096_s8 = inlined_call_operand.vmem [shape: f32[2,1,200], index: 8, kind: input, shape index: {}]   ;;  %s13097_s9 = inlined_call_operand.hbm [shape: f32[2,200,200], index: 9, kind: input, shape index: {}]   ;;  %s13098_s10 = inlined_call_operand.vmem [shape: f32[2,1,200], index: 10, kind: input, shape index: {}]   ;;  %s13099_s11 = inlined_call_operand.hbm [shape: f32[2,32,64], index: 11, kind: input, shape index: {}]   ;;  %s13100_s12 = inlined_call_operand.hbm [shape: f32[2,1,64], index: 12, kind: input, shape index: {}]   ;;  %s13101_s13 = inlined_call_operand.vmem [shape: f32[2,64,32], index: 13, kind: input, shape index: {}]   ;;  %s13102_s14 = inlined_call_operand.hbm [shape: f32[2,1,32], index: 14, kind: input, shape index: {}]   ;;  %s13103_s15 = inlined_call_operand.hbm [shape: f32[2,8,32], index: 15, kind: output, shape index: {0}]   ;;  %s13104_s16 = inlined_call_operand.vmem [shape: f32[2,2,200,32], index: 16, kind: output, shape index: {1}]   ;;  %s13105_s17 = inlined_call_operand.vmem [shape: f32[2,2,2,32], index: 17, kind: output, shape index: {2}]   ;;  %s13106_s18 = inlined_call_operand.vmem [shape: f32[2,2,2,32], index: 18, kind: output, shape index: {3}]  }
   0x1   :  { %13143 = sst [smem:[#allocation28_spill]] %s13088_s0 }
   0x2   :  { %13144 = sst [smem:[#allocation29_spill]] %s13089_s1 }
   0x3   :  { %13145 = sst [smem:[#allocation30_spill]] %s13090_s2 }
   0x4   :  { %24 = vsyncpa [#allocation3], 0 }
   0x5   :  { %25 = vsyncpa [#allocation6], 0 }
   0x6   :  { %26 = vsyncpa [#allocation9], 0 }
   0x7   :  { %27 = vsyncpa [#allocation12], 0 }
   0x8   :  { %28 = vsyncpa [#allocation4], 0  ;;  %s10242_s27 = smov [#allocation5]   ;;  %s10243_s29 = smov [#allocation8]  }
   0x9   :  { %s58_s28 = sshll.u32 %s10242_s27, 4  ;;  %s86_s30 = sshll.u32 %s10243_s29, 4  ;;  %s59_s28 = int_to_ptr.vmem [resolvable:$true] %s58_s28  ;;  %s10370_s30 = int_to_ptr.vmem [resolvable:$true] %s86_s30 }
   0xa   :  { %s10078_s1 = scalar_lea.hbm %s13095_s7, 10240 }
   0xb   :  { %p10079_p0 = scmp.ne.s32.totalorder %s13095_s7, %s10078_s1  ;;  %p10082_p1 = scmp.lt.u32.totalorder %s10078_s1, %s13095_s7 }
   0xd   :  { %p10084_p2 = pnand %p10082_p1, %p10079_p0 }
   0xf   :  { %10087 = shalt.err (!%p10084_p2)
}
  0x10   :  { %s10088_s23 = scalar_lea.vmem %s59_s28, 10240  ;;  %p10093_p4 = scmp.lt.s32.totalorder %s59_s28, %s59_s28 }
  0x11   :  { %p10089_p3 = scmp.ne.s32.totalorder %s59_s28, %s10088_s23  ;;  %p10094_p5 = scmp.lt.s32.totalorder %s10088_s23, %s10088_s23 }
  0x13   :  { %p10095_p6 = por %p10094_p5, %p10093_p4 }
  0x15   :  { %p10096_p7 = pnand %p10095_p6, %p10089_p3 }
  0x17   :  { %10099 = shalt.err (!%p10096_p7)
}
  0x18   :  { %s13110_s24 = smov 256   ;;  %s13112_s25 = smov 16  }
  0x19   :  { %64 = dma.hbm_to_vmem [thread:$0]  %s13095_s7, 10240, %s59_s28, [#allocation6], %s13110_s24, %s13110_s24, %s13112_s25  }
  0x1a   :  { %s10100_s19 = scalar_lea.hbm %s13099_s11, 1024 }
  0x1b   :  { %p10101_p8 = scmp.ne.s32.totalorder %s13099_s11, %s10100_s19  ;;  %p10104_p9 = scmp.lt.u32.totalorder %s10100_s19, %s13099_s11 }
  0x1d   :  { %p10106_p10 = pnand %p10104_p9, %p10101_p8 }
  0x1f   :  { %10109 = shalt.err (!%p10106_p10)
}
  0x20   :  { %s10110_s2 = scalar_lea.vmem %s10370_s30, 1024  ;;  %p10115_p12 = scmp.lt.s32.totalorder %s10370_s30, %s10370_s30 }
  0x21   :  { %p10111_p11 = scmp.ne.s32.totalorder %s10370_s30, %s10110_s2  ;;  %p10116_p13 = scmp.lt.s32.totalorder %s10110_s2, %s10110_s2 }
  0x23   :  { %p10117_p0 = por %p10116_p13, %p10115_p12 }
  0x25   :  { %p10118_p1 = pnand %p10117_p0, %p10111_p11 }
  0x27   :  { %10121 = shalt.err (!%p10118_p1)
}
  0x28   :  { %s10246_s7 = smov 128   ;;  %s10247_s28 = smov 8  }
  0x29   :  { %92 = dma.hbm_to_vmem [thread:$0]  %s13099_s11, 1024, %s10370_s30, [#allocation9], %s10246_s7, %s10246_s7, %s10247_s28  }
  0x2a   :  { %s10248_s27 = smov [#allocation2]   ;;  %s10249_s0 = smov [#allocation7]  }
  0x2b   :  { %s40_s29 = sshll.u32 %s10248_s27, 4  ;;  %s72_s19 = sshll.u32 %s10249_s0, 4  ;;  %s41_s29 = int_to_ptr.vmem [resolvable:$true] %s40_s29  ;;  %s10407_s19 = int_to_ptr.vmem [resolvable:$true] %s72_s19 }
  0x2c   :  { %s10122_s21 = scalar_lea.hbm %s13091_s3, 4096 }
  0x2d   :  { %p10123_p2 = scmp.ne.s32.totalorder %s13091_s3, %s10122_s21  ;;  %p10126_p3 = scmp.lt.u32.totalorder %s10122_s21, %s13091_s3 }
  0x2f   :  { %p10128_p4 = pnand %p10126_p3, %p10123_p2 }
  0x31   :  { %10131 = shalt.err (!%p10128_p4)
}
  0x32   :  { %s10132_s11 = scalar_lea.vmem %s41_s29, 4096  ;;  %p10137_p6 = scmp.lt.s32.totalorder %s41_s29, %s41_s29 }
  0x33   :  { %p10133_p5 = scmp.ne.s32.totalorder %s41_s29, %s10132_s11  ;;  %p10138_p7 = scmp.lt.s32.totalorder %s10132_s11, %s10132_s11 }
  0x35   :  { %p10139_p8 = por %p10138_p7, %p10137_p6 }
  0x37   :  { %p10140_p9 = pnand %p10139_p8, %p10133_p5 }
  0x39   :  { %10143 = shalt.err (!%p10140_p9)
}
  0x3a   :  { %s13146_s30 = smov 16   ;;  %s13147_s23 = smov 256  }
  0x3b   :  { %46 = dma.hbm_to_vmem [thread:$0]  %s13091_s3, 4096, %s41_s29, [#allocation3], %s13147_s23, %s13147_s23, %s13146_s30  }
  0x3c   :  { %s10144_s24 = scalar_lea.hbm %s13097_s9, 12800 }
  0x3d   :  { %p10145_p10 = scmp.ne.s32.totalorder %s13097_s9, %s10144_s24  ;;  %p10148_p11 = scmp.lt.u32.totalorder %s10144_s24, %s13097_s9 }
  0x3f   :  { %p10150_p12 = pnand %p10148_p11, %p10145_p10 }
  0x41   :  { %10153 = shalt.err (!%p10150_p12)
}
  0x42   :  { %s10154_s2 = scalar_lea.vmem %s10407_s19, 12800  ;;  %p10159_p0 = scmp.lt.s32.totalorder %s10407_s19, %s10407_s19 }
  0x43   :  { %p10155_p13 = scmp.ne.s32.totalorder %s10407_s19, %s10154_s2  ;;  %p10160_p1 = scmp.lt.s32.totalorder %s10154_s2, %s10154_s2 }
  0x45   :  { %p10161_p2 = por %p10160_p1, %p10159_p0 }
  0x47   :  { %p10162_p3 = pnand %p10161_p2, %p10155_p13 }
  0x49   :  { %10165 = shalt.err (!%p10162_p3)
}
  0x4a   :  { %78 = dma.hbm_to_vmem [thread:$0]  %s13097_s9, 12800, %s10407_s19, [#allocation6], %s13147_s23, %s13147_s23, %s13146_s30  }
  0x4b   :  { %s10250_s11 = smov [#allocation10]   ;;  %s10251_s27 = smov [#allocation11]  }
  0x4c   :  { %s98_s26 = sshll.u32 %s10250_s11, 4  ;;  %s112_s0 = sshll.u32 %s10251_s27, 4  ;;  %s99_s26 = int_to_ptr.vmem [resolvable:$true] %s98_s26  ;;  %s113_s0 = int_to_ptr.vmem [resolvable:$true] %s112_s0 }
  0x4d   :  { %s10166_s25 = scalar_lea.hbm %s13100_s12, 32 }
  0x4e   :  { %p10167_p4 = scmp.ne.s32.totalorder %s13100_s12, %s10166_s25  ;;  %p10170_p5 = scmp.lt.u32.totalorder %s10166_s25, %s13100_s12 }
  0x50   :  { %p10172_p6 = pnand %p10170_p5, %p10167_p4 }
  0x52   :  { %10175 = shalt.err (!%p10172_p6)
}
  0x53   :  { %s10176_s9 = scalar_lea.vmem %s99_s26, 32  ;;  %p10181_p8 = scmp.lt.s32.totalorder %s99_s26, %s99_s26 }
  0x54   :  { %p10177_p7 = scmp.ne.s32.totalorder %s99_s26, %s10176_s9  ;;  %p10182_p9 = scmp.lt.s32.totalorder %s10176_s9, %s10176_s9 }
  0x56   :  { %p10183_p10 = por %p10182_p9, %p10181_p8 }
  0x58   :  { %p10184_p11 = pnand %p10183_p10, %p10177_p7 }
  0x5a   :  { %10187 = shalt.err (!%p10184_p11)
}
  0x5b   :  { %s10252_s19 = smov 1   ;;  %s10188_s27 = scalar_lea.hbm %s13102_s14, 32 }
  0x5c   :  { %104 = dma.hbm_to_vmem [thread:$0]  %s13100_s12, 32, %s99_s26, [#allocation9], %s13146_s30, %s13146_s30, %s10252_s19  }
  0x5d   :  { %p10189_p12 = scmp.ne.s32.totalorder %s13102_s14, %s10188_s27  ;;  %p10192_p13 = scmp.lt.u32.totalorder %s10188_s27, %s13102_s14 }
  0x5f   :  { %p10194_p0 = pnand %p10192_p13, %p10189_p12 }
  0x61   :  { %10197 = shalt.err (!%p10194_p0)
}
  0x62   :  { %s10198_s21 = scalar_lea.vmem %s113_s0, 32  ;;  %p10203_p2 = scmp.lt.s32.totalorder %s113_s0, %s113_s0 }
  0x63   :  { %p10199_p1 = scmp.ne.s32.totalorder %s113_s0, %s10198_s21  ;;  %p10204_p3 = scmp.lt.s32.totalorder %s10198_s21, %s10198_s21 }
  0x65   :  { %p10205_p4 = por %p10204_p3, %p10203_p2 }
  0x67   :  { %p10206_p5 = pnand %p10205_p4, %p10199_p1 }
  0x69   :  { %10209 = shalt.err (!%p10206_p5)
}
  0x6a   :  { %118 = dma.hbm_to_vmem [thread:$0]  %s13102_s14, 32, %s113_s0, [#allocation12], %s13146_s30, %s13146_s30, %s10252_s19  }
  0x6b   :  { %10232 = dma.done.wait [#allocation3], 4096  }
  0x6c   :  { %10233 = vsyncadd [#allocation3], 4294963200 }
  0x6d   :  { %10234 = dma.done.wait [#allocation6], 23040  }
  0x6e   :  { %10235 = vsyncadd [#allocation6], 4294944256 }
  0x6f   :  { %10236 = dma.done.wait [#allocation9], 1056  }
  0x70   :  { %10237 = vsyncadd [#allocation9], 4294966240 }
  0x71   :  { %10238 = dma.done.wait [#allocation12], 32  }
  0x72   :  { %10239 = vsyncadd [#allocation12], 4294967264  ;;  %vm146_vm0 = vcmask 261120   ;;  %v13127_v0 = vmov 0.0   ;;  %s13148_s20 = sld [smem:[#allocation28_spill]]  ;;  %s13149_s14 = sld [smem:[#allocation29_spill]]  ;;  %v137_v51 = vlaneseq }
  0x73   :  { %2720 = vst.msk [vmem:[%s13104_s16] sm:$0xff] %vm146_vm0, %v13127_v0  ;;  %2721 = vst.msk [vmem:[%s13104_s16 + $0x8] sm:$0xff] %vm146_vm0, %v13127_v0  ;;  %296 = vmatprep.mubr.f32.mxu1 %v13127_v0  ;;  %608 = vmatprep.mubr.f32.mxu0 %v13127_v0  ;;  %s13150_s30 = sld [smem:[#allocation30_spill]]  ;;  %vm392_vm1 = vcmask 1041409   ;;  %s10254_s0 = smov 64   ;;  %vm406_vm3 = vcmask 523264  }
  0x74   :  { %2722 = vst.msk [vmem:[%s13104_s16 + $0x10] sm:$0xff] %vm146_vm0, %v13127_v0  ;;  %2723 = vst.msk [vmem:[%s13104_s16 + $0x18] sm:$0xff] %vm146_vm0, %v13127_v0  ;;  %v10987_v52 = vshrl.u32 %v137_v51, 7  ;;  %vm2681_vm4 = vcmask 1040384   ;;  %vm2684_vm5 = vcmask 1041408   ;;  %vm2687_vm6 = vcmask 1042432  }
  0x75   :  { %2724 = vst.msk [vmem:[%s13104_s16 + $0x20] sm:$0xff] %vm146_vm0, %v13127_v0  ;;  %2725 = vst.msk [vmem:[%s13104_s16 + $0x28] sm:$0xff] %vm146_vm0, %v13127_v0  ;;  %vm2690_vm7 = vcmask 1043456   ;;  %vm2693_vm8 = vcmask 1044480   ;;  %vm2696_vm9 = vcmask 1045504   ;;  %vm2699_vm10 = vcmask 1046528  }
  0x76   :  { %2726 = vst.msk [vmem:[%s13104_s16 + $0x30] sm:$0xff] %vm146_vm0, %v13127_v0  ;;  %2727 = vst.msk [vmem:[%s13104_s16 + $0x38] sm:$0xff] %vm146_vm0, %v13127_v0  ;;  %v10990_v53 = vsub.s32 0, %v10987_v52  ;;  %v10999_v56 = vsub.s32 1, %v10987_v52  ;;  %s10256_s19 = smov 32   ;;  %s10257_s11 = smov 96  }
  0x77   :  { %2728 = vst.msk [vmem:[%s13104_s16 + $0x40] sm:$0xff] %vm146_vm0, %v13127_v0  ;;  %2729 = vst.msk [vmem:[%s13104_s16 + $0x48] sm:$0xff] %vm146_vm0, %v13127_v0  ;;  %vm3062_vm11 = vcmask 785408   ;;  %vm13114_vm12 = vcmask 588800   ;;  %vm4428_vm13 = vcmask 584704  }
  0x78   :  { %2730 = vst.msk [vmem:[%s13104_s16 + $0x50] sm:$0xff] %vm146_vm0, %v13127_v0  ;;  %2731 = vst.msk [vmem:[%s13104_s16 + $0x58] sm:$0xff] %vm146_vm0, %v13127_v0  ;;  %v142_v1 = vld [vmem:[%s13148_s20] sm:$0xff]  ;;  %v144_v2 = vld [vmem:[%s13148_s20 + $0x10] sm:$0xff] }
  0x79   :  { %2732 = vst.msk [vmem:[%s13104_s16 + $0x60] sm:$0xff] %vm146_vm0, %v13127_v0  ;;  %2733 = vst.msk [vmem:[%s13104_s16 + $0x68] sm:$0xff] %vm146_vm0, %v13127_v0  ;;  %v143_v3 = vld [vmem:[%s13148_s20 + $0x8] sm:$0xff]  ;;  %v147_v4 = vsel %vm146_vm0, %v142_v1, 0.0  ;;  %v153_v5 = vsel %vm146_vm0, %v144_v2, 0.0  ;;  %v203_v23 = vld [vmem:[%s13149_s14 + $0x18] sm:$0xff] }
  0x7a   :  { %2734 = vst.msk [vmem:[%s13104_s16 + $0x70] sm:$0xff] %vm146_vm0, %v13127_v0  ;;  %2735 = vst.msk [vmem:[%s13104_s16 + $0x78] sm:$0xff] %vm146_vm0, %v13127_v0  ;;  %148 = vadd.xlane.f32.xlu0 %v147_v4  ;;  %154 = vadd.xlane.f32.xlu1 %v153_v5  ;;  %v150_v6 = vsel %vm146_vm0, %v143_v3, 0.0  ;;  %v201_v22 = vld [vmem:[%s13149_s14 + $0x8] sm:$0xff]  ;;  %v200_v25 = vld [vmem:[%s13149_s14] sm:$0xff] }
  0x7b   :  { %2736 = vst.msk [vmem:[%s13104_s16 + $0x80] sm:$0xff] %vm146_vm0, %v13127_v0  ;;  %2737 = vst.msk [vmem:[%s13104_s16 + $0x88] sm:$0xff] %vm146_vm0, %v13127_v0  ;;  %v8775_v24 = vpack.c.bf16 %v203_v23, %v201_v22  ;;  %v202_v26 = vld [vmem:[%s13149_s14 + $0x10] sm:$0xff]  ;;  %v205_v28 = vld [vmem:[%s13149_s14 + $0x28] sm:$0xff] }
  0x7c   :  { %2738 = vst.msk [vmem:[%s13104_s16 + $0x90] sm:$0xff] %vm146_vm0, %v13127_v0  ;;  %2739 = vst.msk [vmem:[%s13104_s16 + $0x98] sm:$0xff] %vm146_vm0, %v13127_v0  ;;  %v8777_v27 = vpack.c.bf16 %v202_v26, %v200_v25  ;;  %v207_v29 = vld [vmem:[%s13149_s14 + $0x38] sm:$0xff]  ;;  %v204_v30 = vld [vmem:[%s13149_s14 + $0x20] sm:$0xff] }
  0x7d   :  { %2740 = vst.msk [vmem:[%s13104_s16 + $0xa0] sm:$0xff] %vm146_vm0, %v13127_v0  ;;  %2741 = vst.msk [vmem:[%s13104_s16 + $0xa8] sm:$0xff] %vm146_vm0, %v13127_v0  ;;  %8776 = vmatprep.subr.bf16.mxu1 %v8775_v24  ;;  %v8779_v31 = vpack.c.bf16 %v207_v29, %v205_v28  ;;  %v206_v32 = vld [vmem:[%s13149_s14 + $0x30] sm:$0xff]  ;;  %v10976_v34 = vld [vmem:[%s13148_s20 + $0x18] sm:$0xff] }
  0x7e   :  { %2742 = vst.msk [vmem:[%s13104_s16 + $0xb0] sm:$0xff] %vm146_vm0, %v13127_v0  ;;  %2743 = vst.msk [vmem:[%s13104_s16 + $0x190] sm:$0xff] %vm146_vm0, %v13127_v0  ;;  %151 = vadd.xlane.f32.xlu0 %v150_v6  ;;  %8778 = vmatpush1.bf16.msra.mxu1 %v8777_v27  ;;  %v8781_v33 = vpack.c.bf16 %v206_v32, %v204_v30  ;;  %v156_v35 = vsel %vm146_vm0, %v10976_v34, 0.0  ;;  %v208_v54 = vld [vmem:[%s13150_s30] sm:$0x3] }
  0x7f   :  { %2744 = vst.msk [vmem:[%s13104_s16 + $0x198] sm:$0xff] %vm146_vm0, %v13127_v0  ;;  %2745 = vst.msk [vmem:[%s13104_s16 + $0x1a0] sm:$0xff] %vm146_vm0, %v13127_v0  ;;  %8780 = vmatprep.subr.bf16.mxu1 %v8779_v31  ;;  %v10996_v55 = vrot.slane %v208_v54, %v10990_v53  ;;  %v11003_v59 = vrot.slane %v208_v54, %v10999_v56 }
  0x80   :  { %2746 = vst.msk [vmem:[%s13104_s16 + $0x1a8] sm:$0xff] %vm146_vm0, %v13127_v0  ;;  %2747 = vst.msk [vmem:[%s13104_s16 + $0x1b0] sm:$0xff] %vm146_vm0, %v13127_v0 }
  0x81   :  { %2748 = vst.msk [vmem:[%s13104_s16 + $0x1b8] sm:$0xff] %vm146_vm0, %v13127_v0  ;;  %2749 = vst.msk [vmem:[%s13104_s16 + $0x1c0] sm:$0xff] %vm146_vm0, %v13127_v0 }
  0x82   :  { %2750 = vst.msk [vmem:[%s13104_s16 + $0x1c8] sm:$0xff] %vm146_vm0, %v13127_v0  ;;  %2751 = vst.msk [vmem:[%s13104_s16 + $0x1d0] sm:$0xff] %vm146_vm0, %v13127_v0  ;;  %8782 = vmatpush1.bf16.msra.mxu1 %v8781_v33 }
  0x83   :  { %2752 = vst.msk [vmem:[%s13104_s16 + $0x1d8] sm:$0xff] %vm146_vm0, %v13127_v0  ;;  %2753 = vst.msk [vmem:[%s13104_s16 + $0x1e0] sm:$0xff] %vm146_vm0, %v13127_v0 }
  0x84   :  { %2754 = vst.msk [vmem:[%s13104_s16 + $0x1e8] sm:$0xff] %vm146_vm0, %v13127_v0  ;;  %2755 = vst.msk [vmem:[%s13104_s16 + $0x1f0] sm:$0xff] %vm146_vm0, %v13127_v0 }
  0x85   :  { %2756 = vst.msk [vmem:[%s13104_s16 + $0x1f8] sm:$0xff] %vm146_vm0, %v13127_v0  ;;  %2757 = vst.msk [vmem:[%s13104_s16 + $0x200] sm:$0xff] %vm146_vm0, %v13127_v0 }
  0x86   :  { %2758 = vst.msk [vmem:[%s13104_s16 + $0x208] sm:$0xff] %vm146_vm0, %v13127_v0  ;;  %2759 = vst.msk [vmem:[%s13104_s16 + $0x210] sm:$0xff] %vm146_vm0, %v13127_v0 }
  0x87   :  { %2760 = vst.msk [vmem:[%s13104_s16 + $0x218] sm:$0xff] %vm146_vm0, %v13127_v0  ;;  %2761 = vst.msk [vmem:[%s13104_s16 + $0x220] sm:$0xff] %vm146_vm0, %v13127_v0 }
  0x88   :  { %2762 = vst.msk [vmem:[%s13104_s16 + $0x228] sm:$0xff] %vm146_vm0, %v13127_v0  ;;  %2763 = vst.msk [vmem:[%s13104_s16 + $0x230] sm:$0xff] %vm146_vm0, %v13127_v0 }
  0x89   :  { %2764 = vst.msk [vmem:[%s13104_s16 + $0x238] sm:$0xff] %vm146_vm0, %v13127_v0  ;;  %2765 = vst.msk [vmem:[%s13104_s16 + $0x240] sm:$0xff] %vm146_vm0, %v13127_v0 }
  0x8a   :  { %8488 = vst.msk [vmem:[%s13104_s16 + $0xc8] sm:$0xff] %vm146_vm0, %v13127_v0  ;;  %8489 = vst.msk [vmem:[%s13104_s16 + $0xd0] sm:$0xff] %vm146_vm0, %v13127_v0 }
  0x8b   :  { %8490 = vst.msk [vmem:[%s13104_s16 + $0xd8] sm:$0xff] %vm146_vm0, %v13127_v0  ;;  %8491 = vst.msk [vmem:[%s13104_s16 + $0xe0] sm:$0xff] %vm146_vm0, %v13127_v0 }
  0x8c   :  { %8492 = vst.msk [vmem:[%s13104_s16 + $0xe8] sm:$0xff] %vm146_vm0, %v13127_v0  ;;  %8493 = vst.msk [vmem:[%s13104_s16 + $0xf0] sm:$0xff] %vm146_vm0, %v13127_v0 }
  0x8d   :  { %8494 = vst.msk [vmem:[%s13104_s16 + $0xf8] sm:$0xff] %vm146_vm0, %v13127_v0  ;;  %8495 = vst.msk [vmem:[%s13104_s16 + $0x100] sm:$0xff] %vm146_vm0, %v13127_v0 }
  0x8e   :  { %8496 = vst.msk [vmem:[%s13104_s16 + $0x108] sm:$0xff] %vm146_vm0, %v13127_v0  ;;  %8497 = vst.msk [vmem:[%s13104_s16 + $0x110] sm:$0xff] %vm146_vm0, %v13127_v0 }
  0x8f   :  { %8498 = vst.msk [vmem:[%s13104_s16 + $0x118] sm:$0xff] %vm146_vm0, %v13127_v0  ;;  %8499 = vst.msk [vmem:[%s13104_s16 + $0x120] sm:$0xff] %vm146_vm0, %v13127_v0 }
  0x90   :  { %8500 = vst.msk [vmem:[%s13104_s16 + $0x128] sm:$0xff] %vm146_vm0, %v13127_v0  ;;  %8501 = vst.msk [vmem:[%s13104_s16 + $0x130] sm:$0xff] %vm146_vm0, %v13127_v0 }
  0x91   :  { %8502 = vst.msk [vmem:[%s13104_s16 + $0x138] sm:$0xff] %vm146_vm0, %v13127_v0  ;;  %8503 = vst.msk [vmem:[%s13104_s16 + $0x140] sm:$0xff] %vm146_vm0, %v13127_v0 }
  0x92   :  { %8504 = vst.msk [vmem:[%s13104_s16 + $0x148] sm:$0xff] %vm146_vm0, %v13127_v0  ;;  %8505 = vst.msk [vmem:[%s13104_s16 + $0x150] sm:$0xff] %vm146_vm0, %v13127_v0 }
  0x93   :  { %8506 = vst.msk [vmem:[%s13104_s16 + $0x158] sm:$0xff] %vm146_vm0, %v13127_v0  ;;  %8507 = vst.msk [vmem:[%s13104_s16 + $0x160] sm:$0xff] %vm146_vm0, %v13127_v0 }
  0x94   :  { %8508 = vst.msk [vmem:[%s13104_s16 + $0x168] sm:$0xff] %vm146_vm0, %v13127_v0  ;;  %8509 = vst.msk [vmem:[%s13104_s16 + $0x170] sm:$0xff] %vm146_vm0, %v13127_v0 }
  0x95   :  { %8510 = vst.msk [vmem:[%s13104_s16 + $0x178] sm:$0xff] %vm146_vm0, %v13127_v0  ;;  %8512 = vst.msk [vmem:[%s13104_s16 + $0x258] sm:$0xff] %vm146_vm0, %v13127_v0 }
  0x96   :  { %8513 = vst.msk [vmem:[%s13104_s16 + $0x260] sm:$0xff] %vm146_vm0, %v13127_v0  ;;  %8514 = vst.msk [vmem:[%s13104_s16 + $0x268] sm:$0xff] %vm146_vm0, %v13127_v0 }
  0x97   :  { %8515 = vst.msk [vmem:[%s13104_s16 + $0x270] sm:$0xff] %vm146_vm0, %v13127_v0  ;;  %8516 = vst.msk [vmem:[%s13104_s16 + $0x278] sm:$0xff] %vm146_vm0, %v13127_v0 }
  0x98   :  { %8517 = vst.msk [vmem:[%s13104_s16 + $0x280] sm:$0xff] %vm146_vm0, %v13127_v0  ;;  %8518 = vst.msk [vmem:[%s13104_s16 + $0x288] sm:$0xff] %vm146_vm0, %v13127_v0 }
  0x99   :  { %8519 = vst.msk [vmem:[%s13104_s16 + $0x290] sm:$0xff] %vm146_vm0, %v13127_v0  ;;  %8520 = vst.msk [vmem:[%s13104_s16 + $0x298] sm:$0xff] %vm146_vm0, %v13127_v0 }
  0x9a   :  { %8521 = vst.msk [vmem:[%s13104_s16 + $0x2a0] sm:$0xff] %vm146_vm0, %v13127_v0  ;;  %8522 = vst.msk [vmem:[%s13104_s16 + $0x2a8] sm:$0xff] %vm146_vm0, %v13127_v0 }
  0x9b   :  { %8523 = vst.msk [vmem:[%s13104_s16 + $0x2b0] sm:$0xff] %vm146_vm0, %v13127_v0  ;;  %8524 = vst.msk [vmem:[%s13104_s16 + $0x2b8] sm:$0xff] %vm146_vm0, %v13127_v0 }
  0x9c   :  { %8525 = vst.msk [vmem:[%s13104_s16 + $0x2c0] sm:$0xff] %vm146_vm0, %v13127_v0  ;;  %8526 = vst.msk [vmem:[%s13104_s16 + $0x2c8] sm:$0xff] %vm146_vm0, %v13127_v0 }
  0x9d   :  { %8527 = vst.msk [vmem:[%s13104_s16 + $0x2d0] sm:$0xff] %vm146_vm0, %v13127_v0  ;;  %8528 = vst.msk [vmem:[%s13104_s16 + $0x2d8] sm:$0xff] %vm146_vm0, %v13127_v0 }
  0x9e   :  { %8529 = vst.msk [vmem:[%s13104_s16 + $0x2e0] sm:$0xff] %vm146_vm0, %v13127_v0  ;;  %8530 = vst.msk [vmem:[%s13104_s16 + $0x2e8] sm:$0xff] %vm146_vm0, %v13127_v0 }
  0x9f   :  { %8531 = vst.msk [vmem:[%s13104_s16 + $0x2f0] sm:$0xff] %vm146_vm0, %v13127_v0  ;;  %8532 = vst.msk [vmem:[%s13104_s16 + $0x2f8] sm:$0xff] %vm146_vm0, %v13127_v0 }
  0xa0   :  { %8533 = vst.msk [vmem:[%s13104_s16 + $0x300] sm:$0xff] %vm146_vm0, %v13127_v0  ;;  %8534 = vst.msk [vmem:[%s13104_s16 + $0x308] sm:$0xff] %vm146_vm0, %v13127_v0 }
 0x107   :  { %v149_v7 = vpop.xlane.xlu0 %148  ;;  %v155_v8 = vpop.xlane.xlu1 %154 }
 0x108   :  { %v160_v9 = vmul.f32 0.03125, %v149_v7  ;;  %v162_v10 = vmul.f32 0.03125, %v155_v8 }
 0x10a   :  { %v164_v11 = vsub.f32 %v142_v1, %v160_v9  ;;  %v166_v12 = vsub.f32 %v144_v2, %v162_v10 }
 0x10b   :  { %v152_v13 = vpop.xlane.xlu0 %151 }
 0x10c   :  { %v161_v14 = vmul.f32 0.03125, %v152_v13  ;;  %v168_v15 = vmul.f32 %v164_v11, %v164_v11  ;;  %v170_v16 = vmul.f32 %v166_v12, %v166_v12 }
 0x10e   :  { %v165_v17 = vsub.f32 %v143_v3, %v161_v14  ;;  %v172_v18 = vsel %vm146_vm0, %v168_v15, 0.0  ;;  %v178_v19 = vsel %vm146_vm0, %v170_v16, 0.0 }
 0x10f   :  { %173 = vadd.xlane.f32.xlu1 %v172_v18 }
 0x110   :  { %v169_v20 = vmul.f32 %v165_v17, %v165_v17 }
 0x112   :  { %v175_v21 = vsel %vm146_vm0, %v169_v20, 0.0 }
 0x113   :  { %179 = vadd.xlane.f32.xlu1 %v178_v19  ;;  %176 = vadd.xlane.f32.xlu0 %v175_v21 }
 0x117   :  { %157 = vadd.xlane.f32.xlu0 %v156_v35 }
 0x19c   :  { %v174_v36 = vpop.xlane.xlu1 %173 }
 0x19d   :  { %v184_v37 = vmul.f32 0.03125, %v174_v36 }
 0x19f   :  { %v188_v38 = vadd.f32 1e-05, %v184_v37 }
 0x1a0   :  { %v180_v39 = vpop.xlane.xlu1 %179  ;;  %v177_v40 = vpop.xlane.xlu0 %176 }
 0x1a1   :  { %9614 = vrsqrt.f32 %v188_v38  ;;  %v186_v41 = vmul.f32 0.03125, %v180_v39  ;;  %v185_v42 = vmul.f32 0.03125, %v177_v40 }
 0x1a3   :  { %v189_v43 = vadd.f32 1e-05, %v185_v42  ;;  %v190_v44 = vadd.f32 1e-05, %v186_v41 }
 0x1a5   :  { %9616 = vrsqrt.f32 %v189_v43 }
 0x1a6   :  { %9618 = vrsqrt.f32 %v190_v44 }
 0x1ab   :  { %v9615_v45 = vpop.eup %9614 }
 0x1ac   :  { %v196_v46 = vmul.f32 %v9615_v45, %v164_v11 }
 0x1ae   :  { %8315 = vmatmul.mubr.msk.f32.vlgmr.msra.gmra.mrb[0].mxu1 %vm146_vm0, %v196_v46 }
 0x1af   :  { %302 = vmatprep.mubr.f32.mxu1 %v13127_v0  ;;  %v9617_v47 = vpop.eup %9616 }
 0x1b0   :  { %v197_v48 = vmul.f32 %v9617_v47, %v165_v17  ;;  %v9619_v49 = vpop.eup %9618 }
 0x1b1   :  { %v198_v50 = vmul.f32 %v9619_v49, %v166_v12 }
 0x1b2   :  { %8316 = vmatmul.mubr.msk.f32.gmra.mrb[2].mxu1 %vm146_vm0, %v197_v48 }
 0x1b3   :  { %308 = vmatprep.mubr.f32.mxu1 %v13127_v0 }
 0x1b6   :  { %8317 = vmatmul.mubr.msk.f32.gmra.mrb[4].mxu1 %vm146_vm0, %v198_v50 }
 0x1b7   :  { %314 = vmatprep.mubr.f32.mxu1 %v13127_v0 }
 0x281   :  { %v298_v57 = vpop.f32.mrb[0].mxu1 }
 0x282   :  { %v299_v58 = vadd.f32 %v298_v57, %v10996_v55  ;;  %v300_v60 = vpop.f32.mrb[1].mxu1 }
 0x283   :  { %v11006_v62 = vadd.f32 %v300_v60, %v11003_v59 }
 0x284   :  { %v8319_v61 = vmul.f32 -1.442695, %v299_v58  ;;  %v400_v3 = vrot.slane %v299_v58, 1  ;;  %v534_v4 = vrot.slane %v299_v58, 2  ;;  %v662_v5 = vrot.slane %v299_v58, 3 }
 0x285   :  { %v11008_v63 = vpop.f32.mrb[2].mxu1  ;;  %v402_v8 = vrot.slane %v11006_v62, 1  ;;  %v537_v9 = vrot.slane %v11006_v62, 2  ;;  %v665_v10 = vrot.slane %v11006_v62, 3  ;;  %v790_v12 = vrot.slane %v299_v58, 4 }
 0x286   :  { %9620 = vpow2.f32 %v8319_v61  ;;  %v11010_v1 = vpop.f32.mrb[3].mxu1  ;;  %v793_v13 = vrot.slane %v11006_v62, 4  ;;  %v918_v14 = vrot.slane %v299_v58, 5  ;;  %v921_v21 = vrot.slane %v11006_v62, 5 }
 0x287   :  { %9622 = vtanh.f32 %v11006_v62  ;;  %v1046_v22 = vrot.slane %v299_v58, 6  ;;  %v1049_v30 = vrot.slane %v11006_v62, 6  ;;  %v1174_v39 = vrot.slane %v299_v58, 7 }
 0x288   :  { %v1177_v46 = vrot.slane %v11006_v62, 7  ;;  %v11079_v61 = vand.u32 127, %v137_v51 }
 0x289   :  { %v310_v2 = vpop.f32.mrb[4].mxu1 }
 0x28a   :  { %v311_v6 = vadd.f32 %v310_v2, %v10996_v55  ;;  %v312_v7 = vpop.f32.mrb[5].mxu1  ;;  %vm139_vm2 = vcmp.lt.s32.totalorder %v11079_v61, 32 }
 0x28b   :  { %v11018_v11 = vadd.f32 %v312_v7, %v11003_v59 }
 0x28c   :  { %v8321_v15 = vmul.f32 -1.442695, %v311_v6  ;;  %v11022_v16 = vsel %vm392_vm1, %v311_v6, %v400_v3  ;;  %v535_v17 = vrot.slane %v311_v6, 1  ;;  %v663_v18 = vrot.slane %v311_v6, 2 }
 0x28d   :  { %v11026_v19 = vsel %vm392_vm1, %v11018_v11, %v402_v8  ;;  %v538_v20 = vrot.slane %v11018_v11, 1  ;;  %v666_v25 = vrot.slane %v11018_v11, 2  ;;  %v791_v28 = vrot.slane %v311_v6, 3 }
 0x28e   :  { %9624 = vpow2.f32 %v8321_v15  ;;  %v11031_v23 = vsel %vm392_vm1, %v535_v17, %v534_v4  ;;  %v11034_v24 = vsel %vm392_vm1, %v663_v18, %v662_v5  ;;  %v794_v29 = vrot.slane %v11018_v11, 3  ;;  %v323_v15 = vld [vmem:[#allocation2 + $0x10] sm:$0xff]  ;;  %v326_v17 = vld [vmem:[#allocation2 + $0x28] sm:$0xff]  ;;  %v328_v18 = vld [vmem:[#allocation2 + $0x38] sm:$0xff] }
 0x28f   :  { %v11038_v27 = vsel %vm392_vm1, %v538_v20, %v537_v9  ;;  %v11043_v32 = vsel %vm392_vm1, %v666_v25, %v665_v10  ;;  %v919_v33 = vrot.slane %v311_v6, 4  ;;  %v922_v35 = vrot.slane %v11018_v11, 4  ;;  %v322_v10 = vld [vmem:[#allocation2 + $0x8] sm:$0xff] }
 0x290   :  { %v9621_v26 = vpop.eup %9620  ;;  %v11047_v36 = vsel %vm392_vm1, %v791_v28, %v790_v12  ;;  %v11050_v37 = vsel %vm392_vm1, %v794_v29, %v793_v13  ;;  %v1047_v38 = vrot.slane %v311_v6, 5  ;;  %v1050_v42 = vrot.slane %v11018_v11, 5  ;;  %v324_v12 = vld [vmem:[#allocation2 + $0x18] sm:$0xff]  ;;  %v321_v13 = vld [vmem:[#allocation2] sm:$0xff]  ;;  %v330_v25 = vld [vmem:[#allocation2 + $0x48] sm:$0xff] }
 0x291   :  { %v349_v31 = vadd.f32 1.0, %v9621_v26  ;;  %v11053_v40 = vsel %vm392_vm1, %v919_v33, %v918_v14  ;;  %v11056_v41 = vsel %vm392_vm1, %v922_v35, %v921_v21  ;;  %v9623_v43 = vpop.eup %9622  ;;  %v1175_v45 = vrot.slane %v311_v6, 6  ;;  %v158_v6 = vpop.xlane.xlu0 %157  ;;  %v332_v26 = vld [vmem:[#allocation2 + $0x58] sm:$0xff]  ;;  %v334_v33 = vld [vmem:[#allocation2 + $0x68] sm:$0xff] }
 0x292   :  { %v11060_v44 = vsel %vm392_vm1, %v1047_v38, %v1046_v22  ;;  %v1178_v47 = vrot.slane %v11018_v11, 6  ;;  %v11065_v48 = vsel %vm392_vm1, %v1050_v42, %v1049_v30  ;;  %v11087_v5 = vsel %vm139_vm2, 1.0, %v13127_v0  ;;  %v327_v22 = vld [vmem:[#allocation2 + $0x30] sm:$0xff]  ;;  %v329_v30 = vld [vmem:[#allocation2 + $0x40] sm:$0xff]  ;;  %v336_v35 = vld [vmem:[#allocation2 + $0x78] sm:$0xff] }
 0x293   :  { %9626 = vrcp.f32 %v349_v31  ;;  %v11068_v49 = vsel %vm392_vm1, %v1175_v45, %v1174_v39  ;;  %v163_v7 = vmul.f32 0.03125, %v158_v6  ;;  %v11097_v14 = vpack.c.bf16 %v324_v12, %v322_v10  ;;  %v331_v31 = vld [vmem:[#allocation2 + $0x50] sm:$0xff]  ;;  %v333_v42 = vld [vmem:[#allocation2 + $0x60] sm:$0xff] }
 0x294   :  { %v11071_v50 = vsel %vm392_vm1, %v1178_v47, %v1177_v46  ;;  %9628 = vtanh.f32 %v11018_v11  ;;  %v11099_v20 = vpack.c.bf16 %v323_v15, %v321_v13  ;;  %v11101_v21 = vpack.c.bf16 %v328_v18, %v326_v17 }
 0x295   :  { %v11092_v51 = vsub.f32 %v10976_v34, %v163_v7  ;;  %v325_v34 = vld [vmem:[#allocation2 + $0x20] sm:$0xff]  ;;  %8784 = vmatprep.subr.bf16.mxu1 %v11097_v14  ;;  %8800 = vmatprep.subr.bf16.mxu0 %v11097_v14  ;;  %v11110_v29 = vpack.c.bf16 %v332_v26, %v330_v25  ;;  %v11114_v38 = vpack.c.bf16 %v331_v31, %v329_v30  ;;  %v8320_v46 = vmul.f32 -1.442695, %v11006_v62 }
 0x296   :  { %8786 = vmatpush1.bf16.msra.mxu1 %v11099_v20  ;;  %v11106_v28 = vpack.c.bf16 %v327_v22, %v325_v34  ;;  %8802 = vmatpush1.bf16.msra.mxu0 %v11099_v20  ;;  %v11118_v39 = vpack.c.bf16 %v336_v35, %v334_v33  ;;  %v8322_v47 = vmul.f32 -1.442695, %v11018_v11 }
 0x297   :  { %v171_v8 = vmul.f32 %v11092_v51, %v11092_v51  ;;  %8788 = vmatprep.subr.bf16.mxu1 %v11101_v21  ;;  %8804 = vmatprep.subr.bf16.mxu0 %v11101_v21 }
 0x298   :  { %v9625_v54 = vpop.eup %9624 }
 0x299   :  { %v351_v57 = vadd.f32 1.0, %v9625_v54  ;;  %v181_v9 = vsel %vm146_vm0, %v171_v8, 0.0 }
 0x29a   :  { %8790 = vmatpush1.bf16.msra.mxu1 %v11106_v28  ;;  %8806 = vmatpush1.bf16.msra.mxu0 %v11106_v28 }
 0x29b   :  { %9630 = vrcp.f32 %v351_v57  ;;  %8792 = vmatprep.subr.bf16.mxu1 %v11110_v29  ;;  %8808 = vmatprep.subr.bf16.mxu0 %v11110_v29 }
 0x29c   :  { %9632 = vpow2.f32 %v8320_v46 }
 0x29d   :  { %v11074_v58 = vpop.eup %9626  ;;  %9634 = vpow2.f32 %v8322_v47 }
 0x29e   :  { %v365_v60 = vmul.f32 %v11074_v58, %v9623_v43  ;;  %v9629_v2 = vpop.eup %9628  ;;  %v335_v43 = vld [vmem:[#allocation2 + $0x70] sm:$0xff]  ;;  %8794 = vmatpush1.bf16.msra.mxu1 %v11114_v38  ;;  %8810 = vmatpush1.bf16.msra.mxu0 %v11114_v38 }
 0x29f   :  { %v11122_v45 = vpack.c.bf16 %v335_v43, %v333_v42  ;;  %8796 = vmatprep.subr.bf16.mxu1 %v11118_v39  ;;  %8812 = vmatprep.subr.bf16.mxu0 %v11118_v39 }
 0x2a0   :  { %369 = vrot.lane.b32.xlu0 %v365_v60, %s10254_s0  ;;  %v363_v60 = vmul.f32 0.0, %v11074_v58 }
 0x2a2   :  { %8798 = vmatpush1.bf16.msra.mxu1 %v11122_v45  ;;  %8814 = vmatpush1.bf16.msra.mxu0 %v11122_v45 }
 0x2a3   :  { %8816 = vmatprep.subr.bf16.mxu1 %v11097_v14  ;;  %8832 = vmatprep.subr.bf16.mxu0 %v11097_v14 }
 0x2a5   :  { %v11081_v3 = vpop.eup %9630 }
 0x2a6   :  { %v366_v4 = vmul.f32 %v11081_v3, %v9629_v2  ;;  %v9633_v54 = vpop.eup %9632  ;;  %v364_v7 = vmul.f32 0.0, %v11081_v3 }
 0x2a7   :  { %v350_v57 = vadd.f32 1.0, %v9633_v54  ;;  %v9635_v62 = vpop.eup %9634 }
 0x2a8   :  { %371 = vrot.lane.b32.xlu1 %v366_v4, %s10254_s0  ;;  %v352_v6 = vadd.f32 1.0, %v9635_v62 }
 0x2a9   :  { %9636 = vrcp.f32 %v350_v57 }
 0x2ac   :  { %382 = vrot.lane.b32.xlu1 %v11087_v5, %s10254_s0 }
 0x2b3   :  { %v9637_v10 = vpop.eup %9636 }
 0x2d0   :  { %182 = vadd.xlane.f32.xlu1 %v181_v9 }
 0x312   :  { %v370_v2 = vpop.permute.xlu0 %369 }
 0x313   :  { %v375_v4 = vadd.f32 %v370_v2, %v363_v60 }
 0x315   :  { %9638 = vtanh.f32 %v375_v4 }
 0x316   :  { %9640 = vrcp.f32 %v352_v6 }
 0x31a   :  { %v372_v8 = vpop.permute.xlu1 %371 }
 0x31b   :  { %v376_v9 = vadd.f32 %v372_v8, %v364_v7 }
 0x31d   :  { %9642 = vtanh.f32 %v376_v9 }
 0x31e   :  { %v11135_v11 = vpop.permute.xlu1 %382 }
 0x31f   :  { %v9639_v12 = vpop.eup %9638  ;;  %v388_v15 = vmul.f32 %v11135_v11, %v376_v9  ;;  %v387_v58 = vmul.f32 %v11135_v11, %v375_v4 }
 0x320   :  { %v379_v13 = vmul.f32 %v9639_v12, %v9637_v10  ;;  %v9641_v34 = vpop.eup %9640 }
 0x321   :  { %v495_v17 = vrot.slane %v388_v15, 7 }
 0x322   :  { %v385_v26 = vmul.f32 %v11135_v11, %v379_v13 }
 0x323   :  { %v496_v18 = vsel %vm392_vm1, %v495_v17, %v387_v58 }
 0x327   :  { %v9643_v22 = vpop.eup %9642 }
 0x328   :  { %v380_v25 = vmul.f32 %v9643_v22, %v9641_v34 }
 0x32a   :  { %v386_v3 = vmul.f32 %v11135_v11, %v380_v25 }
 0x32c   :  { %v391_v30 = vrot.slane %v386_v3, 7 }
 0x32e   :  { %v393_v31 = vsel %vm392_vm1, %v391_v30, %v385_v26 }
 0x32f   :  { %394 = vrot.lane.b32.xlu0 %v393_v31, %s10254_s0 }
 0x35d   :  { %v183_v33 = vpop.xlane.xlu1 %182 }
 0x35e   :  { %v187_v35 = vmul.f32 0.03125, %v183_v33 }
 0x360   :  { %v191_v42 = vadd.f32 1e-05, %v187_v35 }
 0x362   :  { %9644 = vrsqrt.f32 %v191_v42 }
 0x36c   :  { %v9645_v43 = vpop.eup %9644 }
 0x36d   :  { %v199_v46 = vmul.f32 %v9645_v43, %v11092_v51 }
 0x36f   :  { %8318 = vmatmul.mubr.msk.f32.gmra.mrb[6].mxu1 %vm146_vm0, %v199_v46 }
 0x370   :  { %473 = vmatprep.mubr.f32.mxu1 %v13127_v0 }
 0x3a1   :  { %v395_v47 = vpop.permute.xlu0 %394 }
 0x3a2   :  { %8323 = vmatmul.mubr.msk.f32.vlgmr.msra.gmra.mrb[8].mxu1 %vm406_vm3, %v395_v47 }
 0x3a3   :  { %8818 = vmatpush1.bf16.msra.mxu1 %v11099_v20  ;;  %736 = vmatprep.mubr.f32.mxu1 %v13127_v0 }
 0x3a4   :  { %8820 = vmatprep.subr.bf16.mxu1 %v11101_v21 }
 0x3a7   :  { %8822 = vmatpush1.bf16.msra.mxu1 %v11106_v28 }
 0x3a8   :  { %8824 = vmatprep.subr.bf16.mxu1 %v11110_v29 }
 0x3ab   :  { %8826 = vmatpush1.bf16.msra.mxu1 %v11114_v38 }
 0x3ac   :  { %8828 = vmatprep.subr.bf16.mxu1 %v11118_v39 }
 0x3af   :  { %8830 = vmatpush1.bf16.msra.mxu1 %v11122_v45 }
 0x3b0   :  { %8848 = vmatprep.subr.bf16.mxu1 %v11097_v14 }
 0x442   :  { %v11157_v51 = vpop.f32.mrb[6].mxu1 }
 0x443   :  { %v11159_v54 = vpop.f32.mrb[7].mxu1 }
 0x475   :  { %v475_v57 = vpop.f32.mrb[8].mxu1 }
 0x476   :  { %v476_v60 = vadd.f32 %v475_v57, %v11022_v16  ;;  %v477_v2 = vpop.f32.mrb[9].mxu1 }
 0x477   :  { %v478_v4 = vadd.f32 %v477_v2, %v11026_v19 }
 0x478   :  { %v8324_v62 = vmul.f32 -1.442695, %v476_v60 }
 0x479   :  { %v8325_v13 = vmul.f32 -1.442695, %v478_v4 }
 0x47a   :  { %9646 = vpow2.f32 %v8324_v62  ;;  %v10255_v62 = vmov 1966171168  }
 0x47b   :  { %9648 = vtanh.f32 %v478_v4 }
 0x484   :  { %v9647_v6 = vpop.eup %9646 }
 0x485   :  { %v486_v7 = vadd.f32 1.0, %v9647_v6  ;;  %v9649_v8 = vpop.eup %9648 }
 0x487   :  { %9650 = vrcp.f32 %v486_v7 }
 0x488   :  { %9652 = vpow2.f32 %v8325_v13 }
 0x491   :  { %v9651_v9 = vpop.eup %9650 }
 0x492   :  { %v499_v10 = vmul.f32 %v9651_v9, %v9649_v8  ;;  %v498_v12 = vmul.f32 %v9651_v9, %v496_v18  ;;  %v9653_v15 = vpop.eup %9652 }
 0x493   :  { %v487_v58 = vadd.f32 1.0, %v9653_v15 }
 0x494   :  { %501 = vrot.lane.b32.xlu0 %v499_v10, %s10254_s0 }
 0x495   :  { %9654 = vrcp.f32 %v487_v58 }
 0x49f   :  { %v9655_v19 = vpop.eup %9654 }
 0x506   :  { %v502_v16 = vpop.permute.xlu0 %501 }
 0x507   :  { %v504_v17 = vadd.f32 %v502_v16, %v498_v12 }
 0x509   :  { %9656 = vtanh.f32 %v504_v17 }
 0x513   :  { %v9657_v34 = vpop.eup %9656 }
 0x514   :  { %v506_v22 = vmul.f32 %v9657_v34, %v9655_v19 }
 0x516   :  { %532 = vrot.lane.b32.xlu0 %v506_v22, %s10254_s0 }
 0x588   :  { %v533_v25 = vpop.permute.xlu0 %532 }
 0x589   :  { %8326 = vmatmul.mubr.msk.f32.vlgmr.msra.gmra.mrb[0].mxu0 %vm406_vm3, %v533_v25 }
 0x58a   :  { %8834 = vmatpush1.bf16.msra.mxu0 %v11099_v20  ;;  %864 = vmatprep.mubr.f32.mxu0 %v13127_v0 }
 0x58b   :  { %8836 = vmatprep.subr.bf16.mxu0 %v11101_v21 }
 0x58e   :  { %8838 = vmatpush1.bf16.msra.mxu0 %v11106_v28 }
 0x58f   :  { %8840 = vmatprep.subr.bf16.mxu0 %v11110_v29 }
 0x592   :  { %8842 = vmatpush1.bf16.msra.mxu0 %v11114_v38 }
 0x593   :  { %8844 = vmatprep.subr.bf16.mxu0 %v11118_v39 }
 0x596   :  { %8846 = vmatpush1.bf16.msra.mxu0 %v11122_v45 }
 0x597   :  { %8864 = vmatprep.subr.bf16.mxu0 %v11097_v14 }
 0x65c   :  { %v610_v18 = vpop.f32.mrb[0].mxu0 }
 0x65d   :  { %v611_v3 = vadd.f32 %v610_v18, %v11031_v23  ;;  %v612_v26 = vpop.f32.mrb[1].mxu0 }
 0x65e   :  { %v613_v30 = vadd.f32 %v612_v26, %v11038_v27  ;;  %v509_v27 = vunpack.c.l.s4 %v10255_v62 }
 0x65f   :  { %v8327_v31 = vmul.f32 -1.442695, %v611_v3 }
 0x660   :  { %v8328_v47 = vmul.f32 -1.442695, %v613_v30  ;;  %v510_v6 = vunpack.c.0.s8 %v509_v27 }
 0x661   :  { %9658 = vpow2.f32 %v8327_v31 }
 0x662   :  { %9660 = vtanh.f32 %v613_v30  ;;  %v11179_v7 = vsub.s32 %v510_v6, %v10987_v52 }
 0x664   :  { %v514_v10 = vrot.slane %v506_v22, %v11179_v7 }
 0x666   :  { %v515_v15 = vcombine.high %v514_v10, %v514_v10 }
 0x668   :  { %v529_v25 = vrot.slane %v515_v15, %v11179_v7 }
 0x66b   :  { %v9659_v33 = vpop.eup %9658 }
 0x66c   :  { %v621_v35 = vadd.f32 1.0, %v9659_v33  ;;  %v9661_v42 = vpop.eup %9660 }
 0x66e   :  { %9662 = vrcp.f32 %v621_v35 }
 0x66f   :  { %9664 = vpow2.f32 %v8328_v47 }
 0x678   :  { %v9663_v43 = vpop.eup %9662 }
 0x679   :  { %v629_v46 = vmul.f32 %v9663_v43, %v9661_v42  ;;  %v9665_v57 = vpop.eup %9664  ;;  %v628_v2 = vmul.f32 %v9663_v43, %v504_v17  ;;  %v522_v17 = vrot.slane %v514_v10, %v11179_v7 }
 0x67a   :  { %v622_v60 = vadd.f32 1.0, %v9665_v57 }
 0x67b   :  { %631 = vrot.lane.b32.xlu0 %v629_v46, %s10254_s0 }
 0x67c   :  { %9666 = vrcp.f32 %v622_v60 }
 0x686   :  { %v9667_v8 = vpop.eup %9666 }
 0x6ed   :  { %v632_v23 = vpop.permute.xlu0 %631 }
 0x6ee   :  { %v634_v4 = vadd.f32 %v632_v23, %v628_v2 }
 0x6f0   :  { %9668 = vtanh.f32 %v634_v4 }
 0x6fa   :  { %v9669_v9 = vpop.eup %9668 }
 0x6fb   :  { %v636_v12 = vmul.f32 %v9669_v9, %v9667_v8 }
 0x6fd   :  { %660 = vrot.lane.b32.xlu0 %v636_v12, %s10254_s0  ;;  %v644_v13 = vrot.slane %v636_v12, %v11179_v7 }
 0x6ff   :  { %v645_v58 = vcombine.high %v644_v13, %v644_v13  ;;  %v652_v16 = vrot.slane %v644_v13, %v11179_v7 }
 0x701   :  { %v659_v19 = vrot.slane %v645_v58, %v11179_v7  ;;  %v2560_v34 = vrot.slane %v652_v16, %v10990_v53 }
 0x703   :  { %v2564_v22 = vrot.slane %v659_v19, %v10990_v53  ;;  %v2682_v18 = vsel %vm2681_vm4, %v522_v17, %v2560_v34 }
 0x705   :  { %v2683_v3 = vsel %vm2681_vm4, %v529_v25, %v2564_v22 }
 0x76f   :  { %v661_v26 = vpop.permute.xlu0 %660 }
 0x770   :  { %8329 = vmatmul.mubr.msk.f32.vlgmr.msra.gmra.mrb[10].mxu1 %vm406_vm3, %v661_v26 }
 0x771   :  { %8850 = vmatpush1.bf16.msra.mxu1 %v11099_v20  ;;  %992 = vmatprep.mubr.f32.mxu1 %v13127_v0 }
 0x772   :  { %8852 = vmatprep.subr.bf16.mxu1 %v11101_v21 }
 0x775   :  { %8854 = vmatpush1.bf16.msra.mxu1 %v11106_v28 }
 0x776   :  { %8856 = vmatprep.subr.bf16.mxu1 %v11110_v29 }
 0x779   :  { %8858 = vmatpush1.bf16.msra.mxu1 %v11114_v38 }
 0x77a   :  { %8860 = vmatprep.subr.bf16.mxu1 %v11118_v39 }
 0x77d   :  { %8862 = vmatpush1.bf16.msra.mxu1 %v11122_v45 }
 0x77e   :  { %8880 = vmatprep.subr.bf16.mxu1 %v11097_v14 }
 0x843   :  { %v738_v30 = vpop.f32.mrb[10].mxu1 }
 0x844   :  { %v739_v31 = vadd.f32 %v738_v30, %v11034_v24  ;;  %v740_v33 = vpop.f32.mrb[11].mxu1 }
 0x845   :  { %v741_v35 = vadd.f32 %v740_v33, %v11043_v32 }
 0x846   :  { %v8330_v42 = vmul.f32 -1.442695, %v739_v31 }
 0x847   :  { %v8331_v2 = vmul.f32 -1.442695, %v741_v35 }
 0x848   :  { %9670 = vpow2.f32 %v8330_v42 }
 0x849   :  { %9672 = vtanh.f32 %v741_v35 }
 0x852   :  { %v9671_v43 = vpop.eup %9670 }
 0x853   :  { %v749_v46 = vadd.f32 1.0, %v9671_v43  ;;  %v9673_v47 = vpop.eup %9672 }
 0x855   :  { %9674 = vrcp.f32 %v749_v46 }
 0x856   :  { %9676 = vpow2.f32 %v8331_v2 }
 0x85f   :  { %v9675_v57 = vpop.eup %9674 }
 0x860   :  { %v757_v60 = vmul.f32 %v9675_v57, %v9673_v47  ;;  %v9677_v23 = vpop.eup %9676  ;;  %v756_v27 = vmul.f32 %v9675_v57, %v634_v4 }
 0x861   :  { %v750_v62 = vadd.f32 1.0, %v9677_v23 }
 0x862   :  { %759 = vrot.lane.b32.xlu0 %v757_v60, %s10254_s0 }
 0x863   :  { %9678 = vrcp.f32 %v750_v62 }
 0x86d   :  { %v9679_v32 = vpop.eup %9678 }
 0x8d4   :  { %v760_v24 = vpop.permute.xlu0 %759 }
 0x8d5   :  { %v762_v6 = vadd.f32 %v760_v24, %v756_v27 }
 0x8d7   :  { %9680 = vtanh.f32 %v762_v6 }
 0x8e1   :  { %v9681_v8 = vpop.eup %9680 }
 0x8e2   :  { %v764_v9 = vmul.f32 %v9681_v8, %v9679_v32 }
 0x8e4   :  { %788 = vrot.lane.b32.xlu0 %v764_v9, %s10254_s0  ;;  %v772_v10 = vrot.slane %v764_v9, %v11179_v7 }
 0x8e6   :  { %v773_v12 = vcombine.high %v772_v10, %v772_v10  ;;  %v780_v13 = vrot.slane %v772_v10, %v11179_v7 }
 0x8e8   :  { %v787_v15 = vrot.slane %v773_v12, %v11179_v7  ;;  %v2570_v58 = vrot.slane %v780_v13, %v10990_v53 }
 0x8ea   :  { %v2574_v4 = vrot.slane %v787_v15, %v10990_v53  ;;  %v2685_v16 = vsel %vm2684_vm5, %v2682_v18, %v2570_v58 }
 0x8ec   :  { %v2686_v17 = vsel %vm2684_vm5, %v2683_v3, %v2574_v4 }
 0x956   :  { %v789_v19 = vpop.permute.xlu0 %788 }
 0x957   :  { %8332 = vmatmul.mubr.msk.f32.vlgmr.msra.gmra.mrb[2].mxu0 %vm406_vm3, %v789_v19 }
 0x958   :  { %8866 = vmatpush1.bf16.msra.mxu0 %v11099_v20  ;;  %1120 = vmatprep.mubr.f32.mxu0 %v13127_v0 }
 0x959   :  { %8868 = vmatprep.subr.bf16.mxu0 %v11101_v21 }
 0x95c   :  { %8870 = vmatpush1.bf16.msra.mxu0 %v11106_v28 }
 0x95d   :  { %8872 = vmatprep.subr.bf16.mxu0 %v11110_v29 }
 0x960   :  { %8874 = vmatpush1.bf16.msra.mxu0 %v11114_v38 }
 0x961   :  { %8876 = vmatprep.subr.bf16.mxu0 %v11118_v39 }
 0x964   :  { %8878 = vmatpush1.bf16.msra.mxu0 %v11122_v45 }
 0x965   :  { %8896 = vmatprep.subr.bf16.mxu0 %v11097_v14 }
 0xa2a   :  { %v866_v34 = vpop.f32.mrb[2].mxu0 }
 0xa2b   :  { %v867_v25 = vadd.f32 %v866_v34, %v11047_v36  ;;  %v868_v22 = vpop.f32.mrb[3].mxu0 }
 0xa2c   :  { %v869_v18 = vadd.f32 %v868_v22, %v11050_v37 }
 0xa2d   :  { %v8333_v3 = vmul.f32 -1.442695, %v867_v25 }
 0xa2e   :  { %v8334_v42 = vmul.f32 -1.442695, %v869_v18 }
 0xa2f   :  { %9682 = vpow2.f32 %v8333_v3 }
 0xa30   :  { %9684 = vtanh.f32 %v869_v18 }
 0xa39   :  { %v9683_v26 = vpop.eup %9682 }
 0xa3a   :  { %v877_v30 = vadd.f32 1.0, %v9683_v26  ;;  %v9685_v31 = vpop.eup %9684 }
 0xa3c   :  { %9686 = vrcp.f32 %v877_v30 }
 0xa3d   :  { %9688 = vpow2.f32 %v8334_v42 }
 0xa46   :  { %v9687_v33 = vpop.eup %9686 }
 0xa47   :  { %v885_v35 = vmul.f32 %v9687_v33, %v9685_v31  ;;  %v9689_v43 = vpop.eup %9688  ;;  %v884_v47 = vmul.f32 %v9687_v33, %v762_v6 }
 0xa48   :  { %v878_v46 = vadd.f32 1.0, %v9689_v43 }
 0xa49   :  { %887 = vrot.lane.b32.xlu0 %v885_v35, %s10254_s0 }
 0xa4a   :  { %9690 = vrcp.f32 %v878_v46 }
 0xa54   :  { %v9691_v37 = vpop.eup %9690 }
 0xabb   :  { %v888_v36 = vpop.permute.xlu0 %887 }
 0xabc   :  { %v890_v57 = vadd.f32 %v888_v36, %v884_v47 }
 0xabe   :  { %9692 = vtanh.f32 %v890_v57 }
 0xac8   :  { %v9693_v60 = vpop.eup %9692 }
 0xac9   :  { %v892_v2 = vmul.f32 %v9693_v60, %v9691_v37 }
 0xacb   :  { %916 = vrot.lane.b32.xlu1 %v892_v2, %s10254_s0  ;;  %v900_v23 = vrot.slane %v892_v2, %v11179_v7 }
 0xacd   :  { %v901_v62 = vcombine.high %v900_v23, %v900_v23  ;;  %v908_v27 = vrot.slane %v900_v23, %v11179_v7 }
 0xacf   :  { %v915_v24 = vrot.slane %v901_v62, %v11179_v7  ;;  %v2580_v32 = vrot.slane %v908_v27, %v10990_v53 }
 0xad1   :  { %v2584_v6 = vrot.slane %v915_v24, %v10990_v53  ;;  %v2688_v8 = vsel %vm2687_vm6, %v2685_v16, %v2580_v32 }
 0xad3   :  { %v2689_v9 = vsel %vm2687_vm6, %v2686_v17, %v2584_v6 }
 0xb3d   :  { %v917_v10 = vpop.permute.xlu1 %916 }
 0xb3e   :  { %8335 = vmatmul.mubr.msk.f32.vlgmr.msra.gmra.mrb[12].mxu1 %vm406_vm3, %v917_v10 }
 0xb3f   :  { %8882 = vmatpush1.bf16.msra.mxu1 %v11099_v20  ;;  %1248 = vmatprep.mubr.f32.mxu1 %v13127_v0 }
 0xb40   :  { %8884 = vmatprep.subr.bf16.mxu1 %v11101_v21 }
 0xb43   :  { %8886 = vmatpush1.bf16.msra.mxu1 %v11106_v28 }
 0xb44   :  { %8888 = vmatprep.subr.bf16.mxu1 %v11110_v29 }
 0xb47   :  { %8890 = vmatpush1.bf16.msra.mxu1 %v11114_v38 }
 0xb48   :  { %8892 = vmatprep.subr.bf16.mxu1 %v11118_v39 }
 0xb4b   :  { %8894 = vmatpush1.bf16.msra.mxu1 %v11122_v45 }
 0xb4c   :  { %8912 = vmatprep.subr.bf16.mxu1 %v11097_v14 }
 0xc11   :  { %v994_v12 = vpop.f32.mrb[12].mxu1 }
 0xc12   :  { %v995_v13 = vadd.f32 %v994_v12, %v11053_v40  ;;  %v996_v15 = vpop.f32.mrb[13].mxu1 }
 0xc13   :  { %v997_v58 = vadd.f32 %v996_v15, %v11056_v41 }
 0xc14   :  { %v8336_v4 = vmul.f32 -1.442695, %v995_v13 }
 0xc15   :  { %v8337_v22 = vmul.f32 -1.442695, %v997_v58 }
 0xc16   :  { %9694 = vpow2.f32 %v8336_v4 }
 0xc17   :  { %9696 = vtanh.f32 %v997_v58 }
 0xc20   :  { %v9695_v16 = vpop.eup %9694 }
 0xc21   :  { %v1005_v17 = vadd.f32 1.0, %v9695_v16  ;;  %v9697_v19 = vpop.eup %9696 }
 0xc23   :  { %9698 = vrcp.f32 %v1005_v17 }
 0xc24   :  { %9700 = vpow2.f32 %v8337_v22 }
 0xc2d   :  { %v9699_v34 = vpop.eup %9698 }
 0xc2e   :  { %v1013_v25 = vmul.f32 %v9699_v34, %v9697_v19  ;;  %v9701_v18 = vpop.eup %9700  ;;  %v1012_v26 = vmul.f32 %v9699_v34, %v890_v57 }
 0xc2f   :  { %v1006_v3 = vadd.f32 1.0, %v9701_v18 }
 0xc30   :  { %1015 = vrot.lane.b32.xlu0 %v1013_v25, %s10254_s0 }
 0xc31   :  { %9702 = vrcp.f32 %v1006_v3 }
 0xc3b   :  { %v9703_v41 = vpop.eup %9702 }
 0xca2   :  { %v1016_v40 = vpop.permute.xlu0 %1015 }
 0xca3   :  { %v1018_v30 = vadd.f32 %v1016_v40, %v1012_v26 }
 0xca5   :  { %9704 = vtanh.f32 %v1018_v30 }
 0xcaf   :  { %v9705_v31 = vpop.eup %9704 }
 0xcb0   :  { %v1020_v33 = vmul.f32 %v9705_v31, %v9703_v41 }
 0xcb2   :  { %1044 = vrot.lane.b32.xlu0 %v1020_v33, %s10254_s0  ;;  %v1028_v35 = vrot.slane %v1020_v33, %v11179_v7 }
 0xcb4   :  { %v1029_v42 = vcombine.high %v1028_v35, %v1028_v35  ;;  %v1036_v43 = vrot.slane %v1028_v35, %v11179_v7 }
 0xcb6   :  { %v1043_v46 = vrot.slane %v1029_v42, %v11179_v7  ;;  %v2590_v47 = vrot.slane %v1036_v43, %v10990_v53 }
 0xcb8   :  { %v2594_v36 = vrot.slane %v1043_v46, %v10990_v53  ;;  %v2691_v57 = vsel %vm2690_vm7, %v2688_v8, %v2590_v47 }
 0xcba   :  { %v2692_v37 = vsel %vm2690_vm7, %v2689_v9, %v2594_v36 }
 0xd24   :  { %v1045_v60 = vpop.permute.xlu0 %1044 }
 0xd25   :  { %8338 = vmatmul.mubr.msk.f32.vlgmr.msra.gmra.mrb[4].mxu0 %vm406_vm3, %v1045_v60 }
 0xd26   :  { %8898 = vmatpush1.bf16.msra.mxu0 %v11099_v20  ;;  %1378 = vmatprep.mubr.f32.mxu0 %v13127_v0 }
 0xd27   :  { %8900 = vmatprep.subr.bf16.mxu0 %v11101_v21 }
 0xd2a   :  { %8902 = vmatpush1.bf16.msra.mxu0 %v11106_v28 }
 0xd2b   :  { %8904 = vmatprep.subr.bf16.mxu0 %v11110_v29 }
 0xd2e   :  { %8906 = vmatpush1.bf16.msra.mxu0 %v11114_v38 }
 0xd2f   :  { %8908 = vmatprep.subr.bf16.mxu0 %v11118_v39 }
 0xd32   :  { %8910 = vmatpush1.bf16.msra.mxu0 %v11122_v45 }
 0xd33   :  { %8928 = vmatprep.subr.bf16.mxu0 %v11097_v14 }
 0xdf8   :  { %v1122_v2 = vpop.f32.mrb[4].mxu0 }
 0xdf9   :  { %v1123_v23 = vadd.f32 %v1122_v2, %v11060_v44  ;;  %v1124_v62 = vpop.f32.mrb[5].mxu0 }
 0xdfa   :  { %v1125_v27 = vadd.f32 %v1124_v62, %v11065_v48 }
 0xdfb   :  { %v8339_v24 = vmul.f32 -1.442695, %v1123_v23 }
 0xdfc   :  { %v8340_v12 = vmul.f32 -1.442695, %v1125_v27 }
 0xdfd   :  { %9706 = vpow2.f32 %v8339_v24 }
 0xdfe   :  { %9708 = vtanh.f32 %v1125_v27 }
 0xe07   :  { %v9707_v32 = vpop.eup %9706 }
 0xe08   :  { %v1133_v6 = vadd.f32 1.0, %v9707_v32  ;;  %v9709_v8 = vpop.eup %9708 }
 0xe0a   :  { %9710 = vrcp.f32 %v1133_v6 }
 0xe0b   :  { %9712 = vpow2.f32 %v8340_v12 }
 0xe14   :  { %v9711_v9 = vpop.eup %9710 }
 0xe15   :  { %v1141_v10 = vmul.f32 %v9711_v9, %v9709_v8  ;;  %v9713_v13 = vpop.eup %9712  ;;  %v1140_v58 = vmul.f32 %v9711_v9, %v1018_v30 }
 0xe16   :  { %v1134_v15 = vadd.f32 1.0, %v9713_v13 }
 0xe17   :  { %1143 = vrot.lane.b32.xlu0 %v1141_v10, %s10254_s0 }
 0xe18   :  { %9714 = vrcp.f32 %v1134_v15 }
 0xe22   :  { %v9715_v48 = vpop.eup %9714 }
 0xe89   :  { %v1144_v44 = vpop.permute.xlu0 %1143 }
 0xe8a   :  { %v1146_v4 = vadd.f32 %v1144_v44, %v1140_v58  ;;  %v11309_v44 = vadd.f32 %v11157_v51, %v10996_v55 }
 0xe8c   :  { %9716 = vtanh.f32 %v1146_v4 }
 0xe96   :  { %v9717_v16 = vpop.eup %9716 }
 0xe97   :  { %v1148_v17 = vmul.f32 %v9717_v16, %v9715_v48  ;;  %v1306_v48 = vrot.slane %v11309_v44, 7 }
 0xe99   :  { %1172 = vrot.lane.b32.xlu0 %v1148_v17, %s10254_s0  ;;  %v1156_v19 = vrot.slane %v1148_v17, %v11179_v7  ;;  %v11319_v17 = vadd.f32 %v11008_v63, %v10996_v55 }
 0xe9b   :  { %v1157_v34 = vcombine.high %v1156_v19, %v1156_v19  ;;  %v1164_v25 = vrot.slane %v1156_v19, %v11179_v7  ;;  %v11323_v19 = vadd.f32 %v11010_v1, %v11003_v59  ;;  %v1307_v51 = vsel %vm392_vm1, %v1306_v48, %v11319_v17 }
 0xe9d   :  { %v1171_v22 = vrot.slane %v1157_v34, %v11179_v7  ;;  %v2600_v18 = vrot.slane %v1164_v25, %v10990_v53 }
 0xe9f   :  { %v2604_v3 = vrot.slane %v1171_v22, %v10990_v53  ;;  %v2694_v26 = vsel %vm2693_vm8, %v2691_v57, %v2600_v18 }
 0xea1   :  { %v2695_v40 = vsel %vm2693_vm8, %v2692_v37, %v2604_v3 }
 0xf0b   :  { %v1173_v30 = vpop.permute.xlu0 %1172 }
 0xf0c   :  { %8341 = vmatmul.mubr.msk.f32.vlgmr.msra.gmra.mrb[14].mxu1 %vm406_vm3, %v1173_v30 }
 0xf0d   :  { %8914 = vmatpush1.bf16.msra.mxu1 %v11099_v20  ;;  %1504 = vmatprep.mubr.f32.mxu1 %v13127_v0 }
 0xf0e   :  { %8916 = vmatprep.subr.bf16.mxu1 %v11101_v21 }
 0xf11   :  { %8918 = vmatpush1.bf16.msra.mxu1 %v11106_v28 }
 0xf12   :  { %8920 = vmatprep.subr.bf16.mxu1 %v11110_v29 }
 0xf15   :  { %8922 = vmatpush1.bf16.msra.mxu1 %v11114_v38 }
 0xf16   :  { %8924 = vmatprep.subr.bf16.mxu1 %v11118_v39 }
 0xf19   :  { %8926 = vmatpush1.bf16.msra.mxu1 %v11122_v45 }
 0xf1a   :  { %8944 = vmatprep.subr.bf16.mxu1 %v11097_v14 }
 0xfdf   :  { %v1250_v41 = vpop.f32.mrb[14].mxu1 }
 0xfe0   :  { %v1251_v31 = vadd.f32 %v1250_v41, %v11068_v49  ;;  %v1252_v33 = vpop.f32.mrb[15].mxu1 }
 0xfe1   :  { %v1253_v35 = vadd.f32 %v1252_v33, %v11071_v50 }
 0xfe2   :  { %v8342_v42 = vmul.f32 -1.442695, %v1251_v31 }
 0xfe3   :  { %v8343_v37 = vmul.f32 -1.442695, %v1253_v35 }
 0xfe4   :  { %9718 = vpow2.f32 %v8342_v42 }
 0xfe5   :  { %9720 = vtanh.f32 %v1253_v35 }
 0xfee   :  { %v9719_v43 = vpop.eup %9718 }
 0xfef   :  { %v1261_v46 = vadd.f32 1.0, %v9719_v43  ;;  %v9721_v47 = vpop.eup %9720 }
 0xff1   :  { %9722 = vrcp.f32 %v1261_v46 }
 0xff2   :  { %9724 = vpow2.f32 %v8343_v37 }
 0xffb   :  { %v9723_v36 = vpop.eup %9722 }
 0xffc   :  { %v1269_v57 = vmul.f32 %v9723_v36, %v9721_v47  ;;  %v9725_v60 = vpop.eup %9724  ;;  %v1268_v23 = vmul.f32 %v9723_v36, %v1146_v4  ;;  %v11313_v4 = vadd.f32 %v11159_v54, %v11003_v59 }
 0xffd   :  { %v1262_v2 = vadd.f32 1.0, %v9725_v60 }
 0xffe   :  { %1271 = vrot.lane.b32.xlu0 %v1269_v57, %s10254_s0  ;;  %v1308_v16 = vrot.slane %v11313_v4, 7 }
 0xfff   :  { %9726 = vrcp.f32 %v1262_v2 }
0x1000   :  { %v1309_v54 = vsel %vm392_vm1, %v1308_v16, %v11323_v19 }
0x1009   :  { %v9727_v50 = vpop.eup %9726 }
0x1070   :  { %v1272_v49 = vpop.permute.xlu0 %1271 }
0x1071   :  { %v1274_v62 = vadd.f32 %v1272_v49, %v1268_v23 }
0x1073   :  { %9728 = vtanh.f32 %v1274_v62 }
0x107d   :  { %v9729_v27 = vpop.eup %9728 }
0x107e   :  { %v1276_v24 = vmul.f32 %v9729_v27, %v9727_v50 }
0x1080   :  { %1300 = vrot.lane.b32.xlu1 %v1276_v24, %s10254_s0  ;;  %v1284_v32 = vrot.slane %v1276_v24, %v11179_v7  ;;  %v1432_v24 = vrot.slane %v11319_v17, 1 }
0x1082   :  { %v1285_v6 = vcombine.high %v1284_v32, %v1284_v32  ;;  %v1292_v8 = vrot.slane %v1284_v32, %v11179_v7  ;;  %v1434_v32 = vrot.slane %v11323_v19, 1 }
0x1084   :  { %v1299_v9 = vrot.slane %v1285_v6, %v11179_v7  ;;  %v2610_v10 = vrot.slane %v1292_v8, %v10990_v53  ;;  %v1433_v6 = vsel %vm392_vm1, %v11309_v44, %v1432_v24 }
0x1086   :  { %v2697_v12 = vsel %vm2696_vm9, %v2694_v26, %v2610_v10  ;;  %v2614_v13 = vrot.slane %v1299_v9, %v10990_v53  ;;  %v1435_v10 = vsel %vm392_vm1, %v11313_v4, %v1434_v32 }
0x1088   :  { %v2698_v15 = vsel %vm2696_vm9, %v2695_v40, %v2614_v13 }
0x10f2   :  { %v1301_v58 = vpop.permute.xlu1 %1300 }
0x10f3   :  { %8344 = vmatmul.mubr.msk.f32.vlgmr.msra.gmra.mrb[6].mxu0 %vm406_vm3, %v1301_v58 }
0x10f4   :  { %8930 = vmatpush1.bf16.msra.mxu0 %v11099_v20  ;;  %1634 = vmatprep.mubr.f32.mxu0 %v13127_v0 }
0x10f5   :  { %8932 = vmatprep.subr.bf16.mxu0 %v11101_v21 }
0x10f8   :  { %8934 = vmatpush1.bf16.msra.mxu0 %v11106_v28 }
0x10f9   :  { %8936 = vmatprep.subr.bf16.mxu0 %v11110_v29 }
0x10fc   :  { %8938 = vmatpush1.bf16.msra.mxu0 %v11114_v38 }
0x10fd   :  { %8940 = vmatprep.subr.bf16.mxu0 %v11118_v39 }
0x1100   :  { %8942 = vmatpush1.bf16.msra.mxu0 %v11122_v45 }
0x1101   :  { %8960 = vmatprep.subr.bf16.mxu0 %v11097_v14 }
0x11c6   :  { %v1380_v34 = vpop.f32.mrb[6].mxu0 }
0x11c7   :  { %v1381_v25 = vadd.f32 %v1380_v34, %v1307_v51  ;;  %v1382_v22 = vpop.f32.mrb[7].mxu0 }
0x11c8   :  { %v1383_v18 = vadd.f32 %v1382_v22, %v1309_v54 }
0x11c9   :  { %v8345_v3 = vmul.f32 -1.442695, %v1381_v25 }
0x11ca   :  { %v8346_v41 = vmul.f32 -1.442695, %v1383_v18 }
0x11cb   :  { %9730 = vpow2.f32 %v8345_v3 }
0x11cc   :  { %9732 = vtanh.f32 %v1383_v18 }
0x11d5   :  { %v9731_v26 = vpop.eup %9730 }
0x11d6   :  { %v1391_v40 = vadd.f32 1.0, %v9731_v26  ;;  %v9733_v63 = vpop.eup %9732 }
0x11d8   :  { %9734 = vrcp.f32 %v1391_v40 }
0x11d9   :  { %9736 = vpow2.f32 %v8346_v41  ;;  %v1561_v41 = vrot.slane %v11309_v44, 1 }
0x11e2   :  { %v9735_v30 = vpop.eup %9734 }
0x11e3   :  { %v1399_v1 = vmul.f32 %v9735_v30, %v9733_v63  ;;  %v9737_v31 = vpop.eup %9736  ;;  %v1398_v35 = vmul.f32 %v9735_v30, %v1274_v62 }
0x11e4   :  { %v1392_v33 = vadd.f32 1.0, %v9737_v31  ;;  %v1564_v31 = vrot.slane %v11313_v4, 1 }
0x11e5   :  { %1401 = vrot.lane.b32.xlu0 %v1399_v1, %s10254_s0 }
0x11e6   :  { %9738 = vrcp.f32 %v1392_v33  ;;  %v1560_v33 = vrot.slane %v11319_v17, 2 }
0x11f0   :  { %v9739_v46 = vpop.eup %9738 }
0x1257   :  { %v1402_v42 = vpop.permute.xlu0 %1401 }
0x1258   :  { %v1404_v43 = vadd.f32 %v1402_v42, %v1398_v35  ;;  %v1563_v35 = vrot.slane %v11323_v19, 2  ;;  %v1562_v42 = vsel %vm392_vm1, %v1561_v41, %v1560_v33  ;;  %v1688_v41 = vrot.slane %v11319_v17, 3 }
0x125a   :  { %9740 = vtanh.f32 %v1404_v43 }
0x1264   :  { %v9741_v47 = vpop.eup %9740 }
0x1265   :  { %v1406_v36 = vmul.f32 %v9741_v47, %v9739_v46  ;;  %v1565_v47 = vsel %vm392_vm1, %v1564_v31, %v1563_v35  ;;  %v1691_v31 = vrot.slane %v11323_v19, 3 }
0x1267   :  { %1430 = vrot.lane.b32.xlu1 %v1406_v36, %s10254_s0  ;;  %v1414_v57 = vrot.slane %v1406_v36, %v11179_v7 }
0x1269   :  { %v1415_v37 = vcombine.high %v1414_v57, %v1414_v57  ;;  %v1422_v60 = vrot.slane %v1414_v57, %v11179_v7 }
0x126b   :  { %v1429_v2 = vrot.slane %v1415_v37, %v11179_v7  ;;  %v2620_v23 = vrot.slane %v1422_v60, %v10990_v53 }
0x126d   :  { %v11336_v49 = vsel %vm2699_vm10, %v2697_v12, %v2620_v23  ;;  %v2624_v62 = vrot.slane %v1429_v2, %v10990_v53 }
0x126f   :  { %v11340_v50 = vsel %vm2699_vm10, %v2698_v15, %v2624_v62 }
0x12d9   :  { %v1431_v27 = vpop.permute.xlu1 %1430 }
0x12da   :  { %8347 = vmatmul.mubr.msk.f32.vlgmr.msra.gmra.mrb[16].mxu1 %vm406_vm3, %v1431_v27 }
0x12db   :  { %8946 = vmatpush1.bf16.msra.mxu1 %v11099_v20  ;;  %1762 = vmatprep.mubr.f32.mxu1 %v13127_v0 }
0x12dc   :  { %8948 = vmatprep.subr.bf16.mxu1 %v11101_v21 }
0x12df   :  { %8950 = vmatpush1.bf16.msra.mxu1 %v11106_v28 }
0x12e0   :  { %8952 = vmatprep.subr.bf16.mxu1 %v11110_v29 }
0x12e3   :  { %8954 = vmatpush1.bf16.msra.mxu1 %v11114_v38 }
0x12e4   :  { %8956 = vmatprep.subr.bf16.mxu1 %v11118_v39 }
0x12e7   :  { %8958 = vmatpush1.bf16.msra.mxu1 %v11122_v45 }
0x12e8   :  { %8976 = vmatprep.subr.bf16.mxu1 %v11097_v14 }
0x13ad   :  { %v1506_v8 = vpop.f32.mrb[16].mxu1 }
0x13ae   :  { %v1507_v9 = vadd.f32 %v1506_v8, %v1433_v6  ;;  %v1508_v12 = vpop.f32.mrb[17].mxu1 }
0x13af   :  { %v1509_v13 = vadd.f32 %v1508_v12, %v1435_v10 }
0x13b0   :  { %v8348_v15 = vmul.f32 -1.442695, %v1507_v9 }
0x13b1   :  { %v8349_v25 = vmul.f32 -1.442695, %v1509_v13 }
0x13b2   :  { %9742 = vpow2.f32 %v8348_v15 }
0x13b3   :  { %9744 = vtanh.f32 %v1509_v13 }
0x13bc   :  { %v9743_v58 = vpop.eup %9742 }
0x13bd   :  { %v1517_v48 = vadd.f32 1.0, %v9743_v58  ;;  %v9745_v16 = vpop.eup %9744 }
0x13bf   :  { %9746 = vrcp.f32 %v1517_v48 }
0x13c0   :  { %9748 = vpow2.f32 %v8349_v25 }
0x13c9   :  { %v9747_v51 = vpop.eup %9746 }
0x13ca   :  { %v1525_v34 = vmul.f32 %v9747_v51, %v9745_v16  ;;  %v9749_v54 = vpop.eup %9748  ;;  %v1524_v18 = vmul.f32 %v9747_v51, %v1404_v43 }
0x13cb   :  { %v1518_v22 = vadd.f32 1.0, %v9749_v54 }
0x13cc   :  { %1527 = vrot.lane.b32.xlu0 %v1525_v34, %s10254_s0 }
0x13cd   :  { %9750 = vrcp.f32 %v1518_v22 }
0x13d7   :  { %v9751_v40 = vpop.eup %9750 }
0x143e   :  { %v1528_v3 = vpop.permute.xlu0 %1527 }
0x143f   :  { %v1530_v26 = vadd.f32 %v1528_v3, %v1524_v18 }
0x1441   :  { %9752 = vtanh.f32 %v1530_v26 }
0x144b   :  { %v9753_v63 = vpop.eup %9752 }
0x144c   :  { %v1532_v30 = vmul.f32 %v9753_v63, %v9751_v40 }
0x144e   :  { %1558 = vrot.lane.b32.xlu1 %v1532_v30, %s10254_s0  ;;  %v1540_v15 = vrot.slane %v1532_v30, %v11179_v7  ;;  %v1689_v30 = vrot.slane %v11309_v44, 2 }
0x1450   :  { %v1541_v16 = vcombine.high %v1540_v15, %v1540_v15  ;;  %v1548_v25 = vrot.slane %v1540_v15, %v11179_v7  ;;  %v1690_v33 = vsel %vm392_vm1, %v1689_v30, %v1688_v41 }
0x1452   :  { %v1555_v18 = vrot.slane %v1541_v16, %v11179_v7 }
0x14c0   :  { %v1559_v1 = vpop.permute.xlu1 %1558 }
0x14c1   :  { %8350 = vmatmul.mubr.msk.f32.vlgmr.msra.gmra.mrb[8].mxu0 %vm406_vm3, %v1559_v1  ;;  %v1692_v1 = vrot.slane %v11313_v4, 2 }
0x14c2   :  { %8962 = vmatpush1.bf16.msra.mxu0 %v11099_v20  ;;  %1890 = vmatprep.mubr.f32.mxu0 %v13127_v0 }
0x14c3   :  { %8964 = vmatprep.subr.bf16.mxu0 %v11101_v21 }
0x14c6   :  { %8966 = vmatpush1.bf16.msra.mxu0 %v11106_v28 }
0x14c7   :  { %8968 = vmatprep.subr.bf16.mxu0 %v11110_v29 }
0x14ca   :  { %8970 = vmatpush1.bf16.msra.mxu0 %v11114_v38 }
0x14cb   :  { %8972 = vmatprep.subr.bf16.mxu0 %v11118_v39 }
0x14ce   :  { %8974 = vmatpush1.bf16.msra.mxu0 %v11122_v45 }
0x14cf   :  { %8992 = vmatprep.subr.bf16.mxu0 %v11097_v14 }
0x1594   :  { %v1636_v43 = vpop.f32.mrb[8].mxu0 }
0x1595   :  { %v1637_v46 = vadd.f32 %v1636_v43, %v1562_v42  ;;  %v1638_v36 = vpop.f32.mrb[9].mxu0  ;;  %v1693_v43 = vsel %vm392_vm1, %v1692_v1, %v1691_v31 }
0x1596   :  { %v1639_v57 = vadd.f32 %v1638_v36, %v1565_v47 }
0x1597   :  { %v8351_v37 = vmul.f32 -1.442695, %v1637_v46 }
0x1598   :  { %v8352_v24 = vmul.f32 -1.442695, %v1639_v57 }
0x1599   :  { %9754 = vpow2.f32 %v8351_v37 }
0x159a   :  { %9756 = vtanh.f32 %v1639_v57 }
0x15a3   :  { %v9755_v60 = vpop.eup %9754 }
0x15a4   :  { %v1647_v2 = vadd.f32 1.0, %v9755_v60  ;;  %v9757_v23 = vpop.eup %9756 }
0x15a6   :  { %9758 = vrcp.f32 %v1647_v2 }
0x15a7   :  { %9760 = vpow2.f32 %v8352_v24 }
0x15b0   :  { %v9759_v62 = vpop.eup %9758 }
0x15b1   :  { %v1655_v27 = vmul.f32 %v9759_v62, %v9757_v23  ;;  %v9761_v32 = vpop.eup %9760  ;;  %v1654_v8 = vmul.f32 %v9759_v62, %v1530_v26 }
0x15b2   :  { %v1648_v6 = vadd.f32 1.0, %v9761_v32 }
0x15b3   :  { %1657 = vrot.lane.b32.xlu0 %v1655_v27, %s10254_s0 }
0x15b4   :  { %9762 = vrcp.f32 %v1648_v6 }
0x15be   :  { %v9763_v12 = vpop.eup %9762 }
0x1625   :  { %v1658_v9 = vpop.permute.xlu0 %1657 }
0x1626   :  { %v1660_v10 = vadd.f32 %v1658_v9, %v1654_v8 }
0x1628   :  { %9764 = vtanh.f32 %v1660_v10 }
0x1632   :  { %v9765_v13 = vpop.eup %9764 }
0x1633   :  { %v1662_v58 = vmul.f32 %v9765_v13, %v9763_v12 }
0x1635   :  { %1686 = vrot.lane.b32.xlu1 %v1662_v58, %s10254_s0  ;;  %v1670_v48 = vrot.slane %v1662_v58, %v11179_v7 }
0x1637   :  { %v1671_v51 = vcombine.high %v1670_v48, %v1670_v48  ;;  %v1678_v34 = vrot.slane %v1670_v48, %v11179_v7 }
0x1639   :  { %v1685_v54 = vrot.slane %v1671_v51, %v11179_v7  ;;  %v2630_v22 = vrot.slane %v1678_v34, %v10990_v53 }
0x163b   :  { %v2634_v3 = vrot.slane %v1685_v54, %v10990_v53  ;;  %v2702_v26 = vsel %vm2681_vm4, %v1548_v25, %v2630_v22  ;;  %v1817_v22 = vrot.slane %v11309_v44, 3 }
0x163d   :  { %v2703_v40 = vsel %vm2681_vm4, %v1555_v18, %v2634_v3  ;;  %v1820_v18 = vrot.slane %v11313_v4, 3  ;;  %v1816_v3 = vrot.slane %v11319_v17, 4 }
0x16a7   :  { %v1687_v63 = vpop.permute.xlu1 %1686 }
0x16a8   :  { %8353 = vmatmul.mubr.msk.f32.vlgmr.msra.gmra.mrb[18].mxu1 %vm406_vm3, %v1687_v63 }
0x16a9   :  { %8978 = vmatpush1.bf16.msra.mxu1 %v11099_v20  ;;  %2018 = vmatprep.mubr.f32.mxu1 %v13127_v0 }
0x16aa   :  { %8980 = vmatprep.subr.bf16.mxu1 %v11101_v21 }
0x16ad   :  { %8982 = vmatpush1.bf16.msra.mxu1 %v11106_v28 }
0x16ae   :  { %8984 = vmatprep.subr.bf16.mxu1 %v11110_v29 }
0x16b1   :  { %8986 = vmatpush1.bf16.msra.mxu1 %v11114_v38 }
0x16b2   :  { %8988 = vmatprep.subr.bf16.mxu1 %v11118_v39 }
0x16b5   :  { %8990 = vmatpush1.bf16.msra.mxu1 %v11122_v45 }
0x16b6   :  { %9008 = vmatprep.subr.bf16.mxu1 %v11097_v14 }
0x177b   :  { %v1764_v35 = vpop.f32.mrb[18].mxu1 }
0x177c   :  { %v1765_v42 = vadd.f32 %v1764_v35, %v1690_v33  ;;  %v1766_v46 = vpop.f32.mrb[19].mxu1 }
0x177d   :  { %v1767_v47 = vadd.f32 %v1766_v46, %v1693_v43 }
0x177e   :  { %v8354_v36 = vmul.f32 -1.442695, %v1765_v42 }
0x177f   :  { %v8355_v62 = vmul.f32 -1.442695, %v1767_v47 }
0x1780   :  { %9766 = vpow2.f32 %v8354_v36 }
0x1781   :  { %9768 = vtanh.f32 %v1767_v47 }
0x178a   :  { %v9767_v57 = vpop.eup %9766 }
0x178b   :  { %v1775_v37 = vadd.f32 1.0, %v9767_v57  ;;  %v9769_v60 = vpop.eup %9768 }
0x178d   :  { %9770 = vrcp.f32 %v1775_v37 }
0x178e   :  { %9772 = vpow2.f32 %v8355_v62 }
0x1797   :  { %v9771_v2 = vpop.eup %9770 }
0x1798   :  { %v1783_v23 = vmul.f32 %v9771_v2, %v9769_v60  ;;  %v9773_v27 = vpop.eup %9772  ;;  %v1782_v32 = vmul.f32 %v9771_v2, %v1660_v10 }
0x1799   :  { %v1776_v24 = vadd.f32 1.0, %v9773_v27 }
0x179a   :  { %1785 = vrot.lane.b32.xlu0 %v1783_v23, %s10254_s0 }
0x179b   :  { %9774 = vrcp.f32 %v1776_v24 }
0x17a5   :  { %v9775_v9 = vpop.eup %9774 }
0x180c   :  { %v1786_v6 = vpop.permute.xlu0 %1785 }
0x180d   :  { %v1788_v8 = vadd.f32 %v1786_v6, %v1782_v32 }
0x180f   :  { %9776 = vtanh.f32 %v1788_v8 }
0x1819   :  { %v9777_v12 = vpop.eup %9776 }
0x181a   :  { %v1790_v13 = vmul.f32 %v9777_v12, %v9775_v9 }
0x181c   :  { %1814 = vrot.lane.b32.xlu1 %v1790_v13, %s10254_s0  ;;  %v1798_v15 = vrot.slane %v1790_v13, %v11179_v7 }
0x181e   :  { %v1799_v58 = vcombine.high %v1798_v15, %v1798_v15  ;;  %v1806_v48 = vrot.slane %v1798_v15, %v11179_v7 }
0x1820   :  { %v1813_v16 = vrot.slane %v1799_v58, %v11179_v7  ;;  %v2640_v51 = vrot.slane %v1806_v48, %v10990_v53  ;;  %v1945_v48 = vrot.slane %v11309_v44, 4 }
0x1822   :  { %v2644_v10 = vrot.slane %v1813_v16, %v10990_v53  ;;  %v2704_v34 = vsel %vm2684_vm5, %v2702_v26, %v2640_v51  ;;  %v1819_v26 = vrot.slane %v11323_v19, 4  ;;  %v1948_v16 = vrot.slane %v11313_v4, 4 }
0x1823   :  { %v1944_v51 = vrot.slane %v11319_v17, 5 }
0x1824   :  { %v2705_v25 = vsel %vm2684_vm5, %v2703_v40, %v2644_v10  ;;  %v1818_v40 = vsel %vm392_vm1, %v1817_v22, %v1816_v3  ;;  %v1821_v1 = vsel %vm392_vm1, %v1820_v18, %v1819_v26  ;;  %v1947_v10 = vrot.slane %v11323_v19, 5 }
0x1826   :  { %v1949_v22 = vsel %vm392_vm1, %v1948_v16, %v1947_v10 }
0x188e   :  { %v1815_v54 = vpop.permute.xlu1 %1814 }
0x188f   :  { %8356 = vmatmul.mubr.msk.f32.vlgmr.msra.gmra.mrb[10].mxu0 %vm406_vm3, %v1815_v54 }
0x1890   :  { %8994 = vmatpush1.bf16.msra.mxu0 %v11099_v20  ;;  %2146 = vmatprep.mubr.f32.mxu0 %v13127_v0 }
0x1891   :  { %8996 = vmatprep.subr.bf16.mxu0 %v11101_v21 }
0x1894   :  { %8998 = vmatpush1.bf16.msra.mxu0 %v11106_v28 }
0x1895   :  { %9000 = vmatprep.subr.bf16.mxu0 %v11110_v29 }
0x1898   :  { %9002 = vmatpush1.bf16.msra.mxu0 %v11114_v38 }
0x1899   :  { %9004 = vmatprep.subr.bf16.mxu0 %v11118_v39 }
0x189c   :  { %9006 = vmatpush1.bf16.msra.mxu0 %v11122_v45 }
0x189d   :  { %9024 = vmatprep.subr.bf16.mxu0 %v11097_v14 }
0x1962   :  { %v1892_v63 = vpop.f32.mrb[10].mxu0 }
0x1963   :  { %v1893_v30 = vadd.f32 %v1892_v63, %v1818_v40  ;;  %v1894_v41 = vpop.f32.mrb[11].mxu0 }
0x1964   :  { %v1895_v31 = vadd.f32 %v1894_v41, %v1821_v1 }
0x1965   :  { %v8357_v33 = vmul.f32 -1.442695, %v1893_v30 }
0x1966   :  { %v8358_v47 = vmul.f32 -1.442695, %v1895_v31 }
0x1967   :  { %9778 = vpow2.f32 %v8357_v33 }
0x1968   :  { %9780 = vtanh.f32 %v1895_v31 }
0x1971   :  { %v9779_v35 = vpop.eup %9778 }
0x1972   :  { %v1903_v14 = vadd.f32 1.0, %v9779_v35  ;;  %v9781_v42 = vpop.eup %9780 }
0x1974   :  { %9782 = vrcp.f32 %v1903_v14 }
0x1975   :  { %9784 = vpow2.f32 %v8358_v47 }
0x197e   :  { %v9783_v43 = vpop.eup %9782 }
0x197f   :  { %v1911_v46 = vmul.f32 %v9783_v43, %v9781_v42  ;;  %v9785_v36 = vpop.eup %9784  ;;  %v1910_v37 = vmul.f32 %v9783_v43, %v1788_v8 }
0x1980   :  { %v1904_v57 = vadd.f32 1.0, %v9785_v36 }
0x1981   :  { %1913 = vrot.lane.b32.xlu0 %v1911_v46, %s10254_s0 }
0x1982   :  { %9786 = vrcp.f32 %v1904_v57 }
0x198c   :  { %v9787_v23 = vpop.eup %9786 }
0x19f3   :  { %v1914_v60 = vpop.permute.xlu0 %1913 }
0x19f4   :  { %v1916_v2 = vadd.f32 %v1914_v60, %v1910_v37 }
0x19f6   :  { %9788 = vtanh.f32 %v1916_v2 }
0x1a00   :  { %v9789_v62 = vpop.eup %9788 }
0x1a01   :  { %v1918_v27 = vmul.f32 %v9789_v62, %v9787_v23 }
0x1a03   :  { %1942 = vrot.lane.b32.xlu1 %v1918_v27, %s10254_s0  ;;  %v1926_v24 = vrot.slane %v1918_v27, %v11179_v7 }
0x1a05   :  { %v1927_v32 = vcombine.high %v1926_v24, %v1926_v24  ;;  %v1934_v6 = vrot.slane %v1926_v24, %v11179_v7 }
0x1a07   :  { %v1941_v9 = vrot.slane %v1927_v32, %v11179_v7  ;;  %v2650_v12 = vrot.slane %v1934_v6, %v10990_v53  ;;  %v2073_v6 = vrot.slane %v11309_v44, 5 }
0x1a09   :  { %v2654_v8 = vrot.slane %v1941_v9, %v10990_v53  ;;  %v2706_v13 = vsel %vm2687_vm6, %v2704_v34, %v2650_v12  ;;  %v1946_v34 = vsel %vm392_vm1, %v1945_v48, %v1944_v51  ;;  %v2076_v9 = vrot.slane %v11313_v4, 5 }
0x1a0a   :  { %v2075_v12 = vrot.slane %v11323_v19, 6 }
0x1a0b   :  { %v2707_v15 = vsel %vm2687_vm6, %v2705_v25, %v2654_v8 }
0x1a75   :  { %v1943_v58 = vpop.permute.xlu1 %1942 }
0x1a76   :  { %8359 = vmatmul.mubr.msk.f32.vlgmr.msra.gmra.mrb[20].mxu1 %vm406_vm3, %v1943_v58 }
0x1a77   :  { %9010 = vmatpush1.bf16.msra.mxu1 %v11099_v20  ;;  %2274 = vmatprep.mubr.f32.mxu1 %v13127_v0 }
0x1a78   :  { %9012 = vmatprep.subr.bf16.mxu1 %v11101_v21 }
0x1a7b   :  { %9014 = vmatpush1.bf16.msra.mxu1 %v11106_v28 }
0x1a7c   :  { %9016 = vmatprep.subr.bf16.mxu1 %v11110_v29 }
0x1a7f   :  { %9018 = vmatpush1.bf16.msra.mxu1 %v11114_v38 }
0x1a80   :  { %9020 = vmatprep.subr.bf16.mxu1 %v11118_v39 }
0x1a83   :  { %9022 = vmatpush1.bf16.msra.mxu1 %v11122_v45 }
0x1b49   :  { %v2020_v25 = vpop.f32.mrb[20].mxu1 }
0x1b4a   :  { %v2021_v54 = vadd.f32 %v2020_v25, %v1946_v34  ;;  %v2022_v18 = vpop.f32.mrb[21].mxu1 }
0x1b4b   :  { %v2023_v3 = vadd.f32 %v2022_v18, %v1949_v22 }
0x1b4c   :  { %v8360_v26 = vmul.f32 -1.442695, %v2021_v54 }
0x1b4d   :  { %v8361_v31 = vmul.f32 -1.442695, %v2023_v3 }
0x1b4e   :  { %9790 = vpow2.f32 %v8360_v26 }
0x1b4f   :  { %9792 = vtanh.f32 %v2023_v3 }
0x1b58   :  { %v9791_v40 = vpop.eup %9790 }
0x1b59   :  { %v2031_v63 = vadd.f32 1.0, %v9791_v40  ;;  %v9793_v30 = vpop.eup %9792 }
0x1b5b   :  { %9794 = vrcp.f32 %v2031_v63 }
0x1b5c   :  { %9796 = vpow2.f32 %v8361_v31 }
0x1b65   :  { %v9795_v1 = vpop.eup %9794 }
0x1b66   :  { %v2039_v41 = vmul.f32 %v9795_v1, %v9793_v30  ;;  %v9797_v33 = vpop.eup %9796  ;;  %v2038_v14 = vmul.f32 %v9795_v1, %v1916_v2 }
0x1b67   :  { %v2032_v35 = vadd.f32 1.0, %v9797_v33 }
0x1b68   :  { %2041 = vrot.lane.b32.xlu0 %v2039_v41, %s10254_s0 }
0x1b69   :  { %9798 = vrcp.f32 %v2032_v35 }
0x1b73   :  { %v9799_v46 = vpop.eup %9798 }
0x1bda   :  { %v2042_v42 = vpop.permute.xlu0 %2041 }
0x1bdb   :  { %v2044_v43 = vadd.f32 %v2042_v42, %v2038_v14  ;;  %v2201_v42 = vrot.slane %v11309_v44, 6 }
0x1bdd   :  { %9800 = vtanh.f32 %v2044_v43 }
0x1be7   :  { %v9801_v47 = vpop.eup %9800 }
0x1be8   :  { %v2046_v36 = vmul.f32 %v9801_v47, %v9799_v46  ;;  %v2200_v46 = vrot.slane %v11319_v17, 7  ;;  %v2203_v47 = vrot.slane %v11323_v19, 7 }
0x1bea   :  { %2070 = vrot.lane.b32.xlu1 %v2046_v36, %s10254_s0  ;;  %v2054_v57 = vrot.slane %v2046_v36, %v11179_v7  ;;  %v2202_v36 = vsel %vm392_vm1, %v2201_v42, %v2200_v46 }
0x1bec   :  { %v2055_v37 = vcombine.high %v2054_v57, %v2054_v57  ;;  %v2062_v60 = vrot.slane %v2054_v57, %v11179_v7 }
0x1bee   :  { %v2069_v23 = vrot.slane %v2055_v37, %v11179_v7  ;;  %v2660_v62 = vrot.slane %v2062_v60, %v10990_v53 }
0x1bf0   :  { %v2664_v2 = vrot.slane %v2069_v23, %v10990_v53  ;;  %v2708_v27 = vsel %vm2690_vm7, %v2706_v13, %v2660_v62 }
0x1bf2   :  { %v2709_v24 = vsel %vm2690_vm7, %v2707_v15, %v2664_v2 }
0x1c5c   :  { %v2071_v32 = vpop.permute.xlu1 %2070 }
0x1c5d   :  { %8362 = vmatmul.mubr.msk.f32.vlgmr.msra.gmra.mrb[12].mxu0 %vm406_vm3, %v2071_v32 }
0x1c5e   :  { %9026 = vmatpush1.bf16.msra.mxu0 %v11099_v20  ;;  %2394 = vmatprep.mubr.f32.mxu0 %v13127_v0  ;;  %v2072_v20 = vrot.slane %v11319_v17, 6 }
0x1c5f   :  { %9028 = vmatprep.subr.bf16.mxu0 %v11101_v21 }
0x1c60   :  { %v2074_v21 = vsel %vm392_vm1, %v2073_v6, %v2072_v20 }
0x1c62   :  { %9030 = vmatpush1.bf16.msra.mxu0 %v11106_v28 }
0x1c63   :  { %9032 = vmatprep.subr.bf16.mxu0 %v11110_v29  ;;  %v2077_v29 = vsel %vm392_vm1, %v2076_v9, %v2075_v12 }
0x1c66   :  { %9034 = vmatpush1.bf16.msra.mxu0 %v11114_v38 }
0x1c67   :  { %9036 = vmatprep.subr.bf16.mxu0 %v11118_v39 }
0x1c6a   :  { %9038 = vmatpush1.bf16.msra.mxu0 %v11122_v45 }
0x1d30   :  { %v2148_v8 = vpop.f32.mrb[12].mxu0 }
0x1d31   :  { %v2149_v28 = vadd.f32 %v2148_v8, %v2074_v21  ;;  %v2150_v13 = vpop.f32.mrb[13].mxu0 }
0x1d32   :  { %v2151_v38 = vadd.f32 %v2150_v13, %v2077_v29  ;;  %v2716_v29 = vmax.f32 %v11336_v49, 0.0  ;;  %v2718_v13 = vmax.f32 %v11340_v50, 0.0 }
0x1d33   :  { %v8363_v15 = vmul.f32 -1.442695, %v2149_v28 }
0x1d34   :  { %v8364_v51 = vmul.f32 -1.442695, %v2151_v38 }
0x1d35   :  { %9802 = vpow2.f32 %v8363_v15 }
0x1d36   :  { %9804 = vtanh.f32 %v2151_v38 }
0x1d3f   :  { %v9803_v39 = vpop.eup %9802 }
0x1d40   :  { %v2159_v45 = vadd.f32 1.0, %v9803_v39  ;;  %v9805_v58 = vpop.eup %9804 }
0x1d42   :  { %9806 = vrcp.f32 %v2159_v45 }
0x1d43   :  { %9808 = vpow2.f32 %v8364_v51 }
0x1d4c   :  { %v9807_v48 = vpop.eup %9806 }
0x1d4d   :  { %v2167_v16 = vmul.f32 %v9807_v48, %v9805_v58  ;;  %v9809_v10 = vpop.eup %9808  ;;  %v2166_v25 = vmul.f32 %v9807_v48, %v2044_v43  ;;  %v2204_v43 = vrot.slane %v11313_v4, 6 }
0x1d4e   :  { %v2160_v34 = vadd.f32 1.0, %v9809_v10 }
0x1d4f   :  { %2169 = vrot.lane.b32.xlu0 %v2167_v16, %s10254_s0  ;;  %v2205_v60 = vsel %vm392_vm1, %v2204_v43, %v2203_v47 }
0x1d50   :  { %9810 = vrcp.f32 %v2160_v34 }
0x1d5a   :  { %v9811_v18 = vpop.eup %9810 }
0x1dc1   :  { %v2170_v54 = vpop.permute.xlu0 %2169 }
0x1dc2   :  { %v2172_v22 = vadd.f32 %v2170_v54, %v2166_v25 }
0x1dc4   :  { %9812 = vtanh.f32 %v2172_v22 }
0x1dce   :  { %v9813_v3 = vpop.eup %9812 }
0x1dcf   :  { %v2174_v26 = vmul.f32 %v9813_v3, %v9811_v18 }
0x1dd1   :  { %2198 = vrot.lane.b32.xlu1 %v2174_v26, %s10254_s0  ;;  %v2182_v40 = vrot.slane %v2174_v26, %v11179_v7 }
0x1dd3   :  { %v2183_v63 = vcombine.high %v2182_v40, %v2182_v40  ;;  %v2190_v30 = vrot.slane %v2182_v40, %v11179_v7 }
0x1dd5   :  { %v2197_v1 = vrot.slane %v2183_v63, %v11179_v7  ;;  %v2670_v41 = vrot.slane %v2190_v30, %v10990_v53 }
0x1dd7   :  { %v2674_v31 = vrot.slane %v2197_v1, %v10990_v53  ;;  %v11485_v33 = vsel %vm2693_vm8, %v2708_v27, %v2670_v41 }
0x1dd9   :  { %v11488_v35 = vsel %vm2693_vm8, %v2709_v24, %v2674_v31 }
0x1e43   :  { %v2199_v14 = vpop.permute.xlu1 %2198 }
0x1e44   :  { %8365 = vmatmul.mubr.msk.f32.vlgmr.msra.gmra.mrb[22].mxu1 %vm406_vm3, %v2199_v14 }
0x1f17   :  { %v2276_v57 = vpop.f32.mrb[22].mxu1 }
0x1f18   :  { %v2277_v37 = vadd.f32 %v2276_v57, %v2202_v36  ;;  %v2278_v23 = vpop.f32.mrb[23].mxu1 }
0x1f19   :  { %v2279_v62 = vadd.f32 %v2278_v23, %v2205_v60 }
0x1f1a   :  { %v8366_v2 = vmul.f32 -1.442695, %v2277_v37 }
0x1f1b   :  { %v8367_v17 = vmul.f32 -1.442695, %v2279_v62 }
0x1f1c   :  { %9814 = vpow2.f32 %v8366_v2 }
0x1f1d   :  { %9816 = vtanh.f32 %v2279_v62 }
0x1f26   :  { %v9815_v27 = vpop.eup %9814 }
0x1f27   :  { %v2287_v24 = vadd.f32 1.0, %v9815_v27  ;;  %v9817_v44 = vpop.eup %9816 }
0x1f29   :  { %9818 = vrcp.f32 %v2287_v24 }
0x1f2a   :  { %9820 = vpow2.f32 %v8367_v17 }
0x1f33   :  { %v9819_v4 = vpop.eup %9818 }
0x1f34   :  { %v2295_v32 = vmul.f32 %v9819_v4, %v9817_v44  ;;  %v9821_v19 = vpop.eup %9820  ;;  %v2294_v9 = vmul.f32 %v9819_v4, %v2172_v22 }
0x1f35   :  { %v2288_v6 = vadd.f32 1.0, %v9821_v19 }
0x1f36   :  { %2297 = vrot.lane.b32.xlu0 %v2295_v32, %s10254_s0 }
0x1f37   :  { %9822 = vrcp.f32 %v2288_v6 }
0x1f41   :  { %v9823_v21 = vpop.eup %9822 }
0x1fa8   :  { %v2298_v20 = vpop.permute.xlu0 %2297 }
0x1fa9   :  { %v11498_v12 = vadd.f32 %v2298_v20, %v2294_v9 }
0x1fab   :  { %13151 = vst [vmem:[#allocation19_spill] sm:$0xff] %v11498_v12  ;;  %9824 = vtanh.f32 %v11498_v12 }
0x1fb5   :  { %v9825_v8 = vpop.eup %9824 }
0x1fb6   :  { %v2302_v28 = vmul.f32 %v9825_v8, %v9823_v21 }
0x1fb8   :  { %2326 = vrot.lane.b32.xlu1 %v2302_v28, %s10254_s0 }
0x1fbc   :  { %2770 = vrot.lane.b32.xlu1 %v2716_v29, %s10256_s19 }
0x1fc0   :  { %2774 = vrot.lane.b32.xlu1 %v2718_v13, %s10256_s19 }
0x202a   :  { %v2327_v38 = vpop.permute.xlu1 %2326 }
0x202b   :  { %8368 = vmatmul.mubr.msk.f32.vlgmr.msra.gmra.mrb[14].mxu0 %vm406_vm3, %v2327_v38 }
0x202e   :  { %v2771_v15 = vpop.permute.xlu1 %2770 }
0x202f   :  { %2782 = vst.msk [vmem:[%s13104_s16 + $0xb8] sm:$0xff] %vm146_vm0, %v2771_v15  ;;  %v2786_v39 = vsel %vm146_vm0, %v2771_v15, 0.0 }
0x2030   :  { %2787 = vadd.xlane.f32.xlu1 %v2786_v39 }
0x2032   :  { %v2775_v45 = vpop.permute.xlu1 %2774 }
0x2033   :  { %2784 = vst.msk [vmem:[%s13104_s16 + $0x248] sm:$0xff] %vm146_vm0, %v2775_v45  ;;  %v2792_v6 = vsel %vm146_vm0, %v2775_v45, 0.0 }
0x20bd   :  { %v2788_v9 = vpop.xlane.xlu1 %2787 }
0x20be   :  { %v2798_v20 = vmul.f32 0.03125, %v2788_v9 }
0x20c0   :  { %v2802_v21 = vsub.f32 %v2716_v29, %v2798_v20 }
0x20c2   :  { %v2806_v8 = vmul.f32 %v2802_v21, %v2802_v21 }
0x20fe   :  { %v2396_v58 = vpop.f32.mrb[14].mxu0 }
0x20ff   :  { %v2397_v48 = vadd.f32 %v2396_v58, %v10996_v55  ;;  %v2398_v16 = vpop.f32.mrb[15].mxu0 }
0x2100   :  { %v2399_v10 = vadd.f32 %v2398_v16, %v11003_v59  ;;  %v2310_v59 = vrot.slane %v2302_v28, %v11179_v7 }
0x2101   :  { %v8369_v51 = vmul.f32 -1.442695, %v2397_v48 }
0x2102   :  { %v8370_v3 = vmul.f32 -1.442695, %v2399_v10  ;;  %v2311_v1 = vcombine.high %v2310_v59, %v2310_v59  ;;  %v2318_v14 = vrot.slane %v2310_v59, %v11179_v7  ;;  %v2855_v59 = vld [vmem:[%s13092_s4 + $0x8] sm:$0xff] }
0x2103   :  { %9826 = vpow2.f32 %v8369_v51 }
0x2104   :  { %9828 = vtanh.f32 %v2399_v10  ;;  %v2325_v43 = vrot.slane %v2311_v1, %v11179_v7  ;;  %v11532_v47 = vrot.slane %v2318_v14, %v10990_v53  ;;  %v2856_v1 = vld [vmem:[%s13092_s4 + $0x10] sm:$0xff] }
0x2106   :  { %13153 = vst [vmem:[#allocation21_spill] sm:$0xff] %v11532_v47  ;;  %v11536_v37 = vrot.slane %v2325_v43, %v10990_v53  ;;  %v2712_v62 = vsel %vm2696_vm9, %v11485_v33, %v11532_v47 }
0x2108   :  { %13154 = vst [vmem:[#allocation22_spill] sm:$0xff] %v11536_v37  ;;  %v2713_v44 = vsel %vm2696_vm9, %v11488_v35, %v11536_v37 }
0x210d   :  { %v9827_v34 = vpop.eup %9826 }
0x210e   :  { %v2407_v25 = vadd.f32 1.0, %v9827_v34  ;;  %v9829_v54 = vpop.eup %9828 }
0x2110   :  { %9830 = vrcp.f32 %v2407_v25 }
0x2111   :  { %9832 = vpow2.f32 %v8370_v3 }
0x211a   :  { %v9831_v22 = vpop.eup %9830 }
0x211b   :  { %v2415_v18 = vmul.f32 %v9831_v22, %v9829_v54  ;;  %v9833_v26 = vpop.eup %9832  ;;  %v2414_v55 = vmul.f32 %v9831_v22, %v11498_v12 }
0x211c   :  { %v2408_v40 = vadd.f32 1.0, %v9833_v26 }
0x211d   :  { %2417 = vrot.lane.b32.xlu0 %v2415_v18, %s10254_s0 }
0x211e   :  { %9834 = vrcp.f32 %v2408_v40 }
0x2128   :  { %v9835_v41 = vpop.eup %9834 }
0x218f   :  { %v2418_v63 = vpop.permute.xlu0 %2417 }
0x2190   :  { %v11524_v30 = vadd.f32 %v2418_v63, %v2414_v55  ;;  %v2854_v63 = vld [vmem:[%s13092_s4] sm:$0xff] }
0x2192   :  { %13152 = vst [vmem:[#allocation20_spill] sm:$0xff] %v11524_v30  ;;  %9836 = vtanh.f32 %v11524_v30 }
0x219c   :  { %v9837_v31 = vpop.eup %9836 }
0x219d   :  { %v2422_v42 = vmul.f32 %v9837_v31, %v9835_v41  ;;  %v9039_v41 = vpack.c.bf16 %v2855_v59, %v2854_v63  ;;  %v2857_v31 = vld [vmem:[%s13092_s4 + $0x18] sm:$0xff]  ;;  %v3094_v63 = vld [vmem:[#allocation5 + $0x88] sm:$0xff] }
0x219e   :  { %v9043_v14 = vpack.c.bf16 %v2857_v31, %v2856_v1  ;;  %v3096_v59 = vld [vmem:[#allocation5 + $0x98] sm:$0xff]  ;;  %v3093_v31 = vld [vmem:[#allocation5 + $0x80] sm:$0xff] }
0x219f   :  { %v2430_v46 = vrot.slane %v2422_v42, %v11179_v7  ;;  %9040 = vmatprep.subr.bf16.mxu1 %v9039_v41 }
0x21a0   :  { %9042 = vmatpush3.bf16.msra.mxu1 %v9039_v41  ;;  %v9063_v41 = vpack.c.bf16 %v3096_v59, %v3094_v63 }
0x21a1   :  { %v2438_v36 = vrot.slane %v2430_v46, %v11179_v7  ;;  %v2431_v57 = vcombine.high %v2430_v46, %v2430_v46  ;;  %9044 = vmatprep.subr.bf16.mxu1 %v9043_v14 }
0x21a3   :  { %v11539_v60 = vrot.slane %v2438_v36, %v10990_v53  ;;  %v2445_v23 = vrot.slane %v2431_v57, %v11179_v7 }
0x21a4   :  { %9046 = vmatpush3.bf16.msra.mxu1 %v9043_v14  ;;  %v3095_v14 = vld [vmem:[#allocation5 + $0x90] sm:$0xff] }
0x21a5   :  { %13155 = vst [vmem:[#allocation23_spill] sm:$0xff] %v11539_v60  ;;  %v2714_v2 = vsel %vm2699_vm10, %v2712_v62, %v11539_v60  ;;  %v11548_v27 = vrot.slane %v2445_v23, %v10990_v53 }
0x21a6   :  { %v2717_v24 = vmax.f32 %v2714_v2, 0.0 }
0x21a7   :  { %13156 = vst [vmem:[#allocation24_spill] sm:$0xff] %v11548_v27  ;;  %v2715_v4 = vsel %vm2699_vm10, %v2713_v44, %v11548_v27 }
0x21a8   :  { %2772 = vrot.lane.b32.xlu0 %v2717_v24, %s10256_s19  ;;  %v2719_v32 = vmax.f32 %v2715_v4, 0.0 }
0x21ac   :  { %2776 = vrot.lane.b32.xlu0 %v2719_v32, %s10256_s19 }
0x221a   :  { %v2773_v33 = vpop.permute.xlu0 %2772 }
0x221b   :  { %2783 = vst.msk [vmem:[%s13104_s16 + $0xc0] sm:$0xff] %vm146_vm0, %v2773_v33  ;;  %v2789_v17 = vsel %vm146_vm0, %v2773_v33, 0.0 }
0x221c   :  { %2790 = vadd.xlane.f32.xlu0 %v2789_v17 }
0x221e   :  { %v2777_v19 = vpop.permute.xlu0 %2776 }
0x221f   :  { %2785 = vst.msk [vmem:[%s13104_s16 + $0x250] sm:$0xff] %vm146_vm0, %v2777_v19  ;;  %v2795_v35 = vsel %vm146_vm0, %v2777_v19, 0.0 }
0x2220   :  { %2796 = vadd.xlane.f32.xlu1 %v2795_v35  ;;  %2793 = vadd.xlane.f32.xlu0 %v2792_v6 }
0x2236   :  { %2814 = vrot.lane.b32.xlu0 %v2806_v8, %s10256_s19 }
0x22a9   :  { %v2791_v28 = vpop.xlane.xlu0 %2790 }
0x22aa   :  { %v2799_v38 = vmul.f32 0.03125, %v2791_v28  ;;  %v3078_v28 = vld [vmem:[#allocation5 + $0x8] sm:$0xff] }
0x22ac   :  { %v2803_v15 = vsub.f32 %v2717_v24, %v2799_v38  ;;  %v3080_v38 = vld [vmem:[#allocation5 + $0x18] sm:$0xff] }
0x22ad   :  { %v2794_v39 = vpop.xlane.xlu0 %2793  ;;  %v2797_v58 = vpop.xlane.xlu1 %2796 }
0x22ae   :  { %v2800_v48 = vmul.f32 0.03125, %v2794_v39  ;;  %v2801_v16 = vmul.f32 0.03125, %v2797_v58  ;;  %v2807_v51 = vmul.f32 %v2803_v15, %v2803_v15  ;;  %v9047_v39 = vpack.c.bf16 %v3080_v38, %v3078_v28  ;;  %v3079_v58 = vld [vmem:[#allocation5 + $0x10] sm:$0xff]  ;;  %v3109_v28 = vld [vmem:[#allocation5 + $0x100] sm:$0xff] }
0x22b0   :  { %v2804_v45 = vsub.f32 %v2718_v13, %v2800_v48  ;;  %v2805_v10 = vsub.f32 %v2719_v32, %v2801_v16  ;;  %2816 = vrot.lane.b32.xlu1 %v2807_v51, %s10256_s19  ;;  %v3082_v48 = vld [vmem:[#allocation5 + $0x28] sm:$0xff]  ;;  %v3084_v16 = vld [vmem:[#allocation5 + $0x38] sm:$0xff]  ;;  %9048 = vmatprep.subr.bf16.mxu0 %v9047_v39  ;;  %v8371_v39 = vld [vmem:[%s13093_s5] ss:$0 sm:$0xff] }
0x22b1   :  { %v2815_v29 = vpop.permute.xlu0 %2814 }
0x22b2   :  { %v2808_v34 = vmul.f32 %v2804_v45, %v2804_v45  ;;  %v2809_v49 = vmul.f32 %v2805_v10, %v2805_v10  ;;  %v2826_v25 = vsel %vm146_vm0, %v2815_v29, 0.0  ;;  %v3088_v29 = vld [vmem:[#allocation5 + $0x58] sm:$0xff] }
0x22b4   :  { %2818 = vrot.lane.b32.xlu1 %v2808_v34, %s10256_s19  ;;  %2820 = vrot.lane.b32.xlu0 %v2809_v49, %s10256_s19  ;;  %v3083_v34 = vld [vmem:[#allocation5 + $0x30] sm:$0xff]  ;;  %v3086_v49 = vld [vmem:[#allocation5 + $0x48] sm:$0xff] }
0x22d8   :  { %2827 = vadd.xlane.f32.xlu1 %v2826_v25 }
0x2322   :  { %v2817_v54 = vpop.permute.xlu1 %2816 }
0x2323   :  { %v2829_v22 = vsel %vm146_vm0, %v2817_v54, 0.0  ;;  %v9055_v54 = vpack.c.bf16 %v3088_v29, %v3086_v49  ;;  %v3115_v29 = vld [vmem:[#allocation5 + $0x130] sm:$0xff] }
0x2324   :  { %2830 = vadd.xlane.f32.xlu0 %v2829_v22  ;;  %v3085_v22 = vld [vmem:[#allocation5 + $0x40] sm:$0xff] }
0x2326   :  { %v2821_v18 = vpop.permute.xlu0 %2820  ;;  %v2819_v50 = vpop.permute.xlu1 %2818 }
0x2327   :  { %v2835_v13 = vsel %vm146_vm0, %v2821_v18, 0.0  ;;  %v2832_v3 = vsel %vm146_vm0, %v2819_v50, 0.0  ;;  %v3087_v18 = vld [vmem:[#allocation5 + $0x50] sm:$0xff]  ;;  %v3090_v50 = vld [vmem:[#allocation5 + $0x68] sm:$0xff] }
0x2328   :  { %2836 = vadd.xlane.f32.xlu1 %v2835_v13  ;;  %2833 = vadd.xlane.f32.xlu0 %v2832_v3  ;;  %v3092_v13 = vld [vmem:[#allocation5 + $0x78] sm:$0xff]  ;;  %v9057_v3 = vpack.c.bf16 %v3087_v18, %v3085_v22 }
0x2365   :  { %v2828_v26 = vpop.xlane.xlu1 %2827 }
0x2366   :  { %v2838_v40 = vmul.f32 0.03125, %v2828_v26  ;;  %v9059_v26 = vpack.c.bf16 %v3092_v13, %v3090_v50 }
0x2368   :  { %v2842_v55 = vadd.f32 1e-05, %v2838_v40  ;;  %v3089_v40 = vld [vmem:[#allocation5 + $0x60] sm:$0xff] }
0x236a   :  { %9838 = vrsqrt.f32 %v2842_v55  ;;  %v3091_v55 = vld [vmem:[#allocation5 + $0x70] sm:$0xff] }
0x236b   :  { %v9061_v1 = vpack.c.bf16 %v3091_v55, %v3089_v40 }
0x2374   :  { %v9839_v42 = vpop.eup %9838 }
0x2375   :  { %v2850_v43 = vmul.f32 %v9839_v42, %v2802_v21  ;;  %v3098_v42 = vld [vmem:[#allocation5 + $0xa8] sm:$0xff] }
0x2377   :  { %2869 = vrot.lane.b32.xlu0 %v2850_v43, %s10256_s19  ;;  %v3100_v43 = vld [vmem:[#allocation5 + $0xb8] sm:$0xff] }
0x23b1   :  { %v2831_v46 = vpop.xlane.xlu0 %2830 }
0x23b2   :  { %v2839_v36 = vmul.f32 0.03125, %v2831_v46  ;;  %v9065_v46 = vpack.c.bf16 %v3095_v14, %v3093_v31 }
0x23b4   :  { %v2843_v57 = vadd.f32 1e-05, %v2839_v36  ;;  %v9067_v36 = vpack.c.bf16 %v3100_v43, %v3098_v42 }
0x23b5   :  { %v2834_v23 = vpop.xlane.xlu0 %2833  ;;  %v2837_v62 = vpop.xlane.xlu1 %2836 }
0x23b6   :  { %9840 = vrsqrt.f32 %v2843_v57  ;;  %v2840_v2 = vmul.f32 0.03125, %v2834_v23  ;;  %v2841_v24 = vmul.f32 0.03125, %v2837_v62  ;;  %v3097_v57 = vld [vmem:[#allocation5 + $0xa0] sm:$0xff]  ;;  %v3099_v23 = vld [vmem:[#allocation5 + $0xb0] sm:$0xff]  ;;  %v3102_v62 = vld [vmem:[#allocation5 + $0xc8] sm:$0xff] }
0x23b8   :  { %v2844_v44 = vadd.f32 1e-05, %v2840_v2  ;;  %v2845_v4 = vadd.f32 1e-05, %v2841_v24  ;;  %v3104_v2 = vld [vmem:[#allocation5 + $0xd8] sm:$0xff]  ;;  %v9069_v24 = vpack.c.bf16 %v3099_v23, %v3097_v57 }
0x23ba   :  { %9842 = vrsqrt.f32 %v2844_v44  ;;  %v9071_v44 = vpack.c.bf16 %v3104_v2, %v3102_v62 }
0x23bb   :  { %9844 = vrsqrt.f32 %v2845_v4  ;;  %v3101_v4 = vld [vmem:[#allocation5 + $0xc0] sm:$0xff] }
0x23c0   :  { %v9841_v32 = vpop.eup %9840 }
0x23c1   :  { %v2851_v33 = vmul.f32 %v9841_v32, %v2803_v15  ;;  %v3077_v15 = vld [vmem:[#allocation5] sm:$0xff]  ;;  %v3103_v32 = vld [vmem:[#allocation5 + $0xd0] sm:$0xff] }
0x23c2   :  { %v9049_v51 = vpack.c.bf16 %v3079_v58, %v3077_v15  ;;  %v3111_v15 = vld [vmem:[#allocation5 + $0x110] sm:$0xff] }
0x23c3   :  { %2871 = vrot.lane.b32.xlu1 %v2851_v33, %s10256_s19  ;;  %v9073_v33 = vpack.c.bf16 %v3103_v32, %v3101_v4  ;;  %v9081_v58 = vpack.c.bf16 %v3111_v15, %v3109_v28  ;;  %v3234_v4 = vld [vmem:[#allocation7 + $0x8] sm:$0xff]  ;;  %v3236_v32 = vld [vmem:[#allocation7 + $0x18] sm:$0xff]  ;;  %v3239_v28 = vld [vmem:[#allocation7 + $0x30] sm:$0xff] }
0x23c4   :  { %v9843_v17 = vpop.eup %9842  ;;  %9050 = vmatpush1.bf16.msra.mxu0 %v9049_v51  ;;  %v3116_v51 = vld [vmem:[#allocation5 + $0x138] sm:$0xff] }
0x23c5   :  { %v9845_v19 = vpop.eup %9844  ;;  %v2852_v35 = vmul.f32 %v9843_v17, %v2804_v45  ;;  %v9051_v45 = vpack.c.bf16 %v3084_v16, %v3082_v48  ;;  %v3106_v17 = vld [vmem:[#allocation5 + $0xe8] sm:$0xff]  ;;  %v3244_v15 = vld [vmem:[#allocation7 + $0x58] sm:$0xff] }
0x23c6   :  { %v2853_v6 = vmul.f32 %v9845_v19, %v2805_v10  ;;  %v3081_v10 = vld [vmem:[#allocation5 + $0x20] sm:$0xff]  ;;  %v3108_v19 = vld [vmem:[#allocation5 + $0xf8] sm:$0xff]  ;;  %v3114_v16 = vld [vmem:[#allocation5 + $0x128] sm:$0xff] }
0x23c7   :  { %2873 = vrot.lane.b32.xlu1 %v2852_v35, %s10256_s19  ;;  %v9053_v25 = vpack.c.bf16 %v3083_v34, %v3081_v10  ;;  %9052 = vmatprep.subr.bf16.mxu0 %v9051_v45  ;;  %v3105_v35 = vld [vmem:[#allocation5 + $0xe0] sm:$0xff]  ;;  %v9083_v49 = vpack.c.bf16 %v3116_v51, %v3114_v16  ;;  %v3243_v16 = vld [vmem:[#allocation7 + $0x50] sm:$0xff]  ;;  %v3246_v51 = vld [vmem:[#allocation7 + $0x68] sm:$0xff] }
0x23c8   :  { %2875 = vrot.lane.b32.xlu0 %v2853_v6, %s10256_s19  ;;  %v9075_v6 = vpack.c.bf16 %v3108_v19, %v3106_v17  ;;  %v3113_v45 = vld [vmem:[#allocation5 + $0x120] sm:$0xff]  ;;  %v9087_v17 = vpack.c.bf16 %v3236_v32, %v3234_v4  ;;  %v3235_v19 = vld [vmem:[#allocation7 + $0x10] sm:$0xff] }
0x23c9   :  { %9054 = vmatpush1.bf16.msra.mxu0 %v9053_v25  ;;  %v3261_v32 = vld [vmem:[#allocation7 + $0xe0] sm:$0xff] }
0x23ca   :  { %9056 = vmatprep.subr.bf16.mxu0 %v9055_v54  ;;  %v9085_v54 = vpack.c.bf16 %v3115_v29, %v3113_v45  ;;  %9088 = vmatprep.subr.bf16.mxu1 %v9087_v17  ;;  %v3248_v45 = vld [vmem:[#allocation7 + $0x78] sm:$0xff]  ;;  %v3245_v29 = vld [vmem:[#allocation7 + $0x60] sm:$0xff]  ;;  %v3266_v17 = vld [vmem:[#allocation7 + $0x108] sm:$0xff] }
0x23cd   :  { %9058 = vmatpush1.bf16.msra.mxu0 %v9057_v3 }
0x23ce   :  { %9060 = vmatprep.subr.bf16.mxu0 %v9059_v26 }
0x23d1   :  { %9062 = vmatpush1.bf16.msra.mxu0 %v9061_v1 }
0x23d2   :  { %9064 = vmatprep.subr.bf16.mxu0 %v9063_v41 }
0x23d5   :  { %9066 = vmatpush1.bf16.msra.mxu0 %v9065_v46 }
0x23d6   :  { %9068 = vmatprep.subr.bf16.mxu0 %v9067_v36 }
0x23d9   :  { %9070 = vmatpush1.bf16.msra.mxu0 %v9069_v24 }
0x23da   :  { %9072 = vmatprep.subr.bf16.mxu0 %v9071_v44 }
0x23dd   :  { %9074 = vmatpush1.bf16.msra.mxu0 %v9073_v33  ;;  %v3233_v33 = vld [vmem:[#allocation7] sm:$0xff] }
0x23de   :  { %9076 = vmatprep.subr.bf16.mxu0 %v9075_v6  ;;  %v3240_v6 = vld [vmem:[#allocation7 + $0x38] sm:$0xff] }
0x23e9   :  { %v2870_v9 = vpop.permute.xlu0 %2869 }
0x23ea   :  { %8652 = vmatprep.mubr.msk.f32.mxu1 %vm146_vm0, %v2870_v9  ;;  %v3107_v9 = vld [vmem:[#allocation5 + $0xf0] sm:$0xff] }
0x2435   :  { %v2872_v20 = vpop.permute.xlu1 %2871 }
0x2436   :  { %8653 = vmatmul.mubr.msk.f32.vlgmr.msra.gmra.mrb[24].mxu1 %vm146_vm0, %v2872_v20  ;;  %v9077_v20 = vpack.c.bf16 %v3107_v9, %v3105_v35  ;;  %v3238_v35 = vld [vmem:[#allocation7 + $0x28] sm:$0xff] }
0x2438   :  { %9078 = vmatpush1.bf16.msra.mxu0 %v9077_v20  ;;  %v9089_v20 = vpack.c.bf16 %v3235_v19, %v3233_v33  ;;  %v3263_v33 = vld [vmem:[#allocation7 + $0xf0] sm:$0xff]  ;;  %v3268_v19 = vld [vmem:[#allocation7 + $0x118] sm:$0xff] }
0x2439   :  { %v2874_v21 = vpop.permute.xlu1 %2873 }
0x243a   :  { %v2876_v8 = vpop.permute.xlu0 %2875  ;;  %8655 = vmatprep.mubr.msk.f32.mxu1 %vm146_vm0, %v2874_v21  ;;  %v3110_v21 = vld [vmem:[#allocation5 + $0x108] sm:$0xff]  ;;  %9090 = vmatpush1.bf16.msra.mxu1 %v9089_v20  ;;  %v3267_v20 = vld [vmem:[#allocation7 + $0x110] sm:$0xff] }
0x243b   :  { %8656 = vmatmul.mubr.msk.f32.gmra.mrb[26].mxu1 %vm146_vm0, %v2876_v8  ;;  %v3112_v8 = vld [vmem:[#allocation5 + $0x118] sm:$0xff] }
0x243c   :  { %v9079_v38 = vpack.c.bf16 %v3112_v8, %v3110_v21  ;;  %v9091_v21 = vpack.c.bf16 %v3240_v6, %v3238_v35  ;;  %v3237_v8 = vld [vmem:[#allocation7 + $0x20] sm:$0xff]  ;;  %v9117_v35 = vpack.c.bf16 %v3263_v33, %v3261_v32  ;;  %v9119_v6 = vpack.c.bf16 %v3268_v19, %v3266_v17 }
0x243e   :  { %9080 = vmatprep.subr.bf16.mxu0 %v9079_v38  ;;  %v3242_v38 = vld [vmem:[#allocation7 + $0x48] sm:$0xff]  ;;  %9092 = vmatprep.subr.bf16.mxu1 %v9091_v21 }
0x243f   :  { %9082 = vmatpush1.bf16.msra.mxu0 %v9081_v58  ;;  %v9095_v58 = vpack.c.bf16 %v3244_v15, %v3242_v38  ;;  %v3270_v21 = vld [vmem:[#allocation7 + $0x128] sm:$0xff]  ;;  %v3269_v15 = vld [vmem:[#allocation7 + $0x120] sm:$0xff] }
0x2440   :  { %9084 = vmatprep.subr.bf16.mxu0 %v9083_v49  ;;  %v9099_v49 = vpack.c.bf16 %v3248_v45, %v3246_v51  ;;  %v3273_v45 = vld [vmem:[#allocation7 + $0x140] sm:$0xff] }
0x2443   :  { %9086 = vmatpush1.bf16.msra.mxu0 %v9085_v54  ;;  %v3247_v54 = vld [vmem:[#allocation7 + $0x70] sm:$0xff] }
0x2509   :  { %v8654_v48 = vpop.f32.mrb[24].mxu1 }
0x250a   :  { %v11603_v10 = vadd.f32 %v8654_v48, %v8371_v39  ;;  %v2951_v34 = vpop.f32.mrb[25].mxu1  ;;  %v3241_v48 = vld [vmem:[#allocation7 + $0x40] sm:$0xff] }
0x250b   :  { %v11605_v25 = vadd.f32 %v8371_v39, %v2951_v34  ;;  %v9097_v34 = vpack.c.bf16 %v3243_v16, %v3241_v48  ;;  %v3276_v48 = vld [vmem:[#allocation7 + $0x158] sm:$0xff] }
0x250c   :  { %v3031_v22 = vrot.slane %v11603_v10, 3  ;;  %v2995_v18 = vrot.slane %v11603_v10, 1  ;;  %v3049_v50 = vrot.slane %v11603_v10, 4  ;;  %v3013_v3 = vrot.slane %v11603_v10, 2 }
0x250d   :  { %v3048_v13 = vrot.slane %v11605_v25, 4  ;;  %v3012_v26 = vrot.slane %v11605_v25, 2  ;;  %v2994_v31 = vrot.slane %v11605_v25, 1  ;;  %v3030_v43 = vrot.slane %v11605_v25, 3 }
0x250e   :  { %3038 = vrot.lane.b32.xlu0 %v3031_v22, %s10257_s11  ;;  %3002 = vrot.lane.b32.xlu1 %v2995_v18, %s10256_s19  ;;  %v8657_v40 = vpop.f32.mrb[26].mxu1 }
0x250f   :  { %v2961_v55 = vpop.f32.mrb[27].mxu1  ;;  %v3050_v63 = vsel %vm2690_vm7, %v3048_v13, %v3049_v50  ;;  %v11618_v59 = vadd.f32 %v8657_v40, %v8371_v39  ;;  %v3014_v41 = vsel %vm2696_vm9, %v3012_v26, %v3013_v3  ;;  %v2996_v42 = vsel %vm2699_vm10, %v2994_v31, %v2995_v18  ;;  %v3252_v18 = vld [vmem:[#allocation7 + $0x98] sm:$0xff]  ;;  %v3249_v26 = vld [vmem:[#allocation7 + $0x80] sm:$0xff]  ;;  %v3251_v40 = vld [vmem:[#allocation7 + $0x90] sm:$0xff] }
0x2510   :  { %8380 = vmatprep.mubr.msk.f32.mxu0 %vm146_vm0, %v3050_v63  ;;  %v11621_v1 = vadd.f32 %v8371_v39, %v2961_v55  ;;  %v3032_v36 = vsel %vm2693_vm8, %v3030_v43, %v3031_v22  ;;  %v9093_v39 = vpack.c.bf16 %v3239_v28, %v3237_v8  ;;  %v3250_v22 = vld [vmem:[#allocation7 + $0x88] sm:$0xff]  ;;  %v9101_v13 = vpack.c.bf16 %v3247_v54, %v3245_v29  ;;  %v3256_v63 = vld [vmem:[#allocation7 + $0xb8] sm:$0xff] }
0x2511   :  { %v2998_v14 = vrot.slane %v11618_v59, 1  ;;  %v3016_v23 = vrot.slane %v11618_v59, 2  ;;  %v3034_v44 = vrot.slane %v11618_v59, 3  ;;  %v3254_v55 = vld [vmem:[#allocation7 + $0xa8] sm:$0xff]  ;;  %v3272_v8 = vld [vmem:[#allocation7 + $0x138] sm:$0xff] }
0x2512   :  { %3020 = vrot.lane.b32.xlu1 %v3013_v3, %s10254_s0  ;;  %3018 = vrot.lane.b32.xlu0 %v3014_v41, %s10254_s0  ;;  %v2997_v46 = vrot.slane %v11621_v1, 1  ;;  %v3015_v62 = vrot.slane %v11621_v1, 2  ;;  %v3033_v24 = vrot.slane %v11621_v1, 3  ;;  %v9103_v3 = vpack.c.bf16 %v3252_v18, %v3250_v22  ;;  %v3258_v43 = vld [vmem:[#allocation7 + $0xc8] sm:$0xff] }
0x2513   :  { %9094 = vmatpush1.bf16.msra.mxu1 %v9093_v39  ;;  %v9105_v41 = vpack.c.bf16 %v3251_v40, %v3249_v26  ;;  %v9107_v31 = vpack.c.bf16 %v3256_v63, %v3254_v55  ;;  %v9123_v38 = vpack.c.bf16 %v3272_v8, %v3270_v21  ;;  %v3271_v39 = vld [vmem:[#allocation7 + $0x130] sm:$0xff]  ;;  %v3278_v21 = vld [vmem:[#allocation7 + $0x168] sm:$0xff]  ;;  %v3280_v8 = vld [vmem:[#allocation7 + $0x178] sm:$0xff] }
0x2514   :  { %v2999_v57 = vsel %vm2699_vm10, %v2997_v46, %v2998_v14  ;;  %v3017_v2 = vsel %vm2696_vm9, %v3015_v62, %v3016_v23  ;;  %v3035_v9 = vsel %vm2693_vm8, %v3033_v24, %v3034_v44  ;;  %9096 = vmatprep.subr.bf16.mxu1 %v9095_v58  ;;  %v3260_v46 = vld [vmem:[#allocation7 + $0xd8] sm:$0xff]  ;;  %v3259_v62 = vld [vmem:[#allocation7 + $0xd0] sm:$0xff]  ;;  %v3274_v58 = vld [vmem:[#allocation7 + $0x148] sm:$0xff]  ;;  %v9125_v16 = vpack.c.bf16 %v3271_v39, %v3269_v15 }
0x2515   :  { %v3264_v24 = vld [vmem:[#allocation7 + $0xf8] sm:$0xff]  ;;  %v9127_v51 = vpack.c.bf16 %v3276_v48, %v3274_v58  ;;  %v3279_v15 = vld [vmem:[#allocation7 + $0x170] sm:$0xff]  ;;  %v3282_v58 = vld [vmem:[#allocation7 + $0x188] sm:$0xff] }
0x2516   :  { %3000 = vrot.lane.b32.xlu1 %v2996_v42, %s10256_s19  ;;  %3006 = vrot.lane.b32.xlu0 %v2998_v14, %s10256_s19  ;;  %v3253_v14 = vld [vmem:[#allocation7 + $0xa0] sm:$0xff]  ;;  %v3255_v42 = vld [vmem:[#allocation7 + $0xb0] sm:$0xff] }
0x2517   :  { %9098 = vmatpush1.bf16.msra.mxu1 %v9097_v34  ;;  %v3275_v34 = vld [vmem:[#allocation7 + $0x150] sm:$0xff]  ;;  %v3281_v48 = vld [vmem:[#allocation7 + $0x180] sm:$0xff] }
0x2518   :  { %9100 = vmatprep.subr.bf16.mxu1 %v9099_v49  ;;  %v9129_v49 = vpack.c.bf16 %v3275_v34, %v3273_v45 }
0x251a   :  { %3036 = vrot.lane.b32.xlu1 %v3032_v36, %s10257_s11  ;;  %3004 = vrot.lane.b32.xlu0 %v2999_v57, %s10256_s19  ;;  %v9109_v36 = vpack.c.bf16 %v3255_v42, %v3253_v14  ;;  %v9111_v57 = vpack.c.bf16 %v3260_v46, %v3258_v43 }
0x251b   :  { %9102 = vmatpush1.bf16.msra.mxu1 %v9101_v13  ;;  %v3051_v13 = vrot.slane %v11621_v1, 4 }
0x251c   :  { %9104 = vmatprep.subr.bf16.mxu1 %v9103_v3  ;;  %v3052_v3 = vrot.slane %v11618_v59, 4 }
0x251e   :  { %3024 = vrot.lane.b32.xlu1 %v3016_v23, %s10254_s0  ;;  %3022 = vrot.lane.b32.xlu0 %v3017_v2, %s10254_s0  ;;  %v3257_v23 = vld [vmem:[#allocation7 + $0xc0] sm:$0xff]  ;;  %v3262_v2 = vld [vmem:[#allocation7 + $0xe8] sm:$0xff]  ;;  %v3053_v63 = vsel %vm2690_vm7, %v3051_v13, %v3052_v3 }
0x251f   :  { %9106 = vmatpush1.bf16.msra.mxu1 %v9105_v41  ;;  %v9115_v4 = vpack.c.bf16 %v3264_v24, %v3262_v2  ;;  %v8377_v43 = vcombine.low %v3049_v50, %v3053_v63 }
0x2520   :  { %9108 = vmatprep.subr.bf16.mxu1 %v9107_v31 }
0x2522   :  { %3040 = vrot.lane.b32.xlu1 %v3035_v9, %s10257_s11  ;;  %3042 = vrot.lane.b32.xlu0 %v3034_v44, %s10257_s11  ;;  %v9113_v44 = vpack.c.bf16 %v3259_v62, %v3257_v23  ;;  %v3265_v9 = vld [vmem:[#allocation7 + $0x100] sm:$0xff] }
0x2523   :  { %9110 = vmatpush1.bf16.msra.mxu1 %v9109_v36  ;;  %v9121_v28 = vpack.c.bf16 %v3267_v20, %v3265_v9 }
0x2524   :  { %9112 = vmatprep.subr.bf16.mxu1 %v9111_v57 }
0x2526   :  { %2978 = vrot.lane.b32.xlu1 %v11605_v25, %s10257_s11  ;;  %2980 = vrot.lane.b32.xlu0 %v11603_v10, %s10257_s11 }
0x2527   :  { %9114 = vmatpush1.bf16.msra.mxu1 %v9113_v44 }
0x2528   :  { %9116 = vmatprep.subr.bf16.mxu1 %v9115_v4 }
0x252a   :  { %2982 = vrot.lane.b32.xlu1 %v11621_v1, %s10257_s11  ;;  %2984 = vrot.lane.b32.xlu0 %v11618_v59, %s10257_s11 }
0x252b   :  { %9118 = vmatpush1.bf16.msra.mxu1 %v9117_v35 }
0x252c   :  { %9120 = vmatprep.subr.bf16.mxu1 %v9119_v6 }
0x252f   :  { %9122 = vmatpush1.bf16.msra.mxu1 %v9121_v28  ;;  %v3277_v28 = vld [vmem:[#allocation7 + $0x160] sm:$0xff] }
0x2530   :  { %9124 = vmatprep.subr.bf16.mxu1 %v9123_v38  ;;  %v9131_v38 = vpack.c.bf16 %v3280_v8, %v3278_v21  ;;  %v9133_v39 = vpack.c.bf16 %v3279_v15, %v3277_v28 }
0x2533   :  { %9126 = vmatpush1.bf16.msra.mxu1 %v9125_v16  ;;  %v3117_v16 = vld [vmem:[%s13096_s8] sm:$0x3] }
0x2534   :  { %9128 = vmatprep.subr.bf16.mxu1 %v9127_v51  ;;  %v3122_v51 = vrot.slane %v3117_v16, %v10990_v53  ;;  %v3126_v45 = vrot.slane %v3117_v16, %v10999_v56 }
0x2537   :  { %9130 = vmatpush1.bf16.msra.mxu1 %v9129_v49 }
0x2538   :  { %9132 = vmatprep.subr.bf16.mxu1 %v9131_v38 }
0x253b   :  { %9134 = vmatpush1.bf16.msra.mxu1 %v9133_v39 }
0x253c   :  { %3353 = vmatprep.subr.mxu1 %v3282_v58 }
0x253f   :  { %3354 = vmatpush1.msra.mxu1 %v3281_v48 }
0x2580   :  { %v3039_v29 = vpop.permute.xlu0 %3038  ;;  %v3003_v54 = vpop.permute.xlu1 %3002 }
0x2581   :  { %v3055_v57 = vsel %vm146_vm0, %v11603_v10, %v3003_v54 }
0x2584   :  { %v3019_v22 = vpop.permute.xlu0 %3018  ;;  %v3021_v18 = vpop.permute.xlu1 %3020 }
0x2585   :  { %v3059_v23 = vsel %vm406_vm3, %v3055_v57, %v3021_v18  ;;  %v3283_v57 = vld [vmem:[%s13098_s10] sm:$0x3] }
0x2586   :  { %v3064_v33 = vsel %vm3062_vm11, %v3059_v23, %v3039_v29  ;;  %v3288_v23 = vrot.slane %v3283_v57, %v10990_v53 }
0x2588   :  { %v3007_v26 = vpop.permute.xlu0 %3006  ;;  %v3001_v40 = vpop.permute.xlu1 %3000 }
0x2589   :  { %v3054_v55 = vsel %vm146_vm0, %v11605_v25, %v3001_v40  ;;  %v3057_v62 = vsel %vm146_vm0, %v11618_v59, %v3007_v26 }
0x258a   :  { %v3058_v31 = vsel %vm406_vm3, %v3054_v55, %v3019_v22 }
0x258c   :  { %v3005_v41 = vpop.permute.xlu0 %3004  ;;  %v3037_v14 = vpop.permute.xlu1 %3036 }
0x258d   :  { %v3063_v42 = vsel %vm3062_vm11, %v3058_v31, %v3037_v14  ;;  %v3056_v2 = vsel %vm146_vm0, %v11621_v1, %v3005_v41 }
0x258e   :  { %3209 = vmatmul.mubr.f32.vlgmr.msra.gmra.mrb[16].mxu0 %v3063_v42 }
0x258f   :  { %8381 = vmatprep.mubr.msk.f32.mxu0 %vm146_vm0, %v8377_v43 }
0x2590   :  { %v3023_v46 = vpop.permute.xlu0 %3022  ;;  %v3025_v36 = vpop.permute.xlu1 %3024 }
0x2591   :  { %v3060_v24 = vsel %vm406_vm3, %v3056_v2, %v3023_v46  ;;  %v3061_v50 = vsel %vm406_vm3, %v3057_v62, %v3025_v36  ;;  %v13120_v36 = vmov 71   ;;  %v3292_v62 = vrot.slane %v3283_v57, %v10999_v56 }
0x2592   :  { %9521 = vset.pattern.permute.xlu0 %v13120_v36  ;;  %9520 = vset.pattern.permute.xlu1 %v13120_v36  ;;  %v13115_v57 = vmov 67  }
0x2594   :  { %v3043_v44 = vpop.permute.xlu0 %3042  ;;  %v3041_v4 = vpop.permute.xlu1 %3040 }
0x2595   :  { %v3066_v32 = vsel %vm3062_vm11, %v3061_v50, %v3043_v44  ;;  %v3065_v17 = vsel %vm3062_vm11, %v3060_v24, %v3041_v4 }
0x2596   :  { %v3076_v19 = vcombine.low %v3066_v32, %v3052_v3  ;;  %v3075_v35 = vcombine.high %v3065_v17, %v3053_v63  ;;  %v8376_v6 = vcombine.low %v3064_v33, %v3065_v17 }
0x2598   :  { %v8379_v9 = vcombine.high %v3053_v63, %v3076_v19  ;;  %3215 = vmatmul.mubr.f32.gmra.mrb[18].mxu0 %v8376_v6  ;;  %v8378_v20 = vcombine.low %v3075_v35, %v3066_v32 }
0x259a   :  { %8382 = vmatprep.mubr.msk.f32.mxu0 %vm146_vm0, %v8379_v9 }
0x259c   :  { %3221 = vmatmul.mubr.f32.gmra.mrb[20].mxu0 %v8378_v20 }
0x2661   :  { %v3210_v34 = vpop.f32.mrb[16].mxu0 }
0x2662   :  { %v3211_v49 = vadd.f32 %v3210_v34, %v3122_v51  ;;  %v3212_v29 = vpop.f32.mrb[17].mxu0 }
0x2663   :  { %v3213_v54 = vadd.f32 %v3212_v29, %v3126_v45 }
0x2664   :  { %v3227_v18 = vmax.f32 %v3211_v49, 0.0 }
0x2665   :  { %v3228_v22 = vmax.f32 %v3213_v54, 0.0 }
0x2667   :  { %8383 = vmatprep.mubr.msk.f32.mxu1 %vm13114_vm12, %v3228_v22 }
0x2668   :  { %3370 = vmatmul.mubr.f32.vlgmr.msra.gmra.mrb[28].mxu1 %v3227_v18 }
0x266b   :  { %v3216_v13 = vpop.f32.mrb[18].mxu0 }
0x266c   :  { %v3217_v3 = vadd.f32 %v3216_v13, %v3122_v51  ;;  %v3218_v26 = vpop.f32.mrb[19].mxu0 }
0x266d   :  { %v3219_v40 = vadd.f32 %v3218_v26, %v3126_v45 }
0x266e   :  { %v3229_v41 = vmax.f32 %v3217_v3, 0.0 }
0x266f   :  { %v3230_v55 = vmax.f32 %v3219_v40, 0.0  ;;  %v3222_v63 = vpop.f32.mrb[20].mxu0 }
0x2670   :  { %v3223_v31 = vadd.f32 %v3222_v63, %v3122_v51  ;;  %v3224_v14 = vpop.f32.mrb[21].mxu0 }
0x2671   :  { %v3225_v42 = vadd.f32 %v3224_v14, %v3126_v45  ;;  %8384 = vmatprep.mubr.msk.f32.mxu1 %vm13114_vm12, %v3230_v55 }
0x2672   :  { %3376 = vmatmul.mubr.f32.gmra.mrb[30].mxu1 %v3229_v41  ;;  %v3231_v46 = vmax.f32 %v3223_v31, 0.0  ;;  %v13123_v41 = vmov 69   ;;  %v13119_v31 = vmov 70  }
0x2673   :  { %v3232_v43 = vmax.f32 %v3225_v42, 0.0 }
0x2675   :  { %8385 = vmatprep.mubr.msk.f32.mxu1 %vm13114_vm12, %v3232_v43 }
0x2676   :  { %3382 = vmatmul.mubr.f32.gmra.mrb[32].mxu1 %v3231_v46 }
0x273b   :  { %v3371_v2 = vpop.f32.mrb[28].mxu1 }
0x273c   :  { %v3372_v24 = vadd.f32 %v3371_v2, %v3288_v23  ;;  %v3373_v50 = vpop.f32.mrb[29].mxu1 }
0x273d   :  { %v3374_v44 = vadd.f32 %v3373_v50, %v3292_v62 }
0x273e   :  { %v8386_v4 = vmul.f32 -1.442695, %v3372_v24 }
0x273f   :  { %v8387_v32 = vmul.f32 -1.442695, %v3374_v44  ;;  %v13121_v44 = vmov 65  }
0x2740   :  { %9846 = vpow2.f32 %v8386_v4 }
0x2741   :  { %9848 = vpow2.f32 %v8387_v32 }
0x2745   :  { %v3377_v33 = vpop.f32.mrb[30].mxu1 }
0x2746   :  { %v3378_v17 = vadd.f32 %v3377_v33, %v3288_v23  ;;  %v3379_v19 = vpop.f32.mrb[31].mxu1 }
0x2747   :  { %v3380_v35 = vadd.f32 %v3379_v19, %v3292_v62  ;;  %v13117_v19 = vmov 68  }
0x2748   :  { %v8388_v6 = vmul.f32 -1.442695, %v3378_v17 }
0x2749   :  { %v8389_v9 = vmul.f32 -1.442695, %v3380_v35  ;;  %v3383_v20 = vpop.f32.mrb[32].mxu1 }
0x274a   :  { %v9847_v21 = vpop.eup %9846  ;;  %9850 = vpow2.f32 %v8388_v6  ;;  %v3384_v8 = vadd.f32 %v3383_v20, %v3288_v23  ;;  %v3385_v28 = vpop.f32.mrb[33].mxu1  ;;  %v10264_v6 = vmov 64   ;;  %v10266_v20 = vmov 62  }
0x274b   :  { %v9849_v38 = vpop.eup %9848  ;;  %v3406_v15 = vadd.f32 1.0, %v9847_v21  ;;  %9852 = vpow2.f32 %v8389_v9  ;;  %v3386_v39 = vadd.f32 %v3385_v28, %v3292_v62  ;;  %v10265_v9 = vmov 63   ;;  %v11780_v28 = vpop.permute.xlu0 %2980 }
0x274c   :  { %v3407_v58 = vadd.f32 1.0, %v9849_v38  ;;  %v8390_v48 = vmul.f32 -1.442695, %v3384_v8  ;;  %v13125_v21 = vmov 66   ;;  %v10268_v8 = vmov 61   ;;  %v11782_v38 = vpop.permute.xlu1 %2978 }
0x274d   :  { %9854 = vrcp.f32 %v3406_v15  ;;  %v8391_v16 = vmul.f32 -1.442695, %v3386_v39 }
0x274e   :  { %9856 = vrcp.f32 %v3407_v58  ;;  %v2973_v58 = vmax.f32 %v11618_v59, 0.0 }
0x274f   :  { %9858 = vpow2.f32 %v8390_v48  ;;  %v2985_v15 = vpop.permute.xlu0 %2984  ;;  %v2972_v48 = vmax.f32 %v11621_v1, 0.0 }
0x2750   :  { %9860 = vpow2.f32 %v8391_v16  ;;  %v2983_v39 = vpop.permute.xlu1 %2982  ;;  %v2993_v16 = vmul.f32 %v2985_v15, %v2973_v58 }
0x2754   :  { %v9851_v51 = vpop.eup %9850 }
0x2755   :  { %v9853_v45 = vpop.eup %9852  ;;  %v3408_v34 = vadd.f32 1.0, %v9851_v51  ;;  %v2992_v51 = vmul.f32 %v2983_v39, %v2972_v48 }
0x2756   :  { %v3409_v49 = vadd.f32 1.0, %v9853_v45 }
0x2757   :  { %v9855_v29 = vpop.eup %9854  ;;  %9862 = vrcp.f32 %v3408_v34  ;;  %v9584_v45 = vpack.i.bf16 %v2993_v16, %v2992_v51 }
0x2758   :  { %v9857_v54 = vpop.eup %9856  ;;  %9864 = vrcp.f32 %v3409_v49 }
0x2759   :  { %v9859_v22 = vpop.eup %9858  ;;  %v11693_v18 = vcombine.low %v9855_v29, %v9857_v54  ;;  %v3431_v13 = vcombine.high %v9855_v29, %v9857_v54  ;;  %v4423_v3 = vsel %vm13114_vm12, %v9857_v54, 0.0 }
0x275a   :  { %v9861_v26 = vpop.eup %9860  ;;  %v3410_v40 = vadd.f32 1.0, %v9859_v22  ;;  %v11696_v55 = vadd.f32 %v9855_v29, %v4423_v3 }
0x275b   :  { %v3411_v63 = vadd.f32 1.0, %v9861_v26  ;;  %3461 = vperm.xlu0 %9521, %v3431_v13   ;;  %3450 = vperm.xlu1 %9520, %v11693_v18   ;;  %v10269_v26 = vmov 1985246804  }
0x275c   :  { %9866 = vrcp.f32 %v3410_v40  ;;  %v3454_v40 = vunpack.c.l.s4 %v10269_v26 }
0x275d   :  { %9868 = vrcp.f32 %v3411_v63 }
0x275f   :  { %9523 = vset.pattern.permute.xlu0 %v13123_v41  ;;  %9522 = vset.pattern.permute.xlu1 %v13119_v31 }
0x2760   :  { %3626 = vperm.xlu0 %9523, %v11693_v18   ;;  %3538 = vperm.xlu1 %9522, %v11693_v18  }
0x2761   :  { %v9863_v14 = vpop.eup %9862 }
0x2762   :  { %v11703_v42 = vpop.eup %9864 }
0x2763   :  { %v11706_v43 = vcombine.low %v9863_v14, %v11703_v42  ;;  %v11709_v46 = vcombine.high %v9863_v14, %v11703_v42 }
0x2764   :  { %9527 = vset.pattern.permute.xlu0 %v13115_v57  ;;  %3549 = vperm.xlu1 %9522, %v3431_v13  }
0x2765   :  { %3813 = vperm.xlu0 %9527, %v3431_v13  }
0x2766   :  { %v9867_v23 = vpop.eup %9866 }
0x2767   :  { %v9869_v62 = vpop.eup %9868  ;;  %v8411_v33 = vcombine.low %v11709_v46, %v9867_v23 }
0x2768   :  { %v11712_v2 = vcombine.low %v9867_v23, %v9869_v62  ;;  %v11714_v24 = vcombine.high %v9867_v23, %v9869_v62  ;;  %9524 = vset.pattern.permute.xlu1 %v13123_v41  ;;  %v8413_v50 = vcombine.high %v9869_v62, %v9869_v62 }
0x2769   :  { %9530 = vset.pattern.permute.xlu0 %v13121_v44  ;;  %3637 = vperm.xlu1 %9524, %v3431_v13  }
0x276a   :  { %3989 = vperm.xlu0 %9530, %v3431_v13   ;;  %v8412_v4 = vcombine.high %v11703_v42, %v11712_v2  ;;  %v11721_v32 = vsel %vm4428_vm13, %v8413_v50, 0.0  ;;  %v3441_v50 = vsub.s32 %v10987_v52, %v11079_v61 }
0x276c   :  { %v4433_v17 = vsel %vm13114_vm12, %v8412_v4, 0.0  ;;  %vm3531_vm14 = vcmp.eq.s32.totalorder %v3441_v50, 2  ;;  %vm3443_vm15 = vcmp.eq.s32.totalorder %v3441_v50, 1  ;;  %vm3619_vm2 = vcmp.eq.s32.totalorder %v3441_v50, 3 }
0x276d   :  { %9525 = vset.pattern.permute.xlu1 %v13117_v19  ;;  %v11726_v35 = vadd.f32 %v8411_v33, %v4433_v17  ;;  %vm3707_vm12 = vcmp.eq.s32.totalorder %v3441_v50, 4 }
0x276e   :  { %9532 = vset.pattern.permute.xlu0 %v10264_v6  ;;  %3714 = vperm.xlu1 %9525, %v11693_v18  }
0x276f   :  { %4077 = vperm.xlu0 %9532, %v3431_v13  }
0x2772   :  { %3725 = vperm.xlu1 %9525, %v3431_v13  }
0x2773   :  { %9534 = vset.pattern.permute.xlu0 %v10265_v9 }
0x2774   :  { %4165 = vperm.xlu0 %9534, %v3431_v13  }
0x2776   :  { %9526 = vset.pattern.permute.xlu1 %v13115_v57 }
0x2777   :  { %3802 = vperm.xlu1 %9526, %v11693_v18  }
0x2778   :  { %9536 = vset.pattern.permute.xlu0 %v10266_v20 }
0x2779   :  { %4253 = vperm.xlu0 %9536, %v3431_v13  }
0x277b   :  { %9528 = vset.pattern.permute.xlu1 %v13125_v21 }
0x277c   :  { %3890 = vperm.xlu1 %9528, %v11693_v18  }
0x277d   :  { %9538 = vset.pattern.permute.xlu0 %v10268_v8 }
0x277e   :  { %4341 = vperm.xlu0 %9538, %v3431_v13  }
0x2780   :  { %3901 = vperm.xlu1 %9528, %v3431_v13  }
0x2782   :  { %9540 = vset.pattern.permute.xlu0 %v13119_v31 }
0x2783   :  { %3560 = vperm.xlu0 %9540, %v11706_v43  }
0x2784   :  { %9529 = vset.pattern.permute.xlu1 %v13121_v44 }
0x2785   :  { %3978 = vperm.xlu1 %9529, %v11693_v18  }
0x2787   :  { %9541 = vset.pattern.permute.xlu0 %v13123_v41 }
0x2788   :  { %3648 = vperm.xlu0 %9541, %v11706_v43  }
0x2789   :  { %9531 = vset.pattern.permute.xlu1 %v10264_v6 }
0x278a   :  { %4066 = vperm.xlu1 %9531, %v11693_v18  }
0x278c   :  { %9542 = vset.pattern.permute.xlu0 %v13119_v31 }
0x278d   :  { %3571 = vperm.xlu0 %9542, %v11709_v46  }
0x278e   :  { %9533 = vset.pattern.permute.xlu1 %v10265_v9 }
0x278f   :  { %4154 = vperm.xlu1 %9533, %v11693_v18  }
0x2791   :  { %9546 = vset.pattern.permute.xlu0 %v13117_v19 }
0x2792   :  { %3747 = vperm.xlu0 %9546, %v11709_v46  }
0x2793   :  { %9535 = vset.pattern.permute.xlu1 %v10266_v20 }
0x2794   :  { %4242 = vperm.xlu1 %9535, %v11693_v18  }
0x2796   :  { %9548 = vset.pattern.permute.xlu0 %v13115_v57 }
0x2797   :  { %3835 = vperm.xlu0 %9548, %v11709_v46  }
0x2798   :  { %9537 = vset.pattern.permute.xlu1 %v10268_v8 }
0x2799   :  { %4330 = vperm.xlu1 %9537, %v11693_v18  }
0x279b   :  { %9550 = vset.pattern.permute.xlu0 %v13125_v21 }
0x279c   :  { %3923 = vperm.xlu0 %9550, %v11709_v46  }
0x279d   :  { %9539 = vset.pattern.permute.xlu1 %v13120_v36 }
0x279e   :  { %3472 = vperm.xlu1 %9539, %v11706_v43  }
0x27a0   :  { %9552 = vset.pattern.permute.xlu0 %v13121_v44 }
0x27a1   :  { %4011 = vperm.xlu0 %9552, %v11709_v46  }
0x27a2   :  { %3483 = vperm.xlu1 %9539, %v11709_v46  }
0x27a5   :  { %9554 = vset.pattern.permute.xlu0 %v10264_v6 }
0x27a6   :  { %4099 = vperm.xlu0 %9554, %v11709_v46   ;;  %9543 = vset.pattern.permute.xlu1 %v13117_v19 }
0x27a7   :  { %3736 = vperm.xlu1 %9543, %v11706_v43  }
0x27aa   :  { %9556 = vset.pattern.permute.xlu0 %v10265_v9 }
0x27ab   :  { %4187 = vperm.xlu0 %9556, %v11709_v46   ;;  %9544 = vset.pattern.permute.xlu1 %v13123_v41 }
0x27ac   :  { %3659 = vperm.xlu1 %9544, %v11709_v46  }
0x27af   :  { %9557 = vset.pattern.permute.xlu0 %v10268_v8 }
0x27b0   :  { %4352 = vperm.xlu0 %9557, %v11706_v43   ;;  %9545 = vset.pattern.permute.xlu1 %v13115_v57 }
0x27b1   :  { %3824 = vperm.xlu1 %9545, %v11706_v43  }
0x27b4   :  { %9561 = vset.pattern.permute.xlu0 %v13123_v41 }
0x27b5   :  { %9547 = vset.pattern.permute.xlu1 %v13125_v21  ;;  %3670 = vperm.xlu0 %9561, %v11712_v2  }
0x27b6   :  { %3912 = vperm.xlu1 %9547, %v11706_v43  }
0x27b9   :  { %9562 = vset.pattern.permute.xlu0 %v13120_v36 }
0x27ba   :  { %9549 = vset.pattern.permute.xlu1 %v13121_v44  ;;  %3505 = vperm.xlu0 %9562, %v11714_v24  }
0x27bb   :  { %4000 = vperm.xlu1 %9549, %v11706_v43  }
0x27be   :  { %9576 = vset.pattern.permute.xlu0 %v10265_v9 }
0x27bf   :  { %9551 = vset.pattern.permute.xlu1 %v10264_v6  ;;  %4209 = vperm.xlu0 %9576, %v11714_v24  }
0x27c0   :  { %4088 = vperm.xlu1 %9551, %v11706_v43  }
0x27c3   :  { %9578 = vset.pattern.permute.xlu0 %v10266_v20 }
0x27c4   :  { %9553 = vset.pattern.permute.xlu1 %v10265_v9  ;;  %4297 = vperm.xlu0 %9578, %v11714_v24  }
0x27c5   :  { %4176 = vperm.xlu1 %9553, %v11706_v43  }
0x27c8   :  { %9585 = vrot.lane.b32.xlu0 %v9584_v45, %s10257_s11 }
0x27c9   :  { %9555 = vset.pattern.permute.xlu1 %v10266_v20  ;;  %9590 = vset.pattern.permute.xlu0 %v13119_v31 }
0x27ca   :  { %4264 = vperm.xlu1 %9555, %v11706_v43  }
0x27ce   :  { %4275 = vperm.xlu1 %9555, %v11709_v46  }
0x27d2   :  { %9558 = vset.pattern.permute.xlu1 %v10268_v8 }
0x27d3   :  { %4363 = vperm.xlu1 %9558, %v11709_v46   ;;  %v3455_v46 = vunpack.c.0.s8 %v3454_v40  ;;  %v11849_v40 = vsel %vm3619_vm2, 1.0, %v13127_v0  ;;  %vm3971_vm2 = vcmp.eq.s32.totalorder %v3441_v50, 7 }
0x27d5   :  { %v11825_v62 = vsub.s32 %v3455_v46, %v10987_v52 }
0x27d7   :  { %9559 = vset.pattern.permute.xlu1 %v13120_v36 }
0x27d8   :  { %3494 = vperm.xlu1 %9559, %v11712_v2  }
0x27da   :  { %v3451_v59 = vpop.permute.xlu1 %3450  ;;  %v3462_v34 = vpop.permute.xlu0 %3461 }
0x27db   :  { %v3470_v15 = vrot.slane %v3462_v34, %v11825_v62  ;;  %v3459_v39 = vrot.slane %v3451_v59, %v11825_v62 }
0x27dc   :  { %9560 = vset.pattern.permute.xlu1 %v13119_v31 }
0x27dd   :  { %3582 = vperm.xlu1 %9560, %v11712_v2  }
0x27df   :  { %v3539_v1 = vpop.permute.xlu1 %3538  ;;  %v3627_v29 = vpop.permute.xlu0 %3626 }
0x27e0   :  { %v3547_v58 = vrot.slane %v3539_v1, %v11825_v62  ;;  %v3635_v16 = vrot.slane %v3627_v29, %v11825_v62  ;;  %v11846_v1 = vsel %vm3443_vm15, 1.0, %v13127_v0  ;;  %vm3883_vm15 = vcmp.eq.s32.totalorder %v3441_v50, 6 }
0x27e1   :  { %3593 = vperm.xlu1 %9560, %v11714_v24  }
0x27e3   :  { %v3550_v49 = vpop.permute.xlu1 %3549 }
0x27e4   :  { %v3814_v22 = vpop.permute.xlu0 %3813  ;;  %v3558_v17 = vrot.slane %v3550_v49, %v11825_v62  ;;  %v11842_v49 = vsel %vm3531_vm14, 1.0, %v13127_v0  ;;  %vm3795_vm14 = vcmp.eq.s32.totalorder %v3441_v50, 5 }
0x27e5   :  { %9563 = vset.pattern.permute.xlu1 %v13117_v19 }
0x27e6   :  { %3758 = vperm.xlu1 %9563, %v11712_v2   ;;  %v3607_v51 = vcombine.low %v3547_v58, %v3558_v17 }
0x27e8   :  { %v3638_v54 = vpop.permute.xlu1 %3637  ;;  %v3611_v17 = vmul.f32 %v11842_v49, %v3607_v51 }
0x27e9   :  { %v11816_v3 = vpop.permute.xlu0 %3989  ;;  %v3646_v48 = vrot.slane %v3638_v54, %v11825_v62  ;;  %v3519_v54 = vcombine.low %v3459_v39, %v3470_v15 }
0x27ea   :  { %9564 = vset.pattern.permute.xlu1 %v13123_v41 }
0x27eb   :  { %3681 = vperm.xlu1 %9564, %v11714_v24   ;;  %v3695_v26 = vcombine.low %v3635_v16, %v3646_v48  ;;  %v3523_v39 = vmul.f32 %v11846_v1, %v3519_v54  ;;  %v11861_v48 = vsel %vm3707_vm12, 1.0, %v13127_v0  ;;  %v3998_v54 = vrot.slane %v11816_v3, %v11825_v62 }
0x27ec   :  { %vm4442_vm12 = vcmask 130048  }
0x27ed   :  { %v3715_v18 = vpop.permute.xlu1 %3714 }
0x27ee   :  { %v11820_v14 = vpop.permute.xlu0 %4077  ;;  %v3723_v29 = vrot.slane %v3715_v18, %v11825_v62  ;;  %v3699_v18 = vmul.f32 %v11849_v40, %v3695_v26 }
0x27ef   :  { %9565 = vset.pattern.permute.xlu1 %v13115_v57  ;;  %v4086_v50 = vrot.slane %v11820_v14, %v11825_v62 }
0x27f0   :  { %3846 = vperm.xlu1 %9565, %v11712_v2  }
0x27f1   :  { %v3726_v13 = vpop.permute.xlu1 %3725 }
0x27f2   :  { %v3734_v34 = vrot.slane %v3726_v13, %v11825_v62  ;;  %v3822_v13 = vrot.slane %v3814_v22, %v11825_v62 }
0x27f3   :  { %v11830_v4 = vpop.permute.xlu0 %4165 }
0x27f4   :  { %9566 = vset.pattern.permute.xlu1 %v13117_v19  ;;  %v3783_v58 = vcombine.low %v3723_v29, %v3734_v34  ;;  %v3615_v34 = vadd.f32 %v3611_v17, %v3523_v39 }
0x27f5   :  { %3769 = vperm.xlu1 %9566, %v11714_v24  }
0x27f6   :  { %v3803_v63 = vpop.permute.xlu1 %3802  ;;  %v3787_v26 = vmul.f32 %v11861_v48, %v3783_v58 }
0x27f7   :  { %v3811_v46 = vrot.slane %v3803_v63, %v11825_v62 }
0x27f8   :  { %v4254_v59 = vpop.permute.xlu0 %4253 }
0x27f9   :  { %9567 = vset.pattern.permute.xlu1 %v13125_v21  ;;  %v3871_v63 = vcombine.low %v3811_v46, %v3822_v13  ;;  %v11874_v46 = vsel %vm3883_vm15, 1.0, %v13127_v0 }
0x27fa   :  { %3934 = vperm.xlu1 %9567, %v11712_v2   ;;  %13158 = vst [vmem:[#allocation26_spill] sm:$0xff] %v11874_v46 }
0x27fb   :  { %v3891_v23 = vpop.permute.xlu1 %3890 }
0x27fc   :  { %v3899_v16 = vrot.slane %v3891_v23, %v11825_v62  ;;  %v3703_v23 = vadd.f32 %v3699_v18, %v3615_v34 }
0x27fd   :  { %v4342_v51 = vpop.permute.xlu0 %4341 }
0x27fe   :  { %9568 = vset.pattern.permute.xlu1 %v13115_v57  ;;  %v3791_v58 = vadd.f32 %v3787_v26, %v3703_v23 }
0x27ff   :  { %3857 = vperm.xlu1 %9568, %v11714_v24   ;;  %v3902_v33 = vpop.permute.xlu1 %3901 }
0x2800   :  { %v3910_v57 = vrot.slane %v3902_v33, %v11825_v62  ;;  %v11866_v33 = vsel %vm3795_vm14, 1.0, %v13127_v0 }
0x2801   :  { %13157 = vst [vmem:[#allocation25_spill] sm:$0xff] %v11866_v33  ;;  %v3875_v17 = vmul.f32 %v11866_v33, %v3871_v63 }
0x2802   :  { %v3959_v29 = vcombine.low %v3899_v16, %v3910_v57  ;;  %v11882_v57 = vsel %vm3971_vm2, 1.0, %v13127_v0  ;;  %v11887_v18 = vpop.permute.xlu0 %3560 }
0x2803   :  { %9569 = vset.pattern.permute.xlu1 %v13121_v44  ;;  %13159 = vst [vmem:[#allocation27_spill] sm:$0xff] %v11882_v57  ;;  %v3879_v14 = vadd.f32 %v3875_v17, %v3791_v58  ;;  %v4350_v17 = vrot.slane %v4342_v51, %v11825_v62 }
0x2804   :  { %4022 = vperm.xlu1 %9569, %v11712_v2   ;;  %v3979_v45 = vpop.permute.xlu1 %3978  ;;  %v3963_v39 = vmul.f32 %v11874_v46, %v3959_v29 }
0x2805   :  { %v3987_v22 = vrot.slane %v3979_v45, %v11825_v62 }
0x2806   :  { %v3967_v23 = vadd.f32 %v3963_v39, %v3879_v14 }
0x2807   :  { %v4047_v3 = vcombine.low %v3987_v22, %v3998_v54  ;;  %v4262_v54 = vrot.slane %v4254_v59, %v11825_v62  ;;  %v11894_v31 = vpop.permute.xlu0 %3648 }
0x2808   :  { %9570 = vset.pattern.permute.xlu1 %v13125_v21 }
0x2809   :  { %3945 = vperm.xlu1 %9570, %v11714_v24   ;;  %v4067_v15 = vpop.permute.xlu1 %4066  ;;  %v4051_v63 = vmul.f32 %v11882_v57, %v4047_v3 }
0x280a   :  { %v4075_v19 = vrot.slane %v4067_v15, %v11825_v62  ;;  %v4174_v15 = vrot.slane %v11830_v4, %v11825_v62 }
0x280b   :  { %v4055_v29 = vadd.f32 %v4051_v63, %v3967_v23  ;;  %v8410_v63 = vcombine.low %v11703_v42, %v11703_v42  ;;  %v2971_v23 = vmax.f32 %v11603_v10, 0.0 }
0x280c   :  { %v4135_v16 = vcombine.low %v4075_v19, %v4086_v50  ;;  %v11901_v39 = vpop.permute.xlu0 %3571 }
0x280d   :  { %9571 = vset.pattern.permute.xlu1 %v10264_v6 }
0x280e   :  { %4110 = vperm.xlu1 %9571, %v11712_v2   ;;  %v4155_v45 = vpop.permute.xlu1 %4154  ;;  %v4139_v4 = vmul.f32 0.0, %v4135_v16 }
0x280f   :  { %v4163_v13 = vrot.slane %v4155_v45, %v11825_v62 }
0x2810   :  { %v4143_v3 = vadd.f32 %v4139_v4, %v4055_v29  ;;  %v2970_v4 = vmax.f32 %v11605_v25, 0.0 }
0x2811   :  { %v4223_v22 = vcombine.low %v4163_v13, %v4174_v15 }
0x2812   :  { %9572 = vset.pattern.permute.xlu1 %v13121_v44 }
0x2813   :  { %4033 = vperm.xlu1 %9572, %v11714_v24   ;;  %v4243_v34 = vpop.permute.xlu1 %4242  ;;  %v4227_v19 = vmul.f32 0.0, %v4223_v22 }
0x2814   :  { %v4251_v26 = vrot.slane %v4243_v34, %v11825_v62  ;;  %v4427_v34 = vsel %vm2690_vm7, %v11706_v43, 0.0  ;;  %v2991_v43 = vmul.f32 %v11780_v28, %v2971_v23 }
0x2815   :  { %v4231_v58 = vadd.f32 %v4227_v19, %v4143_v3 }
0x2816   :  { %v4311_v45 = vcombine.low %v4251_v26, %v4262_v54  ;;  %v4429_v54 = vsel %vm4428_vm13, %v8410_v63, 0.0  ;;  %v11915_v26 = vpop.permute.xlu0 %3747 }
0x2817   :  { %9573 = vset.pattern.permute.xlu1 %v10265_v9  ;;  %v4430_v42 = vadd.f32 %v4429_v54, %v4427_v34 }
0x2818   :  { %4198 = vperm.xlu1 %9573, %v11712_v2   ;;  %v4331_v50 = vpop.permute.xlu1 %4330  ;;  %v4315_v13 = vmul.f32 0.0, %v4311_v45  ;;  %v2990_v45 = vmul.f32 %v11782_v38, %v2970_v4 }
0x2819   :  { %v4339_v59 = vrot.slane %v4331_v50, %v11825_v62 }
0x281a   :  { %v4319_v16 = vadd.f32 %v4315_v13, %v4231_v58  ;;  %v11923_v29 = vpop.permute.xlu0 %3835  ;;  %v9579_v50 = vpack.i.bf16 %v2991_v43, %v2990_v45  ;;  %v3569_v13 = vrot.slane %v11887_v18, %v11825_v62 }
0x281b   :  { %v4399_v15 = vcombine.low %v4339_v59, %v4350_v17 }
0x281c   :  { %9574 = vset.pattern.permute.xlu1 %v10264_v6 }
0x281d   :  { %v4403_v14 = vmul.f32 0.0, %v4399_v15  ;;  %4121 = vperm.xlu1 %9574, %v11714_v24   ;;  %v3473_v9 = vpop.permute.xlu1 %3472  ;;  %v3657_v15 = vrot.slane %v11894_v31, %v11825_v62 }
0x281e   :  { %v11929_v17 = vpop.permute.xlu0 %3923 }
0x281f   :  { %v4407_v51 = vadd.f32 %v4403_v14, %v4319_v16 }
0x2821   :  { %9575 = vset.pattern.permute.xlu1 %v10266_v20  ;;  %8662 = vmatprep.mubr.msk.f32.mxu0 %vm4442_vm12, %v4407_v51  ;;  %v11908_v22 = vpop.permute.xlu1 %3483  ;;  %v4443_v6 = vsel %vm4442_vm12, %v4407_v51, 0.0 }
0x2822   :  { %4286 = vperm.xlu1 %9575, %v11712_v2   ;;  %4444 = vadd.xlane.f32.xlu0 %v4443_v6  ;;  %v11938_v38 = vpop.permute.xlu0 %4011  ;;  %v3492_v27 = vrot.slane %v11908_v22, %v11825_v62  ;;  %v3756_v22 = vrot.slane %v11915_v26, %v11825_v62 }
0x2826   :  { %9577 = vset.pattern.permute.xlu1 %v10268_v8  ;;  %4431 = vadd.xlane.f32.xlu0 %v4430_v42  ;;  %v3737_v20 = vpop.permute.xlu1 %3736  ;;  %v3440_v8 = vadd.s32 8, %v10987_v52  ;;  %v11953_v18 = vpop.permute.xlu0 %4099 }
0x2827   :  { %4374 = vperm.xlu1 %9577, %v11712_v2   ;;  %v3481_v2 = vrot.slane %v3473_v9, %v11825_v62  ;;  %v3745_v16 = vrot.slane %v3737_v20, %v11825_v62 }
0x2828   :  { %v3442_v10 = vsub.s32 %v3440_v8, %v11079_v61 }
0x282a   :  { %vm3444_vm13 = vcmp.eq.s32.totalorder %v3442_v10, 1  ;;  %vm3532_vm14 = vcmp.eq.s32.totalorder %v3442_v10, 2  ;;  %vm3620_vm15 = vcmp.eq.s32.totalorder %v3442_v10, 3  ;;  %vm3708_vm2 = vcmp.eq.s32.totalorder %v3442_v10, 4  ;;  %v11970_v8 = vpop.permute.xlu0 %4187 }
0x282b   :  { %4385 = vperm.xlu1 %9577, %v11714_v24   ;;  %v11926_v19 = vpop.permute.xlu1 %3659  ;;  %v11936_v28 = vsel %vm3444_vm13, 1.0, %v13127_v0  ;;  %v11943_v59 = vsel %vm3532_vm14, 1.0, %v13127_v0  ;;  %vm3796_vm13 = vcmp.eq.s32.totalorder %v3442_v10, 5  ;;  %v11951_v9 = vsel %vm3620_vm15, 1.0, %v13127_v0 }
0x282c   :  { %v3524_v61 = vmul.f32 %v11936_v28, %v3481_v2  ;;  %v3612_v58 = vmul.f32 %v11943_v59, %v3569_v13  ;;  %v11956_v63 = vsel %vm3708_vm2, 1.0, %v13127_v0  ;;  %vm3884_vm14 = vcmp.eq.s32.totalorder %v3442_v10, 6 }
0x282d   :  { %v11960_v34 = vsel %vm3796_vm13, 1.0, %v13127_v0  ;;  %v3700_v31 = vmul.f32 %v11951_v9, %v3657_v15  ;;  %v3788_v54 = vmul.f32 %v11956_v63, %v3745_v16  ;;  %vm3972_vm15 = vcmp.eq.s32.totalorder %v3442_v10, 7 }
0x282e   :  { %v3616_v51 = vadd.f32 %v3612_v58, %v3524_v61  ;;  %v11966_v20 = vsel %vm3884_vm14, 1.0, %v13127_v0  ;;  %vm4060_vm2 = vcmp.eq.s32.totalorder %v3442_v10, 8  ;;  %vm4148_vm13 = vcmp.eq.s32.totalorder %v3442_v10, 9 }
0x282f   :  { %9580 = vrot.lane.b32.xlu1 %v9579_v50, %s10257_s11  ;;  %v11973_v50 = vsel %vm3972_vm15, 1.0, %v13127_v0  ;;  %v11978_v13 = vsel %vm4060_vm2, 1.0, %v13127_v0  ;;  %vm4324_vm14 = vcmp.eq.s32.totalorder %v3442_v10, 11  ;;  %vm4236_vm15 = vcmp.eq.s32.totalorder %v3442_v10, 10 }
0x2830   :  { %v3825_v25 = vpop.permute.xlu1 %3824  ;;  %9589 = vset.pattern.permute.xlu1 %v13120_v36  ;;  %v3704_v4 = vadd.f32 %v3700_v31, %v3616_v51  ;;  %v11984_v31 = vsel %vm4148_vm13, 1.0, %v13127_v0  ;;  %vm4446_vm2 = vcmask 125952   ;;  %vm10271_vm13 = vmmov 0  }
0x2831   :  { %v3833_v6 = vrot.slane %v3825_v25, %v11825_v62 }
0x2832   :  { %v3792_v25 = vadd.f32 %v3788_v54, %v3704_v4 }
0x2833   :  { %v3876_v43 = vmul.f32 %v11960_v34, %v3833_v6  ;;  %v4353_v6 = vpop.permute.xlu0 %4352 }
0x2834   :  { %v4361_v4 = vrot.slane %v4353_v6, %v11825_v62 }
0x2835   :  { %v3913_v3 = vpop.permute.xlu1 %3912  ;;  %v3880_v61 = vadd.f32 %v3876_v43, %v3792_v25  ;;  %v11990_v25 = vsel %vm4324_vm14, 1.0, %v13127_v0 }
0x2836   :  { %v3921_v42 = vrot.slane %v3913_v3, %v11825_v62  ;;  %v4404_v10 = vmul.f32 %v11990_v25, %v4361_v4 }
0x2838   :  { %v3964_v2 = vmul.f32 %v11966_v20, %v3921_v42 }
0x283a   :  { %v4001_v14 = vpop.permute.xlu1 %4000 }
0x283b   :  { %v4009_v45 = vrot.slane %v4001_v14, %v11825_v62  ;;  %v3968_v14 = vadd.f32 %v3964_v2, %v3880_v61  ;;  %v11993_v2 = vsel %vm4236_vm15, 1.0, %v13127_v0 }
0x283d   :  { %v4052_v58 = vmul.f32 %v11973_v50, %v4009_v45 }
0x283f   :  { %v4089_v23 = vpop.permute.xlu1 %4088  ;;  %v4056_v54 = vadd.f32 %v4052_v58, %v3968_v14 }
0x2840   :  { %v4097_v3 = vrot.slane %v4089_v23, %v11825_v62 }
0x2842   :  { %v4140_v51 = vmul.f32 %v11978_v13, %v4097_v3 }
0x2844   :  { %v4177_v15 = vpop.permute.xlu1 %4176  ;;  %v4144_v43 = vadd.f32 %v4140_v51, %v4056_v54 }
0x2845   :  { %v4185_v16 = vrot.slane %v4177_v15, %v11825_v62 }
0x2847   :  { %v4228_v42 = vmul.f32 %v11984_v31, %v4185_v16 }
0x2849   :  { %v4265_v23 = vpop.permute.xlu1 %4264  ;;  %v4232_v3 = vadd.f32 %v4228_v42, %v4144_v43 }
0x284a   :  { %v4273_v45 = vrot.slane %v4265_v23, %v11825_v62 }
0x284c   :  { %v4316_v61 = vmul.f32 %v11993_v2, %v4273_v45 }
0x284d   :  { %v11996_v15 = vpop.permute.xlu1 %4275 }
0x284e   :  { %v4320_v58 = vadd.f32 %v4316_v61, %v4232_v3 }
0x2850   :  { %v11999_v16 = vadd.f32 %v4404_v10, %v4320_v58  ;;  %v3671_v58 = vpop.permute.xlu0 %3670 }
0x2852   :  { %v12001_v14 = vpop.permute.xlu1 %4363  ;;  %v4447_v51 = vsel %vm4446_vm2, %v11999_v16, 0.0 }
0x2853   :  { %4425 = vadd.xlane.f32.xlu1 %v11696_v55  ;;  %4448 = vadd.xlane.f32.xlu0 %v4447_v51 }
0x2854   :  { %v3506_v44 = vpop.permute.xlu0 %3505 }
0x2855   :  { %v3514_v0 = vrot.slane %v3506_v44, %v11825_v62 }
0x2857   :  { %4435 = vadd.xlane.f32.xlu1 %v11726_v35  ;;  %v3495_v6 = vpop.permute.xlu1 %3494  ;;  %v3580_v35 = vrot.slane %v11901_v39, %v11825_v62 }
0x2858   :  { %v3503_v21 = vrot.slane %v3495_v6, %v11825_v62  ;;  %v3526_v6 = vmul.f32 %v11936_v28, %v3514_v0 }
0x285a   :  { %v3520_v47 = vcombine.low %v3492_v27, %v3503_v21  ;;  %v4210_v27 = vpop.permute.xlu0 %4209 }
0x285c   :  { %v3583_v54 = vpop.permute.xlu1 %3582 }
0x285d   :  { %v3591_v41 = vrot.slane %v3583_v54, %v11825_v62 }
0x285f   :  { %v3608_v60 = vcombine.low %v3580_v35, %v3591_v41  ;;  %v3668_v41 = vrot.slane %v11926_v19, %v11825_v62 }
0x2860   :  { %v3594_v42 = vpop.permute.xlu1 %3593 }
0x2861   :  { %v3602_v55 = vrot.slane %v3594_v42, %v11825_v62  ;;  %v3679_v42 = vrot.slane %v3671_v58, %v11825_v62 }
0x2863   :  { %v3614_v30 = vmul.f32 %v11943_v59, %v3602_v55  ;;  %v3613_v59 = vmul.f32 %v11842_v49, %v3608_v60  ;;  %v3696_v28 = vcombine.low %v3668_v41, %v3679_v42 }
0x2865   :  { %v3759_v23 = vpop.permute.xlu1 %3758  ;;  %v3618_v21 = vadd.f32 %v3614_v30, %v3526_v6 }
0x2866   :  { %v3767_v12 = vrot.slane %v3759_v23, %v11825_v62 }
0x2868   :  { %v3784_v26 = vcombine.low %v3756_v22, %v3767_v12  ;;  %v4020_v12 = vrot.slane %v11938_v38, %v11825_v62 }
0x286a   :  { %v3682_v43 = vpop.permute.xlu1 %3681 }
0x286b   :  { %v3690_v37 = vrot.slane %v3682_v43, %v11825_v62 }
0x286d   :  { %v3702_v44 = vmul.f32 %v11951_v9, %v3690_v37  ;;  %v3844_v37 = vrot.slane %v11923_v29, %v11825_v62  ;;  %v3525_v9 = vmul.f32 %v11846_v1, %v3520_v47  ;;  %v3701_v47 = vmul.f32 %v11849_v40, %v3696_v28 }
0x286f   :  { %v3847_v4 = vpop.permute.xlu1 %3846  ;;  %v3617_v30 = vadd.f32 %v3613_v59, %v3525_v9 }
0x2874   :  { %v3770_v45 = vpop.permute.xlu1 %3769 }
0x2875   :  { %v3778_v54 = vrot.slane %v3770_v45, %v11825_v62  ;;  %v3855_v45 = vrot.slane %v3847_v4, %v11825_v62 }
0x2877   :  { %v3790_v23 = vmul.f32 %v11956_v63, %v3778_v54  ;;  %v3872_v55 = vcombine.low %v3844_v37, %v3855_v45 }
0x2879   :  { %v3935_v3 = vpop.permute.xlu1 %3934 }
0x287a   :  { %v3943_v19 = vrot.slane %v3935_v3, %v11825_v62  ;;  %v4298_v3 = vpop.permute.xlu0 %4297 }
0x287e   :  { %v3858_v61 = vpop.permute.xlu1 %3857 }
0x287f   :  { %v3866_v43 = vrot.slane %v3858_v61, %v11825_v62  ;;  %v3706_v61 = vadd.f32 %v3702_v44, %v3618_v21  ;;  %v3877_v44 = vmul.f32 %v11866_v33, %v3872_v55 }
0x2881   :  { %v3878_v60 = vmul.f32 %v11960_v34, %v3866_v43  ;;  %v3794_v63 = vadd.f32 %v3790_v23, %v3706_v61  ;;  %v3789_v34 = vmul.f32 %v11861_v48, %v3784_v26 }
0x2883   :  { %v4023_v10 = vpop.permute.xlu1 %4022  ;;  %v3882_v42 = vadd.f32 %v3878_v60, %v3794_v63 }
0x2884   :  { %v4031_v29 = vrot.slane %v4023_v10, %v11825_v62  ;;  %v4218_v10 = vrot.slane %v4210_v27, %v11825_v62 }
0x2886   :  { %v4048_v43 = vcombine.low %v4020_v12, %v4031_v29  ;;  %v4372_v29 = vrot.slane %v12001_v14, %v11825_v62 }
0x2888   :  { %v3946_v36 = vpop.permute.xlu1 %3945  ;;  %v4053_v28 = vmul.f32 %v11882_v57, %v4048_v43 }
0x2889   :  { %v3954_v0 = vrot.slane %v3946_v36, %v11825_v62  ;;  %v3932_v36 = vrot.slane %v11929_v17, %v11825_v62  ;;  %v4108_v17 = vrot.slane %v11953_v18, %v11825_v62 }
0x288b   :  { %v3966_v35 = vmul.f32 %v11966_v20, %v3954_v0  ;;  %v3960_v54 = vcombine.low %v3932_v36, %v3943_v19  ;;  %v3705_v20 = vadd.f32 %v3701_v47, %v3617_v30  ;;  %v4230_v0 = vmul.f32 %v11984_v31, %v4218_v10 }
0x288d   :  { %v4111_v51 = vpop.permute.xlu1 %4110  ;;  %v3970_v22 = vadd.f32 %v3966_v35, %v3882_v42  ;;  %v3793_v45 = vadd.f32 %v3789_v34, %v3705_v20  ;;  %v3965_v18 = vmul.f32 %v11874_v46, %v3960_v54  ;;  %v9586_v54 = vpop.permute.xlu0 %9585 }
0x288e   :  { %v9587_v10 = vunpack.i.l.bf16 %v9586_v54 }
0x288f   :  { %v3881_v37 = vadd.f32 %v3877_v44, %v3793_v45  ;;  %v13135_v45 = vmov 0.0|0.0  }
0x2890   :  { %9143 = vmatprep.subr.bf16.mxu1 %v13135_v45 }
0x2892   :  { %v4034_v39 = vpop.permute.xlu1 %4033 }
0x2893   :  { %v4042_v4 = vrot.slane %v4034_v39, %v11825_v62  ;;  %v4119_v39 = vrot.slane %v4111_v51, %v11825_v62  ;;  %v4196_v51 = vrot.slane %v11970_v8, %v11825_v62  ;;  %v4284_v8 = vrot.slane %v11996_v15, %v11825_v62 }
0x2895   :  { %v4054_v6 = vmul.f32 %v11973_v50, %v4042_v4  ;;  %v4306_v50 = vrot.slane %v4298_v3, %v11825_v62  ;;  %v4136_v21 = vcombine.low %v4108_v17, %v4119_v39  ;;  %v3969_v4 = vadd.f32 %v3965_v18, %v3881_v37 }
0x2897   :  { %v4199_v58 = vpop.permute.xlu1 %4198  ;;  %v4058_v27 = vadd.f32 %v4054_v6, %v3970_v22  ;;  %v4318_v60 = vmul.f32 %v11993_v2, %v4306_v50  ;;  %v9588_v6 = vunpack.i.h.bf16 %v9586_v54  ;;  %v4660_v50 = vld [vmem:[#allocation8 + $0x8] sm:$0xff] }
0x2898   :  { %v4207_v41 = vrot.slane %v4199_v58, %v11825_v62  ;;  %v4141_v58 = vmul.f32 0.0, %v4136_v21  ;;  %v4662_v21 = vld [vmem:[#allocation8 + $0x18] sm:$0xff] }
0x2899   :  { %v9139_v22 = vpack.c.bf16 %v9588_v6, %v9587_v10  ;;  %v4785_v6 = vld [vmem:[%s13101_s13 + $0x10] sm:$0xff] }
0x289a   :  { %v4224_v9 = vcombine.low %v4196_v51, %v4207_v41  ;;  %v4659_v51 = vld [vmem:[#allocation8] sm:$0xff] }
0x289b   :  { %v9144_v18 = vpack.c.bf16 %v4660_v50, %v4659_v51 }
0x289c   :  { %v4122_v38 = vpop.permute.xlu1 %4121  ;;  %v4229_v36 = vmul.f32 0.0, %v4224_v9 }
0x289d   :  { %v4130_v59 = vrot.slane %v4122_v38, %v11825_v62  ;;  %9145 = vmatpush3.bf16.msra.mxu1 %v9144_v18 }
0x289e   :  { %9146 = vmatprep.subr.bf16.mxu1 %v13135_v45 }
0x289f   :  { %v4142_v23 = vmul.f32 %v11978_v13, %v4130_v59  ;;  %v4057_v13 = vadd.f32 %v4053_v28, %v3969_v4 }
0x28a1   :  { %v4146_v26 = vadd.f32 %v4142_v23, %v4058_v27  ;;  %v4287_v61 = vpop.permute.xlu1 %4286  ;;  %v4145_v35 = vadd.f32 %v4141_v58, %v4057_v13  ;;  %v13160_v27 = vmov 0.0  }
0x28a2   :  { %v4295_v19 = vrot.slane %v4287_v61, %v11825_v62  ;;  %8680 = vmatprep.mubr.msk.f32.mxu1 %vm10271_vm13, %v13160_v27 }
0x28a3   :  { %v4234_v30 = vadd.f32 %v4230_v0, %v4146_v26  ;;  %v4233_v15 = vadd.f32 %v4229_v36, %v4145_v35 }
0x28a4   :  { %v4312_v55 = vcombine.low %v4284_v8, %v4295_v19  ;;  %v12087_v8 = vld [vmem:[%s13094_s6] ss:$0 sm:$0xff] }
0x28a5   :  { %v4322_v31 = vadd.f32 %v4318_v60, %v4234_v30 }
0x28a6   :  { %v4375_v63 = vpop.permute.xlu1 %4374  ;;  %v4317_v12 = vmul.f32 0.0, %v4312_v55 }
0x28a7   :  { %v4383_v47 = vrot.slane %v4375_v63, %v11825_v62 }
0x28a8   :  { %v4321_v42 = vadd.f32 %v4317_v12, %v4233_v15 }
0x28a9   :  { %v4400_v34 = vcombine.low %v4372_v29, %v4383_v47 }
0x28aa   :  { %v4386_v3 = vpop.permute.xlu1 %4385 }
0x28ab   :  { %v4405_v2 = vmul.f32 0.0, %v4400_v34  ;;  %v4394_v14 = vrot.slane %v4386_v3, %v11825_v62 }
0x28ad   :  { %v4409_v39 = vadd.f32 %v4405_v2, %v4321_v42  ;;  %v4406_v41 = vmul.f32 %v11990_v25, %v4394_v14  ;;  %v4661_v25 = vld [vmem:[#allocation8 + $0x10] sm:$0xff]  ;;  %v4783_v2 = vld [vmem:[%s13101_s13] sm:$0xff]  ;;  %v4784_v42 = vld [vmem:[%s13101_s13 + $0x8] sm:$0xff] }
0x28ae   :  { %v9581_v17 = vpop.permute.xlu1 %9580  ;;  %v4789_v14 = vld [vmem:[%s13101_s13 + $0x30] sm:$0xff] }
0x28af   :  { %v9583_v20 = vunpack.i.h.bf16 %v9581_v17  ;;  %v9582_v44 = vunpack.i.l.bf16 %v9581_v17  ;;  %v4450_v38 = vsel %vm4442_vm12, %v4409_v39, 0.0  ;;  %v12073_v59 = vadd.f32 %v4406_v41, %v4322_v31  ;;  %v4445_v23 = vpop.xlane.xlu0 %4444  ;;  %v4786_v17 = vld [vmem:[%s13101_s13 + $0x18] sm:$0xff]  ;;  %v12130_v41 = vld [vmem:[#allocation10] ss:$0 sm:$0xff] }
0x28b0   :  { %4451 = vadd.xlane.f32.xlu1 %v4450_v38  ;;  %v9153_v10 = vpack.c.bf16 %v4786_v17, %v4785_v6 }
0x28b1   :  { %v9135_v43 = vpack.c.bf16 %v9583_v20, %v9582_v44  ;;  %v4787_v20 = vld [vmem:[%s13101_s13 + $0x20] sm:$0xff]  ;;  %v4788_v44 = vld [vmem:[%s13101_s13 + $0x28] sm:$0xff] }
0x28b2   :  { %v9156_v38 = vpack.c.bf16 %v4788_v44, %v4787_v20 }
0x28b3   :  { %9136 = vmatprep.subr.bf16.mxu0 %v9135_v43  ;;  %v4432_v37 = vpop.xlane.xlu0 %4431 }
0x28b4   :  { %9138 = vmatpush3.bf16.msra.mxu0 %v9135_v43  ;;  %v4790_v43 = vld [vmem:[%s13101_s13 + $0x38] sm:$0xff] }
0x28b5   :  { %9140 = vmatprep.subr.bf16.mxu0 %v9139_v22 }
0x28b7   :  { %8663 = vmatmul.mubr.msk.f32.vlgmr.msra.gmra.mrb[22].mxu0 %vm4442_vm12, %v11999_v16  ;;  %v9147_v16 = vpack.c.bf16 %v4662_v21, %v4661_v25 }
0x28b8   :  { %9142 = vmatpush3.bf16.msra.mxu0 %v9139_v22  ;;  %8669 = vmatprep.mubr.msk.f32.mxu0 %vm4442_vm12, %v4409_v39  ;;  %v9150_v39 = vpack.c.bf16 %v4784_v42, %v4783_v2  ;;  %v9159_v22 = vpack.c.bf16 %v4790_v43, %v4789_v14  ;;  %v4453_v14 = vsel %vm4446_vm2, %v12073_v59, 0.0  ;;  %v8433_v43 = vld [vmem:[%s13149_s14 + $0x58] sm:$0xff] }
0x28b9   :  { %9149 = vmatprep.subr.bf16.mxu0 %v13135_v45  ;;  %9148 = vmatpush3.bf16.msra.mxu1 %v9147_v16 }
0x28bb   :  { %8670 = vmatmul.mubr.msk.f32.vlgmr.msra.gmra.mrb[24].mxu0 %vm4442_vm12, %v12073_v59  ;;  %v8432_v59 = vld [vmem:[%s13149_s14 + $0x50] sm:$0xff] }
0x28bc   :  { %8705 = vmatprep.mubr.msk.f32.mxu0 %vm10271_vm13, %v13160_v27  ;;  %9151 = vmatpush3.bf16.msra.mxu0 %v9150_v39 }
0x28bd   :  { %9152 = vmatprep.subr.bf16.mxu0 %v13135_v45 }
0x28c0   :  { %9154 = vmatpush3.bf16.msra.mxu0 %v9153_v10 }
0x28c1   :  { %9155 = vmatprep.subr.bf16.mxu0 %v13135_v45 }
0x28c4   :  { %9157 = vmatpush3.bf16.msra.mxu0 %v9156_v38 }
0x28c5   :  { %9158 = vmatprep.subr.bf16.mxu0 %v13135_v45 }
0x28c8   :  { %9160 = vmatpush3.bf16.msra.mxu0 %v9159_v22  ;;  %v8430_v22 = vld [vmem:[%s13149_s14 + $0x40] sm:$0xff] }
0x28e0   :  { %v4426_v0 = vpop.xlane.xlu1 %4425  ;;  %v4449_v9 = vpop.xlane.xlu0 %4448 }
0x28e1   :  { %v4456_v26 = vsub.f32 %v4426_v0, %v4445_v23  ;;  %v4457_v19 = vsub.f32 %v4432_v37, %v4449_v9 }
0x28e3   :  { %v4467_v58 = vmul.f32 %v12087_v8, %v4456_v26  ;;  %v4468_v55 = vmul.f32 %v12087_v8, %v4457_v19 }
0x28e4   :  { %v4436_v28 = vpop.xlane.xlu1 %4435 }
0x293d   :  { %v4452_v61 = vpop.xlane.xlu1 %4451 }
0x293e   :  { %v4458_v60 = vsub.f32 %v4436_v28, %v4452_v61 }
0x2940   :  { %v4469_v29 = vmul.f32 %v12087_v8, %v4458_v60 }
0x298a   :  { %v8664_v4 = vpop.f32.mrb[22].mxu0 }
0x298b   :  { %v4551_v30 = vpop.f32.mrb[23].mxu0  ;;  %v4557_v36 = vadd.f32 %v8664_v4, %v4468_v55  ;;  %v12140_v55 = vld [vmem:[#allocation11] ss:$0 sm:$0xff] }
0x298c   :  { %v4552_v13 = vadd.f32 %v4551_v30, %v4467_v58 }
0x298d   :  { %v4650_v15 = vmul.f32 0.005, %v4557_v36 }
0x298e   :  { %v4649_v31 = vmul.f32 0.005, %v4552_v13  ;;  %v12091_v63 = vpop.f32.mrb[24].mxu0 }
0x298f   :  { %v4640_v35 = vpop.f32.mrb[25].mxu0 }
0x2990   :  { %v4657_v12 = vcombine.high %v4649_v31, %v4649_v31  ;;  %v4641_v47 = vadd.f32 %v4640_v35, %v4469_v29 }
0x2992   :  { %v4670_v34 = vcombine.low %v4649_v31, %v4657_v12  ;;  %v12094_v3 = vmul.f32 0.005, %v4641_v47 }
0x2994   :  { %v4671_v54 = vcombine.low %v4650_v15, %v12094_v3  ;;  %8681 = vmatmul.mubr.msk.f32.vlgmr.msra.gmra.mrb[34].mxu1 %vm146_vm0, %v4670_v34  ;;  %v4437_v34 = vsel %vm2690_vm7, %v11714_v24, 0.0 }
0x2995   :  { %8683 = vmatprep.mubr.msk.f32.mxu1 %vm10271_vm13, %v13160_v27 }
0x2998   :  { %8684 = vmatmul.mubr.msk.f32.gmra.mrb[36].mxu1 %vm146_vm0, %v4671_v54  ;;  %v4439_v54 = vadd.f32 %v11721_v32, %v4437_v34  ;;  %v8431_v32 = vld [vmem:[%s13149_s14 + $0x48] sm:$0xff] }
0x2999   :  { %8686 = vmatprep.mubr.msk.f32.mxu1 %vm10271_vm13, %v13160_v27 }
0x2a67   :  { %v4745_v51 = vpop.f32.mrb[34].mxu1 }
0x2a68   :  { %v4746_v50 = vadd.f32 %v12130_v41, %v4745_v51  ;;  %v8682_v18 = vpop.f32.mrb[35].mxu1  ;;  %v9161_v51 = vpack.c.bf16 %v8433_v43, %v8431_v32  ;;  %v12206_v43 = vsub.s32 2, %v10987_v52 }
0x2a69   :  { %v8437_v18 = vld [vmem:[%s13149_s14 + $0x78] sm:$0xff] }
0x2a6a   :  { %v8423_v25 = vmul.f32 -1.702, %v4746_v50  ;;  %9162 = vmatprep.subr.bf16.mxu1 %v9161_v51  ;;  %v12212_v51 = vsub.s32 3, %v10987_v52 }
0x2a6b   :  { %v4750_v21 = vpop.f32.mrb[36].mxu1 }
0x2a6c   :  { %v4765_v16 = vmul.f32 1.442695, %v8423_v25  ;;  %v4751_v23 = vadd.f32 %v12130_v41, %v4750_v21  ;;  %v8685_v0 = vpop.f32.mrb[37].mxu1  ;;  %v9163_v25 = vpack.c.bf16 %v8432_v59, %v8430_v22  ;;  %v12209_v22 = vsub.s32 6, %v10987_v52 }
0x2a6e   :  { %9870 = vpow2.f32 %v4765_v16  ;;  %v8424_v37 = vmul.f32 -1.702, %v4751_v23  ;;  %v8434_v16 = vld [vmem:[%s13149_s14 + $0x60] sm:$0xff]  ;;  %9164 = vmatpush1.bf16.msra.mxu1 %v9163_v25 }
0x2a70   :  { %v4767_v28 = vmul.f32 1.442695, %v8424_v37 }
0x2a72   :  { %9872 = vpow2.f32 %v4767_v28 }
0x2a78   :  { %v9871_v9 = vpop.eup %9870 }
0x2a79   :  { %v4771_v26 = vadd.f32 1.0, %v9871_v9 }
0x2a7b   :  { %9874 = vrcp.f32 %v4771_v26 }
0x2a7c   :  { %v9873_v61 = vpop.eup %9872 }
0x2a7d   :  { %v4772_v19 = vadd.f32 1.0, %v9873_v61 }
0x2a7f   :  { %9876 = vrcp.f32 %v4772_v19 }
0x2a85   :  { %v9875_v60 = vpop.eup %9874 }
0x2a86   :  { %v4780_v4 = vmul.f32 %v9875_v60, %v4746_v50  ;;  %v8435_v50 = vld [vmem:[%s13149_s14 + $0x68] sm:$0xff] }
0x2a87   :  { %v9165_v21 = vpack.c.bf16 %v8437_v18, %v8435_v50  ;;  %v12216_v18 = vsub.s32 7, %v10987_v52 }
0x2a88   :  { %8706 = vmatmul.mubr.msk.f32.vlgmr.msra.gmra.mrb[26].mxu0 %vm406_vm3, %v4780_v4 }
0x2a89   :  { %v9877_v58 = vpop.eup %9876  ;;  %8708 = vmatprep.mubr.msk.f32.mxu0 %vm10271_vm13, %v13160_v27  ;;  %9166 = vmatprep.subr.bf16.mxu1 %v9165_v21 }
0x2a8a   :  { %v4781_v30 = vmul.f32 %v9877_v58, %v4751_v23  ;;  %v8436_v23 = vld [vmem:[%s13149_s14 + $0x70] sm:$0xff] }
0x2a8b   :  { %v9167_v0 = vpack.c.bf16 %v8436_v23, %v8434_v16 }
0x2a8c   :  { %8709 = vmatmul.mubr.msk.f32.gmra.mrb[28].mxu0 %vm406_vm3, %v4781_v30 }
0x2a8d   :  { %8711 = vmatprep.mubr.msk.f32.mxu0 %vm10271_vm13, %v13160_v27  ;;  %9168 = vmatpush1.bf16.msra.mxu1 %v9167_v0 }
0x2b5b   :  { %v4873_v13 = vpop.f32.mrb[26].mxu0 }
0x2b5c   :  { %v4874_v36 = vadd.f32 %v12140_v55, %v4873_v13  ;;  %v8707_v31 = vpop.f32.mrb[27].mxu0 }
0x2b5e   :  { %v4887_v29 = vsel %vm146_vm0, %v4874_v36, 0.0 }
0x2b5f   :  { %4888 = vadd.xlane.f32.xlu0 %v4887_v29  ;;  %v4878_v35 = vpop.f32.mrb[28].mxu0 }
0x2b60   :  { %v4879_v12 = vadd.f32 %v12140_v55, %v4878_v35  ;;  %v8710_v47 = vpop.f32.mrb[29].mxu0 }
0x2b62   :  { %v4890_v15 = vsel %vm146_vm0, %v4879_v12, 0.0 }
0x2b63   :  { %4891 = vadd.xlane.f32.xlu1 %v4890_v15 }
0x2b67   :  { %4440 = vadd.xlane.f32.xlu1 %v4439_v54 }
0x2bec   :  { %v4889_v2 = vpop.xlane.xlu0 %4888 }
0x2bed   :  { %v4896_v42 = vmul.f32 0.03125, %v4889_v2 }
0x2bef   :  { %v4899_v39 = vsub.f32 %v4874_v36, %v4896_v42  ;;  %v4658_v36 = vcombine.high %v12094_v3, %v12094_v3 }
0x2bf0   :  { %v4892_v6 = vpop.xlane.xlu1 %4891 }
0x2bf1   :  { %v4897_v17 = vmul.f32 0.03125, %v4892_v6  ;;  %v4902_v10 = vmul.f32 %v4899_v39, %v4899_v39 }
0x2bf3   :  { %v4900_v20 = vsub.f32 %v4879_v12, %v4897_v17  ;;  %v4905_v44 = vsel %vm146_vm0, %v4902_v10, 0.0 }
0x2bf4   :  { %4906 = vadd.xlane.f32.xlu0 %v4905_v44  ;;  %v4441_v37 = vpop.xlane.xlu1 %4440 }
0x2bf5   :  { %v4903_v38 = vmul.f32 %v4900_v20, %v4900_v20 }
0x2bf7   :  { %v4908_v24 = vsel %vm146_vm0, %v4903_v38, 0.0 }
0x2bf8   :  { %4454 = vadd.xlane.f32.xlu0 %v4453_v14  ;;  %4909 = vadd.xlane.f32.xlu1 %v4908_v24  ;;  %v12202_v14 = vsub.s32 5, %v10987_v52 }
0x2c81   :  { %v4907_v28 = vpop.xlane.xlu0 %4906 }
0x2c82   :  { %v4914_v9 = vmul.f32 0.03125, %v4907_v28 }
0x2c84   :  { %v4917_v26 = vadd.f32 1e-05, %v4914_v9 }
0x2c85   :  { %v4455_v61 = vpop.xlane.xlu0 %4454  ;;  %v4910_v19 = vpop.xlane.xlu1 %4909 }
0x2c86   :  { %9878 = vrsqrt.f32 %v4917_v26  ;;  %v4459_v60 = vsub.f32 %v4441_v37, %v4455_v61  ;;  %v4915_v4 = vmul.f32 0.03125, %v4910_v19 }
0x2c88   :  { %v4470_v58 = vmul.f32 %v12087_v8, %v4459_v60  ;;  %v4918_v30 = vadd.f32 1e-05, %v4915_v4 }
0x2c8a   :  { %v4646_v13 = vadd.f32 %v12091_v63, %v4470_v58  ;;  %9880 = vrsqrt.f32 %v4918_v30  ;;  %v8438_v63 = vld [vmem:[%s13150_s30 + $0x2] sm:$0x3] }
0x2c8b   :  { %v12192_v54 = vrot.slane %v8438_v63, %v10990_v53  ;;  %v12195_v2 = vrot.slane %v8438_v63, %v10999_v56 }
0x2c8c   :  { %v4652_v31 = vmul.f32 0.005, %v4646_v13 }
0x2c8e   :  { %v4672_v29 = vcombine.low %v4658_v36, %v4652_v31 }
0x2c90   :  { %v9879_v35 = vpop.eup %9878  ;;  %8687 = vmatmul.mubr.msk.f32.gmra.mrb[38].mxu1 %vm146_vm0, %v4672_v29 }
0x2c91   :  { %v4923_v12 = vmul.f32 %v9879_v35, %v4899_v39  ;;  %5021 = vmatprep.mubr.f32.mxu1 %v13160_v27 }
0x2c94   :  { %v9881_v47 = vpop.eup %9880  ;;  %8439 = vmatmul.mubr.msk.f32.vlgmr.msra.gmra.mrb[40].mxu1 %vm146_vm0, %v4923_v12 }
0x2c95   :  { %5027 = vmatprep.mubr.f32.mxu1 %v13160_v27  ;;  %v4924_v8 = vmul.f32 %v9881_v47, %v4900_v20 }
0x2c98   :  { %8440 = vmatmul.mubr.msk.f32.gmra.mrb[42].mxu1 %vm146_vm0, %v4924_v8 }
0x2c99   :  { %5033 = vmatprep.mubr.f32.mxu1 %v13160_v27 }
0x2d63   :  { %v4755_v3 = vpop.f32.mrb[38].mxu1 }
0x2d64   :  { %v4756_v15 = vadd.f32 %v12130_v41, %v4755_v3  ;;  %v8688_v34 = vpop.f32.mrb[39].mxu1 }
0x2d66   :  { %v8425_v42 = vmul.f32 -1.702, %v4756_v15 }
0x2d67   :  { %v5023_v39 = vpop.f32.mrb[40].mxu1 }
0x2d68   :  { %v4769_v6 = vmul.f32 1.442695, %v8425_v42  ;;  %v5024_v17 = vadd.f32 %v5023_v39, %v12192_v54  ;;  %v5025_v10 = vpop.f32.mrb[41].mxu1 }
0x2d69   :  { %v5026_v20 = vadd.f32 %v5025_v10, %v12195_v2 }
0x2d6a   :  { %9882 = vpow2.f32 %v4769_v6 }
0x2d6b   :  { %v5046_v44 = vcombine.low %v5024_v17, %v5026_v20  ;;  %v12199_v38 = vcombine.high %v5024_v17, %v5026_v20  ;;  %v5029_v41 = vpop.f32.mrb[42].mxu1 }
0x2d6c   :  { %v5030_v24 = vadd.f32 %v5029_v41, %v12192_v54  ;;  %v5031_v32 = vpop.f32.mrb[43].mxu1 }
0x2d6d   :  { %v8442_v59 = vmul.f32 -1.442695, %v5046_v44  ;;  %v5032_v50 = vadd.f32 %v5031_v32, %v12195_v2  ;;  %v5151_v16 = vrot.slane %v5046_v44, %v10999_v56  ;;  %v5155_v23 = vrot.slane %v5046_v44, %v12202_v14 }
0x2d6e   :  { %v5305_v0 = vrot.slane %v5046_v44, %v12206_v43  ;;  %v5309_v37 = vrot.slane %v5046_v44, %v12209_v22  ;;  %v5445_v28 = vrot.slane %v5046_v44, %v12212_v51  ;;  %v5449_v19 = vrot.slane %v5046_v44, %v12216_v18 }
0x2d6f   :  { %9884 = vpow2.f32 %v8442_v59  ;;  %v12218_v25 = vcombine.low %v5030_v24, %v5032_v50  ;;  %v5049_v21 = vcombine.high %v5030_v24, %v5032_v50  ;;  %v5058_v50 = vld [vmem:[#allocation2 + $0x98] sm:$0xff] }
0x2d71   :  { %v8443_v9 = vmul.f32 -1.442695, %v5049_v21  ;;  %v5159_v26 = vrot.slane %v5049_v21, %v10999_v56  ;;  %v5163_v61 = vrot.slane %v5049_v21, %v12202_v14  ;;  %v5313_v60 = vrot.slane %v5049_v21, %v12206_v43 }
0x2d72   :  { %v5317_v4 = vrot.slane %v5049_v21, %v12209_v22  ;;  %v5453_v58 = vrot.slane %v5049_v21, %v12212_v51  ;;  %v5457_v30 = vrot.slane %v5049_v21, %v12216_v18 }
0x2d73   :  { %9886 = vpow2.f32 %v8443_v9  ;;  %v12233_v13 = vsel %vm392_vm1, %v5159_v26, %v5151_v16  ;;  %v12236_v36 = vsel %vm392_vm1, %v5163_v61, %v5155_v23  ;;  %v12239_v29 = vsel %vm392_vm1, %v5313_v60, %v5305_v0  ;;  %v5057_v23 = vld [vmem:[#allocation2 + $0x90] sm:$0xff]  ;;  %v5060_v0 = vld [vmem:[#allocation2 + $0xa8] sm:$0xff] }
0x2d74   :  { %v9883_v31 = vpop.eup %9882  ;;  %v12242_v35 = vsel %vm392_vm1, %v5317_v4, %v5309_v37  ;;  %v12245_v12 = vsel %vm392_vm1, %v5453_v58, %v5445_v28  ;;  %v12248_v47 = vsel %vm392_vm1, %v5457_v30, %v5449_v19  ;;  %v5062_v37 = vld [vmem:[#allocation2 + $0xb8] sm:$0xff]  ;;  %v5059_v30 = vld [vmem:[#allocation2 + $0xa0] sm:$0xff] }
0x2d75   :  { %v4773_v8 = vadd.f32 1.0, %v9883_v31  ;;  %v12260_v9 = vpack.c.bf16 %v5062_v37, %v5060_v0  ;;  %v5061_v31 = vld [vmem:[#allocation2 + $0xb0] sm:$0xff] }
0x2d77   :  { %9888 = vrcp.f32 %v4773_v8  ;;  %v5064_v8 = vld [vmem:[#allocation2 + $0xc8] sm:$0xff] }
0x2d78   :  { %9890 = vtanh.f32 %v5046_v44 }
0x2d79   :  { %v9885_v63 = vpop.eup %9884  ;;  %9892 = vtanh.f32 %v5049_v21  ;;  %v5055_v21 = vld [vmem:[#allocation2 + $0x80] sm:$0xff] }
0x2d7a   :  { %v5077_v3 = vadd.f32 1.0, %v9885_v63  ;;  %v12258_v28 = vpack.c.bf16 %v5057_v23, %v5055_v21  ;;  %v12273_v63 = vpack.c.bf16 %v5061_v31, %v5059_v30 }
0x2d7c   :  { %9894 = vrcp.f32 %v5077_v3  ;;  %v5066_v3 = vld [vmem:[#allocation2 + $0xd8] sm:$0xff] }
0x2d7d   :  { %v9887_v34 = vpop.eup %9886 }
0x2d7e   :  { %v5078_v42 = vadd.f32 1.0, %v9887_v34  ;;  %v12276_v34 = vpack.c.bf16 %v5066_v3, %v5064_v8 }
0x2d80   :  { %9896 = vrcp.f32 %v5078_v42  ;;  %v5063_v42 = vld [vmem:[#allocation2 + $0xc0] sm:$0xff] }
0x2d81   :  { %v9889_v39 = vpop.eup %9888 }
0x2d82   :  { %v9891_v6 = vpop.eup %9890  ;;  %v4782_v17 = vmul.f32 %v9889_v39, %v4756_v15  ;;  %v5056_v15 = vld [vmem:[#allocation2 + $0x88] sm:$0xff]  ;;  %v5065_v39 = vld [vmem:[#allocation2 + $0xd0] sm:$0xff] }
0x2d83   :  { %v9893_v10 = vpop.eup %9892  ;;  %v5089_v20 = vrot.slane %v9891_v6, 4  ;;  %v12256_v16 = vpack.c.bf16 %v5058_v50, %v5056_v15  ;;  %v5068_v6 = vld [vmem:[#allocation2 + $0xe8] sm:$0xff]  ;;  %v5127_v15 = vrot.slane %v11087_v5, 1 }
0x2d84   :  { %8712 = vmatmul.mubr.msk.f32.gmra.mrb[30].mxu0 %vm406_vm3, %v4782_v17  ;;  %v5090_v44 = vrot.slane %v9893_v10, 4  ;;  %v12282_v17 = vpack.c.bf16 %v5065_v39, %v5063_v42  ;;  %v5070_v10 = vld [vmem:[#allocation2 + $0xf8] sm:$0xff] }
0x2d85   :  { %5234 = vmatprep.mubr.f32.mxu0 %v13160_v27  ;;  %9170 = vmatprep.subr.bf16.mxu0 %v12256_v16 }
0x2d86   :  { %v9895_v41 = vpop.eup %9894  ;;  %9186 = vmatprep.subr.bf16.mxu1 %v12256_v16  ;;  %9172 = vmatpush1.bf16.msra.mxu0 %v12258_v28 }
0x2d87   :  { %v5093_v24 = vmul.f32 %v9895_v41, %v5089_v20  ;;  %9188 = vmatpush1.bf16.msra.mxu1 %v12258_v28  ;;  %9174 = vmatprep.subr.bf16.mxu0 %v12260_v9  ;;  %v5085_v26 = vmul.f32 0.0, %v9895_v41  ;;  %v12284_v20 = vpack.c.bf16 %v5070_v10, %v5068_v6 }
0x2d88   :  { %9190 = vmatprep.subr.bf16.mxu1 %v12260_v9 }
0x2d89   :  { %5097 = vrot.lane.b32.xlu0 %v5093_v24, %s10254_s0  ;;  %v5069_v24 = vld [vmem:[#allocation2 + $0xf0] sm:$0xff] }
0x2d8a   :  { %v9897_v32 = vpop.eup %9896  ;;  %9176 = vmatpush1.bf16.msra.mxu0 %v12273_v63 }
0x2d8b   :  { %v5094_v59 = vmul.f32 %v9897_v32, %v5090_v44  ;;  %v5086_v60 = vmul.f32 0.0, %v9897_v32  ;;  %9192 = vmatpush1.bf16.msra.mxu1 %v12273_v63  ;;  %9178 = vmatprep.subr.bf16.mxu0 %v12276_v34 }
0x2d8c   :  { %9194 = vmatprep.subr.bf16.mxu1 %v12276_v34 }
0x2d8d   :  { %5099 = vrot.lane.b32.xlu1 %v5094_v59, %s10254_s0  ;;  %5111 = vrot.lane.b32.xlu0 %v9897_v32, %s10254_s0 }
0x2d8e   :  { %9180 = vmatpush1.bf16.msra.mxu0 %v12282_v17 }
0x2d8f   :  { %9196 = vmatpush1.bf16.msra.mxu1 %v12282_v17  ;;  %9182 = vmatprep.subr.bf16.mxu0 %v12284_v20 }
0x2d90   :  { %9198 = vmatprep.subr.bf16.mxu1 %v12284_v20 }
0x2d91   :  { %5109 = vrot.lane.b32.xlu1 %v9895_v41, %s10254_s0  ;;  %v5067_v41 = vld [vmem:[#allocation2 + $0xe0] sm:$0xff] }
0x2d92   :  { %v12287_v44 = vpack.c.bf16 %v5069_v24, %v5067_v41 }
0x2d94   :  { %9184 = vmatpush1.bf16.msra.mxu0 %v12287_v44  ;;  %9200 = vmatpush1.bf16.msra.mxu1 %v12287_v44 }
0x2d95   :  { %9202 = vmatprep.subr.bf16.mxu0 %v12256_v16  ;;  %9218 = vmatprep.subr.bf16.mxu1 %v12256_v16 }
0x2dfb   :  { %v5098_v61 = vpop.permute.xlu0 %5097 }
0x2dfc   :  { %v12268_v19 = vadd.f32 %v5098_v61, %v5085_v26 }
0x2dfe   :  { %9898 = vtanh.f32 %v12268_v19 }
0x2dff   :  { %v5100_v4 = vpop.permute.xlu1 %5099  ;;  %v5112_v61 = vpop.permute.xlu0 %5111 }
0x2e00   :  { %v12271_v58 = vadd.f32 %v5100_v4, %v5086_v60  ;;  %v5114_v30 = vrot.slane %v5112_v61, 4 }
0x2e02   :  { %9900 = vtanh.f32 %v12271_v58 }
0x2e03   :  { %v5110_v37 = vpop.permute.xlu1 %5109 }
0x2e04   :  { %v5113_v26 = vrot.slane %v5110_v37, 4 }
0x2e08   :  { %v9899_v32 = vpop.eup %9898 }
0x2e09   :  { %5119 = vrot.lane.b32.xlu1 %v9899_v32, %s10254_s0 }
0x2e0c   :  { %v9901_v59 = vpop.eup %9900 }
0x2e0d   :  { %5121 = vrot.lane.b32.xlu0 %v9901_v59, %s10254_s0 }
0x2e11   :  { %5132 = vrot.lane.b32.xlu0 %v5127_v15, %s10254_s0 }
0x2e57   :  { %v4883_v50 = vpop.f32.mrb[30].mxu0 }
0x2e58   :  { %v4884_v21 = vadd.f32 %v12140_v55, %v4883_v50  ;;  %v8713_v23 = vpop.f32.mrb[31].mxu0 }
0x2e5a   :  { %v4893_v0 = vsel %vm146_vm0, %v4884_v21, 0.0 }
0x2e5b   :  { %4894 = vadd.xlane.f32.xlu1 %v4893_v0  ;;  %v5135_v0 = vmul.f32 %v12268_v19, %v11135_v11 }
0x2e7b   :  { %v5120_v60 = vpop.permute.xlu1 %5119 }
0x2e7c   :  { %v5125_v4 = vmul.f32 %v5120_v60, %v5113_v26  ;;  %v5259_v26 = vrot.slane %v5135_v0, %v10990_v53 }
0x2e7e   :  { %v5130_v8 = vmul.f32 %v11087_v5, %v5125_v4 }
0x2e7f   :  { %v5122_v31 = vpop.permute.xlu0 %5121 }
0x2e80   :  { %v5126_v3 = vmul.f32 %v5122_v31, %v5114_v30  ;;  %v5142_v39 = vrot.slane %v5130_v8, %v10990_v53 }
0x2e82   :  { %v5131_v42 = vmul.f32 %v5127_v15, %v5126_v3 }
0x2e83   :  { %v5133_v50 = vpop.permute.xlu0 %5132 }
0x2e84   :  { %v5146_v6 = vrot.slane %v5131_v42, %v10990_v53  ;;  %v5136_v23 = vmul.f32 %v5133_v50, %v12271_v58  ;;  %v5588_v50 = vsub.s32 4, %v10987_v52 }
0x2e86   :  { %v5147_v55 = vsel %vm392_vm1, %v5146_v6, %v5142_v39  ;;  %v5263_v37 = vrot.slane %v5136_v23, %v10990_v53 }
0x2e87   :  { %8444 = vmatmul.mubr.msk.f32.vlgmr.msra.gmra.mrb[32].mxu0 %vm406_vm3, %v5147_v55 }
0x2e88   :  { %9204 = vmatpush1.bf16.msra.mxu0 %v12258_v28  ;;  %5528 = vmatprep.mubr.f32.mxu0 %v13160_v27 }
0x2e89   :  { %9206 = vmatprep.subr.bf16.mxu0 %v12260_v9 }
0x2e8c   :  { %9208 = vmatpush1.bf16.msra.mxu0 %v12273_v63 }
0x2e8d   :  { %9210 = vmatprep.subr.bf16.mxu0 %v12276_v34 }
0x2e90   :  { %9212 = vmatpush1.bf16.msra.mxu0 %v12282_v17 }
0x2e91   :  { %9214 = vmatprep.subr.bf16.mxu0 %v12284_v20 }
0x2e94   :  { %9216 = vmatpush1.bf16.msra.mxu0 %v12287_v44 }
0x2e95   :  { %9234 = vmatprep.subr.bf16.mxu0 %v12256_v16 }
0x2ee8   :  { %v4895_v30 = vpop.xlane.xlu1 %4894 }
0x2ee9   :  { %v4898_v31 = vmul.f32 0.03125, %v4895_v30  ;;  %v5869_v30 = vrot.slane %v12199_v38, %v12209_v22 }
0x2eeb   :  { %v4901_v8 = vsub.f32 %v4884_v21, %v4898_v31  ;;  %v6005_v31 = vrot.slane %v12199_v38, %v12212_v51 }
0x2eed   :  { %v4904_v3 = vmul.f32 %v4901_v8, %v4901_v8 }
0x2eef   :  { %v4911_v58 = vsel %vm146_vm0, %v4904_v3, 0.0  ;;  %v6145_v3 = vrot.slane %v12218_v25, %v10990_v53 }
0x2f5a   :  { %v5236_v5 = vpop.f32.mrb[32].mxu0 }
0x2f5b   :  { %v5237_v10 = vadd.f32 %v5236_v5, %v12233_v13  ;;  %v5238_v41 = vpop.f32.mrb[33].mxu0 }
0x2f5c   :  { %v5239_v24 = vadd.f32 %v5238_v41, %v12236_v36  ;;  %v5264_v36 = vsel %vm392_vm1, %v5263_v37, %v5259_v26  ;;  %v5585_v26 = vrot.slane %v12199_v38, %v10990_v53 }
0x2f5d   :  { %v8445_v32 = vmul.f32 -1.442695, %v5237_v10 }
0x2f5e   :  { %v8446_v11 = vmul.f32 -1.442695, %v5239_v24 }
0x2f5f   :  { %9902 = vpow2.f32 %v8445_v32 }
0x2f60   :  { %9904 = vtanh.f32 %v5239_v24 }
0x2f69   :  { %v9903_v59 = vpop.eup %9902 }
0x2f6a   :  { %v5247_v15 = vadd.f32 1.0, %v9903_v59  ;;  %v9905_v13 = vpop.eup %9904 }
0x2f6c   :  { %9906 = vrcp.f32 %v5247_v15 }
0x2f6d   :  { %9908 = vpow2.f32 %v8446_v11 }
0x2f76   :  { %v9907_v61 = vpop.eup %9906 }
0x2f77   :  { %v5267_v60 = vmul.f32 %v9907_v61, %v9905_v13  ;;  %v5266_v4 = vmul.f32 %v9907_v61, %v5264_v36  ;;  %v9909_v19 = vpop.eup %9908  ;;  %v5589_v13 = vrot.slane %v12199_v38, %v5588_v50  ;;  %v5725_v61 = vrot.slane %v12199_v38, %v10999_v56 }
0x2f78   :  { %v5248_v42 = vadd.f32 1.0, %v9909_v19 }
0x2f79   :  { %5269 = vrot.lane.b32.xlu0 %v5267_v60, %s10254_s0  ;;  %v5729_v60 = vrot.slane %v12199_v38, %v12202_v14 }
0x2f7a   :  { %9910 = vrcp.f32 %v5248_v42  ;;  %v6285_v42 = vrot.slane %v12218_v25, %v10999_v56 }
0x2f84   :  { %v9911_v55 = vpop.eup %9910 }
0x2f98   :  { %4912 = vadd.xlane.f32.xlu0 %v4911_v58  ;;  %v6149_v58 = vrot.slane %v12218_v25, %v5588_v50 }
0x2feb   :  { %v5270_v39 = vpop.permute.xlu0 %5269 }
0x2fec   :  { %v12326_v6 = vadd.f32 %v5270_v39, %v5266_v4  ;;  %v5865_v4 = vrot.slane %v12199_v38, %v12206_v43  ;;  %v6289_v39 = vrot.slane %v12218_v25, %v12202_v14 }
0x2fee   :  { %9912 = vtanh.f32 %v12326_v6 }
0x2ff8   :  { %v9913_v5 = vpop.eup %9912 }
0x2ff9   :  { %v12329_v10 = vmul.f32 %v9913_v5, %v9911_v55  ;;  %v6427_v55 = vrot.slane %v12218_v25, %v12206_v43  ;;  %v6431_v5 = vrot.slane %v12218_v25, %v12209_v22 }
0x2ffb   :  { %5300 = vrot.lane.b32.xlu1 %v12329_v10, %s10254_s0 }
0x3025   :  { %v4913_v21 = vpop.xlane.xlu0 %4912 }
0x3026   :  { %v4916_v41 = vmul.f32 0.03125, %v4913_v21  ;;  %v6571_v21 = vrot.slane %v12218_v25, %v12216_v18 }
0x3028   :  { %v4919_v32 = vadd.f32 1e-05, %v4916_v41 }
0x302a   :  { %9914 = vrsqrt.f32 %v4919_v32 }
0x3034   :  { %v9915_v24 = vpop.eup %9914 }
0x3035   :  { %v4925_v59 = vmul.f32 %v9915_v24, %v4901_v8  ;;  %v6009_v8 = vrot.slane %v12199_v38, %v12216_v18  ;;  %v6567_v38 = vrot.slane %v12218_v25, %v12212_v51 }
0x3037   :  { %8441 = vmatmul.mubr.msk.f32.gmra.mrb[44].mxu1 %vm146_vm0, %v4925_v59 }
0x3038   :  { %5388 = vmatprep.mubr.f32.mxu1 %v13160_v27 }
0x306d   :  { %v5301_v15 = vpop.permute.xlu1 %5300 }
0x306e   :  { %8447 = vmatmul.mubr.msk.f32.vlgmr.msra.gmra.mrb[46].mxu1 %vm406_vm3, %v5301_v15 }
0x306f   :  { %9220 = vmatpush1.bf16.msra.mxu1 %v12258_v28  ;;  %5668 = vmatprep.mubr.f32.mxu1 %v13160_v27 }
0x3070   :  { %9222 = vmatprep.subr.bf16.mxu1 %v12260_v9 }
0x3073   :  { %9224 = vmatpush1.bf16.msra.mxu1 %v12273_v63 }
0x3074   :  { %9226 = vmatprep.subr.bf16.mxu1 %v12276_v34 }
0x3077   :  { %9228 = vmatpush1.bf16.msra.mxu1 %v12282_v17 }
0x3078   :  { %9230 = vmatprep.subr.bf16.mxu1 %v12284_v20 }
0x307b   :  { %9232 = vmatpush1.bf16.msra.mxu1 %v12287_v44 }
0x307c   :  { %9250 = vmatprep.subr.bf16.mxu1 %v12256_v16 }
0x310a   :  { %v5035_v23 = vpop.f32.mrb[44].mxu1 }
0x310b   :  { %v5036_v0 = vadd.f32 %v5035_v23, %v12192_v54  ;;  %v5037_v37 = vpop.f32.mrb[45].mxu1 }
0x310c   :  { %v5038_v36 = vadd.f32 %v5037_v37, %v12195_v2 }
0x310e   :  { %v5050_v11 = vcombine.low %v5036_v0, %v5038_v36  ;;  %v5051_v19 = vcombine.high %v5036_v0, %v5038_v36 }
0x3110   :  { %v5593_v41 = vrot.slane %v5050_v11, %v10990_v53  ;;  %v5597_v32 = vrot.slane %v5050_v11, %v5588_v50  ;;  %v5733_v24 = vrot.slane %v5050_v11, %v10999_v56  ;;  %v5737_v59 = vrot.slane %v5050_v11, %v12202_v14 }
0x3111   :  { %v5873_v15 = vrot.slane %v5050_v11, %v12206_v43  ;;  %v5877_v23 = vrot.slane %v5050_v11, %v12209_v22  ;;  %v6013_v0 = vrot.slane %v5050_v11, %v12212_v51  ;;  %v6017_v37 = vrot.slane %v5050_v11, %v12216_v18 }
0x3112   :  { %v12386_v36 = vsel %vm392_vm1, %v5593_v41, %v5585_v26  ;;  %v12389_v25 = vsel %vm392_vm1, %v5597_v32, %v5589_v13  ;;  %v12392_v45 = vsel %vm392_vm1, %v5733_v24, %v5725_v61  ;;  %v12395_v57 = vsel %vm392_vm1, %v5737_v59, %v5729_v60 }
0x3113   :  { %v12398_v46 = vsel %vm392_vm1, %v5873_v15, %v5865_v4  ;;  %v12401_v33 = vsel %vm392_vm1, %v5877_v23, %v5869_v30  ;;  %v12404_v11 = vsel %vm392_vm1, %v6013_v0, %v6005_v31  ;;  %v12407_v26 = vsel %vm392_vm1, %v6017_v37, %v6009_v8 }
0x3114   :  { %v6153_v13 = vrot.slane %v5051_v19, %v10990_v53  ;;  %v6157_v41 = vrot.slane %v5051_v19, %v5588_v50  ;;  %v6293_v61 = vrot.slane %v5051_v19, %v10999_v56  ;;  %v6297_v60 = vrot.slane %v5051_v19, %v12202_v14 }
0x3115   :  { %v6435_v32 = vrot.slane %v5051_v19, %v12206_v43  ;;  %v6439_v4 = vrot.slane %v5051_v19, %v12209_v22  ;;  %v6575_v30 = vrot.slane %v5051_v19, %v12212_v51  ;;  %v6579_v24 = vrot.slane %v5051_v19, %v12216_v18 }
0x3116   :  { %v12417_v31 = vsel %vm392_vm1, %v6153_v13, %v6145_v3  ;;  %v12420_v8 = vsel %vm392_vm1, %v6157_v41, %v6149_v58  ;;  %v12423_v50 = vsel %vm392_vm1, %v6293_v61, %v6285_v42  ;;  %v12426_v59 = vsel %vm392_vm1, %v6297_v60, %v6289_v39 }
0x3117   :  { %v12429_v14 = vsel %vm392_vm1, %v6435_v32, %v6427_v55  ;;  %v12432_v43 = vsel %vm392_vm1, %v6439_v4, %v6431_v5  ;;  %v12435_v22 = vsel %vm392_vm1, %v6575_v30, %v6567_v38  ;;  %v12438_v51 = vsel %vm392_vm1, %v6579_v24, %v6571_v21 }
0x3118   :  { %v5282_v61 = vrot.slane %v12329_v10, %v11179_v7  ;;  %vm13162_vm1 = vcmask 588800  }
0x311a   :  { %v5283_v4 = vcombine.high %v5282_v61, %v5282_v61 }
0x3141   :  { %v5390_v18 = vpop.f32.mrb[46].mxu1 }
0x3142   :  { %v5391_v3 = vadd.f32 %v5390_v18, %v12239_v29  ;;  %v5392_v58 = vpop.f32.mrb[47].mxu1 }
0x3143   :  { %v5393_v19 = vadd.f32 %v5392_v58, %v12242_v35  ;;  %v5297_v58 = vrot.slane %v5283_v4, %v11179_v7 }
0x3144   :  { %v8448_v42 = vmul.f32 -1.442695, %v5391_v3 }
0x3145   :  { %v8449_v38 = vmul.f32 -1.442695, %v5393_v19 }
0x3146   :  { %9916 = vpow2.f32 %v8448_v42 }
0x3147   :  { %9918 = vtanh.f32 %v5393_v19 }
0x3150   :  { %v9917_v39 = vpop.eup %9916 }
0x3151   :  { %v5401_v55 = vadd.f32 1.0, %v9917_v39  ;;  %v9919_v5 = vpop.eup %9918 }
0x3153   :  { %9920 = vrcp.f32 %v5401_v55 }
0x3154   :  { %9922 = vpow2.f32 %v8449_v38 }
0x315d   :  { %v9921_v15 = vpop.eup %9920 }
0x315e   :  { %v5409_v23 = vmul.f32 %v9921_v15, %v9919_v5  ;;  %v9923_v21 = vpop.eup %9922  ;;  %v5408_v29 = vmul.f32 %v9921_v15, %v12326_v6  ;;  %v5290_v6 = vrot.slane %v5282_v61, %v11179_v7 }
0x315f   :  { %v5402_v0 = vadd.f32 1.0, %v9923_v21 }
0x3160   :  { %5411 = vrot.lane.b32.xlu0 %v5409_v23, %s10254_s0 }
0x3161   :  { %9924 = vrcp.f32 %v5402_v0 }
0x316b   :  { %v9925_v35 = vpop.eup %9924 }
0x31d2   :  { %v5412_v37 = vpop.permute.xlu0 %5411 }
0x31d3   :  { %v5414_v13 = vadd.f32 %v5412_v37, %v5408_v29 }
0x31d5   :  { %9926 = vtanh.f32 %v5414_v13 }
0x31df   :  { %v9927_v41 = vpop.eup %9926 }
0x31e0   :  { %v5416_v60 = vmul.f32 %v9927_v41, %v9925_v35 }
0x31e2   :  { %5440 = vrot.lane.b32.xlu1 %v5416_v60, %s10254_s0  ;;  %v5424_v32 = vrot.slane %v5416_v60, %v11179_v7 }
0x31e4   :  { %v5425_v30 = vcombine.high %v5424_v32, %v5424_v32  ;;  %v5432_v24 = vrot.slane %v5424_v32, %v11179_v7 }
0x31e6   :  { %v5439_v18 = vrot.slane %v5425_v30, %v11179_v7  ;;  %v6937_v3 = vrot.slane %v5432_v24, %v10990_v53 }
0x31e8   :  { %v6941_v19 = vrot.slane %v5439_v18, %v10990_v53  ;;  %v7018_v10 = vsel %vm2681_vm4, %v5290_v6, %v6937_v3 }
0x31ea   :  { %v7019_v42 = vsel %vm2681_vm4, %v5297_v58, %v6941_v19 }
0x3254   :  { %v5441_v39 = vpop.permute.xlu1 %5440 }
0x3255   :  { %8450 = vmatmul.mubr.msk.f32.vlgmr.msra.gmra.mrb[34].mxu0 %vm406_vm3, %v5441_v39 }
0x3256   :  { %9236 = vmatpush1.bf16.msra.mxu0 %v12258_v28  ;;  %5808 = vmatprep.mubr.f32.mxu0 %v13160_v27 }
0x3257   :  { %9238 = vmatprep.subr.bf16.mxu0 %v12260_v9 }
0x325a   :  { %9240 = vmatpush1.bf16.msra.mxu0 %v12273_v63 }
0x325b   :  { %9242 = vmatprep.subr.bf16.mxu0 %v12276_v34 }
0x325e   :  { %9244 = vmatpush1.bf16.msra.mxu0 %v12282_v17 }
0x325f   :  { %9246 = vmatprep.subr.bf16.mxu0 %v12284_v20 }
0x3262   :  { %9248 = vmatpush1.bf16.msra.mxu0 %v12287_v44 }
0x3263   :  { %9266 = vmatprep.subr.bf16.mxu0 %v12256_v16 }
0x3328   :  { %v5530_v55 = vpop.f32.mrb[34].mxu0 }
0x3329   :  { %v5531_v5 = vadd.f32 %v5530_v55, %v12245_v12  ;;  %v5532_v15 = vpop.f32.mrb[35].mxu0 }
0x332a   :  { %v5533_v23 = vadd.f32 %v5532_v15, %v12248_v47 }
0x332b   :  { %v8451_v38 = vmul.f32 -1.442695, %v5531_v5 }
0x332c   :  { %v8452_v41 = vmul.f32 -1.442695, %v5533_v23 }
0x332d   :  { %9928 = vpow2.f32 %v8451_v38 }
0x332e   :  { %9930 = vtanh.f32 %v5533_v23 }
0x3337   :  { %v9929_v21 = vpop.eup %9928 }
0x3338   :  { %v5541_v0 = vadd.f32 1.0, %v9929_v21  ;;  %v9931_v29 = vpop.eup %9930 }
0x333a   :  { %9932 = vrcp.f32 %v5541_v0 }
0x333b   :  { %9934 = vpow2.f32 %v8452_v41 }
0x3344   :  { %v9933_v37 = vpop.eup %9932 }
0x3345   :  { %v5549_v35 = vmul.f32 %v9933_v37, %v9931_v29  ;;  %v9935_v61 = vpop.eup %9934  ;;  %v5548_v32 = vmul.f32 %v9933_v37, %v5414_v13 }
0x3346   :  { %v5542_v60 = vadd.f32 1.0, %v9935_v61 }
0x3347   :  { %5551 = vrot.lane.b32.xlu1 %v5549_v35, %s10254_s0 }
0x3348   :  { %9936 = vrcp.f32 %v5542_v60 }
0x3352   :  { %v9937_v47 = vpop.eup %9936 }
0x33b9   :  { %v5552_v12 = vpop.permute.xlu1 %5551 }
0x33ba   :  { %v5554_v4 = vadd.f32 %v5552_v12, %v5548_v32 }
0x33bc   :  { %9938 = vtanh.f32 %v5554_v4 }
0x33c6   :  { %v9939_v30 = vpop.eup %9938 }
0x33c7   :  { %v5556_v24 = vmul.f32 %v9939_v30, %v9937_v47 }
0x33c9   :  { %5580 = vrot.lane.b32.xlu1 %v5556_v24, %s10254_s0  ;;  %v5564_v6 = vrot.slane %v5556_v24, %v11179_v7 }
0x33cb   :  { %v5565_v18 = vcombine.high %v5564_v6, %v5564_v6  ;;  %v5572_v3 = vrot.slane %v5564_v6, %v11179_v7 }
0x33cd   :  { %v5579_v58 = vrot.slane %v5565_v18, %v11179_v7  ;;  %v6947_v19 = vrot.slane %v5572_v3, %v10990_v53 }
0x33cf   :  { %v6951_v13 = vrot.slane %v5579_v58, %v10990_v53  ;;  %v7020_v39 = vsel %vm2684_vm5, %v7018_v10, %v6947_v19 }
0x33d1   :  { %v7021_v55 = vsel %vm2684_vm5, %v7019_v42, %v6951_v13 }
0x343b   :  { %v5581_v5 = vpop.permute.xlu1 %5580 }
0x343c   :  { %8453 = vmatmul.mubr.msk.f32.vlgmr.msra.gmra.mrb[48].mxu1 %vm406_vm3, %v5581_v5 }
0x343d   :  { %9252 = vmatpush1.bf16.msra.mxu1 %v12258_v28  ;;  %5948 = vmatprep.mubr.f32.mxu1 %v13160_v27 }
0x343e   :  { %9254 = vmatprep.subr.bf16.mxu1 %v12260_v9 }
0x3441   :  { %9256 = vmatpush1.bf16.msra.mxu1 %v12273_v63 }
0x3442   :  { %9258 = vmatprep.subr.bf16.mxu1 %v12276_v34 }
0x3445   :  { %9260 = vmatpush1.bf16.msra.mxu1 %v12282_v17 }
0x3446   :  { %9262 = vmatprep.subr.bf16.mxu1 %v12284_v20 }
0x3449   :  { %9264 = vmatpush1.bf16.msra.mxu1 %v12287_v44 }
0x344a   :  { %9282 = vmatprep.subr.bf16.mxu1 %v12256_v16 }
0x350f   :  { %v5670_v10 = vpop.f32.mrb[48].mxu1 }
0x3510   :  { %v5671_v42 = vadd.f32 %v5670_v10, %v12386_v36  ;;  %v5672_v15 = vpop.f32.mrb[49].mxu1 }
0x3511   :  { %v5673_v23 = vadd.f32 %v5672_v15, %v12389_v25 }
0x3512   :  { %v8454_v38 = vmul.f32 -1.442695, %v5671_v42 }
0x3513   :  { %v8455_v41 = vmul.f32 -1.442695, %v5673_v23 }
0x3514   :  { %9940 = vpow2.f32 %v8454_v38 }
0x3515   :  { %9942 = vtanh.f32 %v5673_v23 }
0x351e   :  { %v9941_v21 = vpop.eup %9940 }
0x351f   :  { %v5681_v0 = vadd.f32 1.0, %v9941_v21  ;;  %v9943_v29 = vpop.eup %9942 }
0x3521   :  { %9944 = vrcp.f32 %v5681_v0 }
0x3522   :  { %9946 = vpow2.f32 %v8455_v41 }
0x352b   :  { %v9945_v37 = vpop.eup %9944 }
0x352c   :  { %v5689_v35 = vmul.f32 %v9945_v37, %v9943_v29  ;;  %v9947_v61 = vpop.eup %9946  ;;  %v5688_v32 = vmul.f32 %v9945_v37, %v5554_v4 }
0x352d   :  { %v5682_v60 = vadd.f32 1.0, %v9947_v61 }
0x352e   :  { %5691 = vrot.lane.b32.xlu0 %v5689_v35, %s10254_s0 }
0x352f   :  { %9948 = vrcp.f32 %v5682_v60 }
0x3539   :  { %v9949_v25 = vpop.eup %9948 }
0x35a0   :  { %v5692_v36 = vpop.permute.xlu0 %5691 }
0x35a1   :  { %v5694_v12 = vadd.f32 %v5692_v36, %v5688_v32 }
0x35a3   :  { %9950 = vtanh.f32 %v5694_v12 }
0x35ad   :  { %v9951_v47 = vpop.eup %9950 }
0x35ae   :  { %v5696_v30 = vmul.f32 %v9951_v47, %v9949_v25 }
0x35b0   :  { %5720 = vrot.lane.b32.xlu1 %v5696_v30, %s10254_s0  ;;  %v5704_v24 = vrot.slane %v5696_v30, %v11179_v7 }
0x35b2   :  { %v5705_v6 = vcombine.high %v5704_v24, %v5704_v24  ;;  %v5712_v18 = vrot.slane %v5704_v24, %v11179_v7 }
0x35b4   :  { %v5719_v3 = vrot.slane %v5705_v6, %v11179_v7  ;;  %v6957_v58 = vrot.slane %v5712_v18, %v10990_v53 }
0x35b6   :  { %v6961_v4 = vrot.slane %v5719_v3, %v10990_v53  ;;  %v7022_v19 = vsel %vm2687_vm6, %v7020_v39, %v6957_v58 }
0x35b8   :  { %v7023_v13 = vsel %vm2687_vm6, %v7021_v55, %v6961_v4 }
0x3622   :  { %v5721_v5 = vpop.permute.xlu1 %5720 }
0x3623   :  { %8456 = vmatmul.mubr.msk.f32.vlgmr.msra.gmra.mrb[36].mxu0 %vm406_vm3, %v5721_v5 }
0x3624   :  { %9268 = vmatpush1.bf16.msra.mxu0 %v12258_v28  ;;  %6088 = vmatprep.mubr.f32.mxu0 %v13160_v27 }
0x3625   :  { %9270 = vmatprep.subr.bf16.mxu0 %v12260_v9 }
0x3628   :  { %9272 = vmatpush1.bf16.msra.mxu0 %v12273_v63 }
0x3629   :  { %9274 = vmatprep.subr.bf16.mxu0 %v12276_v34 }
0x362c   :  { %9276 = vmatpush1.bf16.msra.mxu0 %v12282_v17 }
0x362d   :  { %9278 = vmatprep.subr.bf16.mxu0 %v12284_v20 }
0x3630   :  { %9280 = vmatpush1.bf16.msra.mxu0 %v12287_v44 }
0x3631   :  { %9298 = vmatprep.subr.bf16.mxu0 %v12256_v16 }
0x36f6   :  { %v5810_v39 = vpop.f32.mrb[36].mxu0 }
0x36f7   :  { %v5811_v55 = vadd.f32 %v5810_v39, %v12392_v45  ;;  %v5812_v10 = vpop.f32.mrb[37].mxu0 }
0x36f8   :  { %v5813_v42 = vadd.f32 %v5812_v10, %v12395_v57 }
0x36f9   :  { %v8457_v15 = vmul.f32 -1.442695, %v5811_v55 }
0x36fa   :  { %v8458_v37 = vmul.f32 -1.442695, %v5813_v42 }
0x36fb   :  { %9952 = vpow2.f32 %v8457_v15 }
0x36fc   :  { %9954 = vtanh.f32 %v5813_v42 }
0x3705   :  { %v9953_v23 = vpop.eup %9952 }
0x3706   :  { %v5821_v38 = vadd.f32 1.0, %v9953_v23  ;;  %v9955_v21 = vpop.eup %9954 }
0x3708   :  { %9956 = vrcp.f32 %v5821_v38 }
0x3709   :  { %9958 = vpow2.f32 %v8458_v37 }
0x3712   :  { %v9957_v0 = vpop.eup %9956 }
0x3713   :  { %v5829_v29 = vmul.f32 %v9957_v0, %v9955_v21  ;;  %v9959_v35 = vpop.eup %9958  ;;  %v5828_v61 = vmul.f32 %v9957_v0, %v5694_v12 }
0x3714   :  { %v5822_v41 = vadd.f32 1.0, %v9959_v35 }
0x3715   :  { %5831 = vrot.lane.b32.xlu0 %v5829_v29, %s10254_s0 }
0x3716   :  { %9960 = vrcp.f32 %v5822_v41 }
0x3720   :  { %v9961_v57 = vpop.eup %9960 }
0x3787   :  { %v5832_v45 = vpop.permute.xlu0 %5831 }
0x3788   :  { %v5834_v60 = vadd.f32 %v5832_v45, %v5828_v61 }
0x378a   :  { %9962 = vtanh.f32 %v5834_v60 }
0x3794   :  { %v9963_v32 = vpop.eup %9962 }
0x3795   :  { %v5836_v36 = vmul.f32 %v9963_v32, %v9961_v57 }
0x3797   :  { %5860 = vrot.lane.b32.xlu1 %v5836_v36, %s10254_s0  ;;  %v5844_v25 = vrot.slane %v5836_v36, %v11179_v7 }
0x3799   :  { %v5845_v47 = vcombine.high %v5844_v25, %v5844_v25  ;;  %v5852_v30 = vrot.slane %v5844_v25, %v11179_v7 }
0x379b   :  { %v5859_v24 = vrot.slane %v5845_v47, %v11179_v7  ;;  %v6967_v6 = vrot.slane %v5852_v30, %v10990_v53 }
0x379d   :  { %v6971_v12 = vrot.slane %v5859_v24, %v10990_v53  ;;  %v7024_v18 = vsel %vm2690_vm7, %v7022_v19, %v6967_v6 }
0x379f   :  { %v7025_v3 = vsel %vm2690_vm7, %v7023_v13, %v6971_v12 }
0x3809   :  { %v5861_v58 = vpop.permute.xlu1 %5860 }
0x380a   :  { %8459 = vmatmul.mubr.msk.f32.vlgmr.msra.gmra.mrb[50].mxu1 %vm406_vm3, %v5861_v58 }
0x380b   :  { %9284 = vmatpush1.bf16.msra.mxu1 %v12258_v28  ;;  %6228 = vmatprep.mubr.f32.mxu1 %v13160_v27 }
0x380c   :  { %9286 = vmatprep.subr.bf16.mxu1 %v12260_v9 }
0x380f   :  { %9288 = vmatpush1.bf16.msra.mxu1 %v12273_v63 }
0x3810   :  { %9290 = vmatprep.subr.bf16.mxu1 %v12276_v34 }
0x3813   :  { %9292 = vmatpush1.bf16.msra.mxu1 %v12282_v17 }
0x3814   :  { %9294 = vmatprep.subr.bf16.mxu1 %v12284_v20 }
0x3817   :  { %9296 = vmatpush1.bf16.msra.mxu1 %v12287_v44 }
0x3818   :  { %9314 = vmatprep.subr.bf16.mxu1 %v12256_v16 }
0x38dd   :  { %v5950_v4 = vpop.f32.mrb[50].mxu1 }
0x38de   :  { %v5951_v19 = vadd.f32 %v5950_v4, %v12398_v46  ;;  %v5952_v13 = vpop.f32.mrb[51].mxu1 }
0x38df   :  { %v5953_v5 = vadd.f32 %v5952_v13, %v12401_v33 }
0x38e0   :  { %v8460_v39 = vmul.f32 -1.442695, %v5951_v19 }
0x38e1   :  { %v8461_v38 = vmul.f32 -1.442695, %v5953_v5 }
0x38e2   :  { %9964 = vpow2.f32 %v8460_v39 }
0x38e3   :  { %9966 = vtanh.f32 %v5953_v5 }
0x38ec   :  { %v9965_v55 = vpop.eup %9964 }
0x38ed   :  { %v5961_v10 = vadd.f32 1.0, %v9965_v55  ;;  %v9967_v42 = vpop.eup %9966 }
0x38ef   :  { %9968 = vrcp.f32 %v5961_v10 }
0x38f0   :  { %9970 = vpow2.f32 %v8461_v38 }
0x38f9   :  { %v9969_v15 = vpop.eup %9968 }
0x38fa   :  { %v5969_v23 = vmul.f32 %v9969_v15, %v9967_v42  ;;  %v9971_v21 = vpop.eup %9970  ;;  %v5968_v29 = vmul.f32 %v9969_v15, %v5834_v60 }
0x38fb   :  { %v5962_v0 = vadd.f32 1.0, %v9971_v21 }
0x38fc   :  { %5971 = vrot.lane.b32.xlu0 %v5969_v23, %s10254_s0 }
0x38fd   :  { %9972 = vrcp.f32 %v5962_v0 }
0x3907   :  { %v9973_v33 = vpop.eup %9972 }
0x396e   :  { %v5972_v46 = vpop.permute.xlu0 %5971 }
0x396f   :  { %v5974_v37 = vadd.f32 %v5972_v46, %v5968_v29 }
0x3971   :  { %9974 = vtanh.f32 %v5974_v37 }
0x397b   :  { %v9975_v35 = vpop.eup %9974 }
0x397c   :  { %v5976_v41 = vmul.f32 %v9975_v35, %v9973_v33 }
0x397e   :  { %6000 = vrot.lane.b32.xlu1 %v5976_v41, %s10254_s0  ;;  %v5984_v61 = vrot.slane %v5976_v41, %v11179_v7 }
0x3980   :  { %v5985_v45 = vcombine.high %v5984_v61, %v5984_v61  ;;  %v5992_v57 = vrot.slane %v5984_v61, %v11179_v7 }
0x3982   :  { %v5999_v32 = vrot.slane %v5985_v45, %v11179_v7  ;;  %v6977_v36 = vrot.slane %v5992_v57, %v10990_v53 }
0x3984   :  { %v6981_v60 = vrot.slane %v5999_v32, %v10990_v53  ;;  %v7026_v25 = vsel %vm2693_vm8, %v7024_v18, %v6977_v36 }
0x3986   :  { %v7027_v47 = vsel %vm2693_vm8, %v7025_v3, %v6981_v60 }
0x39f0   :  { %v6001_v30 = vpop.permute.xlu1 %6000 }
0x39f1   :  { %8462 = vmatmul.mubr.msk.f32.vlgmr.msra.gmra.mrb[38].mxu0 %vm406_vm3, %v6001_v30 }
0x39f2   :  { %9300 = vmatpush1.bf16.msra.mxu0 %v12258_v28  ;;  %6368 = vmatprep.mubr.f32.mxu0 %v13160_v27 }
0x39f3   :  { %9302 = vmatprep.subr.bf16.mxu0 %v12260_v9 }
0x39f6   :  { %9304 = vmatpush1.bf16.msra.mxu0 %v12273_v63 }
0x39f7   :  { %9306 = vmatprep.subr.bf16.mxu0 %v12276_v34 }
0x39fa   :  { %9308 = vmatpush1.bf16.msra.mxu0 %v12282_v17 }
0x39fb   :  { %9310 = vmatprep.subr.bf16.mxu0 %v12284_v20 }
0x39fe   :  { %9312 = vmatpush1.bf16.msra.mxu0 %v12287_v44 }
0x39ff   :  { %9330 = vmatprep.subr.bf16.mxu0 %v12256_v16 }
0x3ac4   :  { %v6090_v24 = vpop.f32.mrb[38].mxu0 }
0x3ac5   :  { %v6091_v6 = vadd.f32 %v6090_v24, %v12404_v11  ;;  %v6092_v12 = vpop.f32.mrb[39].mxu0 }
0x3ac6   :  { %v6093_v18 = vadd.f32 %v6092_v12, %v12407_v26 }
0x3ac7   :  { %v8463_v3 = vmul.f32 -1.442695, %v6091_v6 }
0x3ac8   :  { %v8464_v39 = vmul.f32 -1.442695, %v6093_v18 }
0x3ac9   :  { %9976 = vpow2.f32 %v8463_v3 }
0x3aca   :  { %9978 = vtanh.f32 %v6093_v18 }
0x3ad3   :  { %v9977_v58 = vpop.eup %9976 }
0x3ad4   :  { %v6101_v4 = vadd.f32 1.0, %v9977_v58  ;;  %v9979_v19 = vpop.eup %9978 }
0x3ad6   :  { %9980 = vrcp.f32 %v6101_v4 }
0x3ad7   :  { %9982 = vpow2.f32 %v8464_v39 }
0x3ae0   :  { %v9981_v13 = vpop.eup %9980 }
0x3ae1   :  { %v6109_v5 = vmul.f32 %v9981_v13, %v9979_v19  ;;  %v9983_v55 = vpop.eup %9982  ;;  %v6108_v42 = vmul.f32 %v9981_v13, %v5974_v37 }
0x3ae2   :  { %v6102_v10 = vadd.f32 1.0, %v9983_v55 }
0x3ae3   :  { %6111 = vrot.lane.b32.xlu0 %v6109_v5, %s10254_s0 }
0x3ae4   :  { %9984 = vrcp.f32 %v6102_v10 }
0x3aee   :  { %v9985_v26 = vpop.eup %9984 }
0x3b55   :  { %v6112_v11 = vpop.permute.xlu0 %6111 }
0x3b56   :  { %v6114_v15 = vadd.f32 %v6112_v11, %v6108_v42 }
0x3b58   :  { %9986 = vtanh.f32 %v6114_v15 }
0x3b62   :  { %v9987_v23 = vpop.eup %9986 }
0x3b63   :  { %v6116_v38 = vmul.f32 %v9987_v23, %v9985_v26  ;;  %v13161_v23 = vmov 0.0|0.0  }
0x3b65   :  { %6140 = vrot.lane.b32.xlu1 %v6116_v38, %s10254_s0  ;;  %v6124_v21 = vrot.slane %v6116_v38, %v11179_v7 }
0x3b67   :  { %v6125_v0 = vcombine.high %v6124_v21, %v6124_v21  ;;  %v6132_v29 = vrot.slane %v6124_v21, %v11179_v7 }
0x3b69   :  { %v6139_v46 = vrot.slane %v6125_v0, %v11179_v7  ;;  %v6987_v33 = vrot.slane %v6132_v29, %v10990_v53 }
0x3b6b   :  { %v6991_v37 = vrot.slane %v6139_v46, %v10990_v53  ;;  %v7028_v35 = vsel %vm2696_vm9, %v7026_v25, %v6987_v33 }
0x3b6d   :  { %v7029_v41 = vsel %vm2696_vm9, %v7027_v47, %v6991_v37 }
0x3bd7   :  { %v6141_v61 = vpop.permute.xlu1 %6140 }
0x3bd8   :  { %8465 = vmatmul.mubr.msk.f32.vlgmr.msra.gmra.mrb[52].mxu1 %vm406_vm3, %v6141_v61 }
0x3bd9   :  { %9316 = vmatpush1.bf16.msra.mxu1 %v12258_v28  ;;  %6510 = vmatprep.mubr.f32.mxu1 %v13160_v27 }
0x3bda   :  { %9318 = vmatprep.subr.bf16.mxu1 %v12260_v9 }
0x3bdd   :  { %9320 = vmatpush1.bf16.msra.mxu1 %v12273_v63 }
0x3bde   :  { %9322 = vmatprep.subr.bf16.mxu1 %v12276_v34 }
0x3be1   :  { %9324 = vmatpush1.bf16.msra.mxu1 %v12282_v17 }
0x3be2   :  { %9326 = vmatprep.subr.bf16.mxu1 %v12284_v20 }
0x3be5   :  { %9328 = vmatpush1.bf16.msra.mxu1 %v12287_v44 }
0x3be6   :  { %9346 = vmatprep.subr.bf16.mxu1 %v12256_v16 }
0x3cab   :  { %v6230_v45 = vpop.f32.mrb[52].mxu1 }
0x3cac   :  { %v6231_v57 = vadd.f32 %v6230_v45, %v12417_v31  ;;  %v6232_v32 = vpop.f32.mrb[53].mxu1 }
0x3cad   :  { %v6233_v36 = vadd.f32 %v6232_v32, %v12420_v8 }
0x3cae   :  { %v8466_v60 = vmul.f32 -1.442695, %v6231_v57 }
0x3caf   :  { %v8467_v12 = vmul.f32 -1.442695, %v6233_v36 }
0x3cb0   :  { %9988 = vpow2.f32 %v8466_v60 }
0x3cb1   :  { %9990 = vtanh.f32 %v6233_v36 }
0x3cba   :  { %v9989_v25 = vpop.eup %9988 }
0x3cbb   :  { %v6241_v47 = vadd.f32 1.0, %v9989_v25  ;;  %v9991_v30 = vpop.eup %9990 }
0x3cbd   :  { %9992 = vrcp.f32 %v6241_v47 }
0x3cbe   :  { %9994 = vpow2.f32 %v8467_v12 }
0x3cc7   :  { %v9993_v24 = vpop.eup %9992 }
0x3cc8   :  { %v6249_v6 = vmul.f32 %v9993_v24, %v9991_v30  ;;  %v9995_v16 = vpop.eup %9994  ;;  %v6248_v3 = vmul.f32 %v9993_v24, %v6114_v15 }
0x3cc9   :  { %v6242_v18 = vadd.f32 1.0, %v9995_v16 }
0x3cca   :  { %6251 = vrot.lane.b32.xlu0 %v6249_v6, %s10254_s0 }
0x3ccb   :  { %9996 = vrcp.f32 %v6242_v18 }
0x3cd5   :  { %v9997_v8 = vpop.eup %9996 }
0x3d3c   :  { %v6252_v31 = vpop.permute.xlu0 %6251 }
0x3d3d   :  { %v6254_v58 = vadd.f32 %v6252_v31, %v6248_v3 }
0x3d3f   :  { %9998 = vtanh.f32 %v6254_v58 }
0x3d49   :  { %v9999_v4 = vpop.eup %9998 }
0x3d4a   :  { %v6256_v19 = vmul.f32 %v9999_v4, %v9997_v8 }
0x3d4c   :  { %6280 = vrot.lane.b32.xlu1 %v6256_v19, %s10254_s0  ;;  %v6264_v13 = vrot.slane %v6256_v19, %v11179_v7 }
0x3d4e   :  { %v6265_v5 = vcombine.high %v6264_v13, %v6264_v13  ;;  %v6272_v39 = vrot.slane %v6264_v13, %v11179_v7 }
0x3d50   :  { %v6279_v55 = vrot.slane %v6265_v5, %v11179_v7  ;;  %v6997_v10 = vrot.slane %v6272_v39, %v10990_v53 }
0x3d52   :  { %v7001_v42 = vrot.slane %v6279_v55, %v10990_v53  ;;  %v12581_v11 = vsel %vm2699_vm10, %v7028_v35, %v6997_v10 }
0x3d54   :  { %v12584_v15 = vsel %vm2699_vm10, %v7029_v41, %v7001_v42 }
0x3dbe   :  { %v6281_v26 = vpop.permute.xlu1 %6280 }
0x3dbf   :  { %8468 = vmatmul.mubr.msk.f32.vlgmr.msra.gmra.mrb[40].mxu0 %vm406_vm3, %v6281_v26 }
0x3dc0   :  { %9332 = vmatpush1.bf16.msra.mxu0 %v12258_v28  ;;  %6650 = vmatprep.mubr.f32.mxu0 %v13160_v27 }
0x3dc1   :  { %9334 = vmatprep.subr.bf16.mxu0 %v12260_v9 }
0x3dc4   :  { %9336 = vmatpush1.bf16.msra.mxu0 %v12273_v63 }
0x3dc5   :  { %9338 = vmatprep.subr.bf16.mxu0 %v12276_v34 }
0x3dc8   :  { %9340 = vmatpush1.bf16.msra.mxu0 %v12282_v17 }
0x3dc9   :  { %9342 = vmatprep.subr.bf16.mxu0 %v12284_v20 }
0x3dcc   :  { %9344 = vmatpush1.bf16.msra.mxu0 %v12287_v44 }
0x3dcd   :  { %9361 = vmatprep.subr.bf16.mxu0 %v13161_v23 }
0x3e92   :  { %v6370_v38 = vpop.f32.mrb[40].mxu0 }
0x3e93   :  { %v6371_v21 = vadd.f32 %v6370_v38, %v12423_v50  ;;  %v6372_v0 = vpop.f32.mrb[41].mxu0 }
0x3e94   :  { %v6373_v29 = vadd.f32 %v6372_v0, %v12426_v59 }
0x3e95   :  { %v8469_v46 = vmul.f32 -1.442695, %v6371_v21 }
0x3e96   :  { %v8470_v45 = vmul.f32 -1.442695, %v6373_v29 }
0x3e97   :  { %10000 = vpow2.f32 %v8469_v46 }
0x3e98   :  { %10002 = vtanh.f32 %v6373_v29 }
0x3ea1   :  { %v10001_v33 = vpop.eup %10000 }
0x3ea2   :  { %v6381_v37 = vadd.f32 1.0, %v10001_v33  ;;  %v10003_v35 = vpop.eup %10002 }
0x3ea4   :  { %10004 = vrcp.f32 %v6381_v37 }
0x3ea5   :  { %10006 = vpow2.f32 %v8470_v45 }
0x3eae   :  { %v10005_v41 = vpop.eup %10004 }
0x3eaf   :  { %v6389_v61 = vmul.f32 %v10005_v41, %v10003_v35  ;;  %v10007_v57 = vpop.eup %10006  ;;  %v6388_v36 = vmul.f32 %v10005_v41, %v6254_v58 }
0x3eb0   :  { %v6382_v32 = vadd.f32 1.0, %v10007_v57 }
0x3eb1   :  { %6391 = vrot.lane.b32.xlu0 %v6389_v61, %s10254_s0 }
0x3eb2   :  { %10008 = vrcp.f32 %v6382_v32 }
0x3ebc   :  { %v10009_v59 = vpop.eup %10008 }
0x3f23   :  { %v6392_v50 = vpop.permute.xlu0 %6391 }
0x3f24   :  { %v6394_v60 = vadd.f32 %v6392_v50, %v6388_v36 }
0x3f26   :  { %10010 = vtanh.f32 %v6394_v60 }
0x3f30   :  { %v10011_v25 = vpop.eup %10010 }
0x3f31   :  { %v6396_v47 = vmul.f32 %v10011_v25, %v10009_v59 }
0x3f33   :  { %6422 = vrot.lane.b32.xlu1 %v6396_v47, %s10254_s0  ;;  %v6404_v4 = vrot.slane %v6396_v47, %v11179_v7 }
0x3f35   :  { %v6405_v5 = vcombine.high %v6404_v4, %v6404_v4  ;;  %v6412_v10 = vrot.slane %v6404_v4, %v11179_v7 }
0x3f37   :  { %v6419_v38 = vrot.slane %v6405_v5, %v11179_v7 }
0x3fa5   :  { %v6423_v30 = vpop.permute.xlu1 %6422 }
0x3fa6   :  { %8471 = vmatmul.mubr.msk.f32.vlgmr.msra.gmra.mrb[54].mxu1 %vm406_vm3, %v6423_v30 }
0x3fa7   :  { %9348 = vmatpush1.bf16.msra.mxu1 %v12258_v28  ;;  %6770 = vmatprep.mubr.f32.mxu1 %v13160_v27 }
0x3fa8   :  { %9350 = vmatprep.subr.bf16.mxu1 %v12260_v9 }
0x3fab   :  { %9352 = vmatpush1.bf16.msra.mxu1 %v12273_v63 }
0x3fac   :  { %9354 = vmatprep.subr.bf16.mxu1 %v12276_v34 }
0x3faf   :  { %9356 = vmatpush1.bf16.msra.mxu1 %v12282_v17 }
0x3fb0   :  { %9358 = vmatprep.subr.bf16.mxu1 %v12284_v20 }
0x3fb3   :  { %9360 = vmatpush1.bf16.msra.mxu1 %v12287_v44 }
0x4079   :  { %v6512_v24 = vpop.f32.mrb[54].mxu1 }
0x407a   :  { %v6513_v6 = vadd.f32 %v6512_v24, %v12429_v14  ;;  %v6514_v12 = vpop.f32.mrb[55].mxu1 }
0x407b   :  { %v6515_v28 = vadd.f32 %v6514_v12, %v12432_v43 }
0x407c   :  { %v8472_v16 = vmul.f32 -1.442695, %v6513_v6 }
0x407d   :  { %v8473_v17 = vmul.f32 -1.442695, %v6515_v28 }
0x407e   :  { %10012 = vpow2.f32 %v8472_v16 }
0x407f   :  { %10014 = vtanh.f32 %v6515_v28 }
0x4088   :  { %v10013_v18 = vpop.eup %10012 }
0x4089   :  { %v6523_v9 = vadd.f32 1.0, %v10013_v18  ;;  %v10015_v63 = vpop.eup %10014 }
0x408b   :  { %10016 = vrcp.f32 %v6523_v9 }
0x408c   :  { %10018 = vpow2.f32 %v8473_v17 }
0x4095   :  { %v10017_v34 = vpop.eup %10016 }
0x4096   :  { %v6531_v3 = vmul.f32 %v10017_v34, %v10015_v63  ;;  %v10019_v20 = vpop.eup %10018  ;;  %v6530_v31 = vmul.f32 %v10017_v34, %v6394_v60 }
0x4097   :  { %v6524_v44 = vadd.f32 1.0, %v10019_v20 }
0x4098   :  { %6533 = vrot.lane.b32.xlu0 %v6531_v3, %s10254_s0 }
0x4099   :  { %10020 = vrcp.f32 %v6524_v44 }
0x40a3   :  { %v10021_v43 = vpop.eup %10020 }
0x410a   :  { %v6534_v14 = vpop.permute.xlu0 %6533 }
0x410b   :  { %v6536_v58 = vadd.f32 %v6534_v14, %v6530_v31 }
0x410d   :  { %10022 = vtanh.f32 %v6536_v58 }
0x4117   :  { %v10023_v8 = vpop.eup %10022 }
0x4118   :  { %v6538_v19 = vmul.f32 %v10023_v8, %v10021_v43 }
0x411a   :  { %6562 = vrot.lane.b32.xlu1 %v6538_v19, %s10254_s0  ;;  %v6546_v13 = vrot.slane %v6538_v19, %v11179_v7 }
0x411c   :  { %v6547_v39 = vcombine.high %v6546_v13, %v6546_v13  ;;  %v6554_v55 = vrot.slane %v6546_v13, %v11179_v7 }
0x411e   :  { %v6561_v42 = vrot.slane %v6547_v39, %v11179_v7  ;;  %v7007_v26 = vrot.slane %v6554_v55, %v10990_v53 }
0x4120   :  { %v7011_v21 = vrot.slane %v6561_v42, %v10990_v53  ;;  %v12622_v0 = vsel %vm2681_vm4, %v6412_v10, %v7007_v26 }
0x4122   :  { %v12625_v29 = vsel %vm2681_vm4, %v6419_v38, %v7011_v21  ;;  %vm13163_vm4 = vmmov %vm13162_vm1 }
0x418c   :  { %v6563_v46 = vpop.permute.xlu1 %6562 }
0x418d   :  { %8474 = vmatmul.mubr.msk.f32.vlgmr.msra.gmra.mrb[42].mxu0 %vm406_vm3, %v6563_v46 }
0x418e   :  { %8722 = vmatprep.mubr.msk.f32.mxu0 %vm10271_vm13, %v13160_v27 }
0x4260   :  { %v6652_v33 = vpop.f32.mrb[42].mxu0 }
0x4261   :  { %v6653_v37 = vadd.f32 %v6652_v33, %v12435_v22  ;;  %v6654_v35 = vpop.f32.mrb[43].mxu0 }
0x4262   :  { %v6655_v41 = vadd.f32 %v6654_v35, %v12438_v51  ;;  %v12637_v51 = vmax.f32 %v12581_v11, 0.0 }
0x4263   :  { %v8475_v61 = vmul.f32 -1.442695, %v6653_v37 }
0x4264   :  { %v8476_v60 = vmul.f32 -1.442695, %v6655_v41  ;;  %v12641_v28 = vcombine.high %v12637_v51, %v12637_v51 }
0x4265   :  { %10024 = vpow2.f32 %v8475_v61  ;;  %v12674_v61 = vmax.f32 %v12584_v15, 0.0 }
0x4266   :  { %10026 = vtanh.f32 %v6655_v41  ;;  %v7116_v16 = vcombine.low %v12637_v51, %v12641_v28 }
0x426f   :  { %v10025_v45 = vpop.eup %10024 }
0x4270   :  { %v6663_v57 = vadd.f32 1.0, %v10025_v45  ;;  %v10027_v32 = vpop.eup %10026 }
0x4272   :  { %10028 = vrcp.f32 %v6663_v57 }
0x4273   :  { %10030 = vpow2.f32 %v8476_v60  ;;  %v7113_v60 = vcombine.high %v12674_v61, %v12674_v61 }
0x427c   :  { %v10029_v36 = vpop.eup %10028 }
0x427d   :  { %v6671_v50 = vmul.f32 %v10029_v36, %v10027_v32  ;;  %v10031_v59 = vpop.eup %10030  ;;  %v6670_v47 = vmul.f32 %v10029_v36, %v6536_v58 }
0x427e   :  { %v6664_v25 = vadd.f32 1.0, %v10031_v59 }
0x427f   :  { %6673 = vrot.lane.b32.xlu0 %v6671_v50, %s10254_s0 }
0x4280   :  { %10032 = vrcp.f32 %v6664_v25 }
0x428a   :  { %v10033_v24 = vpop.eup %10032 }
0x42f1   :  { %v6674_v22 = vpop.permute.xlu0 %6673 }
0x42f2   :  { %v12633_v30 = vadd.f32 %v6674_v22, %v6670_v47 }
0x42f4   :  { %10034 = vtanh.f32 %v12633_v30 }
0x42fe   :  { %v10035_v6 = vpop.eup %10034 }
0x42ff   :  { %v6678_v12 = vmul.f32 %v10035_v6, %v10033_v24 }
0x4301   :  { %6702 = vrot.lane.b32.xlu1 %v6678_v12, %s10254_s0 }
0x4305   :  { %7119 = vrot.lane.b32.xlu1 %v7116_v16, %s10256_s19 }
0x4373   :  { %v6703_v18 = vpop.permute.xlu1 %6702 }
0x4374   :  { %8477 = vmatmul.mubr.msk.f32.vlgmr.msra.gmra.mrb[56].mxu1 %vm406_vm3, %v6703_v18 }
0x4377   :  { %v7120_v25 = vpop.permute.xlu1 %7119 }
0x4447   :  { %v6772_v9 = vpop.f32.mrb[56].mxu1 }
0x4448   :  { %v6773_v11 = vadd.f32 %v6772_v9, %v12192_v54  ;;  %v6774_v63 = vpop.f32.mrb[57].mxu1 }
0x4449   :  { %v6775_v3 = vadd.f32 %v6774_v63, %v12195_v2  ;;  %v6686_v2 = vrot.slane %v6678_v12, %v11179_v7  ;;  %v10272_v12 = vmov 839922192  }
0x444a   :  { %v8478_v34 = vmul.f32 -1.442695, %v6773_v11  ;;  %v7144_v16 = vunpack.c.l.s4 %v10272_v12 }
0x444b   :  { %v8479_v58 = vmul.f32 -1.442695, %v6775_v3  ;;  %v6687_v13 = vcombine.high %v6686_v2, %v6686_v2  ;;  %v6694_v55 = vrot.slane %v6686_v2, %v11179_v7 }
0x444c   :  { %10036 = vpow2.f32 %v8478_v34  ;;  %v7145_v18 = vunpack.c.0.s8 %v7144_v16 }
0x444d   :  { %10038 = vtanh.f32 %v6775_v3  ;;  %v6701_v42 = vrot.slane %v6687_v13, %v11179_v7  ;;  %v12660_v38 = vrot.slane %v6694_v55, %v10990_v53 }
0x444e   :  { %v12701_v9 = vsub.s32 %v7145_v18, %v10987_v52 }
0x444f   :  { %v12664_v33 = vrot.slane %v6701_v42, %v10990_v53  ;;  %v7034_v41 = vsel %vm2684_vm5, %v12622_v0, %v12660_v38 }
0x4451   :  { %v7035_v36 = vsel %vm2684_vm5, %v12625_v29, %v12664_v33  ;;  %v7128_v29 = vsel %vm146_vm0, %v7120_v25, 0.0  ;;  %v8541_v25 = vld [vmem:[%s13092_s4 + $0x28] sm:$0xff]  ;;  %vm13164_vm5 = vmmov %vm13162_vm1 }
0x4456   :  { %v10037_v17 = vpop.eup %10036 }
0x4457   :  { %v6783_v20 = vadd.f32 1.0, %v10037_v17  ;;  %v10039_v44 = vpop.eup %10038 }
0x4459   :  { %10040 = vrcp.f32 %v6783_v20 }
0x445a   :  { %10042 = vpow2.f32 %v8479_v58 }
0x4463   :  { %v10041_v31 = vpop.eup %10040 }
0x4464   :  { %v6791_v14 = vmul.f32 %v10041_v31, %v10039_v44  ;;  %v10043_v43 = vpop.eup %10042  ;;  %v6790_v54 = vmul.f32 %v10041_v31, %v12633_v30 }
0x4465   :  { %v6784_v8 = vadd.f32 1.0, %v10043_v43 }
0x4466   :  { %6793 = vrot.lane.b32.xlu0 %v6791_v14, %s10254_s0 }
0x4467   :  { %10044 = vrcp.f32 %v6784_v8 }
0x4471   :  { %v10045_v5 = vpop.eup %10044 }
0x44d8   :  { %v6794_v4 = vpop.permute.xlu0 %6793 }
0x44d9   :  { %v12652_v19 = vadd.f32 %v6794_v4, %v6790_v54 }
0x44db   :  { %10046 = vtanh.f32 %v12652_v19 }
0x44e5   :  { %v10047_v39 = vpop.eup %10046 }
0x44e6   :  { %v6798_v10 = vmul.f32 %v10047_v39, %v10045_v5 }
0x44e8   :  { %v6806_v26 = vrot.slane %v6798_v10, %v11179_v7 }
0x44ea   :  { %v6807_v21 = vcombine.high %v6806_v26, %v6806_v26  ;;  %v6814_v46 = vrot.slane %v6806_v26, %v11179_v7 }
0x44ec   :  { %v12667_v37 = vrot.slane %v6814_v46, %v10990_v53  ;;  %v6821_v35 = vrot.slane %v6807_v21, %v11179_v7 }
0x44ee   :  { %v7036_v45 = vsel %vm2687_vm6, %v7034_v41, %v12667_v37  ;;  %v12679_v57 = vrot.slane %v6821_v35, %v10990_v53 }
0x44ef   :  { %v12681_v32 = vmax.f32 %v7036_v45, 0.0 }
0x44f0   :  { %v7037_v50 = vsel %vm2687_vm6, %v7035_v36, %v12679_v57  ;;  %vm13167_vm6 = vmmov %vm13162_vm1 }
0x44f1   :  { %v7117_v0 = vcombine.low %v12681_v32, %v12674_v61  ;;  %v12690_v15 = vmax.f32 %v7037_v50, 0.0 }
0x44f3   :  { %7121 = vrot.lane.b32.xlu0 %v7117_v0, %s10256_s19  ;;  %v7118_v59 = vcombine.low %v7113_v60, %v12690_v15 }
0x44f5   :  { %7123 = vrot.lane.b32.xlu1 %v7118_v59, %s10256_s19  ;;  %v8540_v59 = vld [vmem:[%s13092_s4 + $0x20] sm:$0xff] }
0x4512   :  { %7129 = vadd.xlane.f32.xlu0 %v7128_v29  ;;  %v8542_v29 = vld [vmem:[%s13092_s4 + $0x30] sm:$0xff] }
0x4565   :  { %v7122_v47 = vpop.permute.xlu0 %7121 }
0x4566   :  { %v7131_v22 = vsel %vm146_vm0, %v7122_v47, 0.0  ;;  %v9362_v47 = vpack.c.bf16 %v8541_v25, %v8540_v59  ;;  %v7490_v59 = vld [vmem:[#allocation5 + $0x160] sm:$0xff]  ;;  %v7492_v25 = vld [vmem:[#allocation5 + $0x170] sm:$0xff] }
0x4567   :  { %7132 = vadd.xlane.f32.xlu1 %v7131_v22  ;;  %v7124_v24 = vpop.permute.xlu1 %7123  ;;  %v8543_v22 = vld [vmem:[%s13092_s4 + $0x38] sm:$0xff] }
0x4568   :  { %v7134_v6 = vsel %vm146_vm0, %v7124_v24, 0.0  ;;  %9363 = vmatpush3.bf16.msra.mxu0 %v9362_v47  ;;  %v9365_v24 = vpack.c.bf16 %v8543_v22, %v8542_v29  ;;  %v7495_v29 = vld [vmem:[#allocation5 + $0x188] sm:$0xff]  ;;  %v7497_v47 = vld [vmem:[#allocation5 + $0x198] sm:$0xff]  ;;  %v9373_v22 = vpack.c.bf16 %v7492_v25, %v7490_v59  ;;  %v7520_v59 = vld [vmem:[#allocation5 + $0x250] sm:$0xff] }
0x4569   :  { %7135 = vadd.xlane.f32.xlu0 %v7134_v6  ;;  %9364 = vmatprep.subr.bf16.mxu0 %v13161_v23 }
0x456c   :  { %9366 = vmatpush3.bf16.msra.mxu0 %v9365_v24  ;;  %v9375_v24 = vpack.c.bf16 %v7497_v47, %v7495_v29  ;;  %v8545_v29 = vld [vmem:[%s13093_s5 + $0x1] ss:$0 sm:$0xff] }
0x459f   :  { %v7130_v11 = vpop.xlane.xlu0 %7129 }
0x45a0   :  { %v7137_v63 = vmul.f32 0.03125, %v7130_v11 }
0x45a2   :  { %v7149_v34 = vrot.slane %v7137_v63, %v12701_v9  ;;  %v7156_v3 = vrot.slane %v7137_v63, %v11825_v62 }
0x45a4   :  { %v7191_v17 = vsub.f32 %v12637_v51, %v7149_v34  ;;  %v7192_v20 = vsub.f32 %v12641_v28, %v7156_v3 }
0x45a6   :  { %v7197_v44 = vmul.f32 %v7191_v17, %v7191_v17  ;;  %v7198_v31 = vmul.f32 %v7192_v20, %v7192_v20 }
0x45a8   :  { %v7209_v14 = vcombine.low %v7197_v44, %v7198_v31 }
0x45aa   :  { %7212 = vrot.lane.b32.xlu0 %v7209_v14, %s10256_s19 }
0x45f4   :  { %v7133_v58 = vpop.xlane.xlu1 %7132 }
0x45f5   :  { %v7138_v43 = vmul.f32 0.03125, %v7133_v58 }
0x45f6   :  { %v7136_v8 = vpop.xlane.xlu0 %7135 }
0x45f7   :  { %v7163_v52 = vrot.slane %v7138_v43, %v12701_v9  ;;  %v7170_v54 = vrot.slane %v7138_v43, %v11825_v62  ;;  %v7139_v4 = vmul.f32 0.03125, %v7136_v8 }
0x45f9   :  { %v7193_v2 = vsub.f32 %v12681_v32, %v7163_v52  ;;  %v7194_v13 = vsub.f32 %v12674_v61, %v7170_v54  ;;  %v7177_v5 = vrot.slane %v7139_v4, %v12701_v9  ;;  %v7184_v28 = vrot.slane %v7139_v4, %v11825_v62 }
0x45fb   :  { %v7199_v39 = vmul.f32 %v7193_v2, %v7193_v2  ;;  %v7200_v55 = vmul.f32 %v7194_v13, %v7194_v13  ;;  %v7195_v10 = vsub.f32 %v7113_v60, %v7177_v5  ;;  %v7196_v42 = vsub.f32 %v12690_v15, %v7184_v28 }
0x45fd   :  { %v7201_v26 = vmul.f32 %v7195_v10, %v7195_v10  ;;  %v7202_v21 = vmul.f32 %v7196_v42, %v7196_v42  ;;  %v7210_v46 = vcombine.low %v7199_v39, %v7200_v55 }
0x45ff   :  { %7214 = vrot.lane.b32.xlu1 %v7210_v46, %s10256_s19  ;;  %v7211_v35 = vcombine.low %v7201_v26, %v7202_v21 }
0x4603   :  { %7216 = vrot.lane.b32.xlu1 %v7211_v35, %s10256_s19 }
0x461c   :  { %v7213_v41 = vpop.permute.xlu0 %7212 }
0x461d   :  { %v7221_v45 = vsel %vm146_vm0, %v7213_v41, 0.0 }
0x461e   :  { %7222 = vadd.xlane.f32.xlu0 %v7221_v45  ;;  %v7488_v45 = vld [vmem:[#allocation5 + $0x150] sm:$0xff] }
0x4671   :  { %v7215_v36 = vpop.permute.xlu1 %7214 }
0x4672   :  { %v7224_v50 = vsel %vm146_vm0, %v7215_v36, 0.0  ;;  %v7491_v36 = vld [vmem:[#allocation5 + $0x168] sm:$0xff] }
0x4673   :  { %7225 = vadd.xlane.f32.xlu1 %v7224_v50  ;;  %v7493_v50 = vld [vmem:[#allocation5 + $0x178] sm:$0xff] }
0x4675   :  { %v7217_v0 = vpop.permute.xlu1 %7216 }
0x4676   :  { %v7227_v60 = vsel %vm146_vm0, %v7217_v0, 0.0 }
0x4677   :  { %7228 = vadd.xlane.f32.xlu0 %v7227_v60  ;;  %v9371_v60 = vpack.c.bf16 %v7493_v50, %v7491_v36  ;;  %v7521_v36 = vld [vmem:[#allocation5 + $0x258] sm:$0xff] }
0x46ab   :  { %v7223_v6 = vpop.xlane.xlu0 %7222 }
0x46ac   :  { %v7230_v12 = vmul.f32 0.03125, %v7223_v6  ;;  %v7494_v6 = vld [vmem:[#allocation5 + $0x180] sm:$0xff] }
0x46ae   :  { %v7233_v16 = vadd.f32 1e-05, %v7230_v12  ;;  %v7496_v12 = vld [vmem:[#allocation5 + $0x190] sm:$0xff] }
0x46b0   :  { %10048 = vrsqrt.f32 %v7233_v16  ;;  %v7499_v16 = vld [vmem:[#allocation5 + $0x1a8] sm:$0xff] }
0x46ba   :  { %v10049_v18 = vpop.eup %10048 }
0x46bb   :  { %v7248_v11 = vrot.slane %v10049_v18, %v12701_v9  ;;  %v7255_v63 = vrot.slane %v10049_v18, %v11825_v62  ;;  %v7501_v18 = vld [vmem:[#allocation5 + $0x1b8] sm:$0xff] }
0x46bd   :  { %v7290_v34 = vmul.f32 %v7248_v11, %v7191_v17  ;;  %v7291_v3 = vmul.f32 %v7255_v63, %v7192_v20  ;;  %v9377_v11 = vpack.c.bf16 %v7496_v12, %v7494_v6  ;;  %v9379_v63 = vpack.c.bf16 %v7501_v18, %v7499_v16  ;;  %v7525_v6 = vld [vmem:[#allocation5 + $0x278] sm:$0xff]  ;;  %v7522_v12 = vld [vmem:[#allocation5 + $0x260] sm:$0xff]  ;;  %v7524_v18 = vld [vmem:[#allocation5 + $0x270] sm:$0xff] }
0x46bf   :  { %v7315_v44 = vcombine.low %v7290_v34, %v7291_v3  ;;  %v7498_v34 = vld [vmem:[#allocation5 + $0x1a0] sm:$0xff]  ;;  %v7500_v3 = vld [vmem:[#allocation5 + $0x1b0] sm:$0xff] }
0x46c1   :  { %7318 = vrot.lane.b32.xlu0 %v7315_v44, %s10256_s19  ;;  %v7503_v44 = vld [vmem:[#allocation5 + $0x1c8] sm:$0xff] }
0x4700   :  { %v7226_v31 = vpop.xlane.xlu1 %7225 }
0x4701   :  { %v7231_v14 = vmul.f32 0.03125, %v7226_v31  ;;  %v7505_v31 = vld [vmem:[#allocation5 + $0x1d8] sm:$0xff] }
0x4703   :  { %v7234_v58 = vadd.f32 1e-05, %v7231_v14  ;;  %v9381_v14 = vpack.c.bf16 %v7500_v3, %v7498_v34 }
0x4704   :  { %v7229_v43 = vpop.xlane.xlu0 %7228 }
0x4705   :  { %10050 = vrsqrt.f32 %v7234_v58  ;;  %v7232_v8 = vmul.f32 0.03125, %v7229_v43  ;;  %v9383_v58 = vpack.c.bf16 %v7505_v31, %v7503_v44  ;;  %v7502_v43 = vld [vmem:[#allocation5 + $0x1c0] sm:$0xff] }
0x4707   :  { %v7235_v52 = vadd.f32 1e-05, %v7232_v8  ;;  %v7504_v8 = vld [vmem:[#allocation5 + $0x1d0] sm:$0xff] }
0x4709   :  { %10052 = vrsqrt.f32 %v7235_v52  ;;  %v7507_v52 = vld [vmem:[#allocation5 + $0x1e8] sm:$0xff] }
0x470f   :  { %v10051_v54 = vpop.eup %10050 }
0x4710   :  { %v7262_v4 = vrot.slane %v10051_v54, %v12701_v9  ;;  %v7269_v5 = vrot.slane %v10051_v54, %v11825_v62  ;;  %v7509_v54 = vld [vmem:[#allocation5 + $0x1f8] sm:$0xff] }
0x4712   :  { %v7292_v28 = vmul.f32 %v7262_v4, %v7193_v2  ;;  %v7293_v39 = vmul.f32 %v7269_v5, %v7194_v13  ;;  %v7489_v13 = vld [vmem:[#allocation5 + $0x158] sm:$0xff]  ;;  %v9385_v4 = vpack.c.bf16 %v7504_v8, %v7502_v43  ;;  %v9387_v5 = vpack.c.bf16 %v7509_v54, %v7507_v52 }
0x4713   :  { %v10053_v17 = vpop.eup %10052 }
0x4714   :  { %v7316_v20 = vcombine.low %v7292_v28, %v7293_v39  ;;  %v7276_v55 = vrot.slane %v10053_v17, %v12701_v9  ;;  %v7283_v26 = vrot.slane %v10053_v17, %v11825_v62  ;;  %v7487_v9 = vld [vmem:[#allocation5 + $0x148] sm:$0xff]  ;;  %v7506_v28 = vld [vmem:[#allocation5 + $0x1e0] sm:$0xff]  ;;  %v7508_v39 = vld [vmem:[#allocation5 + $0x1f0] sm:$0xff] }
0x4715   :  { %v7511_v17 = vld [vmem:[#allocation5 + $0x208] sm:$0xff] }
0x4716   :  { %7320 = vrot.lane.b32.xlu1 %v7316_v20, %s10256_s19  ;;  %v7294_v21 = vmul.f32 %v7276_v55, %v7195_v10  ;;  %v7295_v46 = vmul.f32 %v7283_v26, %v7196_v42  ;;  %v7486_v10 = vld [vmem:[#allocation5 + $0x140] sm:$0xff]  ;;  %v9367_v42 = vpack.c.bf16 %v7489_v13, %v7487_v9  ;;  %v7513_v20 = vld [vmem:[#allocation5 + $0x218] sm:$0xff]  ;;  %v9389_v55 = vpack.c.bf16 %v7508_v39, %v7506_v28 }
0x4717   :  { %v9369_v0 = vpack.c.bf16 %v7488_v45, %v7486_v10  ;;  %v7514_v10 = vld [vmem:[#allocation5 + $0x220] sm:$0xff]  ;;  %v7519_v45 = vld [vmem:[#allocation5 + $0x248] sm:$0xff] }
0x4718   :  { %v7317_v35 = vcombine.low %v7294_v21, %v7295_v46  ;;  %9368 = vmatprep.subr.bf16.mxu1 %v9367_v42  ;;  %v9391_v21 = vpack.c.bf16 %v7513_v20, %v7511_v17  ;;  %v7510_v46 = vld [vmem:[#allocation5 + $0x200] sm:$0xff]  ;;  %v7516_v42 = vld [vmem:[#allocation5 + $0x230] sm:$0xff] }
0x4719   :  { %9370 = vmatpush1.bf16.msra.mxu1 %v9369_v0  ;;  %v9397_v50 = vpack.c.bf16 %v7516_v42, %v7514_v10  ;;  %v9399_v0 = vpack.c.bf16 %v7521_v36, %v7519_v45  ;;  %v7626_v45 = vld [vmem:[#allocation7 + $0x198] sm:$0xff]  ;;  %v7628_v36 = vld [vmem:[#allocation7 + $0x1a8] sm:$0xff] }
0x471a   :  { %7322 = vrot.lane.b32.xlu1 %v7317_v35, %s10256_s19  ;;  %9372 = vmatprep.subr.bf16.mxu1 %v9371_v60  ;;  %v7512_v35 = vld [vmem:[#allocation5 + $0x210] sm:$0xff]  ;;  %v7518_v60 = vld [vmem:[#allocation5 + $0x240] sm:$0xff] }
0x471b   :  { %v9393_v9 = vpack.c.bf16 %v7512_v35, %v7510_v46  ;;  %v9401_v25 = vpack.c.bf16 %v7520_v59, %v7518_v60  ;;  %v7627_v60 = vld [vmem:[#allocation7 + $0x1a0] sm:$0xff]  ;;  %v7630_v59 = vld [vmem:[#allocation7 + $0x1b8] sm:$0xff] }
0x471d   :  { %9374 = vmatpush1.bf16.msra.mxu1 %v9373_v22 }
0x471e   :  { %9376 = vmatprep.subr.bf16.mxu1 %v9375_v24  ;;  %v7523_v24 = vld [vmem:[#allocation5 + $0x268] sm:$0xff] }
0x471f   :  { %v9403_v16 = vpack.c.bf16 %v7525_v6, %v7523_v24  ;;  %v7629_v6 = vld [vmem:[#allocation7 + $0x1b0] sm:$0xff] }
0x4721   :  { %9378 = vmatpush1.bf16.msra.mxu1 %v9377_v11  ;;  %v9405_v11 = vpack.c.bf16 %v7524_v18, %v7522_v12  ;;  %v7631_v12 = vld [vmem:[#allocation7 + $0x1c0] sm:$0xff]  ;;  %v7636_v18 = vld [vmem:[#allocation7 + $0x1e8] sm:$0xff] }
0x4722   :  { %9380 = vmatprep.subr.bf16.mxu1 %v9379_v63 }
0x4725   :  { %9382 = vmatpush1.bf16.msra.mxu1 %v9381_v14 }
0x4726   :  { %9384 = vmatprep.subr.bf16.mxu1 %v9383_v58 }
0x4729   :  { %9386 = vmatpush1.bf16.msra.mxu1 %v9385_v4 }
0x472a   :  { %9388 = vmatprep.subr.bf16.mxu1 %v9387_v5 }
0x472d   :  { %9390 = vmatpush1.bf16.msra.mxu1 %v9389_v55 }
0x472e   :  { %9392 = vmatprep.subr.bf16.mxu1 %v9391_v21 }
0x4731   :  { %9394 = vmatpush1.bf16.msra.mxu1 %v9393_v9 }
0x4733   :  { %v7319_v41 = vpop.permute.xlu0 %7318 }
0x4734   :  { %8723 = vmatmul.mubr.msk.f32.vlgmr.msra.gmra.mrb[44].mxu0 %vm146_vm0, %v7319_v41 }
0x4735   :  { %8725 = vmatprep.mubr.msk.f32.mxu0 %vm10271_vm13, %v13160_v27 }
0x4788   :  { %v7321_v2 = vpop.permute.xlu1 %7320 }
0x4789   :  { %8726 = vmatmul.mubr.msk.f32.gmra.mrb[46].mxu0 %vm146_vm0, %v7321_v2  ;;  %v7515_v2 = vld [vmem:[#allocation5 + $0x228] sm:$0xff] }
0x478a   :  { %8728 = vmatprep.mubr.msk.f32.mxu0 %vm10271_vm13, %v13160_v27 }
0x478c   :  { %v7323_v62 = vpop.permute.xlu1 %7322 }
0x478d   :  { %8729 = vmatmul.mubr.msk.f32.gmra.mrb[48].mxu0 %vm146_vm0, %v7323_v62  ;;  %v7517_v62 = vld [vmem:[#allocation5 + $0x238] sm:$0xff] }
0x478e   :  { %v9395_v13 = vpack.c.bf16 %v7517_v62, %v7515_v2 }
0x4790   :  { %9396 = vmatprep.subr.bf16.mxu1 %v9395_v13 }
0x4791   :  { %9398 = vmatpush1.bf16.msra.mxu1 %v9397_v50  ;;  %v7625_v50 = vld [vmem:[#allocation7 + $0x190] sm:$0xff] }
0x4792   :  { %9400 = vmatprep.subr.bf16.mxu1 %v9399_v0  ;;  %v9407_v0 = vpack.c.bf16 %v7628_v36, %v7626_v45 }
0x4794   :  { %9408 = vmatprep.subr.bf16.mxu0 %v9407_v0  ;;  %v7651_v0 = vld [vmem:[#allocation7 + $0x260] sm:$0xff] }
0x4795   :  { %9402 = vmatpush1.bf16.msra.mxu1 %v9401_v25  ;;  %v7632_v25 = vld [vmem:[#allocation7 + $0x1c8] sm:$0xff] }
0x4796   :  { %9404 = vmatprep.subr.bf16.mxu1 %v9403_v16  ;;  %v9411_v24 = vpack.c.bf16 %v7632_v25, %v7630_v59  ;;  %v7634_v16 = vld [vmem:[#allocation7 + $0x1d8] sm:$0xff]  ;;  %v7656_v59 = vld [vmem:[#allocation7 + $0x288] sm:$0xff] }
0x4799   :  { %9406 = vmatpush1.bf16.msra.mxu1 %v9405_v11  ;;  %v9413_v11 = vpack.c.bf16 %v7631_v12, %v7629_v6  ;;  %v7658_v6 = vld [vmem:[#allocation7 + $0x298] sm:$0xff]  ;;  %v7660_v12 = vld [vmem:[#allocation7 + $0x2a8] sm:$0xff] }
0x479a   :  { %9455 = vmatprep.subr.bf16.mxu1 %v13161_v23 }
0x4807   :  { %v7396_v26 = vpop.f32.mrb[44].mxu0 }
0x4808   :  { %v8724_v41 = vpop.f32.mrb[45].mxu0  ;;  %v12752_v47 = vadd.f32 %v8545_v29, %v7396_v26 }
0x480a   :  { %v7413_v22 = vcombine.high %v12752_v47, %v12752_v47 }
0x480c   :  { %v12757_v63 = vcombine.low %v12752_v47, %v7413_v22 }
0x480e   :  { %v7453_v31 = vrot.slane %v12757_v63, 2  ;;  %v7441_v43 = vrot.slane %v12757_v63, 1  ;;  %v7465_v20 = vrot.slane %v12757_v63, 3 }
0x485c   :  { %v7401_v34 = vpop.f32.mrb[46].mxu0 }
0x485d   :  { %v12760_v3 = vadd.f32 %v8545_v29, %v7401_v34  ;;  %v8727_v44 = vpop.f32.mrb[47].mxu0  ;;  %v9415_v34 = vpack.c.bf16 %v7636_v18, %v7634_v16  ;;  %v9439_v18 = vpack.c.bf16 %v7660_v12, %v7658_v6  ;;  %v7670_v6 = vld [vmem:[#allocation7 + $0x2f8] sm:$0xff]  ;;  %v7672_v12 = vld [vmem:[#allocation7 + $0x308] sm:$0xff] }
0x485e   :  { %v7633_v44 = vld [vmem:[#allocation7 + $0x1d0] sm:$0xff] }
0x485f   :  { %v7477_v14 = vcombine.low %v7413_v22, %v12760_v3  ;;  %v7454_v58 = vrot.slane %v12760_v3, 2  ;;  %v7442_v8 = vrot.slane %v12760_v3, 1  ;;  %v7466_v54 = vrot.slane %v12760_v3, 3 }
0x4860   :  { %v7406_v52 = vpop.f32.mrb[48].mxu0  ;;  %v7414_v5 = vcombine.high %v12760_v3, %v12760_v3  ;;  %v9409_v22 = vpack.c.bf16 %v7627_v60, %v7625_v50  ;;  %v7649_v50 = vld [vmem:[#allocation7 + $0x250] sm:$0xff]  ;;  %v7654_v60 = vld [vmem:[#allocation7 + $0x278] sm:$0xff] }
0x4861   :  { %v12768_v4 = vadd.f32 %v8545_v29, %v7406_v52  ;;  %v8730_v28 = vpop.f32.mrb[49].mxu0  ;;  %8550 = vmatprep.mubr.msk.f32.mxu1 %vm146_vm0, %v7477_v14  ;;  %v7455_v39 = vsel %vm2696_vm9, %v7453_v31, %v7454_v58  ;;  %v7443_v17 = vsel %vm2699_vm10, %v7441_v43, %v7442_v8  ;;  %v7467_v21 = vsel %vm2693_vm8, %v7465_v20, %v7466_v54  ;;  %v7635_v31 = vld [vmem:[#allocation7 + $0x1e0] sm:$0xff]  ;;  %v7638_v14 = vld [vmem:[#allocation7 + $0x1f8] sm:$0xff]  ;;  %v7640_v58 = vld [vmem:[#allocation7 + $0x208] sm:$0xff] }
0x4862   :  { %7459 = vrot.lane.b32.xlu1 %v7455_v39, %s10254_s0  ;;  %7447 = vrot.lane.b32.xlu0 %v7443_v17, %s10256_s19  ;;  %v9417_v43 = vpack.c.bf16 %v7635_v31, %v7633_v44  ;;  %v9419_v8 = vpack.c.bf16 %v7640_v58, %v7638_v14  ;;  %v7637_v52 = vld [vmem:[#allocation7 + $0x1f0] sm:$0xff]  ;;  %v7639_v54 = vld [vmem:[#allocation7 + $0x200] sm:$0xff]  ;;  %v7644_v28 = vld [vmem:[#allocation7 + $0x228] sm:$0xff]  ;;  %v9433_v25 = vpack.c.bf16 %v7651_v0, %v7649_v50  ;;  %v7417_v0 = vmax.f32 %v12760_v3, 0.0 }
0x4863   :  { %v12780_v55 = vcombine.high %v12768_v4, %v12768_v4  ;;  %v12783_v26 = vcombine.low %v7414_v5, %v12768_v4  ;;  %9410 = vmatpush1.bf16.msra.mxu0 %v9409_v22  ;;  %v7642_v5 = vld [vmem:[#allocation7 + $0x218] sm:$0xff]  ;;  %v9421_v39 = vpack.c.bf16 %v7639_v54, %v7637_v52  ;;  %v7641_v20 = vld [vmem:[#allocation7 + $0x210] sm:$0xff]  ;;  %v7664_v31 = vld [vmem:[#allocation7 + $0x2c8] sm:$0xff] }
0x4864   :  { %9412 = vmatprep.subr.bf16.mxu0 %v9411_v24  ;;  %v9423_v17 = vpack.c.bf16 %v7644_v28, %v7642_v5  ;;  %v7653_v22 = vld [vmem:[#allocation7 + $0x270] sm:$0xff]  ;;  %v7655_v24 = vld [vmem:[#allocation7 + $0x280] sm:$0xff]  ;;  %v7662_v44 = vld [vmem:[#allocation7 + $0x2b8] sm:$0xff] }
0x4865   :  { %v7444_v46 = vrot.slane %v12783_v26, 1  ;;  %v7445_v35 = vrot.slane %v12780_v55, 1  ;;  %v7456_v41 = vrot.slane %v12783_v26, 2  ;;  %v7457_v2 = vrot.slane %v12780_v55, 2  ;;  %v7666_v52 = vld [vmem:[#allocation7 + $0x2d8] sm:$0xff]  ;;  %v7668_v54 = vld [vmem:[#allocation7 + $0x2e8] sm:$0xff] }
0x4866   :  { %7471 = vrot.lane.b32.xlu0 %v7467_v21, %s10257_s11  ;;  %v7478_v62 = vcombine.low %v12768_v4, %v12780_v55  ;;  %v7468_v13 = vrot.slane %v12783_v26, 3  ;;  %v7469_v10 = vrot.slane %v12780_v55, 3  ;;  %v7643_v21 = vld [vmem:[#allocation7 + $0x220] sm:$0xff]  ;;  %v9437_v16 = vpack.c.bf16 %v7655_v24, %v7653_v22 }
0x4867   :  { %v7446_v9 = vsel %vm2699_vm10, %v7444_v46, %v7445_v35  ;;  %v7458_v42 = vsel %vm2696_vm9, %v7456_v41, %v7457_v2  ;;  %9414 = vmatpush1.bf16.msra.mxu0 %v9413_v11  ;;  %v7646_v46 = vld [vmem:[#allocation7 + $0x238] sm:$0xff]  ;;  %v7648_v35 = vld [vmem:[#allocation7 + $0x248] sm:$0xff]  ;;  %v9425_v41 = vpack.c.bf16 %v7643_v21, %v7641_v20  ;;  %v7657_v11 = vld [vmem:[#allocation7 + $0x290] sm:$0xff]  ;;  %v9443_v58 = vpack.c.bf16 %v7664_v31, %v7662_v44 }
0x4868   :  { %7449 = vrot.lane.b32.xlu1 %v7446_v9, %s10256_s19  ;;  %v7470_v29 = vsel %vm2693_vm8, %v7468_v13, %v7469_v10  ;;  %9416 = vmatprep.subr.bf16.mxu0 %v9415_v34  ;;  %v9427_v2 = vpack.c.bf16 %v7648_v35, %v7646_v46  ;;  %v7645_v9 = vld [vmem:[#allocation7 + $0x230] sm:$0xff]  ;;  %v7647_v13 = vld [vmem:[#allocation7 + $0x240] sm:$0xff]  ;;  %v7650_v10 = vld [vmem:[#allocation7 + $0x258] sm:$0xff]  ;;  %v9447_v28 = vpack.c.bf16 %v7668_v54, %v7666_v52  ;;  %v7418_v55 = vmax.f32 %v12768_v4, 0.0 }
0x4869   :  { %v9429_v45 = vpack.c.bf16 %v7647_v13, %v7645_v9  ;;  %v7659_v34 = vld [vmem:[#allocation7 + $0x2a0] sm:$0xff]  ;;  %vm7889_vm8 = vcmask 97280   ;;  %vm10273_vm9 = vmmov 1  }
0x486a   :  { %7461 = vrot.lane.b32.xlu0 %v7458_v42, %s10254_s0  ;;  %v7652_v42 = vld [vmem:[#allocation7 + $0x268] sm:$0xff]  ;;  %v9441_v14 = vpack.c.bf16 %v7659_v34, %v7657_v11  ;;  %v7674_v34 = vld [vmem:[#allocation7 + $0x318] sm:$0xff]  ;;  %v8549_v44 = vld [vmem:[%s13096_s8 + $0x2] sm:$0x3] }
0x486b   :  { %9418 = vmatpush1.bf16.msra.mxu0 %v9417_v43  ;;  %v9431_v36 = vpack.c.bf16 %v7652_v42, %v7650_v10  ;;  %v7661_v43 = vld [vmem:[#allocation7 + $0x2b0] sm:$0xff]  ;;  %v7532_v31 = vrot.slane %v8549_v44, %v10990_v53  ;;  %vm12875_vm10 = vmpackc.low %vm2690_vm7, %vm10273_vm9  ;;  %vm7066_vm7 = vcmask 257024  }
0x486c   :  { %7473 = vrot.lane.b32.xlu1 %v7470_v29, %s10257_s11  ;;  %9420 = vmatprep.subr.bf16.mxu0 %v9419_v8  ;;  %v9435_v29 = vpack.c.bf16 %v7656_v59, %v7654_v60  ;;  %v7663_v8 = vld [vmem:[#allocation7 + $0x2c0] sm:$0xff]  ;;  %8511 = vst.msk [vmem:[%s13104_s16 + $0x180] sm:$0xf] %vm7066_vm7, %v13160_v27  ;;  %8535 = vst.msk [vmem:[%s13104_s16 + $0x310] sm:$0xf] %vm7066_vm7, %v13160_v27 }
0x486d   :  { %v9445_v5 = vpack.c.bf16 %v7663_v8, %v7661_v43 }
0x486e   :  { %7419 = vrot.lane.b32.xlu0 %v12752_v47, %s10257_s11 }
0x486f   :  { %9422 = vmatpush1.bf16.msra.mxu0 %v9421_v39  ;;  %v7665_v39 = vld [vmem:[#allocation7 + $0x2d0] sm:$0xff] }
0x4870   :  { %7421 = vrot.lane.b32.xlu1 %v12760_v3, %s10257_s11  ;;  %9424 = vmatprep.subr.bf16.mxu0 %v9423_v17  ;;  %v7667_v17 = vld [vmem:[#allocation7 + $0x2e0] sm:$0xff]  ;;  %v7669_v3 = vld [vmem:[#allocation7 + $0x2f0] sm:$0xff] }
0x4871   :  { %v9449_v20 = vpack.c.bf16 %v7667_v17, %v7665_v39 }
0x4872   :  { %7423 = vrot.lane.b32.xlu0 %v12768_v4, %s10257_s11  ;;  %v7673_v4 = vld [vmem:[#allocation7 + $0x310] sm:$0xff] }
0x4873   :  { %9426 = vmatpush1.bf16.msra.mxu0 %v9425_v41 }
0x4874   :  { %9428 = vmatprep.subr.bf16.mxu0 %v9427_v2 }
0x4877   :  { %9430 = vmatpush1.bf16.msra.mxu0 %v9429_v45 }
0x4878   :  { %9432 = vmatprep.subr.bf16.mxu0 %v9431_v36 }
0x487b   :  { %9434 = vmatpush1.bf16.msra.mxu0 %v9433_v25 }
0x487c   :  { %9436 = vmatprep.subr.bf16.mxu0 %v9435_v29 }
0x487f   :  { %9438 = vmatpush1.bf16.msra.mxu0 %v9437_v16  ;;  %v9451_v16 = vpack.c.bf16 %v7672_v12, %v7670_v6 }
0x4880   :  { %9440 = vmatprep.subr.bf16.mxu0 %v9439_v18  ;;  %v7671_v18 = vld [vmem:[#allocation7 + $0x300] sm:$0xff] }
0x4881   :  { %v9453_v11 = vpack.c.bf16 %v7671_v18, %v7669_v3 }
0x4883   :  { %9442 = vmatpush1.bf16.msra.mxu0 %v9441_v14  ;;  %v7536_v14 = vrot.slane %v8549_v44, %v10999_v56  ;;  %v13165_v44 = vmov 66  }
0x4884   :  { %9444 = vmatprep.subr.bf16.mxu0 %v9443_v58 }
0x4887   :  { %9446 = vmatpush1.bf16.msra.mxu0 %v9445_v5 }
0x4888   :  { %9448 = vmatprep.subr.bf16.mxu0 %v9447_v28 }
0x488b   :  { %9450 = vmatpush1.bf16.msra.mxu0 %v9449_v20 }
0x488c   :  { %9452 = vmatprep.subr.bf16.mxu0 %v9451_v16 }
0x488f   :  { %9454 = vmatpush1.bf16.msra.mxu0 %v9453_v11 }
0x4890   :  { %7742 = vmatprep.subr.mxu0 %v7674_v34 }
0x4893   :  { %7743 = vmatpush1.msra.mxu0 %v7673_v4 }
0x48d4   :  { %v7448_v21 = vpop.permute.xlu0 %7447  ;;  %v7460_v35 = vpop.permute.xlu1 %7459 }
0x48d5   :  { %v7479_v46 = vsel %vm146_vm0, %v12757_v63, %v7448_v21 }
0x48d6   :  { %v7481_v41 = vsel %vm406_vm3, %v7479_v46, %v7460_v35  ;;  %v8552_v35 = vld [vmem:[%s13098_s10 + $0x2] sm:$0x3] }
0x48d8   :  { %v7472_v2 = vpop.permute.xlu0 %7471 }
0x48d9   :  { %v7483_v9 = vsel %vm3062_vm11, %v7481_v41, %v7472_v2  ;;  %v7681_v41 = vrot.slane %v8552_v35, %v10990_v53  ;;  %v7685_v2 = vrot.slane %v8552_v35, %v10999_v56 }
0x48da   :  { %7608 = vmatmul.mubr.f32.vlgmr.msra.gmra.mrb[58].mxu1 %v7483_v9  ;;  %v7450_v13 = vpop.permute.xlu1 %7449 }
0x48db   :  { %v7480_v10 = vsel %vm146_vm0, %v12783_v26, %v7450_v13  ;;  %8551 = vmatprep.mubr.msk.f32.mxu1 %vm146_vm0, %v7478_v62 }
0x48dc   :  { %v7462_v42 = vpop.permute.xlu0 %7461 }
0x48dd   :  { %v7482_v45 = vsel %vm406_vm3, %v7480_v10, %v7462_v42 }
0x48de   :  { %v7474_v63 = vpop.permute.xlu1 %7473 }
0x48df   :  { %v7484_v36 = vsel %vm3062_vm11, %v7482_v45, %v7474_v63  ;;  %vm2460_vm11 = vcmask 253952  }
0x48e0   :  { %v12819_v50 = vpop.permute.xlu0 %7419  ;;  %7614 = vmatmul.mubr.f32.gmra.mrb[60].mxu1 %v7484_v36 }
0x48e1   :  { %8735 = vmatprep.mubr.msk.f32.mxu1 %vm10271_vm13, %v13160_v27 }
0x48e2   :  { %v7422_v26 = vpop.permute.xlu1 %7421 }
0x48e3   :  { %v12824_v60 = vmul.f32 %v7422_v26, %v7417_v0 }
0x48e4   :  { %v7424_v62 = vpop.permute.xlu0 %7423 }
0x48e5   :  { %v7435_v59 = vcombine.high %v12824_v60, %v12824_v60  ;;  %v7430_v25 = vmul.f32 %v7424_v62, %v7418_v55 }
0x48e7   :  { %v7436_v29 = vcombine.high %v7430_v25, %v7430_v25  ;;  %v7989_v22 = vcombine.low %v7435_v59, %v7430_v25 }
0x48e9   :  { %v12829_v24 = vpack.i.bf16 %v7436_v29, %v7989_v22 }
0x49ad   :  { %v7609_v58 = vpop.f32.mrb[58].mxu1 }
0x49ae   :  { %v7610_v43 = vadd.f32 %v7609_v58, %v7532_v31  ;;  %v7611_v8 = vpop.f32.mrb[59].mxu1 }
0x49af   :  { %v7612_v52 = vadd.f32 %v7611_v8, %v7536_v14 }
0x49b0   :  { %v7620_v5 = vmax.f32 %v7610_v43, 0.0 }
0x49b1   :  { %v7621_v54 = vmax.f32 %v7612_v52, 0.0  ;;  %v7416_v52 = vmax.f32 %v12752_v47, 0.0 }
0x49b3   :  { %v7615_v28 = vpop.f32.mrb[60].mxu1  ;;  %8553 = vmatprep.mubr.msk.f32.mxu0 %vm13162_vm1, %v7621_v54  ;;  %v13168_v54 = vmov 70  }
0x49b4   :  { %v7616_v39 = vadd.f32 %v7615_v28, %v7532_v31  ;;  %v7617_v17 = vpop.f32.mrb[61].mxu1  ;;  %7759 = vmatmul.mubr.f32.vlgmr.msra.gmra.mrb[50].mxu0 %v7620_v5  ;;  %v13166_v31 = vmov 69   ;;  %v13169_v5 = vmov 68   ;;  %v7428_v28 = vmul.f32 %v12819_v50, %v7416_v52 }
0x49b5   :  { %v7618_v20 = vadd.f32 %v7617_v17, %v7536_v14  ;;  %v13170_v17 = vmov 67  }
0x49b6   :  { %v7622_v46 = vmax.f32 %v7616_v39, 0.0  ;;  %v7434_v39 = vcombine.high %v7428_v28, %v7428_v28 }
0x49b7   :  { %v7623_v21 = vmax.f32 %v7618_v20, 0.0 }
0x49b8   :  { %v7908_v20 = vcombine.low %v7428_v28, %v7434_v39 }
0x49b9   :  { %8554 = vmatprep.mubr.msk.f32.mxu0 %vm13163_vm4, %v7623_v21  ;;  %v13171_v21 = vmov 65  }
0x49ba   :  { %7765 = vmatmul.mubr.f32.gmra.mrb[52].mxu0 %v7622_v46  ;;  %v9603_v47 = vpack.i.bf16 %v12824_v60, %v7908_v20  ;;  %v13172_v46 = vmov 71  }
0x4a87   :  { %v7760_v9 = vpop.f32.mrb[50].mxu0 }
0x4a88   :  { %v7761_v13 = vadd.f32 %v7760_v9, %v7681_v41  ;;  %v7762_v10 = vpop.f32.mrb[51].mxu0 }
0x4a89   :  { %v7763_v42 = vadd.f32 %v7762_v10, %v7685_v2 }
0x4a8a   :  { %v8555_v45 = vmul.f32 -1.442695, %v7761_v13 }
0x4a8b   :  { %v8556_v63 = vmul.f32 -1.442695, %v7763_v42 }
0x4a8c   :  { %10054 = vpow2.f32 %v8555_v45 }
0x4a8d   :  { %10056 = vpow2.f32 %v8556_v63  ;;  %v7766_v36 = vpop.f32.mrb[52].mxu0 }
0x4a8e   :  { %v7767_v0 = vadd.f32 %v7766_v36, %v7681_v41  ;;  %v7768_v26 = vpop.f32.mrb[53].mxu0 }
0x4a8f   :  { %v7769_v55 = vadd.f32 %v7768_v26, %v7685_v2 }
0x4a90   :  { %v8557_v62 = vmul.f32 -1.442695, %v7767_v0 }
0x4a91   :  { %v8558_v59 = vmul.f32 -1.442695, %v7769_v55  ;;  %v13173_v55 = vld [vmem:[#allocation25_spill] sm:$0xff] }
0x4a92   :  { %10058 = vpow2.f32 %v8557_v62 }
0x4a93   :  { %10060 = vpow2.f32 %v8558_v59  ;;  %v13174_v59 = vld [vmem:[#allocation26_spill] sm:$0xff] }
0x4a96   :  { %v10055_v25 = vpop.eup %10054 }
0x4a97   :  { %v10057_v29 = vpop.eup %10056  ;;  %v7783_v22 = vadd.f32 1.0, %v10055_v25 }
0x4a98   :  { %v7784_v56 = vadd.f32 1.0, %v10057_v29 }
0x4a9a   :  { %10062 = vrcp.f32 %v7784_v56 }
0x4a9b   :  { %10064 = vrcp.f32 %v7783_v22 }
0x4a9c   :  { %v10059_v6 = vpop.eup %10058 }
0x4a9d   :  { %v10061_v12 = vpop.eup %10060  ;;  %v7785_v3 = vadd.f32 1.0, %v10059_v6 }
0x4a9e   :  { %v7786_v16 = vadd.f32 1.0, %v10061_v12  ;;  %v13175_v12 = vld [vmem:[#allocation27_spill] sm:$0xff] }
0x4aa0   :  { %10066 = vrcp.f32 %v7786_v16 }
0x4aa1   :  { %10068 = vrcp.f32 %v7785_v3 }
0x4aa4   :  { %v10063_v18 = vpop.eup %10062 }
0x4aa5   :  { %v10065_v11 = vpop.eup %10064  ;;  %7810 = vperm.xlu0 %9590, %v10063_v18   ;;  %7797 = vperm.xlu1 %9589, %v10063_v18   ;;  %v7881_v34 = vsel %vm13164_vm5, %v10063_v18, 0.0 }
0x4aa6   :  { %v7882_v4 = vadd.f32 %v10065_v11, %v7881_v34 }
0x4aa9   :  { %9594 = vset.pattern.permute.xlu0 %v13165_v44  ;;  %9591 = vset.pattern.permute.xlu1 %v13166_v31 }
0x4aaa   :  { %v10067_v14 = vpop.eup %10066  ;;  %7858 = vperm.xlu0 %9594, %v10063_v18   ;;  %7822 = vperm.xlu1 %9591, %v10063_v18  }
0x4aab   :  { %v10069_v58 = vpop.eup %10068  ;;  %v7885_v43 = vsel %vm13167_vm6, %v10067_v14, 0.0 }
0x4aac   :  { %v7886_v8 = vadd.f32 %v10069_v58, %v7885_v43 }
0x4aae   :  { %9597 = vset.pattern.permute.xlu0 %v13168_v54  ;;  %9592 = vset.pattern.permute.xlu1 %v13169_v5 }
0x4aaf   :  { %7834 = vperm.xlu1 %9592, %v10063_v18   ;;  %7814 = vperm.xlu0 %9597, %v10067_v14  }
0x4ab3   :  { %9593 = vset.pattern.permute.xlu1 %v13170_v17  ;;  %9598 = vset.pattern.permute.xlu0 %v13166_v31 }
0x4ab4   :  { %7846 = vperm.xlu1 %9593, %v10063_v18   ;;  %7826 = vperm.xlu0 %9598, %v10067_v14  }
0x4ab8   :  { %9595 = vset.pattern.permute.xlu1 %v13171_v21  ;;  %9601 = vset.pattern.permute.xlu0 %v13165_v44 }
0x4ab9   :  { %7870 = vperm.xlu1 %9595, %v10063_v18   ;;  %7862 = vperm.xlu0 %9601, %v10067_v14  }
0x4abd   :  { %9596 = vset.pattern.permute.xlu1 %v13172_v46  ;;  %9604 = vrot.lane.b32.xlu0 %v9603_v47, %s10257_s11 }
0x4abe   :  { %7802 = vperm.xlu1 %9596, %v10067_v14   ;;  %9613 = vset.pattern.permute.xlu0 %v13171_v21 }
0x4ac2   :  { %9599 = vset.pattern.permute.xlu1 %v13169_v5 }
0x4ac3   :  { %7838 = vperm.xlu1 %9599, %v10067_v14  }
0x4ac7   :  { %9600 = vset.pattern.permute.xlu1 %v13170_v17 }
0x4ac8   :  { %7850 = vperm.xlu1 %9600, %v10067_v14  }
0x4acc   :  { %9602 = vset.pattern.permute.xlu1 %v13171_v21 }
0x4acd   :  { %7874 = vperm.xlu1 %9602, %v10067_v14  }
0x4ad1   :  { %9609 = vrot.lane.b32.xlu1 %v12829_v24, %s10257_s11 }
0x4adc   :  { %7883 = vadd.xlane.f32.xlu0 %v7882_v4 }
0x4ae0   :  { %7887 = vadd.xlane.f32.xlu0 %v7886_v8 }
0x4b24   :  { %v7811_v50 = vpop.permute.xlu0 %7810  ;;  %v7798_v60 = vpop.permute.xlu1 %7797 }
0x4b25   :  { %v7817_v2 = vmul.f32 %v11842_v49, %v7811_v50  ;;  %v7805_v9 = vmul.f32 %v11846_v1, %v7798_v60  ;;  %v13179_v50 = vld [vmem:[#allocation21_spill] sm:$0xff] }
0x4b27   :  { %v7819_v45 = vadd.f32 %v7817_v2, %v7805_v9 }
0x4b29   :  { %v7859_v35 = vpop.permute.xlu0 %7858  ;;  %v7823_v41 = vpop.permute.xlu1 %7822 }
0x4b2a   :  { %v7829_v13 = vmul.f32 %v11849_v40, %v7823_v41  ;;  %v7865_v25 = vmul.f32 %v13174_v59, %v7859_v35  ;;  %v13180_v41 = vld [vmem:[#allocation20_spill] sm:$0xff] }
0x4b2b   :  { %v2525_v2 = vrot.slane %v13180_v41, %v11179_v7 }
0x4b2c   :  { %v7831_v36 = vadd.f32 %v7829_v13, %v7819_v45  ;;  %v13181_v45 = vld [vmem:[#allocation23_spill] sm:$0xff] }
0x4b2e   :  { %v7815_v10 = vpop.permute.xlu0 %7814  ;;  %v7835_v42 = vpop.permute.xlu1 %7834 }
0x4b2f   :  { %v7841_v63 = vmul.f32 %v11861_v48, %v7835_v42  ;;  %v7818_v31 = vmul.f32 %v11842_v49, %v7815_v10 }
0x4b31   :  { %v7843_v26 = vadd.f32 %v7841_v63, %v7831_v36  ;;  %v2526_v63 = vcombine.high %v2525_v2, %v2525_v2 }
0x4b33   :  { %v7827_v0 = vpop.permute.xlu0 %7826  ;;  %v7847_v24 = vpop.permute.xlu1 %7846 }
0x4b34   :  { %v7853_v62 = vmul.f32 %v13173_v55, %v7847_v24  ;;  %v7830_v52 = vmul.f32 %v11849_v40, %v7827_v0  ;;  %v13178_v40 = vld [vmem:[#allocation19_spill] sm:$0xff]  ;;  %v13182_v0 = vld [vmem:[#allocation24_spill] sm:$0xff]  ;;  %v2540_v24 = vrot.slane %v2526_v63, %v11179_v7 }
0x4b35   :  { %v2486_v21 = vrot.slane %v13178_v40, %v11179_v7 }
0x4b36   :  { %v7855_v29 = vadd.f32 %v7853_v62, %v7843_v26  ;;  %v2548_v62 = vrot.slane %v2540_v24, %v10990_v53  ;;  %v8571_v24 = vld [vmem:[%s13101_s13 + $0x48] sm:$0xff] }
0x4b37   :  { %v2487_v60 = vcombine.high %v2486_v21, %v2486_v21 }
0x4b38   :  { %v7863_v22 = vpop.permute.xlu0 %7862  ;;  %v7867_v56 = vadd.f32 %v7865_v25, %v7855_v29  ;;  %v7871_v6 = vpop.permute.xlu1 %7870  ;;  %v6902_v25 = vrot.slane %v12652_v19, %v11179_v7  ;;  %v2533_v19 = vrot.slane %v2525_v2, %v11179_v7 }
0x4b39   :  { %v7877_v3 = vmul.f32 %v13175_v12, %v7871_v6  ;;  %v7866_v17 = vmul.f32 %v13174_v59, %v7863_v22  ;;  %v2501_v36 = vrot.slane %v2487_v60, %v11179_v7  ;;  %v8560_v60 = vld [vmem:[%s13094_s6 + $0x1] ss:$0 sm:$0xff] }
0x4b3a   :  { %v6903_v22 = vcombine.high %v6902_v25, %v6902_v25 }
0x4b3b   :  { %v7879_v16 = vadd.f32 %v7877_v3, %v7867_v56  ;;  %v2509_v26 = vrot.slane %v2501_v36, %v10990_v53  ;;  %v2494_v56 = vrot.slane %v2486_v21, %v11179_v7 }
0x4b3c   :  { %v9605_v18 = vpop.permute.xlu0 %9604  ;;  %v6917_v6 = vrot.slane %v6903_v22, %v11179_v7 }
0x4b3d   :  { %v9607_v11 = vunpack.i.h.bf16 %v9605_v18  ;;  %v9606_v34 = vunpack.i.l.bf16 %v9605_v18  ;;  %v7803_v4 = vpop.permute.xlu1 %7802  ;;  %v7890_v44 = vsel %vm7889_vm8, %v7879_v16, 0.0  ;;  %v2505_v3 = vrot.slane %v2494_v56, %v10990_v53  ;;  %v8576_v56 = vld [vmem:[%s13101_s13 + $0x70] sm:$0xff] }
0x4b3e   :  { %v7806_v14 = vmul.f32 %v11846_v1, %v7803_v4  ;;  %7891 = vadd.xlane.f32.xlu1 %v7890_v44 }
0x4b3f   :  { %v9456_v43 = vpack.c.bf16 %v9607_v11, %v9606_v34 }
0x4b40   :  { %v7820_v8 = vadd.f32 %v7818_v31, %v7806_v14 }
0x4b41   :  { %9458 = vmatpush3.bf16.msk.msra.mxu1 %vm12875_vm10, %v9456_v43 }
0x4b42   :  { %v7839_v54 = vpop.permute.xlu1 %7838  ;;  %9459 = vmatprep.subr.bf16.mxu1 %v13161_v23  ;;  %v7832_v49 = vadd.f32 %v7830_v52, %v7820_v8 }
0x4b43   :  { %v7842_v1 = vmul.f32 %v11861_v48, %v7839_v54 }
0x4b44   :  { %8736 = vmatmul.mubr.msk.f32.vlgmr.msra.gmra.mrb[62].mxu1 %vm7889_vm8, %v7879_v16  ;;  %v2544_v16 = vrot.slane %v2533_v19, %v10990_v53 }
0x4b45   :  { %8742 = vmatprep.mubr.msk.f32.mxu1 %vm10271_vm13, %v13160_v27  ;;  %v7844_v28 = vadd.f32 %v7842_v1, %v7832_v49  ;;  %v8073_v27 = vld [vmem:[#allocation8 + $0x20] sm:$0xff] }
0x4b47   :  { %v7851_v5 = vpop.permute.xlu1 %7850 }
0x4b48   :  { %v7854_v39 = vmul.f32 %v13173_v55, %v7851_v5  ;;  %v6862_v55 = vrot.slane %v12633_v30, %v11179_v7  ;;  %v13183_v30 = vld [vmem:[#allocation22_spill] sm:$0xff] }
0x4b4a   :  { %v7856_v20 = vadd.f32 %v7854_v39, %v7844_v28  ;;  %v6863_v59 = vcombine.high %v6862_v55, %v6862_v55 }
0x4b4c   :  { %v7868_v47 = vadd.f32 %v7866_v17, %v7856_v20  ;;  %v7875_v23 = vpop.permute.xlu1 %7874  ;;  %v6877_v29 = vrot.slane %v6863_v59, %v11179_v7 }
0x4b4d   :  { %v7878_v46 = vmul.f32 %v13175_v12, %v7875_v23 }
0x4b4e   :  { %v6885_v12 = vrot.slane %v6877_v29, %v10990_v53  ;;  %v8575_v29 = vld [vmem:[%s13101_s13 + $0x68] sm:$0xff] }
0x4b4f   :  { %v7880_v48 = vadd.f32 %v7878_v46, %v7868_v47  ;;  %2454 = vrot.lane.b32.xlu1 %v13179_v50, %s10254_s0 }
0x4b50   :  { %v9610_v35 = vpop.permute.xlu1 %9609 }
0x4b51   :  { %v9612_v9 = vunpack.i.h.bf16 %v9610_v35  ;;  %v9611_v13 = vunpack.i.l.bf16 %v9610_v35  ;;  %v7893_v10 = vsel %vm7889_vm8, %v7880_v48, 0.0 }
0x4b52   :  { %7894 = vadd.xlane.f32.xlu0 %v7893_v10 }
0x4b53   :  { %v9460_v42 = vpack.c.bf16 %v9612_v9, %v9611_v13  ;;  %2471 = vrot.lane.b32.xlu1 %v13181_v45, %s10256_s19 }
0x4b55   :  { %9462 = vmatpush3.bf16.msk.msra.mxu1 %vm12875_vm10, %v9460_v42 }
0x4b57   :  { %2473 = vrot.lane.b32.xlu1 %v13182_v0, %s10256_s19  ;;  %v8570_v0 = vld [vmem:[%s13101_s13 + $0x40] sm:$0xff] }
0x4b58   :  { %8743 = vmatmul.mubr.msk.f32.vlgmr.msra.gmra.mrb[64].mxu1 %vm7889_vm8, %v7880_v48 }
0x4b5b   :  { %2512 = vrot.lane.b32.xlu1 %v2509_v26, %s10254_s0  ;;  %v9471_v26 = vpack.c.bf16 %v8571_v24, %v8570_v0 }
0x4b5d   :  { %9472 = vmatprep.subr.bf16.mxu0 %v9471_v26 }
0x4b5e   :  { %9474 = vmatpush3.bf16.msra.mxu0 %v9471_v26 }
0x4b5f   :  { %2551 = vrot.lane.b32.xlu1 %v2548_v62, %s10256_s19  ;;  %v8573_v62 = vld [vmem:[%s13101_s13 + $0x58] sm:$0xff] }
0x4b63   :  { %6832 = vrot.lane.b32.xlu1 %v12664_v33, %s10254_s0  ;;  %v6925_v33 = vrot.slane %v6917_v6, %v10990_v53 }
0x4b67   :  { %6849 = vrot.lane.b32.xlu1 %v12679_v57, %s10256_s19  ;;  %v6870_v57 = vrot.slane %v6862_v55, %v11179_v7  ;;  %v8572_v55 = vld [vmem:[%s13101_s13 + $0x50] sm:$0xff] }
0x4b68   :  { %2456 = vrot.lane.b32.xlu0 %v13183_v30, %s10254_s0  ;;  %v9475_v59 = vpack.c.bf16 %v8573_v62, %v8572_v55  ;;  %v8577_v30 = vld [vmem:[%s13101_s13 + $0x78] sm:$0xff] }
0x4b69   :  { %v9483_v6 = vpack.c.bf16 %v8577_v30, %v8576_v56 }
0x4b6a   :  { %9476 = vmatprep.subr.bf16.mxu0 %v9475_v59 }
0x4b6b   :  { %6888 = vrot.lane.b32.xlu1 %v6885_v12, %s10254_s0  ;;  %9478 = vmatpush3.bf16.msra.mxu0 %v9475_v59  ;;  %v8565_v12 = vld [vmem:[#allocation10 + $0x1] ss:$0 sm:$0xff] }
0x4b6c   :  { %2510 = vrot.lane.b32.xlu0 %v2505_v3, %s10254_s0 }
0x4b6f   :  { %6928 = vrot.lane.b32.xlu1 %v6925_v33, %s10256_s19 }
0x4b70   :  { %2549 = vrot.lane.b32.xlu0 %v2544_v16, %s10256_s19 }
0x4b73   :  { %7098 = vrot.lane.b32.xlu1 %v12681_v32, %s10256_s19  ;;  %v6881_v32 = vrot.slane %v6870_v57, %v10990_v53 }
0x4b74   :  { %6830 = vrot.lane.b32.xlu0 %v12660_v38, %s10254_s0  ;;  %v6910_v38 = vrot.slane %v6902_v25, %v11179_v7  ;;  %v8075_v7 = vld [vmem:[#allocation8 + $0x30] sm:$0xff]  ;;  %v8574_v25 = vld [vmem:[%s13101_s13 + $0x60] sm:$0xff]  ;;  %s10274_s13 = smov [#allocation13]  }
0x4b75   :  { %v9479_v22 = vpack.c.bf16 %v8575_v29, %v8574_v25  ;;  %s8287_s29 = sshll.u32 %s10274_s13, 4  ;;  %s8288_s29 = int_to_ptr.vmem [resolvable:$true] %s8287_s29 }
0x4b76   :  { %v6921_v18 = vrot.slane %v6910_v38, %v10990_v53  ;;  %s10210_s27 = scalar_lea.vmem %s8288_s29, 256  ;;  %p10215_p7 = scmp.lt.s32.totalorder %s8288_s29, %s8288_s29 }
0x4b77   :  { %7102 = vrot.lane.b32.xlu1 %v12690_v15, %s10256_s19  ;;  %v8074_v15 = vld [vmem:[#allocation8 + $0x28] sm:$0xff]  ;;  %9480 = vmatprep.subr.bf16.mxu0 %v9479_v22  ;;  %p10211_p6 = scmp.ne.s32.totalorder %s8288_s29, %s10210_s27  ;;  %p10216_p8 = scmp.lt.s32.totalorder %s10210_s27, %s10210_s27 }
0x4b78   :  { %6847 = vrot.lane.b32.xlu0 %v12667_v37, %s10256_s19  ;;  %v9463_v11 = vpack.c.bf16 %v8074_v15, %v8073_v27  ;;  %v8076_v37 = vld [vmem:[#allocation8 + $0x38] sm:$0xff]  ;;  %9482 = vmatpush3.bf16.msra.mxu0 %v9479_v22 }
0x4b79   :  { %v9467_v34 = vpack.c.bf16 %v8076_v37, %v8075_v7  ;;  %9484 = vmatprep.subr.bf16.mxu0 %v9483_v6  ;;  %p10217_p9 = por %p10216_p8, %p10215_p7 }
0x4b7a   :  { %9464 = vmatprep.subr.bf16.mxu1 %v9463_v11 }
0x4b7b   :  { %9466 = vmatpush3.bf16.msra.mxu1 %v9463_v11  ;;  %p10218_p10 = pnand %p10217_p9, %p10211_p6 }
0x4b7c   :  { %6886 = vrot.lane.b32.xlu0 %v6881_v32, %s10254_s0  ;;  %9468 = vmatprep.subr.bf16.mxu1 %v9467_v34 }
0x4b7d   :  { %9486 = vmatpush3.bf16.msra.mxu0 %v9483_v6 }
0x4b7f   :  { %9470 = vmatpush3.bf16.msra.mxu1 %v9467_v34 }
0x4b80   :  { %6926 = vrot.lane.b32.xlu0 %v6921_v18, %s10256_s19 }
0x4b84   :  { %7096 = vrot.lane.b32.xlu0 %v12637_v51, %s10256_s19 }
0x4b88   :  { %7100 = vrot.lane.b32.xlu0 %v12674_v61, %s10256_s19  ;;  %v7884_v61 = vpop.xlane.xlu0 %7883 }
0x4b8c   :  { %v7888_v31 = vpop.xlane.xlu0 %7887 }
0x4bcb   :  { %v7892_v4 = vpop.xlane.xlu1 %7891 }
0x4bcc   :  { %v7896_v50 = vsub.f32 %v7884_v61, %v7892_v4 }
0x4bce   :  { %v7906_v35 = vmul.f32 %v8560_v60, %v7896_v50 }
0x4bcf   :  { %v2455_v53 = vpop.permute.xlu1 %2454 }
0x4bd0   :  { %2461 = vst.msk [vmem:[%s13105_s17] sm:$0x1] %vm2460_vm11, %v2455_v53 }
0x4bd3   :  { %v2472_v51 = vpop.permute.xlu1 %2471 }
0x4bd4   :  { %2477 = vst.msk [vmem:[%s13105_s17 + $0x1] sm:$0x1] %vm2460_vm11, %v2472_v51  ;;  %v8578_v51 = vld [vmem:[#allocation11 + $0x1] ss:$0 sm:$0xff] }
0x4bd7   :  { %v2474_v44 = vpop.permute.xlu1 %2473 }
0x4bd8   :  { %2478 = vst.msk [vmem:[%s13105_s17 + $0x5] sm:$0x1] %vm2460_vm11, %v2474_v44 }
0x4bdb   :  { %v2513_v14 = vpop.permute.xlu1 %2512 }
0x4bdc   :  { %2517 = vst.msk [vmem:[%s13106_s18 + $0x4] sm:$0x1] %vm2460_vm11, %v2513_v14 }
0x4bdf   :  { %v7895_v58 = vpop.xlane.xlu0 %7894  ;;  %v2552_v43 = vpop.permute.xlu1 %2551 }
0x4be0   :  { %v7897_v8 = vsub.f32 %v7888_v31, %v7895_v58  ;;  %2556 = vst.msk [vmem:[%s13106_s18 + $0x5] sm:$0x1] %vm2460_vm11, %v2552_v43 }
0x4be2   :  { %v7907_v10 = vmul.f32 %v8560_v60, %v7897_v8 }
0x4be3   :  { %v2457_v52 = vpop.permute.xlu0 %2456  ;;  %v6833_v54 = vpop.permute.xlu1 %6832 }
0x4be4   :  { %2462 = vst.msk [vmem:[%s13105_s17 + $0x4] sm:$0x1] %vm2460_vm11, %v2457_v52  ;;  %8481 = vst.msk [vmem:[%s13105_s17 + $0x6] sm:$0x1] %vm2460_vm11, %v6833_v54 }
0x4be7   :  { %v2511_v49 = vpop.permute.xlu0 %2510  ;;  %v6850_v1 = vpop.permute.xlu1 %6849 }
0x4be8   :  { %2516 = vst.msk [vmem:[%s13106_s18] sm:$0x1] %vm2460_vm11, %v2511_v49  ;;  %8483 = vst.msk [vmem:[%s13105_s17 + $0x7] sm:$0x1] %vm2460_vm11, %v6850_v1 }
0x4beb   :  { %v2550_v5 = vpop.permute.xlu0 %2549  ;;  %v6889_v28 = vpop.permute.xlu1 %6888 }
0x4bec   :  { %2555 = vst.msk [vmem:[%s13106_s18 + $0x1] sm:$0x1] %vm2460_vm11, %v2550_v5  ;;  %8485 = vst.msk [vmem:[%s13106_s18 + $0x6] sm:$0x1] %vm2460_vm11, %v6889_v28 }
0x4bef   :  { %v6831_v39 = vpop.permute.xlu0 %6830  ;;  %v6929_v17 = vpop.permute.xlu1 %6928 }
0x4bf0   :  { %8480 = vst.msk [vmem:[%s13105_s17 + $0x2] sm:$0x1] %vm2460_vm11, %v6831_v39  ;;  %8487 = vst.msk [vmem:[%s13106_s18 + $0x7] sm:$0x1] %vm2460_vm11, %v6929_v17 }
0x4bf3   :  { %v6848_v20 = vpop.permute.xlu0 %6847  ;;  %v7099_v40 = vpop.permute.xlu1 %7098 }
0x4bf4   :  { %8482 = vst.msk [vmem:[%s13105_s17 + $0x3] sm:$0x1] %vm2460_vm11, %v6848_v20 }
0x4bf5   :  { %8537 = vst.msk [vmem:[%s13104_s16 + $0x18c] sm:$0xf] %vm7066_vm7, %v7099_v40 }
0x4bf7   :  { %v6887_v21 = vpop.permute.xlu0 %6886  ;;  %v7103_v47 = vpop.permute.xlu1 %7102 }
0x4bf8   :  { %8484 = vst.msk [vmem:[%s13106_s18 + $0x2] sm:$0x1] %vm2460_vm11, %v6887_v21 }
0x4bf9   :  { %8539 = vst.msk [vmem:[%s13104_s16 + $0x31c] sm:$0xf] %vm7066_vm7, %v7103_v47 }
0x4bfb   :  { %v6927_v23 = vpop.permute.xlu0 %6926 }
0x4bfc   :  { %8486 = vst.msk [vmem:[%s13106_s18 + $0x3] sm:$0x1] %vm2460_vm11, %v6927_v23 }
0x4bff   :  { %v7097_v46 = vpop.permute.xlu0 %7096 }
0x4c00   :  { %8536 = vst.msk [vmem:[%s13104_s16 + $0x184] sm:$0xff] %vm146_vm0, %v7097_v46 }
0x4c03   :  { %v7101_v48 = vpop.permute.xlu0 %7100 }
0x4c04   :  { %8538 = vst.msk [vmem:[%s13104_s16 + $0x314] sm:$0xff] %vm146_vm0, %v7101_v48 }
0x4c17   :  { %v7985_v41 = vpop.f32.mrb[62].mxu1 }
0x4c18   :  { %v7986_v2 = vadd.f32 %v7985_v41, %v7906_v35  ;;  %v8737_v9 = vpop.f32.mrb[63].mxu1 }
0x4c1a   :  { %v8070_v13 = vmul.f32 0.005, %v7986_v2 }
0x4c1c   :  { %8753 = vmatprep.mubr.msk.f32.mxu1 %vm146_vm0, %v8070_v13 }
0x4c2b   :  { %v8066_v42 = vpop.f32.mrb[64].mxu1 }
0x4c2c   :  { %v8067_v45 = vadd.f32 %v8066_v42, %v7907_v10  ;;  %v8744_v63 = vpop.f32.mrb[65].mxu1 }
0x4c2e   :  { %v8071_v36 = vmul.f32 0.005, %v8067_v45 }
0x4c30   :  { %8754 = vmatmul.mubr.msk.f32.vlgmr.msra.gmra.mrb[66].mxu1 %vm146_vm0, %v8071_v36 }
0x4d03   :  { %v8755_v19 = vpop.f32.mrb[66].mxu1 }
0x4d04   :  { %v8163_v3 = vadd.f32 %v8755_v19, %v8565_v12  ;;  %v8157_v33 = vpop.f32.mrb[67].mxu1 }
0x4d05   :  { %v8158_v16 = vadd.f32 %v8565_v12, %v8157_v33 }
0x4d06   :  { %v8569_v57 = vmul.f32 -1.702, %v8163_v3 }
0x4d07   :  { %v8568_v38 = vmul.f32 -1.702, %v8158_v16 }
0x4d08   :  { %v8172_v32 = vmul.f32 1.442695, %v8569_v57 }
0x4d09   :  { %v8170_v18 = vmul.f32 1.442695, %v8568_v38 }
0x4d0a   :  { %10070 = vpow2.f32 %v8172_v32 }
0x4d0b   :  { %10072 = vpow2.f32 %v8170_v18 }
0x4d14   :  { %v10071_v27 = vpop.eup %10070 }
0x4d15   :  { %v10073_v15 = vpop.eup %10072  ;;  %v8175_v11 = vadd.f32 1.0, %v10071_v27 }
0x4d16   :  { %v8174_v7 = vadd.f32 1.0, %v10073_v15 }
0x4d17   :  { %10074 = vrcp.f32 %v8175_v11 }
0x4d18   :  { %10076 = vrcp.f32 %v8174_v7 }
0x4d21   :  { %v10075_v37 = vpop.eup %10074 }
0x4d22   :  { %v10077_v34 = vpop.eup %10076  ;;  %v8181_v53 = vmul.f32 %v10075_v37, %v8163_v3 }
0x4d23   :  { %v8180_v4 = vmul.f32 %v10077_v34, %v8158_v16 }
0x4d25   :  { %8772 = vmatprep.mubr.msk.f32.mxu0 %vm406_vm3, %v8180_v4 }
0x4d26   :  { %8773 = vmatmul.mubr.msk.f32.vlgmr.msra.gmra.mrb[54].mxu0 %vm406_vm3, %v8181_v53 }
0x4df9   :  { %v8774_v61 = vpop.f32.mrb[54].mxu0 }
0x4dfa   :  { %v8277_v44 = vadd.f32 %v8774_v61, %v8578_v51  ;;  %v8271_v31 = vpop.f32.mrb[55].mxu0 }
0x4dfb   :  { %v8272_v14 = vadd.f32 %v8578_v51, %v8271_v31 }
0x4dfc   :  { %8281 = vst.msk [vmem:[#allocation13 + $0x8] sm:$0xff] %vm146_vm0, %v8277_v44 }
0x4dfd   :  { %8280 = vst.msk [vmem:[#allocation13] sm:$0xff] %vm146_vm0, %v8272_v14 }
0x4dfe   :  { %10221 = shalt.err (!%p10218_p10)
}
0x4dff   :  { %s10222_s24 = scalar_lea.hbm %s13103_s15, 256 }
0x4e00   :  { %p10223_p11 = scmp.ne.s32.totalorder %s13103_s15, %s10222_s24  ;;  %p10226_p12 = scmp.lt.u32.totalorder %s10222_s24, %s13103_s15 }
0x4e02   :  { %p10228_p13 = pnand %p10226_p12, %p10223_p11 }
0x4e04   :  { %10231 = shalt.err (!%p10228_p13)
}
0x4e05   :  { %8293 = dma.vmem_to_hbm [thread:$0]  %s8288_s29, 256, %s13103_s15, [#allocation4], %s10246_s7, %s10246_s7, %s10247_s28  }
0x4e06   :  { %10240 = dma.done.wait [#allocation4], 256  }
0x4e07   :  { %10241 = vsyncadd [#allocation4], 4294967040 }
0x4e08   :  { %8309 = vsyncpa [#allocation3], 1 }
0x4e09   :  { %8310 = vsyncpa [#allocation6], 1 }
0x4e0a   :  { %8311 = vsyncpa [#allocation9], 1 }
0x4e0b   :  { %8312 = vsyncpa [#allocation12], 1 }
0x4e0c   :  { %8313 = vsyncpa [#allocation4], 1 }

</bundles_post_ra>
